<compile_context>
chip_gen: v6e
topology: v6e:2x2x1
jax: 0.10.0
libtpu: 0.0.40
codegen_flags: <defaults>
</compile_context>

<pallas_src>
import functools

import jax
import jax.numpy as jnp
from jax.experimental import pallas as pl
from jax.experimental.pallas import tpu as pltpu

N_EMBD = 384
N_HEAD = 6
HEAD_SIZE = N_EMBD // N_HEAD
BLOCK_SIZE = 64
LN_EPS = 1e-5
NEG_INF = -1e30


def _layernorm(x, w, b):
    mu = jnp.mean(x, axis=-1, keepdims=True)
    var = jnp.mean((x - mu) ** 2, axis=-1, keepdims=True)
    return (x - mu) * jax.lax.rsqrt(var + LN_EPS) * w + b


def block_kernel(x_ref, ln1w_ref, ln1b_ref, wqkv_ref, wproj_ref, bproj_ref,
                 ln2w_ref, ln2b_ref, w1_ref, b1_ref, w2_ref, b2_ref, out_ref,
                 qkv_scr, ocat_scr, *, seq_len, n_head, batch_block):
    x = x_ref[...]                               # (G, D) f32, G = rows this step
    G, D = x.shape
    hs = D // n_head

    # ---- LayerNorm 1 (f32 stats) ----
    h1 = _layernorm(x, ln1w_ref[...], ln1b_ref[...]).astype(jnp.bfloat16)

    # ---- fused QKV projection: one (G, D) x (D, 3D) bf16 GEMM.
    # Softmax scale is already folded into the Q columns at pack time.
    qkv_scr[...] = jnp.dot(h1, wqkv_ref[...],
                           preferred_element_type=jnp.float32).astype(jnp.bfloat16)

    # Causal mask (block-diagonal across batch elements when batch_block > 1),
    # hoisted out of the head loop.
    row = jax.lax.broadcasted_iota(jnp.int32, (G, G), 0)
    col = jax.lax.broadcasted_iota(jnp.int32, (G, G), 1)
    if batch_block == 1:
        mask = row >= col
    else:
        mask = (row // seq_len == col // seq_len) & (row >= col)

    for h in range(n_head):                      # static unroll over the heads
        # Static ref slices: pure addressing, no value relayout.
        q = qkv_scr[:, h * hs:(h + 1) * hs]
        k = qkv_scr[:, D + h * hs:D + (h + 1) * hs]
        v = qkv_scr[:, 2 * D + h * hs:2 * D + (h + 1) * hs]
        # scores: contract over the head dim of both (no explicit k.T).
        s = jax.lax.dot_general(q, k, (((1,), (1,)), ((), ())),
                                preferred_element_type=jnp.float32)
        s = jnp.where(mask, s, NEG_INF)
        m = jnp.max(s, axis=-1, keepdims=True)
        e = jnp.exp(s - m)                       # masked entries underflow to 0
        l = jnp.sum(e, axis=-1, keepdims=True)
        p = (e * pl.reciprocal(l, approx=True)).astype(jnp.bfloat16)
        # Write head output into its column window of the concat scratch.
        ocat_scr[:, h * hs:(h + 1) * hs] = (
            jnp.dot(p, v, preferred_element_type=jnp.float32).astype(jnp.bfloat16))

    # "concat heads then project" as one (G, D) x (D, D) bf16 GEMM.
    sa = jnp.dot(ocat_scr[...], wproj_ref[...],
                 preferred_element_type=jnp.float32) + bproj_ref[...]
    x1 = x + sa                                  # residual 1 (f32)

    # ---- LayerNorm 2 + FeedForward ----
    h2 = _layernorm(x1, ln2w_ref[...], ln2b_ref[...]).astype(jnp.bfloat16)
    f = jnp.dot(h2, w1_ref[...], preferred_element_type=jnp.float32) + b1_ref[...]
    f = jnp.maximum(f, 0.0).astype(jnp.bfloat16)
    ff = jnp.dot(f, w2_ref[...], preferred_element_type=jnp.float32) + b2_ref[...]

    out_ref[...] = x1 + ff                       # residual 2


def pack_params(params):
    """One-time host-side repack: bf16 GEMM operands, scale folded into Q."""
    (ln1w, ln1b, wq, wk, wv, wproj, bproj, ln2w, ln2b, w1, b1, w2, b2) = params
    D = N_EMBD
    scale = jnp.float32(D ** (-0.5))             # C**-0.5 with C = n_embd (reference)
    wq_all = jnp.transpose(wq, (1, 0, 2)).reshape(D, D) * scale   # fold in f32
    wk_all = jnp.transpose(wk, (1, 0, 2)).reshape(D, D)
    wv_all = jnp.transpose(wv, (1, 0, 2)).reshape(D, D)
    wqkv = jnp.concatenate([wq_all, wk_all, wv_all], axis=1).astype(jnp.bfloat16)
    wproj2 = wproj.reshape(D, D).astype(jnp.bfloat16)              # (H*hs, D)
    return (ln1w, ln1b, wqkv, wproj2, bproj, ln2w, ln2b,
            w1.astype(jnp.bfloat16), b1, w2.astype(jnp.bfloat16), b2)


@functools.partial(jax.jit, static_argnames=("batch_block",))
def block_forward(x, packed, batch_block=None):
    B, T, D = x.shape
    if batch_block is None:
        # >= 2 parallel grid steps when possible: x pipelines against compute,
        # both v7x TensorCores get used, and the per-step mask is purely causal.
        batch_block = B // 2 if (B >= 2 and B % 2 == 0) else B
    assert B % batch_block == 0
    G = batch_block * T

    (ln1w, ln1b, wqkv, wproj2, bproj, ln2w, ln2b, w1b, b1, w2b, b2) = packed

    x2 = x.reshape(B * T, D)

    kernel = functools.partial(block_kernel, seq_len=T, n_head=N_HEAD,
                               batch_block=batch_block)

    def full(a):
        nd = a.ndim
        # Constant block index -> weights stay resident across grid steps.
        return pl.BlockSpec(a.shape, lambda i, nd=nd: (0,) * nd)

    out = pl.pallas_call(
        kernel,
        out_shape=jax.ShapeDtypeStruct((B * T, D), jnp.float32),
        grid_spec=pltpu.PrefetchScalarGridSpec(
            num_scalar_prefetch=0,
            grid=(B // batch_block,),
            in_specs=[
                pl.BlockSpec((G, D), lambda i: (i, 0)),      # x rows
                full(ln1w), full(ln1b),
                full(wqkv), full(wproj2), full(bproj),
                full(ln2w), full(ln2b),
                full(w1b), full(b1), full(w2b), full(b2),
            ],
            out_specs=pl.BlockSpec((G, D), lambda i: (i, 0)),
            scratch_shapes=[
                pltpu.VMEM((G, 3 * D), jnp.bfloat16),        # fused QKV
                pltpu.VMEM((G, D), jnp.bfloat16),            # concat head outputs
            ],
        ),
        compiler_params=pltpu.CompilerParams(
            dimension_semantics=("parallel",),
            vmem_limit_bytes=32 * 1024 * 1024),
    )(x2, ln1w, ln1b, wqkv, wproj2, bproj, ln2w, ln2b, w1b, b1, w2b, b2)
    return out.reshape(B, T, D)


def reference_forward(x, params):
    """Pure-JAX f32 reference mirroring the PyTorch Block forward."""
    (ln1w, ln1b, wq, wk, wv, wproj, bproj, ln2w, ln2b, w1, b1, w2, b2) = params
    B, T, D = x.shape

    def ln(z, w, b):
        mu = jnp.mean(z, axis=-1, keepdims=True)
        var = jnp.mean((z - mu) ** 2, axis=-1, keepdims=True)
        return (z - mu) / jnp.sqrt(var + LN_EPS) * w[0] + b[0]

    h1 = ln(x, ln1w, ln1b)
    scale = D ** (-0.5)
    mask = jnp.tril(jnp.ones((T, T), bool))
    sa = jnp.zeros_like(x)
    for h in range(N_HEAD):
        q = h1 @ wq[h]
        k = h1 @ wk[h]
        v = h1 @ wv[h]
        s = jnp.einsum("btd,bsd->bts", q, k) * scale
        s = jnp.where(mask, s, -jnp.inf)
        p = jax.nn.softmax(s, axis=-1)
        o = jnp.einsum("bts,bsd->btd", p, v)
        sa = sa + o @ wproj[h]
    x1 = x + sa + bproj[0]
    h2 = ln(x1, ln2w, ln2b)
    ff = jax.nn.relu(h2 @ w1 + b1[0]) @ w2 + b2[0]
    return x1 + ff


def init_params(key):
    ks = jax.random.split(key, 8)
    s = 0.02
    ln1w = jnp.ones((1, N_EMBD), jnp.float32)
    ln1b = jnp.zeros((1, N_EMBD), jnp.float32)
    ln2w = jnp.ones((1, N_EMBD), jnp.float32)
    ln2b = jnp.zeros((1, N_EMBD), jnp.float32)
    wq = s * jax.random.normal(ks[0], (N_HEAD, N_EMBD, HEAD_SIZE), jnp.float32)
    wk = s * jax.random.normal(ks[1], (N_HEAD, N_EMBD, HEAD_SIZE), jnp.float32)
    wv = s * jax.random.normal(ks[2], (N_HEAD, N_EMBD, HEAD_SIZE), jnp.float32)
    wproj = s * jax.random.normal(ks[3], (N_HEAD, HEAD_SIZE, N_EMBD), jnp.float32)
    bproj = s * jax.random.normal(ks[4], (1, N_EMBD), jnp.float32)
    w1 = s * jax.random.normal(ks[5], (N_EMBD, 4 * N_EMBD), jnp.float32)
    b1 = s * jax.random.normal(ks[6], (1, 4 * N_EMBD), jnp.float32)
    w2 = s * jax.random.normal(ks[7], (4 * N_EMBD, N_EMBD), jnp.float32)
    b2 = jnp.zeros((1, N_EMBD), jnp.float32)
    return (ln1w, ln1b, wq, wk, wv, wproj, bproj, ln2w, ln2b, w1, b1, w2, b2)


if __name__ == "__main__":
    key = jax.random.PRNGKey(0)
    kx, kp = jax.random.split(key)
    B, T = 2, BLOCK_SIZE                          # (2, 64, 384)
    x = jax.random.normal(kx, (B, T, N_EMBD), jnp.float32)
    params = init_params(kp)

    packed = jax.block_until_ready(pack_params(params))   # ONE-TIME repack

    out = jax.block_until_ready(block_forward(x, packed))
    ref = reference_forward(x, params)

    # bf16 matmul operands + approx reciprocal -> slightly looser tolerance than f32.
    if not jnp.allclose(out, ref, atol=1e-2, rtol=1e-2):
        diff = float(jnp.max(jnp.abs(out - ref)))
        raise AssertionError(f"mismatch vs reference, max abs diff = {diff}")

    print("KERNEL_OK")
</pallas_src>

<mosaic_0001>
module attributes {stable_mosaic.version = 11 : i64} {
  func.func @block_kernel(%arg0: i32, %arg1: memref<64x384xf32, #tpu.memory_space<vmem>>, %arg2: memref<1x384xf32, #tpu.memory_space<vmem>>, %arg3: memref<1x384xf32, #tpu.memory_space<vmem>>, %arg4: memref<384x1152xbf16, #tpu.memory_space<vmem>>, %arg5: memref<384x384xbf16, #tpu.memory_space<vmem>>, %arg6: memref<1x384xf32, #tpu.memory_space<vmem>>, %arg7: memref<1x384xf32, #tpu.memory_space<vmem>>, %arg8: memref<1x384xf32, #tpu.memory_space<vmem>>, %arg9: memref<384x1536xbf16, #tpu.memory_space<vmem>>, %arg10: memref<1x1536xf32, #tpu.memory_space<vmem>>, %arg11: memref<1536x384xbf16, #tpu.memory_space<vmem>>, %arg12: memref<1x384xf32, #tpu.memory_space<vmem>>, %arg13: memref<64x384xf32, #tpu.memory_space<vmem>>, %arg14: memref<64x1152xbf16, #tpu.memory_space<vmem>>, %arg15: memref<64x384xbf16, #tpu.memory_space<vmem>>) attributes {dimension_semantics = [#tpu.dimension_semantics<parallel>], iteration_bounds = array<i64: 2>, scalar_prefetch = 0 : i64, scratch_operands = 2 : i64, tpu.core_type = #tpu.core_type<tc>, window_params = [{transform_indices = @transform_0, window_bounds = array<i64: 64, 384>}, {pipeline_mode = #tpu.pipeline_mode<synchronous>, transform_indices = @transform_1, window_bounds = array<i64: 1, 384>}, {pipeline_mode = #tpu.pipeline_mode<synchronous>, transform_indices = @transform_2, window_bounds = array<i64: 1, 384>}, {pipeline_mode = #tpu.pipeline_mode<synchronous>, transform_indices = @transform_3, window_bounds = array<i64: 384, 1152>}, {pipeline_mode = #tpu.pipeline_mode<synchronous>, transform_indices = @transform_4, window_bounds = array<i64: 384, 384>}, {pipeline_mode = #tpu.pipeline_mode<synchronous>, transform_indices = @transform_5, window_bounds = array<i64: 1, 384>}, {pipeline_mode = #tpu.pipeline_mode<synchronous>, transform_indices = @transform_6, window_bounds = array<i64: 1, 384>}, {pipeline_mode = #tpu.pipeline_mode<synchronous>, transform_indices = @transform_7, window_bounds = array<i64: 1, 384>}, {pipeline_mode = #tpu.pipeline_mode<synchronous>, transform_indices = @transform_8, window_bounds = array<i64: 384, 1536>}, {pipeline_mode = #tpu.pipeline_mode<synchronous>, transform_indices = @transform_9, window_bounds = array<i64: 1, 1536>}, {pipeline_mode = #tpu.pipeline_mode<synchronous>, transform_indices = @transform_10, window_bounds = array<i64: 1536, 384>}, {pipeline_mode = #tpu.pipeline_mode<synchronous>, transform_indices = @transform_11, window_bounds = array<i64: 1, 384>}, {transform_indices = @transform_12, window_bounds = array<i64: 64, 384>}]} {
    %c0 = arith.constant 0 : index
    %c0_0 = arith.constant 0 : index
    %0 = vector.load %arg1[%c0, %c0_0] : memref<64x384xf32, #tpu.memory_space<vmem>>, vector<64x384xf32>
    %c0_1 = arith.constant 0 : index
    %c0_2 = arith.constant 0 : index
    %1 = vector.load %arg2[%c0_1, %c0_2] : memref<1x384xf32, #tpu.memory_space<vmem>>, vector<1x384xf32>
    %c0_3 = arith.constant 0 : index
    %c0_4 = arith.constant 0 : index
    %2 = vector.load %arg3[%c0_3, %c0_4] : memref<1x384xf32, #tpu.memory_space<vmem>>, vector<1x384xf32>
    %cst = arith.constant dense<0.000000e+00> : vector<64xf32>
    %3 = vector.multi_reduction <add>, %0, %cst [1] : vector<64x384xf32> to vector<64xf32>
    %4 = vector.shape_cast %3 : vector<64xf32> to vector<64x1xf32>
    %cst_5 = arith.constant 3.840000e+02 : f32
    %5 = vector.broadcast %cst_5 : f32 to vector<64x1xf32>
    %6 = arith.divf %4, %5 : vector<64x1xf32>
    %7 = vector.broadcast %6 : vector<64x1xf32> to vector<64x384xf32>
    %8 = arith.subf %0, %7 : vector<64x384xf32>
    %9 = arith.mulf %8, %8 : vector<64x384xf32>
    %cst_6 = arith.constant dense<0.000000e+00> : vector<64xf32>
    %10 = vector.multi_reduction <add>, %9, %cst_6 [1] : vector<64x384xf32> to vector<64xf32>
    %11 = vector.shape_cast %10 : vector<64xf32> to vector<64x1xf32>
    %cst_7 = arith.constant 3.840000e+02 : f32
    %12 = vector.broadcast %cst_7 : f32 to vector<64x1xf32>
    %13 = arith.divf %11, %12 : vector<64x1xf32>
    %14 = vector.broadcast %6 : vector<64x1xf32> to vector<64x384xf32>
    %15 = arith.subf %0, %14 : vector<64x384xf32>
    %cst_8 = arith.constant 9.99999974E-6 : f32
    %16 = vector.broadcast %cst_8 : f32 to vector<64x1xf32>
    %17 = arith.addf %13, %16 : vector<64x1xf32>
    %18 = math.rsqrt %17 : vector<64x1xf32>
    %19 = vector.broadcast %18 : vector<64x1xf32> to vector<64x384xf32>
    %20 = arith.mulf %15, %19 : vector<64x384xf32>
    %21 = vector.broadcast %1 : vector<1x384xf32> to vector<64x384xf32>
    %22 = arith.mulf %20, %21 : vector<64x384xf32>
    %23 = vector.broadcast %2 : vector<1x384xf32> to vector<64x384xf32>
    %24 = arith.addf %22, %23 : vector<64x384xf32>
    %25 = arith.truncf %24 : vector<64x384xf32> to vector<64x384xbf16>
    %c0_9 = arith.constant 0 : index
    %c0_10 = arith.constant 0 : index
    %26 = vector.load %arg4[%c0_9, %c0_10] : memref<384x1152xbf16, #tpu.memory_space<vmem>>, vector<384x1152xbf16>
    %cst_11 = arith.constant dense<0.000000e+00> : vector<64x1152xf32>
    %27 = tpu.matmul %25, %26, %cst_11 {dimension_numbers = #tpu.dot_dimension_numbers<[1], [0], [0], [1], [0, 0, 1, 1], [], []>} : vector<64x384xbf16>, vector<384x1152xbf16>, vector<64x1152xf32> -> vector<64x1152xf32>
    %28 = arith.truncf %27 : vector<64x1152xf32> to vector<64x1152xbf16>
    %c0_12 = arith.constant 0 : index
    %c0_13 = arith.constant 0 : index
    %29 = vector.load %arg14[%c0_12, %c0_13] : memref<64x1152xbf16, #tpu.memory_space<vmem>>, vector<64x1152xbf16>
    tpu.vector_store %arg14[%c0_12, %c0_13], %28 {strides = array<i32>} : memref<64x1152xbf16, #tpu.memory_space<vmem>>, vector<64x1152xbf16>,
    %30 = tpu.iota {dimensions = array<i32: 0>} : vector<64x64xi32>
    %31 = tpu.iota {dimensions = array<i32: 1>} : vector<64x64xi32>
    %32 = arith.cmpi sge, %30, %31 : vector<64x64xi32>
    %c0_14 = arith.constant 0 : index
    %c0_15 = arith.constant 0 : index
    %33 = vector.load %arg14[%c0_14, %c0_15] : memref<64x1152xbf16, #tpu.memory_space<vmem>>, vector<64x64xbf16>
    %c0_16 = arith.constant 0 : index
    %c384 = arith.constant 384 : index
    %34 = vector.load %arg14[%c0_16, %c384] : memref<64x1152xbf16, #tpu.memory_space<vmem>>, vector<64x64xbf16>
    %c0_17 = arith.constant 0 : index
    %c768 = arith.constant 768 : index
    %35 = vector.load %arg14[%c0_17, %c768] : memref<64x1152xbf16, #tpu.memory_space<vmem>>, vector<64x64xbf16>
    %cst_18 = arith.constant dense<0.000000e+00> : vector<64x64xf32>
    %36 = tpu.matmul %33, %34, %cst_18 {dimension_numbers = #tpu.dot_dimension_numbers<[1], [1], [0], [0], [0, 0, 1, 0], [], []>} : vector<64x64xbf16>, vector<64x64xbf16>, vector<64x64xf32> -> vector<64x64xf32>
    %cst_19 = arith.constant -1.000000e+30 : f32
    %37 = vector.broadcast %cst_19 : f32 to vector<64x64xf32>
    %38 = arith.select %32, %36, %37 : vector<64x64xi1>, vector<64x64xf32>
    %cst_20 = arith.constant dense<0xFF800000> : vector<64xf32>
    %39 = vector.multi_reduction <maximumf>, %38, %cst_20 [1] : vector<64x64xf32> to vector<64xf32>
    %40 = vector.shape_cast %39 : vector<64xf32> to vector<64x1xf32>
    %41 = vector.broadcast %40 : vector<64x1xf32> to vector<64x64xf32>
    %42 = arith.subf %38, %41 : vector<64x64xf32>
    %43 = math.exp %42 : vector<64x64xf32>
    %cst_21 = arith.constant dense<0.000000e+00> : vector<64xf32>
    %44 = vector.multi_reduction <add>, %43, %cst_21 [1] : vector<64x64xf32> to vector<64xf32>
    %45 = vector.shape_cast %44 : vector<64xf32> to vector<64x1xf32>
    %46 = tpu.reciprocal %45 {approx = true} : vector<64x1xf32> -> vector<64x1xf32>
    %47 = vector.broadcast %46 : vector<64x1xf32> to vector<64x64xf32>
    %48 = arith.mulf %43, %47 : vector<64x64xf32>
    %49 = arith.truncf %48 : vector<64x64xf32> to vector<64x64xbf16>
    %cst_22 = arith.constant dense<0.000000e+00> : vector<64x64xf32>
    %50 = tpu.matmul %49, %35, %cst_22 {dimension_numbers = #tpu.dot_dimension_numbers<[1], [0], [0], [1], [0, 0, 1, 1], [], []>} : vector<64x64xbf16>, vector<64x64xbf16>, vector<64x64xf32> -> vector<64x64xf32>
    %51 = arith.truncf %50 : vector<64x64xf32> to vector<64x64xbf16>
    %c0_23 = arith.constant 0 : index
    %c0_24 = arith.constant 0 : index
    %52 = vector.load %arg15[%c0_23, %c0_24] : memref<64x384xbf16, #tpu.memory_space<vmem>>, vector<64x64xbf16>
    tpu.vector_store %arg15[%c0_23, %c0_24], %51 {strides = array<i32>} : memref<64x384xbf16, #tpu.memory_space<vmem>>, vector<64x64xbf16>,
    %c0_25 = arith.constant 0 : index
    %c64 = arith.constant 64 : index
    %53 = vector.load %arg14[%c0_25, %c64] : memref<64x1152xbf16, #tpu.memory_space<vmem>>, vector<64x64xbf16>
    %c0_26 = arith.constant 0 : index
    %c448 = arith.constant 448 : index
    %54 = vector.load %arg14[%c0_26, %c448] : memref<64x1152xbf16, #tpu.memory_space<vmem>>, vector<64x64xbf16>
    %c0_27 = arith.constant 0 : index
    %c832 = arith.constant 832 : index
    %55 = vector.load %arg14[%c0_27, %c832] : memref<64x1152xbf16, #tpu.memory_space<vmem>>, vector<64x64xbf16>
    %cst_28 = arith.constant dense<0.000000e+00> : vector<64x64xf32>
    %56 = tpu.matmul %53, %54, %cst_28 {dimension_numbers = #tpu.dot_dimension_numbers<[1], [1], [0], [0], [0, 0, 1, 0], [], []>} : vector<64x64xbf16>, vector<64x64xbf16>, vector<64x64xf32> -> vector<64x64xf32>
    %cst_29 = arith.constant -1.000000e+30 : f32
    %57 = vector.broadcast %cst_29 : f32 to vector<64x64xf32>
    %58 = arith.select %32, %56, %57 : vector<64x64xi1>, vector<64x64xf32>
    %cst_30 = arith.constant dense<0xFF800000> : vector<64xf32>
    %59 = vector.multi_reduction <maximumf>, %58, %cst_30 [1] : vector<64x64xf32> to vector<64xf32>
    %60 = vector.shape_cast %59 : vector<64xf32> to vector<64x1xf32>
    %61 = vector.broadcast %60 : vector<64x1xf32> to vector<64x64xf32>
    %62 = arith.subf %58, %61 : vector<64x64xf32>
    %63 = math.exp %62 : vector<64x64xf32>
    %cst_31 = arith.constant dense<0.000000e+00> : vector<64xf32>
    %64 = vector.multi_reduction <add>, %63, %cst_31 [1] : vector<64x64xf32> to vector<64xf32>
    %65 = vector.shape_cast %64 : vector<64xf32> to vector<64x1xf32>
    %66 = tpu.reciprocal %65 {approx = true} : vector<64x1xf32> -> vector<64x1xf32>
    %67 = vector.broadcast %66 : vector<64x1xf32> to vector<64x64xf32>
    %68 = arith.mulf %63, %67 : vector<64x64xf32>
    %69 = arith.truncf %68 : vector<64x64xf32> to vector<64x64xbf16>
    %cst_32 = arith.constant dense<0.000000e+00> : vector<64x64xf32>
    %70 = tpu.matmul %69, %55, %cst_32 {dimension_numbers = #tpu.dot_dimension_numbers<[1], [0], [0], [1], [0, 0, 1, 1], [], []>} : vector<64x64xbf16>, vector<64x64xbf16>, vector<64x64xf32> -> vector<64x64xf32>
    %71 = arith.truncf %70 : vector<64x64xf32> to vector<64x64xbf16>
    %c0_33 = arith.constant 0 : index
    %c64_34 = arith.constant 64 : index
    %72 = vector.load %arg15[%c0_33, %c64_34] : memref<64x384xbf16, #tpu.memory_space<vmem>>, vector<64x64xbf16>
    tpu.vector_store %arg15[%c0_33, %c64_34], %71 {strides = array<i32>} : memref<64x384xbf16, #tpu.memory_space<vmem>>, vector<64x64xbf16>,
    %c0_35 = arith.constant 0 : index
    %c128 = arith.constant 128 : index
    %73 = vector.load %arg14[%c0_35, %c128] : memref<64x1152xbf16, #tpu.memory_space<vmem>>, vector<64x64xbf16>
    %c0_36 = arith.constant 0 : index
    %c512 = arith.constant 512 : index
    %74 = vector.load %arg14[%c0_36, %c512] : memref<64x1152xbf16, #tpu.memory_space<vmem>>, vector<64x64xbf16>
    %c0_37 = arith.constant 0 : index
    %c896 = arith.constant 896 : index
    %75 = vector.load %arg14[%c0_37, %c896] : memref<64x1152xbf16, #tpu.memory_space<vmem>>, vector<64x64xbf16>
    %cst_38 = arith.constant dense<0.000000e+00> : vector<64x64xf32>
    %76 = tpu.matmul %73, %74, %cst_38 {dimension_numbers = #tpu.dot_dimension_numbers<[1], [1], [0], [0], [0, 0, 1, 0], [], []>} : vector<64x64xbf16>, vector<64x64xbf16>, vector<64x64xf32> -> vector<64x64xf32>
    %cst_39 = arith.constant -1.000000e+30 : f32
    %77 = vector.broadcast %cst_39 : f32 to vector<64x64xf32>
    %78 = arith.select %32, %76, %77 : vector<64x64xi1>, vector<64x64xf32>
    %cst_40 = arith.constant dense<0xFF800000> : vector<64xf32>
    %79 = vector.multi_reduction <maximumf>, %78, %cst_40 [1] : vector<64x64xf32> to vector<64xf32>
    %80 = vector.shape_cast %79 : vector<64xf32> to vector<64x1xf32>
    %81 = vector.broadcast %80 : vector<64x1xf32> to vector<64x64xf32>
    %82 = arith.subf %78, %81 : vector<64x64xf32>
    %83 = math.exp %82 : vector<64x64xf32>
    %cst_41 = arith.constant dense<0.000000e+00> : vector<64xf32>
    %84 = vector.multi_reduction <add>, %83, %cst_41 [1] : vector<64x64xf32> to vector<64xf32>
    %85 = vector.shape_cast %84 : vector<64xf32> to vector<64x1xf32>
    %86 = tpu.reciprocal %85 {approx = true} : vector<64x1xf32> -> vector<64x1xf32>
    %87 = vector.broadcast %86 : vector<64x1xf32> to vector<64x64xf32>
    %88 = arith.mulf %83, %87 : vector<64x64xf32>
    %89 = arith.truncf %88 : vector<64x64xf32> to vector<64x64xbf16>
    %cst_42 = arith.constant dense<0.000000e+00> : vector<64x64xf32>
    %90 = tpu.matmul %89, %75, %cst_42 {dimension_numbers = #tpu.dot_dimension_numbers<[1], [0], [0], [1], [0, 0, 1, 1], [], []>} : vector<64x64xbf16>, vector<64x64xbf16>, vector<64x64xf32> -> vector<64x64xf32>
    %91 = arith.truncf %90 : vector<64x64xf32> to vector<64x64xbf16>
    %c0_43 = arith.constant 0 : index
    %c128_44 = arith.constant 128 : index
    %92 = vector.load %arg15[%c0_43, %c128_44] : memref<64x384xbf16, #tpu.memory_space<vmem>>, vector<64x64xbf16>
    tpu.vector_store %arg15[%c0_43, %c128_44], %91 {strides = array<i32>} : memref<64x384xbf16, #tpu.memory_space<vmem>>, vector<64x64xbf16>,
    %c0_45 = arith.constant 0 : index
    %c192 = arith.constant 192 : index
    %93 = vector.load %arg14[%c0_45, %c192] : memref<64x1152xbf16, #tpu.memory_space<vmem>>, vector<64x64xbf16>
    %c0_46 = arith.constant 0 : index
    %c576 = arith.constant 576 : index
    %94 = vector.load %arg14[%c0_46, %c576] : memref<64x1152xbf16, #tpu.memory_space<vmem>>, vector<64x64xbf16>
    %c0_47 = arith.constant 0 : index
    %c960 = arith.constant 960 : index
    %95 = vector.load %arg14[%c0_47, %c960] : memref<64x1152xbf16, #tpu.memory_space<vmem>>, vector<64x64xbf16>
    %cst_48 = arith.constant dense<0.000000e+00> : vector<64x64xf32>
    %96 = tpu.matmul %93, %94, %cst_48 {dimension_numbers = #tpu.dot_dimension_numbers<[1], [1], [0], [0], [0, 0, 1, 0], [], []>} : vector<64x64xbf16>, vector<64x64xbf16>, vector<64x64xf32> -> vector<64x64xf32>
    %cst_49 = arith.constant -1.000000e+30 : f32
    %97 = vector.broadcast %cst_49 : f32 to vector<64x64xf32>
    %98 = arith.select %32, %96, %97 : vector<64x64xi1>, vector<64x64xf32>
    %cst_50 = arith.constant dense<0xFF800000> : vector<64xf32>
    %99 = vector.multi_reduction <maximumf>, %98, %cst_50 [1] : vector<64x64xf32> to vector<64xf32>
    %100 = vector.shape_cast %99 : vector<64xf32> to vector<64x1xf32>
    %101 = vector.broadcast %100 : vector<64x1xf32> to vector<64x64xf32>
    %102 = arith.subf %98, %101 : vector<64x64xf32>
    %103 = math.exp %102 : vector<64x64xf32>
    %cst_51 = arith.constant dense<0.000000e+00> : vector<64xf32>
    %104 = vector.multi_reduction <add>, %103, %cst_51 [1] : vector<64x64xf32> to vector<64xf32>
    %105 = vector.shape_cast %104 : vector<64xf32> to vector<64x1xf32>
    %106 = tpu.reciprocal %105 {approx = true} : vector<64x1xf32> -> vector<64x1xf32>
    %107 = vector.broadcast %106 : vector<64x1xf32> to vector<64x64xf32>
    %108 = arith.mulf %103, %107 : vector<64x64xf32>
    %109 = arith.truncf %108 : vector<64x64xf32> to vector<64x64xbf16>
    %cst_52 = arith.constant dense<0.000000e+00> : vector<64x64xf32>
    %110 = tpu.matmul %109, %95, %cst_52 {dimension_numbers = #tpu.dot_dimension_numbers<[1], [0], [0], [1], [0, 0, 1, 1], [], []>} : vector<64x64xbf16>, vector<64x64xbf16>, vector<64x64xf32> -> vector<64x64xf32>
    %111 = arith.truncf %110 : vector<64x64xf32> to vector<64x64xbf16>
    %c0_53 = arith.constant 0 : index
    %c192_54 = arith.constant 192 : index
    %112 = vector.load %arg15[%c0_53, %c192_54] : memref<64x384xbf16, #tpu.memory_space<vmem>>, vector<64x64xbf16>
    tpu.vector_store %arg15[%c0_53, %c192_54], %111 {strides = array<i32>} : memref<64x384xbf16, #tpu.memory_space<vmem>>, vector<64x64xbf16>,
    %c0_55 = arith.constant 0 : index
    %c256 = arith.constant 256 : index
    %113 = vector.load %arg14[%c0_55, %c256] : memref<64x1152xbf16, #tpu.memory_space<vmem>>, vector<64x64xbf16>
    %c0_56 = arith.constant 0 : index
    %c640 = arith.constant 640 : index
    %114 = vector.load %arg14[%c0_56, %c640] : memref<64x1152xbf16, #tpu.memory_space<vmem>>, vector<64x64xbf16>
    %c0_57 = arith.constant 0 : index
    %c1024 = arith.constant 1024 : index
    %115 = vector.load %arg14[%c0_57, %c1024] : memref<64x1152xbf16, #tpu.memory_space<vmem>>, vector<64x64xbf16>
    %cst_58 = arith.constant dense<0.000000e+00> : vector<64x64xf32>
    %116 = tpu.matmul %113, %114, %cst_58 {dimension_numbers = #tpu.dot_dimension_numbers<[1], [1], [0], [0], [0, 0, 1, 0], [], []>} : vector<64x64xbf16>, vector<64x64xbf16>, vector<64x64xf32> -> vector<64x64xf32>
    %cst_59 = arith.constant -1.000000e+30 : f32
    %117 = vector.broadcast %cst_59 : f32 to vector<64x64xf32>
    %118 = arith.select %32, %116, %117 : vector<64x64xi1>, vector<64x64xf32>
    %cst_60 = arith.constant dense<0xFF800000> : vector<64xf32>
    %119 = vector.multi_reduction <maximumf>, %118, %cst_60 [1] : vector<64x64xf32> to vector<64xf32>
    %120 = vector.shape_cast %119 : vector<64xf32> to vector<64x1xf32>
    %121 = vector.broadcast %120 : vector<64x1xf32> to vector<64x64xf32>
    %122 = arith.subf %118, %121 : vector<64x64xf32>
    %123 = math.exp %122 : vector<64x64xf32>
    %cst_61 = arith.constant dense<0.000000e+00> : vector<64xf32>
    %124 = vector.multi_reduction <add>, %123, %cst_61 [1] : vector<64x64xf32> to vector<64xf32>
    %125 = vector.shape_cast %124 : vector<64xf32> to vector<64x1xf32>
    %126 = tpu.reciprocal %125 {approx = true} : vector<64x1xf32> -> vector<64x1xf32>
    %127 = vector.broadcast %126 : vector<64x1xf32> to vector<64x64xf32>
    %128 = arith.mulf %123, %127 : vector<64x64xf32>
    %129 = arith.truncf %128 : vector<64x64xf32> to vector<64x64xbf16>
    %cst_62 = arith.constant dense<0.000000e+00> : vector<64x64xf32>
    %130 = tpu.matmul %129, %115, %cst_62 {dimension_numbers = #tpu.dot_dimension_numbers<[1], [0], [0], [1], [0, 0, 1, 1], [], []>} : vector<64x64xbf16>, vector<64x64xbf16>, vector<64x64xf32> -> vector<64x64xf32>
    %131 = arith.truncf %130 : vector<64x64xf32> to vector<64x64xbf16>
    %c0_63 = arith.constant 0 : index
    %c256_64 = arith.constant 256 : index
    %132 = vector.load %arg15[%c0_63, %c256_64] : memref<64x384xbf16, #tpu.memory_space<vmem>>, vector<64x64xbf16>
    tpu.vector_store %arg15[%c0_63, %c256_64], %131 {strides = array<i32>} : memref<64x384xbf16, #tpu.memory_space<vmem>>, vector<64x64xbf16>,
    %c0_65 = arith.constant 0 : index
    %c320 = arith.constant 320 : index
    %133 = vector.load %arg14[%c0_65, %c320] : memref<64x1152xbf16, #tpu.memory_space<vmem>>, vector<64x64xbf16>
    %c0_66 = arith.constant 0 : index
    %c704 = arith.constant 704 : index
    %134 = vector.load %arg14[%c0_66, %c704] : memref<64x1152xbf16, #tpu.memory_space<vmem>>, vector<64x64xbf16>
    %c0_67 = arith.constant 0 : index
    %c1088 = arith.constant 1088 : index
    %135 = vector.load %arg14[%c0_67, %c1088] : memref<64x1152xbf16, #tpu.memory_space<vmem>>, vector<64x64xbf16>
    %cst_68 = arith.constant dense<0.000000e+00> : vector<64x64xf32>
    %136 = tpu.matmul %133, %134, %cst_68 {dimension_numbers = #tpu.dot_dimension_numbers<[1], [1], [0], [0], [0, 0, 1, 0], [], []>} : vector<64x64xbf16>, vector<64x64xbf16>, vector<64x64xf32> -> vector<64x64xf32>
    %cst_69 = arith.constant -1.000000e+30 : f32
    %137 = vector.broadcast %cst_69 : f32 to vector<64x64xf32>
    %138 = arith.select %32, %136, %137 : vector<64x64xi1>, vector<64x64xf32>
    %cst_70 = arith.constant dense<0xFF800000> : vector<64xf32>
    %139 = vector.multi_reduction <maximumf>, %138, %cst_70 [1] : vector<64x64xf32> to vector<64xf32>
    %140 = vector.shape_cast %139 : vector<64xf32> to vector<64x1xf32>
    %141 = vector.broadcast %140 : vector<64x1xf32> to vector<64x64xf32>
    %142 = arith.subf %138, %141 : vector<64x64xf32>
    %143 = math.exp %142 : vector<64x64xf32>
    %cst_71 = arith.constant dense<0.000000e+00> : vector<64xf32>
    %144 = vector.multi_reduction <add>, %143, %cst_71 [1] : vector<64x64xf32> to vector<64xf32>
    %145 = vector.shape_cast %144 : vector<64xf32> to vector<64x1xf32>
    %146 = tpu.reciprocal %145 {approx = true} : vector<64x1xf32> -> vector<64x1xf32>
    %147 = vector.broadcast %146 : vector<64x1xf32> to vector<64x64xf32>
    %148 = arith.mulf %143, %147 : vector<64x64xf32>
    %149 = arith.truncf %148 : vector<64x64xf32> to vector<64x64xbf16>
    %cst_72 = arith.constant dense<0.000000e+00> : vector<64x64xf32>
    %150 = tpu.matmul %149, %135, %cst_72 {dimension_numbers = #tpu.dot_dimension_numbers<[1], [0], [0], [1], [0, 0, 1, 1], [], []>} : vector<64x64xbf16>, vector<64x64xbf16>, vector<64x64xf32> -> vector<64x64xf32>
    %151 = arith.truncf %150 : vector<64x64xf32> to vector<64x64xbf16>
    %c0_73 = arith.constant 0 : index
    %c320_74 = arith.constant 320 : index
    %152 = vector.load %arg15[%c0_73, %c320_74] : memref<64x384xbf16, #tpu.memory_space<vmem>>, vector<64x64xbf16>
    tpu.vector_store %arg15[%c0_73, %c320_74], %151 {strides = array<i32>} : memref<64x384xbf16, #tpu.memory_space<vmem>>, vector<64x64xbf16>,
    %c0_75 = arith.constant 0 : index
    %c0_76 = arith.constant 0 : index
    %153 = vector.load %arg15[%c0_75, %c0_76] : memref<64x384xbf16, #tpu.memory_space<vmem>>, vector<64x384xbf16>
    %c0_77 = arith.constant 0 : index
    %c0_78 = arith.constant 0 : index
    %154 = vector.load %arg5[%c0_77, %c0_78] : memref<384x384xbf16, #tpu.memory_space<vmem>>, vector<384x384xbf16>
    %cst_79 = arith.constant dense<0.000000e+00> : vector<64x384xf32>
    %155 = tpu.matmul %153, %154, %cst_79 {dimension_numbers = #tpu.dot_dimension_numbers<[1], [0], [0], [1], [0, 0, 1, 1], [], []>} : vector<64x384xbf16>, vector<384x384xbf16>, vector<64x384xf32> -> vector<64x384xf32>
    %c0_80 = arith.constant 0 : index
    %c0_81 = arith.constant 0 : index
    %156 = vector.load %arg6[%c0_80, %c0_81] : memref<1x384xf32, #tpu.memory_space<vmem>>, vector<1x384xf32>
    %157 = vector.broadcast %156 : vector<1x384xf32> to vector<64x384xf32>
    %158 = arith.addf %155, %157 : vector<64x384xf32>
    %159 = arith.addf %0, %158 : vector<64x384xf32>
    %c0_82 = arith.constant 0 : index
    %c0_83 = arith.constant 0 : index
    %160 = vector.load %arg7[%c0_82, %c0_83] : memref<1x384xf32, #tpu.memory_space<vmem>>, vector<1x384xf32>
    %c0_84 = arith.constant 0 : index
    %c0_85 = arith.constant 0 : index
    %161 = vector.load %arg8[%c0_84, %c0_85] : memref<1x384xf32, #tpu.memory_space<vmem>>, vector<1x384xf32>
    %cst_86 = arith.constant dense<0.000000e+00> : vector<64xf32>
    %162 = vector.multi_reduction <add>, %159, %cst_86 [1] : vector<64x384xf32> to vector<64xf32>
    %163 = vector.shape_cast %162 : vector<64xf32> to vector<64x1xf32>
    %cst_87 = arith.constant 3.840000e+02 : f32
    %164 = vector.broadcast %cst_87 : f32 to vector<64x1xf32>
    %165 = arith.divf %163, %164 : vector<64x1xf32>
    %166 = vector.broadcast %165 : vector<64x1xf32> to vector<64x384xf32>
    %167 = arith.subf %159, %166 : vector<64x384xf32>
    %168 = arith.mulf %167, %167 : vector<64x384xf32>
    %cst_88 = arith.constant dense<0.000000e+00> : vector<64xf32>
    %169 = vector.multi_reduction <add>, %168, %cst_88 [1] : vector<64x384xf32> to vector<64xf32>
    %170 = vector.shape_cast %169 : vector<64xf32> to vector<64x1xf32>
    %cst_89 = arith.constant 3.840000e+02 : f32
    %171 = vector.broadcast %cst_89 : f32 to vector<64x1xf32>
    %172 = arith.divf %170, %171 : vector<64x1xf32>
    %173 = vector.broadcast %165 : vector<64x1xf32> to vector<64x384xf32>
    %174 = arith.subf %159, %173 : vector<64x384xf32>
    %cst_90 = arith.constant 9.99999974E-6 : f32
    %175 = vector.broadcast %cst_90 : f32 to vector<64x1xf32>
    %176 = arith.addf %172, %175 : vector<64x1xf32>
    %177 = math.rsqrt %176 : vector<64x1xf32>
    %178 = vector.broadcast %177 : vector<64x1xf32> to vector<64x384xf32>
    %179 = arith.mulf %174, %178 : vector<64x384xf32>
    %180 = vector.broadcast %160 : vector<1x384xf32> to vector<64x384xf32>
    %181 = arith.mulf %179, %180 : vector<64x384xf32>
    %182 = vector.broadcast %161 : vector<1x384xf32> to vector<64x384xf32>
    %183 = arith.addf %181, %182 : vector<64x384xf32>
    %184 = arith.truncf %183 : vector<64x384xf32> to vector<64x384xbf16>
    %c0_91 = arith.constant 0 : index
    %c0_92 = arith.constant 0 : index
    %185 = vector.load %arg9[%c0_91, %c0_92] : memref<384x1536xbf16, #tpu.memory_space<vmem>>, vector<384x1536xbf16>
    %cst_93 = arith.constant dense<0.000000e+00> : vector<64x1536xf32>
    %186 = tpu.matmul %184, %185, %cst_93 {dimension_numbers = #tpu.dot_dimension_numbers<[1], [0], [0], [1], [0, 0, 1, 1], [], []>} : vector<64x384xbf16>, vector<384x1536xbf16>, vector<64x1536xf32> -> vector<64x1536xf32>
    %c0_94 = arith.constant 0 : index
    %c0_95 = arith.constant 0 : index
    %187 = vector.load %arg10[%c0_94, %c0_95] : memref<1x1536xf32, #tpu.memory_space<vmem>>, vector<1x1536xf32>
    %188 = vector.broadcast %187 : vector<1x1536xf32> to vector<64x1536xf32>
    %189 = arith.addf %186, %188 : vector<64x1536xf32>
    %cst_96 = arith.constant 0.000000e+00 : f32
    %190 = vector.broadcast %cst_96 : f32 to vector<64x1536xf32>
    %191 = arith.maximumf %189, %190 : vector<64x1536xf32>
    %192 = arith.truncf %191 : vector<64x1536xf32> to vector<64x1536xbf16>
    %c0_97 = arith.constant 0 : index
    %c0_98 = arith.constant 0 : index
    %193 = vector.load %arg11[%c0_97, %c0_98] : memref<1536x384xbf16, #tpu.memory_space<vmem>>, vector<1536x384xbf16>
    %cst_99 = arith.constant dense<0.000000e+00> : vector<64x384xf32>
    %194 = tpu.matmul %192, %193, %cst_99 {dimension_numbers = #tpu.dot_dimension_numbers<[1], [0], [0], [1], [0, 0, 1, 1], [], []>} : vector<64x1536xbf16>, vector<1536x384xbf16>, vector<64x384xf32> -> vector<64x384xf32>
    %c0_100 = arith.constant 0 : index
    %c0_101 = arith.constant 0 : index
    %195 = vector.load %arg12[%c0_100, %c0_101] : memref<1x384xf32, #tpu.memory_space<vmem>>, vector<1x384xf32>
    %196 = vector.broadcast %195 : vector<1x384xf32> to vector<64x384xf32>
    %197 = arith.addf %194, %196 : vector<64x384xf32>
    %198 = arith.addf %159, %197 : vector<64x384xf32>
    %c0_102 = arith.constant 0 : index
    %c0_103 = arith.constant 0 : index
    %199 = vector.load %arg13[%c0_102, %c0_103] : memref<64x384xf32, #tpu.memory_space<vmem>>, vector<64x384xf32>
    tpu.vector_store %arg13[%c0_102, %c0_103], %198 {strides = array<i32>} : memref<64x384xf32, #tpu.memory_space<vmem>>, vector<64x384xf32>,
    return
  }
  func.func @transform_0(%arg0: i32) -> (i32, i32) {
    %c0_i32 = arith.constant 0 : i32
    %c0_i32_0 = arith.constant 0 : i32
    return %arg0, %c0_i32 : i32, i32
  }
  func.func @transform_1(%arg0: i32) -> (i32, i32) {
    %c0_i32 = arith.constant 0 : i32
    %c0_i32_0 = arith.constant 0 : i32
    %c0_i32_1 = arith.constant 0 : i32
    return %c0_i32, %c0_i32_0 : i32, i32
  }
  func.func @transform_2(%arg0: i32) -> (i32, i32) {
    %c0_i32 = arith.constant 0 : i32
    %c0_i32_0 = arith.constant 0 : i32
    %c0_i32_1 = arith.constant 0 : i32
    return %c0_i32, %c0_i32_0 : i32, i32
  }
  func.func @transform_3(%arg0: i32) -> (i32, i32) {
    %c0_i32 = arith.constant 0 : i32
    %c0_i32_0 = arith.constant 0 : i32
    %c0_i32_1 = arith.constant 0 : i32
    return %c0_i32, %c0_i32_0 : i32, i32
  }
  func.func @transform_4(%arg0: i32) -> (i32, i32) {
    %c0_i32 = arith.constant 0 : i32
    %c0_i32_0 = arith.constant 0 : i32
    %c0_i32_1 = arith.constant 0 : i32
    return %c0_i32, %c0_i32_0 : i32, i32
  }
  func.func @transform_5(%arg0: i32) -> (i32, i32) {
    %c0_i32 = arith.constant 0 : i32
    %c0_i32_0 = arith.constant 0 : i32
    %c0_i32_1 = arith.constant 0 : i32
    return %c0_i32, %c0_i32_0 : i32, i32
  }
  func.func @transform_6(%arg0: i32) -> (i32, i32) {
    %c0_i32 = arith.constant 0 : i32
    %c0_i32_0 = arith.constant 0 : i32
    %c0_i32_1 = arith.constant 0 : i32
    return %c0_i32, %c0_i32_0 : i32, i32
  }
  func.func @transform_7(%arg0: i32) -> (i32, i32) {
    %c0_i32 = arith.constant 0 : i32
    %c0_i32_0 = arith.constant 0 : i32
    %c0_i32_1 = arith.constant 0 : i32
    return %c0_i32, %c0_i32_0 : i32, i32
  }
  func.func @transform_8(%arg0: i32) -> (i32, i32) {
    %c0_i32 = arith.constant 0 : i32
    %c0_i32_0 = arith.constant 0 : i32
    %c0_i32_1 = arith.constant 0 : i32
    return %c0_i32, %c0_i32_0 : i32, i32
  }
  func.func @transform_9(%arg0: i32) -> (i32, i32) {
    %c0_i32 = arith.constant 0 : i32
    %c0_i32_0 = arith.constant 0 : i32
    %c0_i32_1 = arith.constant 0 : i32
    return %c0_i32, %c0_i32_0 : i32, i32
  }
  func.func @transform_10(%arg0: i32) -> (i32, i32) {
    %c0_i32 = arith.constant 0 : i32
    %c0_i32_0 = arith.constant 0 : i32
    %c0_i32_1 = arith.constant 0 : i32
    return %c0_i32, %c0_i32_0 : i32, i32
  }
  func.func @transform_11(%arg0: i32) -> (i32, i32) {
    %c0_i32 = arith.constant 0 : i32
    %c0_i32_0 = arith.constant 0 : i32
    %c0_i32_1 = arith.constant 0 : i32
    return %c0_i32, %c0_i32_0 : i32, i32
  }
  func.func @transform_12(%arg0: i32) -> (i32, i32) {
    %c0_i32 = arith.constant 0 : i32
    %c0_i32_0 = arith.constant 0 : i32
    return %arg0, %c0_i32 : i32, i32
  }
}

</mosaic_0001>

<bundles_post_ra>
// kernel: block_forward.1
= control target key start
LH: loop header
LB: loop body
LE: loop exit
PB: predicated region body
PF: predicated region fallthrough
CT: control target
= control target key end

     0   :  { %s19982_s0 = inlined_call_operand.hbm [shape: f32[128,384], index: 0, kind: input, shape index: {}]   ;;  %s19983_s1 = inlined_call_operand.hbm [shape: f32[1,384], index: 1, kind: input, shape index: {}]   ;;  %s19984_s2 = inlined_call_operand.hbm [shape: f32[1,384], index: 2, kind: input, shape index: {}]   ;;  %s19985_s3 = inlined_call_operand.hbm [shape: bf16[384,1152], index: 3, kind: input, shape index: {}]   ;;  %s19986_s4 = inlined_call_operand.hbm [shape: bf16[384,384], index: 4, kind: input, shape index: {}]   ;;  %s19987_s5 = inlined_call_operand.hbm [shape: f32[1,384], index: 5, kind: input, shape index: {}]   ;;  %s19988_s6 = inlined_call_operand.hbm [shape: f32[1,384], index: 6, kind: input, shape index: {}]   ;;  %s19989_s7 = inlined_call_operand.hbm [shape: f32[1,384], index: 7, kind: input, shape index: {}]   ;;  %s19990_s8 = inlined_call_operand.hbm [shape: bf16[384,1536], index: 8, kind: input, shape index: {}]   ;;  %s19991_s9 = inlined_call_operand.hbm [shape: f32[1,1536], index: 9, kind: input, shape index: {}]   ;;  %s19992_s10 = inlined_call_operand.hbm [shape: bf16[1536,384], index: 10, kind: input, shape index: {}]   ;;  %s19993_s11 = inlined_call_operand.hbm [shape: f32[1,384], index: 11, kind: input, shape index: {}]   ;;  %s19994_s12 = inlined_call_operand.hbm [shape: f32[128,384], index: 12, kind: output, shape index: {}]  }
   0x1   :  { %20044 = sst [smem:[#allocation91_spill]] %s19983_s1 }
   0x2   :  { %20045 = sst [smem:[#allocation92_spill]] %s19984_s2 }
   0x3   :  { %20046 = sst [smem:[#allocation93_spill]] %s19985_s3 }
   0x4   :  { %20047 = sst [smem:[#allocation94_spill]] %s19986_s4 }
   0x5   :  { %20048 = sst [smem:[#allocation95_spill]] %s19987_s5 }
   0x6   :  { %20049 = sst [smem:[#allocation96_spill]] %s19988_s6 }
   0x7   :  { %17 = vsyncpa [#allocation5], 0 }
   0x8   :  { %19 = vsyncpa [#allocation5 + $0x1], 0 }
   0x9   :  { %20 = vsyncpa [#allocation8], 0 }
   0xa   :  { %21 = vsyncpa [#allocation11], 0 }
   0xb   :  { %22 = vsyncpa [#allocation14], 0 }
   0xc   :  { %23 = vsyncpa [#allocation17], 0 }
   0xd   :  { %24 = vsyncpa [#allocation20], 0 }
   0xe   :  { %25 = vsyncpa [#allocation23], 0 }
   0xf   :  { %26 = vsyncpa [#allocation6], 0 }
  0x10   :  { %28 = vsyncpa [#allocation6 + $0x1], 0  ;;  %s16804_s21 = smov 0   ;;  %s16806_s22 = smov 0  }
  0x11   :  { %s16808_s23 = smov 0   ;;  %s16810_s24 = smov 0  }
  0x12 LB: > { %s16714_s25 = smov [#allocation7]   ;;  %s16825_s27 = sadd.s32 4294967295, %s16712_s24   ;;  %s16712_s24 = sphi %s16810_s24, %s20288_s24   ;;  %s16708_s23 = sphi %s16808_s23, %s20287_s23   ;;  %s16704_s22 = sphi %s16806_s22, %s20286_s22   ;;  %s16700_s21 = sphi %s16804_s21, %s20285_s21  }
  0x13   : > { %s335_s26 = sshll.u32 %s16714_s25, 4  ;;  %p12655_p0 = scmp.ge.s32.totalorder %s16712_s24, 1  ;;  %s336_s26 = int_to_ptr.vmem [resolvable:$true] %s335_s26 }
  0x14   : > { %p19995_p1 = scmp.eq.s32.totalorder %s16825_s27, 0  ;;  %p322_p2 = scmp.lt.s32.totalorder %s16712_s24, 3 }
  0x15   : > { %s16715_s29 = smov [#allocation10]   ;;  %s16716_s14 = smov [#allocation13]  }
  0x16   : > { %p16830_p3 = pnand %p12655_p0, %p322_p2  ;;  %s356_s30 = sshll.u32 %s16715_s29, 4  ;;  %s16837_s30 = int_to_ptr.vmem [resolvable:$true] %s356_s30 }
  0x17   : > { %s383_s15 = sshll.u32 %s16716_s14, 4  ;;  %s16321_s17 = scalar_lea.vmem %s336_s26, 48  ;;  %s16845_s15 = int_to_ptr.vmem [resolvable:$true] %s383_s15 }
  0x18   : > { %s20050_s28 = scalar_select %p16830_p3, 1, 0 }
  0x19   : > { %p14616_p5 = pneg %p16830_p3  ;;  %p16322_p8 = scmp.ne.s32.totalorder %s336_s26, %s16321_s17 }
  0x1a   : > { %s16328_s18 = scalar_lea.vmem %s336_s26, 64  ;;  %p16329_p11 = scmp.lt.s32.totalorder %s336_s26, %s336_s26 }
  0x1b   : > { %p16841_p6 = pnand %p14616_p5, %p19995_p1  ;;  %p16330_p12 = scmp.lt.s32.totalorder %s16328_s18, %s16321_s17 }
  0x1d   : > { %p16849_p7 = pneg %p16841_p6  ;;  %p16331_p13 = por %p16330_p12, %p16329_p11 }
  0x1f   : > { %p16324_p9 = pnand %p16322_p8, %p16849_p7 }
  0x21   : > { %p16325_p10 = pneg %p16324_p9 }
  0x23   : > { %p16332_p0 = pnand %p16331_p13, %p16325_p10 }
  0x25   : > { %16335 = shalt.err (!%p16332_p0)
}
  0x26   : > { %s20053_s1 = sld [smem:[#allocation91_spill]]  ;;  %s16347_s25 = scalar_lea.vmem %s16837_s30, 27648 }
  0x27   : > { %p16348_p2 = scmp.ne.s32.totalorder %s16837_s30, %s16347_s25  ;;  %p16355_p9 = scmp.lt.s32.totalorder %s16837_s30, %s16837_s30 }
  0x28   : > { %p16356_p11 = scmp.lt.s32.totalorder %s16347_s25, %s16347_s25 }
  0x29   : > { %p16350_p5 = pnand %p16348_p2, %p16849_p7 }
  0x2a   : > { %p16357_p10 = por %p16356_p11, %p16355_p9 }
  0x2b   : > { %p16351_p8 = pneg %p16350_p5 }
  0x2c   : > { %14619 = dma.hbm_to_vmem [thread:$0]  (!%p16841_p6), %s20053_s1, 48, %s336_s26, [#allocation8]  }
  0x2d   : > { %p16358_p12 = pnand %p16357_p10, %p16351_p8 }
  0x2f   : > { %16361 = shalt.err (!%p16358_p12)
}
  0x30   : > { %s16717_s29 = smov 576   ;;  %s16718_s26 = smov 36  }
  0x31   : > { %s20054_s3 = sld [smem:[#allocation93_spill]]  ;;  %s16373_s18 = scalar_lea.vmem %s16845_s15, 48 }
  0x32   : > { %p16374_p13 = scmp.ne.s32.totalorder %s16845_s15, %s16373_s18  ;;  %s16380_s19 = scalar_lea.vmem %s16845_s15, 64 }
  0x33   : > { %p16381_p5 = scmp.lt.s32.totalorder %s16845_s15, %s16845_s15  ;;  %p16382_p8 = scmp.lt.s32.totalorder %s16380_s19, %s16373_s18 }
  0x34   : > { %p16376_p0 = pnand %p16374_p13, %p16849_p7 }
  0x35   : > { %p16383_p9 = por %p16382_p8, %p16381_p5 }
  0x36   : > { %p16377_p2 = pneg %p16376_p0 }
  0x37   : > { %14625 = dma.hbm_to_vmem [thread:$0]  (!%p16841_p6), %s20054_s3, 27648, %s16837_s30, [#allocation11], %s16717_s29, %s16717_s29, %s16718_s26  }
  0x38   : > { %p16384_p11 = pnand %p16383_p9, %p16377_p2 }
  0x3a   : > { %16387 = shalt.err (!%p16384_p11)
}
  0x3b   : > { %s20055_s5 = sld [smem:[#allocation95_spill]]  ;;  %s16719_s30 = smov [#allocation16]  }
  0x3c   : > { %s405_s29 = sshll.u32 %s16719_s30, 4  ;;  %s16720_s26 = smov [#allocation19]   ;;  %s406_s29 = int_to_ptr.vmem [resolvable:$true] %s405_s29 }
  0x3d   : > { %s429_s14 = sshll.u32 %s16720_s26, 4  ;;  %s16399_s17 = scalar_lea.vmem %s406_s29, 48  ;;  %s430_s14 = int_to_ptr.vmem [resolvable:$true] %s429_s14 }
  0x3e   : > { %p16400_p10 = scmp.ne.s32.totalorder %s406_s29, %s16399_s17  ;;  %s16406_s18 = scalar_lea.vmem %s406_s29, 64 }
  0x3f   : > { %p16407_p0 = scmp.lt.s32.totalorder %s406_s29, %s406_s29  ;;  %p16408_p2 = scmp.lt.s32.totalorder %s16406_s18, %s16399_s17 }
  0x40   : > { %p16402_p12 = pnand %p16400_p10, %p16849_p7 }
  0x41   : > { %14631 = dma.hbm_to_vmem [thread:$0]  (!%p16841_p6), %s20055_s5, 48, %s16845_s15, [#allocation14]  }
  0x42   : > { %p16403_p13 = pneg %p16402_p12  ;;  %p16409_p5 = por %p16408_p2, %p16407_p0 }
  0x44   : > { %p16410_p8 = pnand %p16409_p5, %p16403_p13 }
  0x46   : > { %16413 = shalt.err (!%p16410_p8)
}
  0x47   : > { %14637 = dma.hbm_to_vmem [thread:$0]  (!%p16841_p6), %s19989_s7, 48, %s406_s29, [#allocation17]  }
  0x48   : > { %s16425_s20 = scalar_lea.vmem %s430_s14, 192  ;;  %p16433_p12 = scmp.lt.s32.totalorder %s430_s14, %s430_s14 }
  0x49   : > { %p16426_p9 = scmp.ne.s32.totalorder %s430_s14, %s16425_s20  ;;  %p16434_p4 = scmp.lt.s32.totalorder %s16425_s20, %s16425_s20 }
  0x4b   : > { %p16428_p11 = pnand %p16426_p9, %p16849_p7  ;;  %p16435_p1 = por %p16434_p4, %p16433_p12 }
  0x4d   : > { %p16429_p10 = pneg %p16428_p11 }
  0x4f   : > { %p16436_p3 = pnand %p16435_p1, %p16429_p10 }
  0x51   : > { %16439 = shalt.err (!%p16436_p3)
}
  0x52   : > { %14643 = dma.hbm_to_vmem [thread:$0]  (!%p16841_p6), %s19991_s9, 192, %s430_s14, [#allocation20]  }
  0x53   : > { %s16721_s26 = smov [#allocation9]   ;;  %s16722_s17 = smov [#allocation12]  }
  0x54   : > { %s346_s29 = sshll.u32 %s16721_s26, 4  ;;  %s369_s18 = sshll.u32 %s16722_s17, 4  ;;  %s347_s29 = int_to_ptr.vmem [resolvable:$true] %s346_s29  ;;  %s370_s18 = int_to_ptr.vmem [resolvable:$true] %s369_s18 }
  0x55   : > { %s16451_s19 = scalar_lea.vmem %s347_s29, 48  ;;  %s16458_s15 = scalar_lea.vmem %s347_s29, 64 }
  0x56   : > { %p16452_p13 = scmp.ne.s32.totalorder %s347_s29, %s16451_s19  ;;  %p16459_p1 = scmp.lt.s32.totalorder %s347_s29, %s347_s29 }
  0x57   : > { %p16460_p3 = scmp.lt.s32.totalorder %s16458_s15, %s16451_s19 }
  0x58   : > { %p16454_p0 = pnand %p16452_p13, %p16849_p7 }
  0x59   : > { %p16461_p4 = por %p16460_p3, %p16459_p1 }
  0x5a   : > { %p16455_p2 = pneg %p16454_p0 }
  0x5c   : > { %p16462_p5 = pnand %p16461_p4, %p16455_p2 }
  0x5e   : > { %16465 = shalt.err (!%p16462_p5)
}
  0x5f   : > { %s20056_s2 = sld [smem:[#allocation92_spill]]  ;;  %s16477_s25 = scalar_lea.vmem %s370_s18, 9216 }
  0x60   : > { %p16478_p8 = scmp.ne.s32.totalorder %s370_s18, %s16477_s25  ;;  %p16485_p10 = scmp.lt.s32.totalorder %s370_s18, %s370_s18 }
  0x61   : > { %p16486_p12 = scmp.lt.s32.totalorder %s16477_s25, %s16477_s25 }
  0x62   : > { %p16480_p9 = pnand %p16478_p8, %p16849_p7 }
  0x63   : > { %p16487_p13 = por %p16486_p12, %p16485_p10 }
  0x64   : > { %p16481_p11 = pneg %p16480_p9 }
  0x65   : > { %14622 = dma.hbm_to_vmem [thread:$0]  (!%p16841_p6), %s20056_s2, 48, %s347_s29, [#allocation8]  }
  0x66   : > { %p16488_p0 = pnand %p16487_p13, %p16481_p11 }
  0x68   : > { %16491 = shalt.err (!%p16488_p0)
}
  0x69   : > { %s19997_s30 = smov 192   ;;  %s19998_s26 = smov 12  }
  0x6a   : > { %s20057_s4 = sld [smem:[#allocation94_spill]]  ;;  %s16725_s19 = smov [#allocation15]  }
  0x6b   : > { %s394_s15 = sshll.u32 %s16725_s19, 4  ;;  %s16726_s20 = smov [#allocation18]   ;;  %s395_s15 = int_to_ptr.vmem [resolvable:$true] %s394_s15 }
  0x6c   : > { %s415_s14 = sshll.u32 %s16726_s20, 4  ;;  %s16503_s25 = scalar_lea.vmem %s395_s15, 48  ;;  %s416_s14 = int_to_ptr.vmem [resolvable:$true] %s415_s14 }
  0x6d   : > { %p16504_p2 = scmp.ne.s32.totalorder %s395_s15, %s16503_s25  ;;  %s16510_s1 = scalar_lea.vmem %s395_s15, 64 }
  0x6e   : > { %p16511_p4 = scmp.lt.s32.totalorder %s395_s15, %s395_s15  ;;  %p16512_p5 = scmp.lt.s32.totalorder %s16510_s1, %s16503_s25 }
  0x6f   : > { %p16506_p1 = pnand %p16504_p2, %p16849_p7 }
  0x70   : > { %14628 = dma.hbm_to_vmem [thread:$0]  (!%p16841_p6), %s20057_s4, 9216, %s370_s18, [#allocation11], %s19997_s30, %s19997_s30, %s19998_s26  }
  0x71   : > { %p16507_p3 = pneg %p16506_p1  ;;  %p16513_p8 = por %p16512_p5, %p16511_p4 }
  0x73   : > { %p16514_p9 = pnand %p16513_p8, %p16507_p3 }
  0x75   : > { %16517 = shalt.err (!%p16514_p9)
}
  0x76   : > { %s20058_s6 = sld [smem:[#allocation96_spill]]  ;;  %s16529_s17 = scalar_lea.vmem %s416_s14, 36864 }
  0x77   : > { %p16530_p11 = scmp.ne.s32.totalorder %s416_s14, %s16529_s17  ;;  %p16537_p13 = scmp.lt.s32.totalorder %s416_s14, %s416_s14 }
  0x78   : > { %p16538_p0 = scmp.lt.s32.totalorder %s16529_s17, %s16529_s17 }
  0x79   : > { %p16532_p10 = pnand %p16530_p11, %p16849_p7 }
  0x7a   : > { %p16539_p2 = por %p16538_p0, %p16537_p13 }
  0x7b   : > { %p16533_p12 = pneg %p16532_p10 }
  0x7c   : > { %14634 = dma.hbm_to_vmem [thread:$0]  (!%p16841_p6), %s20058_s6, 48, %s395_s15, [#allocation14]  }
  0x7d   : > { %p16540_p1 = pnand %p16539_p2, %p16533_p12 }
  0x7f   : > { %16543 = shalt.err (!%p16540_p1)
}
  0x80   : > { %s16727_s1 = smov 768   ;;  %s16728_s19 = smov 48  }
  0x81   : > { %14640 = dma.hbm_to_vmem [thread:$0]  (!%p16841_p6), %s19990_s8, 36864, %s416_s14, [#allocation17], %s16727_s1, %s16727_s1, %s16728_s19  }
  0x82   : > { %s16729_s15 = smov [#allocation21]   ;;  %s16730_s18 = smov [#allocation22]  }
  0x83   : > { %s439_s29 = sshll.u32 %s16729_s15, 4  ;;  %s453_s30 = sshll.u32 %s16730_s18, 4  ;;  %s440_s29 = int_to_ptr.vmem [resolvable:$true] %s439_s29  ;;  %s454_s30 = int_to_ptr.vmem [resolvable:$true] %s453_s30 }
  0x84   : > { %s16555_s26 = scalar_lea.vmem %s440_s29, 36864  ;;  %p16563_p8 = scmp.lt.s32.totalorder %s440_s29, %s440_s29 }
  0x85   : > { %p16556_p3 = scmp.ne.s32.totalorder %s440_s29, %s16555_s26  ;;  %p16564_p9 = scmp.lt.s32.totalorder %s16555_s26, %s16555_s26 }
  0x87   : > { %p16558_p4 = pnand %p16556_p3, %p16849_p7  ;;  %p16565_p11 = por %p16564_p9, %p16563_p8 }
  0x89   : > { %p16559_p5 = pneg %p16558_p4 }
  0x8b   : > { %p16566_p10 = pnand %p16565_p11, %p16559_p5 }
  0x8d   : > { %16569 = shalt.err (!%p16566_p10)
}
  0x8e   : > { %s20059_s17 = smov 12   ;;  %s20060_s20 = smov 192  }
  0x8f   : > { %14646 = dma.hbm_to_vmem [thread:$0]  (!%p16841_p6), %s19992_s10, 36864, %s440_s29, [#allocation20], %s20060_s20, %s20060_s20, %s20059_s17  }
  0x90   : > { %s16581_s19 = scalar_lea.vmem %s454_s30, 48  ;;  %s16588_s26 = scalar_lea.vmem %s454_s30, 64 }
  0x91   : > { %p16582_p12 = scmp.ne.s32.totalorder %s454_s30, %s16581_s19  ;;  %p16589_p2 = scmp.lt.s32.totalorder %s454_s30, %s454_s30 }
  0x92   : > { %p16590_p1 = scmp.lt.s32.totalorder %s16588_s26, %s16581_s19 }
  0x93   : > { %p16584_p13 = pnand %p16582_p12, %p16849_p7 }
  0x94   : > { %p16591_p3 = por %p16590_p1, %p16589_p2 }
  0x95   : > { %p16585_p0 = pneg %p16584_p13 }
  0x97   : > { %p16592_p4 = pnand %p16591_p3, %p16585_p0 }
  0x99   : > { %16595 = shalt.err (!%p16592_p4)
}
  0x9a   : > { %14649 = dma.hbm_to_vmem [thread:$0]  (!%p16841_p6), %s19993_s11, 48, %s454_s30, [#allocation23]  }
  0x9b   : > { %s12654_s16 = sadd.s32 4294967294, %s16712_s24   ;;  %s16949_s13 = sadd.s32 1, %s16712_s24  }
  0x9c   : > { %s41_s29 = sadd.s32 1, %s16708_s23  ;;  %s38_s18 = ssub.s32 %s16712_s24, %s16949_s13 }
  0x9d   : > { %p48_p7 = scmp.ne.s32.totalorder %s16708_s23, %s16704_s22  ;;  %p39_p5 = scmp.eq.s32.totalorder %s38_s18, 0 }
  0x9e   : > { %p49_p8 = scmp.eq.s32.totalorder %s16712_s24, 0  ;;  %p54_p9 = scmp.ne.s32.totalorder %s16704_s22, %s16700_s21 }
  0x9f   : > { %p309_p11 = scmp.eq.s32.totalorder %s16825_s27, 1  ;;  %p20061_p12 = scmp.eq.s32.totalorder %s16825_s27, 0 }
  0xa0   : > { %s16961_s17 = scalar_select %p39_p5, %s16708_s23, %s41_s29  }
  0xa1   : > { %p50_p10 = por %p49_p8, %p48_p7  ;;  %p16965_p13 = por %p20061_p12, %p54_p9 }
  0xa2   : > { %p16969_p6 = por %p309_p11, %p48_p7  ;;  %p315_p0 = scmp.eq.s32.totalorder %s12654_s16, 1 }
  0xa3   : > { %s20062_s20 = scalar_select %p16965_p13, 1, 0 }
  0xa4   : > { %s20063_s30 = scalar_select %p16969_p6, 1, 0 }
  0xa5   : > { %p14669_p2 = scmp.lt.s32.totalorder %s16712_s24, 2  ;;  %s464_s14 = sand.u32 1, %s16708_s23  }
  0xa6   : > { %p16975_p1 = por %p315_p0, %p54_p9  ;;  %s14564_s19 = smul.u32 192, %s464_s14 }
  0xa7   : > { %p16979_p3 = pnand %p14669_p2, %p50_p10  ;;  %s14565_s25 = smul.u32 3072, %s16712_s24 }
  0xa8   : > { %s20064_s1 = scalar_select %p16975_p1, 1, 0 }
  0xa9   : > { %s16987_s18 = scalar_lea.hbm %s19982_s0, %s14565_s25  ;;  %s468_s16 = scalar_lea.vmem [#allocation4], %s14564_s19 }
  0xaa   : > { %s476_s2 = sshll.u32 %s468_s16, 4  ;;  %s16991_s3 = scalar_lea.sflag [#allocation5], %s464_s14  ;;  %s16989_s2 = int_to_ptr.vmem [resolvable:$true] %s476_s2 }
  0xab   : > { %s16596_s4 = scalar_lea.hbm %s16987_s18, 3072  ;;  %p16598_p7 = pneg %p16979_p3 }
  0xac   : > { %p16597_p4 = scmp.ne.s32.totalorder %s16987_s18, %s16596_s4  ;;  %s16601_s25 = scalar_lea.hbm %s19982_s0, 6144 }
  0xad   : > { %p16602_p9 = scmp.lt.s32.totalorder %s16987_s18, %s19982_s0  ;;  %p16603_p11 = scmp.lt.s32.totalorder %s16601_s25, %s16596_s4 }
  0xae   : > { %p16599_p5 = pnand %p16598_p7, %p16597_p4 }
  0xaf   : > { %p16604_p10 = por %p16603_p11, %p16602_p9 }
  0xb0   : > { %p16600_p8 = pneg %p16599_p5 }
  0xb2   : > { %p16605_p12 = pnand %p16604_p10, %p16600_p8 }
  0xb4   : > { %16608 = shalt.err (!%p16605_p12)
}
  0xb5   : > { %s16609_s14 = scalar_lea.vmem %s16989_s2, 3072  ;;  %s16731_s19 = smov [#allocation4]  }
  0xb6   : > { %p16610_p0 = scmp.ne.s32.totalorder %s16989_s2, %s16609_s14  ;;  %s16614_s16 = sshll.u32 %s16731_s19, 4  ;;  %s16615_s16 = int_to_ptr.vmem [resolvable:$false] %s16614_s16 }
  0xb7   : > { %s16616_s5 = scalar_lea.vmem %s16615_s16, 6144  ;;  %p16617_p5 = scmp.lt.s32.totalorder %s16989_s2, %s16615_s16 }
  0xb8   : > { %p16612_p2 = pnand %p16610_p0, %p16598_p7  ;;  %p16618_p1 = scmp.lt.s32.totalorder %s16616_s5, %s16609_s14 }
  0xba   : > { %p16613_p4 = pneg %p16612_p2  ;;  %p16619_p6 = por %p16618_p1, %p16617_p5 }
  0xbc   : > { %p16620_p13 = pnand %p16619_p6, %p16613_p4 }
  0xbe   : > { %16623 = shalt.err (!%p16620_p13)
}
  0xbf   : > { %s16732_s4 = smov 384   ;;  %s16733_s6 = smov 24  }
  0xc0   : > { %14653 = dma.hbm_to_vmem [thread:$0]  (!%p16979_p3), %s16987_s18, 3072, %s16989_s2, %s16991_s3, %s16732_s4, %s16732_s4, %s16733_s6  }
  0xc1   : > { %p20066_p7 = scmp.ne.s32.totalorder %s20050_s28, 0 }
  0xc3   : > { %488 = sbr.rel (%p20066_p7) target bundleno = 5444 (0x1544), region = 68 }
  0xc8   : > { %s17015_s25 = sand.u32 1, %s16704_s22   ;;  %p20067_p13 = scmp.ne.s32.totalorder %s20062_s20, 0 }
  0xc9   : > { %s14566_s15 = smul.u32 192, %s17015_s25  ;;  %s491_s29 = scalar_lea.sflag [#allocation5], %s17015_s25 }
  0xcb   : > { %s17021_s14 = scalar_lea.vmem [#allocation4], %s14566_s15 }
  0xcc   : > { %16667 = dma.done.wait (%p20067_p13), %s491_s29, 3072  }
  0xcd   : > { %16669 = vsyncadd (%p20067_p13), %s491_s29, 4294964224  ;;  %p20068_p6 = scmp.eq.s32.totalorder %s16825_s27, 0 }
  0xcf   : > { %16671 = dma.done.wait (%p20068_p6), [#allocation8], 96   ;;  %p20069_p1 = pmov %p20068_p6 }
  0xd1   : > { %16673 = vsyncadd (%p20069_p1), [#allocation8], 4294967200  ;;  %p20070_p3 = pmov %p20069_p1 }
  0xd2   : > { %p20071_p8 = pmov %p20069_p1 }
  0xd3   : > { %16675 = dma.done.wait (%p20070_p3), [#allocation11], 36864  }
  0xd4   : > { %16677 = vsyncadd (%p20071_p8), [#allocation11], 4294930432  ;;  %p20072_p9 = pmov %p20069_p1 }
  0xd5   : > { %p20073_p11 = pmov %p20069_p1 }
  0xd6   : > { %16679 = dma.done.wait (%p20072_p9), [#allocation14], 96  }
  0xd7   : > { %16681 = vsyncadd (%p20073_p11), [#allocation14], 4294967200  ;;  %p20074_p10 = pmov %p20069_p1 }
  0xd8   : > { %p20075_p12 = pmov %p20069_p1 }
  0xd9   : > { %16683 = dma.done.wait (%p20074_p10), [#allocation17], 36912  }
  0xda   : > { %16685 = vsyncadd (%p20075_p12), [#allocation17], 4294930384  ;;  %p20076_p0 = pmov %p20069_p1 }
  0xdc   : > { %16687 = dma.done.wait (%p20076_p0), [#allocation20], 37056   ;;  %p20077_p2 = pmov %p20076_p0 }
  0xdd   : > { %p20078_p4 = pmov %p20076_p0 }
  0xde   : > { %16689 = vsyncadd (%p20077_p2), [#allocation20], 4294930240 }
  0xdf   : > { %16691 = dma.done.wait (%p20078_p4), [#allocation23], 48   ;;  %p20079_p5 = pmov %p20076_p0 }
  0xe0   : > { %v17052_v0 = vld [vmem:[%s17021_s14] sm:$0xff]  ;;  %v17055_v1 = vld [vmem:[%s17021_s14 + $0x8] sm:$0xff]  ;;  %v17058_v2 = vld [vmem:[%s17021_s14 + $0x10] sm:$0xff]  ;;  %vm3274_vm0 = vcmask 523264   ;;  %s16735_s2 = smov 64   ;;  %vm3597_vm9 = vcmask 519168  }
  0xe1   : > { %16693 = vsyncadd (%p20079_p5), [#allocation23], 4294967248  ;;  %v608_v3 = vadd.f32 %v17055_v1, %v17052_v0  ;;  %v17063_v4 = vld [vmem:[%s17021_s14 + $0x30] sm:$0xff]  ;;  %v17066_v5 = vld [vmem:[%s17021_s14 + $0x38] sm:$0xff]  ;;  %vm4032_vm10 = vcmask 1043968   ;;  %s19677_s3 = scalar_lea.vmem [#allocation24], %s14566_s15 }
  0xe2   : > { %v17069_v6 = vld [vmem:[%s17021_s14 + $0x40] sm:$0xff]  ;;  %v616_v7 = vadd.f32 %v17066_v5, %v17063_v4  ;;  %v17074_v8 = vld [vmem:[%s17021_s14 + $0x18] sm:$0xff]  ;;  %v17080_v10 = vld [vmem:[%s17021_s14 + $0x28] sm:$0xff]  ;;  %s14567_s28 = smul.u32 3072, %s16825_s27  ;;  %s12476_s20 = sshll.u32 %s19677_s3, 4  ;;  %s19938_s20 = int_to_ptr.vmem [resolvable:$true] %s12476_s20 }
  0xe3   : > { %v17077_v9 = vld [vmem:[%s17021_s14 + $0x20] sm:$0xff]  ;;  %v609_v11 = vadd.f32 %v608_v3, %v17058_v2  ;;  %v17086_v13 = vld [vmem:[%s17021_s14 + $0x48] sm:$0xff]  ;;  %v17089_v14 = vld [vmem:[%s17021_s14 + $0x50] sm:$0xff]  ;;  %s12462_s27 = scalar_lea.sflag [#allocation6], %s17015_s25  ;;  %s16624_s16 = scalar_lea.vmem %s19938_s20, 3072 }
  0xe4   : > { %v612_v12 = vadd.f32 %v17077_v9, %v17074_v8  ;;  %v17092_v15 = vld [vmem:[%s17021_s14 + $0x58] sm:$0xff]  ;;  %v617_v16 = vadd.f32 %v616_v7, %v17069_v6  ;;  %v620_v17 = vadd.f32 %v17089_v14, %v17086_v13  ;;  %v594_v18 = vld [vmem:[%s17021_s14 + $0x60] sm:$0xff]  ;;  %v595_v19 = vld [vmem:[%s17021_s14 + $0x68] sm:$0xff]  ;;  %s19935_s19 = scalar_lea.hbm %s19994_s12, %s14567_s28  ;;  %p16625_p7 = scmp.ne.s32.totalorder %s19938_s20, %s16624_s16 }
  0xe5   : > { %610 = vadd.xlane.f32.xlu0 %v609_v11  ;;  %v624_v21 = vadd.f32 %v595_v19, %v594_v18  ;;  %v597_v22 = vld [vmem:[%s17021_s14 + $0x78] sm:$0xff]  ;;  %v598_v23 = vld [vmem:[%s17021_s14 + $0x80] sm:$0xff]  ;;  %v596_v25 = vld [vmem:[%s17021_s14 + $0x70] sm:$0xff]  ;;  %p20282_p13 = scmp.ne.s32.totalorder %s20063_s30, 0  ;;  %s16736_s5 = smov [#allocation24]  }
  0xe6   : > { %v613_v20 = vadd.f32 %v612_v12, %v17080_v10  ;;  %618 = vadd.xlane.f32.xlu1 %v617_v16  ;;  %v621_v24 = vadd.f32 %v620_v17, %v17092_v15  ;;  %v628_v26 = vadd.f32 %v598_v23, %v597_v22  ;;  %v600_v27 = vld [vmem:[%s17021_s14 + $0x90] sm:$0xff]  ;;  %v601_v28 = vld [vmem:[%s17021_s14 + $0x98] sm:$0xff]  ;;  %v599_v29 = vld [vmem:[%s17021_s14 + $0x88] sm:$0xff]  ;;  %s16628_s4 = sshll.u32 %s16736_s5, 4  ;;  %s16629_s4 = int_to_ptr.vmem [resolvable:$false] %s16628_s4 }
  0xe7   : > { %v603_v30 = vld [vmem:[%s17021_s14 + $0xa8] sm:$0xff]  ;;  %v604_v31 = vld [vmem:[%s17021_s14 + $0xb0] sm:$0xff]  ;;  %v602_v32 = vld [vmem:[%s17021_s14 + $0xa0] sm:$0xff]  ;;  %v625_v33 = vadd.f32 %v624_v21, %v596_v25  ;;  %v632_v34 = vadd.f32 %v601_v28, %v600_v27  ;;  %p16626_p6 = pnand %p16625_p7, %p20282_p13  ;;  %s16630_s6 = scalar_lea.vmem %s16629_s4, 6144 }
  0xe8   : > { %v605_v35 = vld [vmem:[%s17021_s14 + $0xb8] sm:$0xff]  ;;  %v629_v36 = vadd.f32 %v628_v26, %v599_v29  ;;  %v636_v37 = vadd.f32 %v604_v31, %v603_v30  ;;  %v14737_v40 = vld [vmem:[#allocation10 + $0x1fc] ss:$36 sps:$4 sm:$0xff]   ;;  %v14745_v45 = vld [vmem:[#allocation10 + $0x168] ss:$36 sps:$4 sm:$0xff]   ;;  %p16631_p3 = scmp.lt.s32.totalorder %s19938_s20, %s16629_s4  ;;  %p16632_p8 = scmp.lt.s32.totalorder %s16630_s6, %s16624_s16 }
  0xe9   : > { %614 = vadd.xlane.f32.xlu0 %v613_v20  ;;  %v633_v38 = vadd.f32 %v632_v34, %v602_v32  ;;  %v14739_v41 = vld [vmem:[#allocation10 + $0x1f8] ss:$36 sps:$4 sm:$0xff]   ;;  %2213 = vmatprep.subr.bf16.mxu0 %v14737_v40  ;;  %v14742_v43 = vld [vmem:[#allocation10 + $0x1b0] ss:$36 sps:$4 sm:$0xff]   ;;  %v14746_v47 = vld [vmem:[#allocation10 + $0x124] ss:$36 sps:$4 sm:$0xff]   ;;  %p16627_p1 = pneg %p16626_p6 }
  0xea   : > { %622 = vadd.xlane.f32.xlu1 %v621_v24  ;;  %v637_v39 = vadd.f32 %v636_v37, %v605_v35  ;;  %v14740_v42 = vld [vmem:[#allocation10 + $0x1b4] ss:$36 sps:$4 sm:$0xff]   ;;  %2214 = vmatpush1.bf16.msra.mxu0 %v14739_v41  ;;  %v14743_v44 = vld [vmem:[#allocation10 + $0x16c] ss:$36 sps:$4 sm:$0xff]   ;;  %v14761_v46 = vld [vmem:[#allocation10 + $0x67c] ss:$36 sps:$4 sm:$0xff]   ;;  %p16633_p9 = por %p16632_p8, %p16631_p3 }
  0xeb   : > { %2215 = vmatprep.subr.bf16.mxu0 %v14740_v42  ;;  %v14765_v48 = vld [vmem:[#allocation10 + $0x678] ss:$36 sps:$4 sm:$0xff]   ;;  %2286 = vmatprep.subr.bf16.mxu1 %v14761_v46  ;;  %v14748_v49 = vld [vmem:[#allocation10 + $0x120] ss:$36 sps:$4 sm:$0xff]   ;;  %v14754_v53 = vld [vmem:[#allocation10 + $0x90] ss:$36 sps:$4 sm:$0xff]  }
  0xec   : > { %2287 = vmatpush1.bf16.msra.mxu1 %v14765_v48  ;;  %v14749_v50 = vld [vmem:[#allocation10 + $0xdc] ss:$36 sps:$4 sm:$0xff]   ;;  %v14752_v52 = vld [vmem:[#allocation10 + $0x94] ss:$36 sps:$4 sm:$0xff]   ;;  %v14755_v54 = vld [vmem:[#allocation10 + $0x4c] ss:$36 sps:$4 sm:$0xff]   ;;  %p16634_p11 = pnand %p16633_p9, %p16627_p1 }
  0xed   : > { %626 = vadd.xlane.f32.xlu0 %v625_v33  ;;  %v14751_v51 = vld [vmem:[#allocation10 + $0xd8] ss:$36 sps:$4 sm:$0xff]   ;;  %v14757_v55 = vld [vmem:[#allocation10 + $0x48] ss:$36 sps:$4 sm:$0xff]   ;;  %v14760_v57 = vld [vmem:[#allocation10] ss:$36 sps:$4 sm:$0xff]  }
  0xee   : > { %630 = vadd.xlane.f32.xlu1 %v629_v36  ;;  %2216 = vmatpush1.bf16.msra.mxu0 %v14742_v43  ;;  %v14758_v56 = vld [vmem:[#allocation10 + $0x4] ss:$36 sps:$4 sm:$0xff]   ;;  %v14763_v58 = vld [vmem:[#allocation10 + $0x43c] ss:$36 sps:$4 sm:$0xff]   ;;  %v16275_v40 = vld [vmem:[%s17021_s14 + $0x78] sm:$0xff] }
  0xef   : > { %2217 = vmatprep.subr.bf16.mxu0 %v14743_v44  ;;  %v14766_v59 = vld [vmem:[#allocation10 + $0x438] ss:$36 sps:$4 sm:$0xff]   ;;  %v16274_v36 = vld [vmem:[%s17021_s14 + $0x68] sm:$0xff]  ;;  %v16277_v46 = vld [vmem:[%s17021_s14 + $0x70] sm:$0xff] }
  0xf0   : > { %v16273_v34 = vld [vmem:[%s17021_s14 + $0x60] sm:$0xff] }
  0xf1   : > { %634 = vadd.xlane.f32.xlu0 %v633_v38  ;;  %v16276_v42 = vld [vmem:[%s17021_s14 + $0x80] sm:$0xff] }
  0xf2   : > { %638 = vadd.xlane.f32.xlu1 %v637_v39  ;;  %2218 = vmatpush1.bf16.msra.mxu0 %v14745_v45 }
  0xf3   : > { %2219 = vmatprep.subr.bf16.mxu0 %v14746_v47 }
  0xf6   : > { %2220 = vmatpush1.bf16.msra.mxu0 %v14748_v49 }
  0xf7   : > { %2221 = vmatprep.subr.bf16.mxu0 %v14749_v50 }
  0xfa   : > { %2222 = vmatpush1.bf16.msra.mxu0 %v14751_v51 }
  0xfb   : > { %2223 = vmatprep.subr.bf16.mxu0 %v14752_v52 }
  0xfe   : > { %2224 = vmatpush1.bf16.msra.mxu0 %v14754_v53 }
  0xff   : > { %2225 = vmatprep.subr.bf16.mxu0 %v14755_v54 }
 0x102   : > { %2226 = vmatpush1.bf16.msra.mxu0 %v14757_v55 }
 0x103   : > { %2227 = vmatprep.subr.bf16.mxu0 %v14758_v56  ;;  %v16278_v56 = vld [vmem:[%s17021_s14 + $0x88] sm:$0xff] }
 0x106   : > { %2228 = vmatpush1.bf16.msra.mxu0 %v14760_v57 }
 0x107   : > { %2229 = vmatprep.subr.bf16.mxu0 %v14763_v58  ;;  %v16279_v58 = vld [vmem:[%s17021_s14 + $0x90] sm:$0xff] }
 0x10a   : > { %2230 = vmatpush2.bf16.msra.mxu0 %v14766_v59 }
 0x16e   : > { %v611_v60 = vpop.xlane.xlu0 %610 }
 0x16f   : > { %v641_v61 = vmul.f32 0.0026041667, %v611_v60  ;;  %v619_v62 = vpop.xlane.xlu1 %618  ;;  %v16280_v60 = vld [vmem:[%s17021_s14 + $0x98] sm:$0xff] }
 0x170   : > { %v643_v63 = vmul.f32 0.0026041667, %v619_v62 }
 0x171   : > { %v17112_v3 = vsub.f32 %v17052_v0, %v641_v61  ;;  %v17115_v7 = vsub.f32 %v17055_v1, %v641_v61  ;;  %v17118_v11 = vsub.f32 %v17058_v2, %v641_v61 }
 0x172   : > { %v17121_v12 = vsub.f32 %v17063_v4, %v643_v63  ;;  %v17124_v16 = vsub.f32 %v17066_v5, %v643_v63  ;;  %v615_v17 = vpop.xlane.xlu0 %614  ;;  %v17127_v18 = vsub.f32 %v17069_v6, %v643_v63  ;;  %v16281_v63 = vld [vmem:[%s17021_s14 + $0xa8] sm:$0xff] }
 0x173   : > { %v642_v19 = vmul.f32 0.0026041667, %v615_v17  ;;  %v623_v20 = vpop.xlane.xlu1 %622  ;;  %v673_v0 = vmul.f32 %v17112_v3, %v17112_v3  ;;  %v674_v1 = vmul.f32 %v17115_v7, %v17115_v7  ;;  %v675_v2 = vmul.f32 %v17118_v11, %v17118_v11 }
 0x174   : > { %v644_v4 = vmul.f32 0.0026041667, %v623_v20  ;;  %v679_v5 = vmul.f32 %v17121_v12, %v17121_v12  ;;  %v680_v21 = vmul.f32 %v17124_v16, %v17124_v16  ;;  %v681_v6 = vmul.f32 %v17127_v18, %v17127_v18 }
 0x175   : > { %v17142_v22 = vsub.f32 %v17074_v8, %v642_v19  ;;  %v17145_v23 = vsub.f32 %v17077_v9, %v642_v19  ;;  %v697_v24 = vadd.f32 %v674_v1, %v673_v0  ;;  %v17148_v25 = vsub.f32 %v17080_v10, %v642_v19  ;;  %v16282_v19 = vld [vmem:[%s17021_s14 + $0xb0] sm:$0xff] }
 0x176   : > { %v17151_v26 = vsub.f32 %v17086_v13, %v644_v4  ;;  %v17154_v27 = vsub.f32 %v17089_v14, %v644_v4  ;;  %v627_v28 = vpop.xlane.xlu0 %626  ;;  %v705_v29 = vadd.f32 %v680_v21, %v679_v5  ;;  %v17157_v8 = vsub.f32 %v17092_v15, %v644_v4  ;;  %v16283_v5 = vld [vmem:[%s17021_s14 + $0xa0] sm:$0xff] }
 0x177   : > { %v645_v30 = vmul.f32 0.0026041667, %v627_v28  ;;  %v698_v9 = vadd.f32 %v697_v24, %v675_v2  ;;  %v631_v31 = vpop.xlane.xlu1 %630  ;;  %v676_v10 = vmul.f32 %v17142_v22, %v17142_v22  ;;  %v677_v13 = vmul.f32 %v17145_v23, %v17145_v23 }
 0x178   : > { %v646_v32 = vmul.f32 0.0026041667, %v631_v31  ;;  %v706_v33 = vadd.f32 %v705_v29, %v681_v6  ;;  %v678_v14 = vmul.f32 %v17148_v25, %v17148_v25  ;;  %v682_v15 = vmul.f32 %v17151_v26, %v17151_v26  ;;  %v16284_v29 = vld [vmem:[%s17021_s14 + $0xb8] sm:$0xff] }
 0x179   : > { %v17168_v35 = vsub.f32 %v16273_v34, %v645_v30  ;;  %v17171_v37 = vsub.f32 %v16274_v36, %v645_v30  ;;  %699 = vadd.xlane.f32.xlu0 %v698_v9  ;;  %v701_v38 = vadd.f32 %v677_v13, %v676_v10  ;;  %v683_v39 = vmul.f32 %v17154_v27, %v17154_v27  ;;  %v14767_v34 = vld [vmem:[#allocation10 + $0x634] ss:$36 sps:$4 sm:$0xff]  }
 0x17a   : > { %v17176_v41 = vsub.f32 %v16275_v40, %v646_v32  ;;  %v17179_v43 = vsub.f32 %v16276_v42, %v646_v32  ;;  %v635_v44 = vpop.xlane.xlu0 %634  ;;  %v684_v45 = vmul.f32 %v17157_v8, %v17157_v8  ;;  %v17184_v47 = vsub.f32 %v16277_v46, %v645_v30  ;;  %2288 = vmatprep.subr.bf16.mxu1 %v14767_v34  ;;  %v14772_v42 = vld [vmem:[#allocation10 + $0x3f0] ss:$36 sps:$4 sm:$0xff]   ;;  %v14777_v46 = vld [vmem:[#allocation10 + $0x5e8] ss:$36 sps:$4 sm:$0xff]  }
 0x17b   : > { %v647_v48 = vmul.f32 0.0026041667, %v635_v44  ;;  %v702_v49 = vadd.f32 %v701_v38, %v678_v14  ;;  %v639_v50 = vpop.xlane.xlu1 %638  ;;  %v709_v51 = vadd.f32 %v683_v39, %v682_v15  ;;  %v685_v52 = vmul.f32 %v17168_v35, %v17168_v35  ;;  %v14769_v38 = vld [vmem:[#allocation10 + $0x3f4] ss:$36 sps:$4 sm:$0xff]   ;;  %v14773_v44 = vld [vmem:[#allocation10 + $0x5ec] ss:$36 sps:$4 sm:$0xff]  }
 0x17c   : > { %v648_v53 = vmul.f32 0.0026041667, %v639_v50  ;;  %v686_v54 = vmul.f32 %v17171_v37, %v17171_v37  ;;  %v687_v55 = vmul.f32 %v17184_v47, %v17184_v47  ;;  %v17193_v57 = vsub.f32 %v16278_v56, %v646_v32  ;;  %v14771_v39 = vld [vmem:[#allocation10 + $0x630] ss:$36 sps:$4 sm:$0xff]   ;;  %2231 = vmatprep.subr.bf16.mxu0 %v14769_v38  ;;  %v14781_v50 = vld [vmem:[#allocation10 + $0x364] ss:$36 sps:$4 sm:$0xff]  }
 0x17d   : > { %v17196_v59 = vsub.f32 %v16279_v58, %v647_v48  ;;  %v17199_v61 = vsub.f32 %v16280_v60, %v647_v48  ;;  %707 = vadd.xlane.f32.xlu0 %v706_v33  ;;  %703 = vadd.xlane.f32.xlu1 %v702_v49  ;;  %v710_v62 = vadd.f32 %v709_v51, %v684_v45  ;;  %v14775_v45 = vld [vmem:[#allocation10 + $0x3ac] ss:$36 sps:$4 sm:$0xff]   ;;  %v14779_v49 = vld [vmem:[#allocation10 + $0x5a4] ss:$36 sps:$4 sm:$0xff]   ;;  %v14790_v56 = vld [vmem:[#allocation10 + $0x318] ss:$36 sps:$4 sm:$0xff]   ;;  %v778_v34 = vlaneseq }
 0x17e   : > { %v17202_v17 = vsub.f32 %v16281_v63, %v648_v53  ;;  %v17205_v20 = vsub.f32 %v16282_v19, %v648_v53  ;;  %v713_v0 = vadd.f32 %v686_v54, %v685_v52  ;;  %v688_v1 = vmul.f32 %v17176_v41, %v17176_v41  ;;  %2289 = vmatpush1.bf16.msra.mxu1 %v14771_v39  ;;  %v14783_v51 = vld [vmem:[#allocation10 + $0x5a0] ss:$36 sps:$4 sm:$0xff]   ;;  %v14791_v58 = vld [vmem:[#allocation10 + $0x514] ss:$36 sps:$4 sm:$0xff]   ;;  %v14797_v19 = vld [vmem:[#allocation10 + $0x4cc] ss:$36 sps:$4 sm:$0xff]  }
 0x17f   : > { %v689_v2 = vmul.f32 %v17179_v43, %v17179_v43  ;;  %v690_v4 = vmul.f32 %v17193_v57, %v17193_v57  ;;  %v17214_v21 = vsub.f32 %v16283_v5, %v647_v48  ;;  %v691_v6 = vmul.f32 %v17196_v59, %v17196_v59  ;;  %2232 = vmatpush2.bf16.msra.mxu0 %v14772_v42  ;;  %v14778_v48 = vld [vmem:[#allocation10 + $0x3a8] ss:$36 sps:$4 sm:$0xff]   ;;  %v14784_v52 = vld [vmem:[#allocation10 + $0x360] ss:$36 sps:$4 sm:$0xff]   ;;  %v14793_v60 = vld [vmem:[#allocation10 + $0x2d4] ss:$36 sps:$4 sm:$0xff]  }
 0x180   : > { %v714_v24 = vadd.f32 %v713_v0, %v687_v55  ;;  %v692_v28 = vmul.f32 %v17199_v61, %v17199_v61  ;;  %v17221_v30 = vsub.f32 %v16284_v29, %v648_v53  ;;  %v694_v9 = vmul.f32 %v17202_v17, %v17202_v17  ;;  %2290 = vmatprep.subr.bf16.mxu1 %v14773_v44  ;;  %v14785_v53 = vld [vmem:[#allocation10 + $0x55c] ss:$36 sps:$4 sm:$0xff]   ;;  %v14796_v63 = vld [vmem:[#allocation10 + $0x2d0] ss:$36 sps:$4 sm:$0xff]   ;;  %v14805_v5 = vld [vmem:[#allocation10 + $0x244] ss:$36 sps:$4 sm:$0xff]  }
 0x181   : > { %711 = vadd.xlane.f32.xlu1 %v710_v62  ;;  %v717_v31 = vadd.f32 %v689_v2, %v688_v1  ;;  %v693_v10 = vmul.f32 %v17214_v21, %v17214_v21  ;;  %v695_v13 = vmul.f32 %v17205_v20, %v17205_v20  ;;  %2233 = vmatprep.subr.bf16.mxu0 %v14775_v45  ;;  %v14787_v54 = vld [vmem:[#allocation10 + $0x31c] ss:$36 sps:$4 sm:$0xff]   ;;  %v14795_v62 = vld [vmem:[#allocation10 + $0x510] ss:$36 sps:$4 sm:$0xff]   ;;  %v14801_v1 = vld [vmem:[#allocation10 + $0x4c8] ss:$36 sps:$4 sm:$0xff]  }
 0x182   : > { %715 = vadd.xlane.f32.xlu0 %v714_v24  ;;  %v721_v32 = vadd.f32 %v692_v28, %v691_v6  ;;  %v696_v33 = vmul.f32 %v17221_v30, %v17221_v30  ;;  %2291 = vmatpush1.bf16.msra.mxu1 %v14777_v46  ;;  %v14789_v55 = vld [vmem:[#allocation10 + $0x558] ss:$36 sps:$4 sm:$0xff]   ;;  %v14799_v0 = vld [vmem:[#allocation10 + $0x28c] ss:$36 sps:$4 sm:$0xff]   ;;  %v14807_v6 = vld [vmem:[#allocation10 + $0x480] ss:$36 sps:$4 sm:$0xff]  }
 0x183   : > { %v718_v14 = vadd.f32 %v717_v31, %v690_v4  ;;  %v725_v15 = vadd.f32 %v695_v13, %v694_v9  ;;  %2234 = vmatpush2.bf16.msra.mxu0 %v14778_v48  ;;  %2292 = vmatprep.subr.bf16.mxu1 %v14779_v49  ;;  %v14802_v2 = vld [vmem:[#allocation10 + $0x288] ss:$36 sps:$4 sm:$0xff]   ;;  %v14808_v24 = vld [vmem:[#allocation10 + $0x240] ss:$36 sps:$4 sm:$0xff]   ;;  %v20001_v28 = vmov 0   ;;  %v17233_v44 = vshrl.u32 %v778_v34, 7 }
 0x184   : > { %v722_v36 = vadd.f32 %v721_v32, %v693_v10  ;;  %2235 = vmatprep.subr.bf16.mxu0 %v14781_v50  ;;  %v14803_v4 = vld [vmem:[#allocation10 + $0x484] ss:$36 sps:$4 sm:$0xff]   ;;  %2318 = vmatprep.mubr.bf16.mxu1 %v20001_v28  ;;  %v606_v50 = vld [vmem:[#allocation7] sm:$0x7] }
 0x185   : > { %719 = vadd.xlane.f32.xlu1 %v718_v14  ;;  %v726_v40 = vadd.f32 %v725_v15, %v696_v33  ;;  %v14811_v29 = vld [vmem:[#allocation10 + $0x204] ss:$36 sps:$4 sm:$0xff]  }
 0x186   : > { %723 = vadd.xlane.f32.xlu0 %v722_v36  ;;  %2293 = vmatpush1.bf16.msra.mxu1 %v14783_v51  ;;  %v14814_v9 = vld [vmem:[#allocation10 + $0x684] ss:$36 sps:$4 sm:$0xff]  }
 0x187   : > { %2236 = vmatpush2.bf16.msra.mxu0 %v14784_v52  ;;  %2294 = vmatprep.subr.bf16.mxu1 %v14785_v53  ;;  %v17236_v53 = vsub.s32 1, %v17233_v44 }
 0x188   : > { %2237 = vmatprep.subr.bf16.mxu0 %v14787_v54 }
 0x189   : > { %727 = vadd.xlane.f32.xlu1 %v726_v40  ;;  %20080 = vst [vmem:[#allocation33_spill] sm:$0xff] %v17236_v53 }
 0x18a   : > { %2295 = vmatpush1.bf16.msra.mxu1 %v14789_v55  ;;  %v17239_v55 = vsub.s32 2, %v17233_v44 }
 0x18b   : > { %2238 = vmatpush2.bf16.msra.mxu0 %v14790_v56  ;;  %2296 = vmatprep.subr.bf16.mxu1 %v14791_v58 }
 0x18c   : > { %2239 = vmatprep.subr.bf16.mxu0 %v14793_v60  ;;  %20081 = vst [vmem:[#allocation34_spill] sm:$0xff] %v17239_v55 }
 0x18e   : > { %2297 = vmatpush1.bf16.msra.mxu1 %v14795_v62  ;;  %v17242_v62 = vsub.s32 0, %v17233_v44 }
 0x18f   : > { %2240 = vmatpush2.bf16.msra.mxu0 %v14796_v63  ;;  %2298 = vmatprep.subr.bf16.mxu1 %v14797_v19  ;;  %v607_v19 = vld [vmem:[#allocation9] sm:$0x7] }
 0x190   : > { %2241 = vmatprep.subr.bf16.mxu0 %v14799_v0  ;;  %20082 = vst [vmem:[#allocation35_spill] sm:$0xff] %v17242_v62  ;;  %v17245_v0 = vrot.slane %v606_v50, %v17236_v53 }
 0x192   : > { %2299 = vmatpush1.bf16.msra.mxu1 %v14801_v1 }
 0x193   : > { %2242 = vmatpush2.bf16.msra.mxu0 %v14802_v2  ;;  %2300 = vmatprep.subr.bf16.mxu1 %v14803_v4  ;;  %v17248_v2 = vrot.slane %v606_v50, %v17239_v55 }
 0x194   : > { %2243 = vmatprep.subr.bf16.mxu0 %v14805_v5 }
 0x196   : > { %2301 = vmatpush1.bf16.msra.mxu1 %v14807_v6 }
 0x197   : > { %2244 = vmatpush2.bf16.msra.mxu0 %v14808_v24  ;;  %2359 = vmatprep.subr.bf16.mxu1 %v14811_v29  ;;  %v17254_v29 = vrot.slane %v606_v50, %v17242_v62 }
 0x198   : > { %2432 = vmatprep.subr.bf16.mxu0 %v14814_v9 }
 0x202   : > { %v700_v31 = vpop.xlane.xlu0 %699 }
 0x203   : > { %v729_v10 = vmul.f32 0.0026041667, %v700_v31  ;;  %v17258_v31 = vrot.slane %v607_v19, %v17236_v53 }
 0x205   : > { %v737_v13 = vadd.f32 1e-05, %v729_v10 }
 0x206   : > { %v704_v32 = vpop.xlane.xlu1 %703  ;;  %v708_v33 = vpop.xlane.xlu0 %707 }
 0x207   : > { %16049 = vrsqrt.f32 %v737_v13  ;;  %v730_v14 = vmul.f32 0.0026041667, %v704_v32  ;;  %v731_v15 = vmul.f32 0.0026041667, %v708_v33  ;;  %v17262_v32 = vrot.slane %v607_v19, %v17239_v55 }
 0x209   : > { %v738_v36 = vadd.f32 1e-05, %v730_v14  ;;  %v739_v38 = vadd.f32 1e-05, %v731_v15  ;;  %v17269_v15 = vrot.slane %v607_v19, %v17242_v62  ;;  %v14817_v19 = vld [vmem:[#allocation10 + $0x1bc] ss:$36 sps:$4 sm:$0xff]  }
 0x20a   : > { %v712_v39 = vpop.xlane.xlu1 %711 }
 0x20b   : > { %16051 = vrsqrt.f32 %v738_v36  ;;  %v732_v40 = vmul.f32 0.0026041667, %v712_v39  ;;  %v716_v42 = vpop.xlane.xlu0 %715 }
 0x20c   : > { %16053 = vrsqrt.f32 %v739_v38  ;;  %v733_v45 = vmul.f32 0.0026041667, %v716_v42 }
 0x20d   : > { %v740_v46 = vadd.f32 1e-05, %v732_v40 }
 0x20e   : > { %v741_v48 = vadd.f32 1e-05, %v733_v45  ;;  %v720_v49 = vpop.xlane.xlu1 %719 }
 0x20f   : > { %16055 = vrsqrt.f32 %v740_v46  ;;  %v734_v51 = vmul.f32 0.0026041667, %v720_v49  ;;  %v724_v52 = vpop.xlane.xlu0 %723 }
 0x210   : > { %16057 = vrsqrt.f32 %v741_v48  ;;  %v735_v54 = vmul.f32 0.0026041667, %v724_v52  ;;  %v14812_v52 = vld [vmem:[#allocation10 + $0x680] ss:$36 sps:$4 sm:$0xff]  }
 0x211   : > { %v742_v56 = vadd.f32 1e-05, %v734_v51  ;;  %v14809_v51 = vld [vmem:[#allocation10 + $0x200] ss:$36 sps:$4 sm:$0xff]  }
 0x212   : > { %v743_v58 = vadd.f32 1e-05, %v735_v54  ;;  %v728_v60 = vpop.xlane.xlu1 %727 }
 0x213   : > { %16059 = vrsqrt.f32 %v742_v56  ;;  %v736_v63 = vmul.f32 0.0026041667, %v728_v60 }
 0x214   : > { %v16050_v1 = vpop.eup %16049  ;;  %16061 = vrsqrt.f32 %v743_v58 }
 0x215   : > { %v744_v4 = vadd.f32 1e-05, %v736_v63  ;;  %v754_v5 = vmul.f32 %v16050_v1, %v17115_v7  ;;  %v755_v6 = vmul.f32 %v16050_v1, %v17118_v11  ;;  %v753_v24 = vmul.f32 %v16050_v1, %v17112_v3 }
 0x217   : > { %16063 = vrsqrt.f32 %v744_v4  ;;  %v794_v9 = vmul.f32 %v17245_v0, %v754_v5  ;;  %v795_v13 = vmul.f32 %v17248_v2, %v755_v6  ;;  %v793_v14 = vmul.f32 %v17254_v29, %v753_v24 }
 0x218   : > { %v16052_v10 = vpop.eup %16051 }
 0x219   : > { %v16054_v7 = vpop.eup %16053  ;;  %v757_v11 = vmul.f32 %v16052_v10, %v17145_v23  ;;  %v758_v3 = vmul.f32 %v16052_v10, %v17148_v25  ;;  %v756_v33 = vmul.f32 %v16052_v10, %v17142_v22  ;;  %v834_v39 = vadd.f32 %v17258_v31, %v794_v9 }
 0x21a   : > { %v760_v36 = vmul.f32 %v16054_v7, %v17124_v16  ;;  %v835_v23 = vadd.f32 %v17262_v32, %v795_v13  ;;  %v761_v45 = vmul.f32 %v16054_v7, %v17127_v18  ;;  %v833_v54 = vadd.f32 %v17269_v15, %v793_v14  ;;  %v14815_v13 = vld [vmem:[#allocation10 + $0x1b8] ss:$36 sps:$4 sm:$0xff]  }
 0x21b   : > { %v797_v38 = vmul.f32 %v17245_v0, %v757_v11  ;;  %v798_v40 = vmul.f32 %v17248_v2, %v758_v3  ;;  %v796_v25 = vmul.f32 %v17254_v29, %v756_v33  ;;  %v759_v58 = vmul.f32 %v16054_v7, %v17121_v12  ;;  %v14818_v7 = vld [vmem:[#allocation10 + $0x638] ss:$36 sps:$4 sm:$0xff]  }
 0x21c   : > { %v16056_v42 = vpop.eup %16055  ;;  %v800_v22 = vmul.f32 %v17245_v0, %v760_v36  ;;  %v801_v6 = vmul.f32 %v17248_v2, %v761_v45  ;;  %v14823_v14 = vld [vmem:[#allocation10 + $0x174] ss:$36 sps:$4 sm:$0xff]  }
 0x21d   : > { %v16058_v46 = vpop.eup %16057  ;;  %v837_v48 = vadd.f32 %v17258_v31, %v797_v38  ;;  %v838_v16 = vadd.f32 %v17262_v32, %v798_v40  ;;  %v763_v49 = vmul.f32 %v16056_v42, %v17154_v27  ;;  %v764_v50 = vmul.f32 %v16056_v42, %v17157_v8  ;;  %v14820_v27 = vld [vmem:[#allocation10 + $0x63c] ss:$36 sps:$4 sm:$0xff]   ;;  %v14826_v36 = vld [vmem:[#allocation10 + $0x5f4] ss:$36 sps:$4 sm:$0xff]  }
 0x21e   : > { %v836_v56 = vadd.f32 %v17269_v15, %v796_v25  ;;  %v762_v60 = vmul.f32 %v16056_v42, %v17151_v26  ;;  %v766_v12 = vmul.f32 %v16058_v46, %v17171_v37  ;;  %v840_v26 = vadd.f32 %v17258_v31, %v800_v22 }
 0x21f   : > { %v17287_v18 = vpack.c.bf16 %v837_v48, %v834_v39  ;;  %v17289_v63 = vpack.c.bf16 %v838_v16, %v835_v23  ;;  %v803_v1 = vmul.f32 %v17245_v0, %v763_v49  ;;  %v804_v8 = vmul.f32 %v17248_v2, %v764_v50  ;;  %v14821_v48 = vld [vmem:[#allocation10 + $0x170] ss:$36 sps:$4 sm:$0xff]  }
 0x220   : > { %v16060_v4 = vpop.eup %16059  ;;  %v17293_v5 = vpack.c.bf16 %v836_v56, %v833_v54  ;;  %v802_v24 = vmul.f32 %v17254_v29, %v762_v60  ;;  %v799_v3 = vmul.f32 %v17254_v29, %v759_v58  ;;  %v806_v38 = vmul.f32 %v17245_v0, %v766_v12  ;;  %v14824_v49 = vld [vmem:[#allocation10 + $0x5f0] ss:$36 sps:$4 sm:$0xff]  }
 0x221   : > { %2245 = vmatprep.mubr.bf16.mxu0 %v17287_v18  ;;  %2319 = vmatmul.mubr.bf16.vlgmr.msra.gmra.mxu1 %v17289_v63  ;;  %v843_v9 = vadd.f32 %v17258_v31, %v803_v1  ;;  %v769_v10 = vmul.f32 %v16060_v4, %v17179_v43  ;;  %v844_v11 = vadd.f32 %v17262_v32, %v804_v8  ;;  %v17306_v37 = vpop.eup %16061  ;;  %v14832_v56 = vld [vmem:[#allocation10 + $0x5ac] ss:$36 sps:$4 sm:$0xff]  }
 0x222   : > { %2360 = vmatpush1.bf16.msra.mxu1 %v14809_v51  ;;  %2246 = vmatmul.mubr.bf16.vlgmr.msra.gmra.mxu0 %v17293_v5  ;;  %v841_v40 = vadd.f32 %v17262_v32, %v801_v6  ;;  %v842_v42 = vadd.f32 %v17269_v15, %v802_v24  ;;  %v767_v25 = vmul.f32 %v16058_v46, %v17184_v47  ;;  %v14829_v47 = vld [vmem:[#allocation10 + $0x12c] ss:$36 sps:$4 sm:$0xff]  }
 0x223   : > { %2433 = vmatpush1.bf16.msra.mxu0 %v14812_v52  ;;  %2361 = vmatprep.subr.bf16.mxu1 %v14817_v19  ;;  %v17308_v33 = vpack.c.bf16 %v843_v9, %v840_v26  ;;  %v809_v43 = vmul.f32 %v17245_v0, %v769_v10  ;;  %v770_v22 = vmul.f32 %v16060_v4, %v17193_v57  ;;  %v14827_v19 = vld [vmem:[#allocation10 + $0x128] ss:$36 sps:$4 sm:$0xff]  }
 0x224   : > { %v16064_v39 = vpop.eup %16063  ;;  %2434 = vmatprep.subr.bf16.mxu0 %v14820_v27  ;;  %2328 = vmatprep.mubr.bf16.mxu1 %v20001_v28  ;;  %v768_v45 = vmul.f32 %v16060_v4, %v17176_v41  ;;  %v17320_v16 = vpack.c.bf16 %v844_v11, %v841_v40  ;;  %v839_v50 = vadd.f32 %v17269_v15, %v799_v3  ;;  %v14830_v1 = vld [vmem:[#allocation10 + $0x5a8] ss:$36 sps:$4 sm:$0xff]  }
 0x225   : > { %2255 = vmatprep.mubr.bf16.mxu0 %v17308_v33  ;;  %v849_v23 = vadd.f32 %v17258_v31, %v809_v43  ;;  %v765_v51 = vmul.f32 %v16058_v46, %v17168_v35  ;;  %v775_v52 = vmul.f32 %v16064_v39, %v17205_v20  ;;  %v846_v54 = vadd.f32 %v17258_v31, %v806_v38  ;;  %v14835_v27 = vld [vmem:[#allocation10 + $0xe4] ss:$36 sps:$4 sm:$0xff]   ;;  %v14844_v38 = vld [vmem:[#allocation10 + $0x51c] ss:$36 sps:$4 sm:$0xff]  }
 0x226   : > { %2362 = vmatpush1.bf16.msra.mxu1 %v14815_v13  ;;  %v810_v57 = vmul.f32 %v17248_v2, %v770_v22  ;;  %v772_v41 = vmul.f32 %v17306_v37, %v17199_v61  ;;  %v17329_v58 = vpack.c.bf16 %v842_v42, %v839_v50  ;;  %v808_v60 = vmul.f32 %v17254_v29, %v768_v45  ;;  %v14838_v4 = vld [vmem:[#allocation10 + $0x564] ss:$36 sps:$4 sm:$0xff]   ;;  %v14847_v42 = vld [vmem:[#allocation10 + $0x54] ss:$36 sps:$4 sm:$0xff]   ;;  %v14853_v50 = vld [vmem:[#allocation10 + $0xc] ss:$36 sps:$4 sm:$0xff]  }
 0x227   : > { %2435 = vmatpush1.bf16.msra.mxu0 %v14818_v7  ;;  %2363 = vmatprep.subr.bf16.mxu1 %v14823_v14  ;;  %v17333_v35 = vpack.c.bf16 %v849_v23, %v846_v54  ;;  %v807_v20 = vmul.f32 %v17248_v2, %v767_v25  ;;  %v815_v46 = vmul.f32 %v17245_v0, %v775_v52  ;;  %v14833_v7 = vld [vmem:[#allocation10 + $0xe0] ss:$36 sps:$4 sm:$0xff]   ;;  %v14850_v25 = vld [vmem:[#allocation10 + $0x4d4] ss:$36 sps:$4 sm:$0xff]   ;;  %v14854_v54 = vld [vmem:[#allocation10 + $0x488] ss:$36 sps:$4 sm:$0xff]  }
 0x228   : > { %2436 = vmatprep.subr.bf16.mxu0 %v14826_v36  ;;  %v805_v61 = vmul.f32 %v17254_v29, %v765_v51  ;;  %v850_v8 = vadd.f32 %v17262_v32, %v810_v57  ;;  %v812_v6 = vmul.f32 %v17245_v0, %v772_v41  ;;  %v776_v24 = vmul.f32 %v16064_v39, %v17221_v30  ;;  %v14836_v0 = vld [vmem:[#allocation10 + $0x560] ss:$36 sps:$4 sm:$0xff]   ;;  %v14845_v45 = vld [vmem:[#allocation10 + $0x50] ss:$36 sps:$4 sm:$0xff]   ;;  %v14860_v57 = vld [vmem:[#allocation10 + $0x208] ss:$36 sps:$4 sm:$0xff]  }
 0x229   : > { %2329 = vmatmul.mubr.bf16.gmra.mxu1 %v17320_v16  ;;  %v848_v12 = vadd.f32 %v17269_v15, %v808_v60  ;;  %v847_v26 = vadd.f32 %v17262_v32, %v807_v20  ;;  %v855_v9 = vadd.f32 %v17258_v31, %v815_v46  ;;  %v773_v10 = vmul.f32 %v17306_v37, %v17214_v21  ;;  %v14841_v36 = vld [vmem:[#allocation10 + $0x9c] ss:$36 sps:$4 sm:$0xff]   ;;  %v14856_v51 = vld [vmem:[#allocation10 + $0x48c] ss:$36 sps:$4 sm:$0xff]   ;;  %v14868_v60 = vld [vmem:[#allocation10 + $0x1c4] ss:$36 sps:$4 sm:$0xff]  }
 0x22a   : > { %2364 = vmatpush1.bf16.msra.mxu1 %v14821_v48  ;;  %2256 = vmatmul.mubr.bf16.gmra.mxu0 %v17329_v58  ;;  %v774_v13 = vmul.f32 %v16064_v39, %v17202_v17  ;;  %v845_v30 = vadd.f32 %v17269_v15, %v805_v61  ;;  %v771_v11 = vmul.f32 %v17306_v37, %v17196_v59  ;;  %v14839_v37 = vld [vmem:[#allocation10 + $0x98] ss:$36 sps:$4 sm:$0xff]   ;;  %v14848_v48 = vld [vmem:[#allocation10 + $0x4d0] ss:$36 sps:$4 sm:$0xff]   ;;  %v14866_v46 = vld [vmem:[#allocation10 + $0x1c0] ss:$36 sps:$4 sm:$0xff]  }
 0x22b   : > { %2437 = vmatpush1.bf16.msra.mxu0 %v14824_v49  ;;  %2265 = vmatprep.mubr.bf16.mxu0 %v17333_v35  ;;  %v17353_v3 = vpack.c.bf16 %v850_v8, %v847_v26  ;;  %v852_v14 = vadd.f32 %v17258_v31, %v812_v6  ;;  %v816_v21 = vmul.f32 %v17248_v2, %v776_v24  ;;  %v14842_v31 = vld [vmem:[#allocation10 + $0x518] ss:$36 sps:$4 sm:$0xff]   ;;  %v14869_v61 = vld [vmem:[#allocation10 + $0x3b0] ss:$36 sps:$4 sm:$0xff]   ;;  %v14875_v6 = vld [vmem:[#allocation10 + $0x368] ss:$36 sps:$4 sm:$0xff]  }
 0x22c   : > { %2365 = vmatprep.subr.bf16.mxu1 %v14829_v47  ;;  %2438 = vmatprep.subr.bf16.mxu0 %v14832_v56  ;;  %v17357_v17 = vpack.c.bf16 %v848_v12, %v845_v30  ;;  %v814_v43 = vmul.f32 %v17254_v29, %v774_v13  ;;  %v813_v59 = vmul.f32 %v17248_v2, %v773_v10  ;;  %v14862_v47 = vld [vmem:[#allocation10 + $0x20c] ss:$36 sps:$4 sm:$0xff]   ;;  %v14857_v56 = vld [vmem:[#allocation10 + $0x440] ss:$36 sps:$4 sm:$0xff]   ;;  %v14863_v20 = vld [vmem:[#allocation10 + $0x3f8] ss:$36 sps:$4 sm:$0xff]  }
 0x22d   : > { %2338 = vmatprep.mubr.bf16.mxu1 %v20001_v28  ;;  %v17361_v39 = vpack.c.bf16 %v855_v9, %v852_v14  ;;  %v811_v40 = vmul.f32 %v17254_v29, %v771_v11  ;;  %v856_v23 = vadd.f32 %v17262_v32, %v816_v21  ;;  %v14865_v41 = vld [vmem:[#allocation10 + $0x3fc] ss:$36 sps:$4 sm:$0xff]   ;;  %v14877_v8 = vld [vmem:[#allocation10 + $0x36c] ss:$36 sps:$4 sm:$0xff]   ;;  %v14883_v12 = vld [vmem:[#allocation10 + $0x324] ss:$36 sps:$4 sm:$0xff]  }
 0x22e   : > { %2366 = vmatpush1.bf16.msra.mxu1 %v14827_v19  ;;  %v854_v22 = vadd.f32 %v17269_v15, %v814_v43  ;;  %v853_v2 = vadd.f32 %v17262_v32, %v813_v59  ;;  %v14851_v32 = vld [vmem:[#allocation10 + $0x8] ss:$36 sps:$4 sm:$0xff]   ;;  %v14871_v19 = vld [vmem:[#allocation10 + $0x3b4] ss:$36 sps:$4 sm:$0xff]   ;;  %v14881_v9 = vld [vmem:[#allocation10 + $0x320] ss:$36 sps:$4 sm:$0xff]  }
 0x22f   : > { %2439 = vmatpush1.bf16.msra.mxu0 %v14830_v1  ;;  %2367 = vmatprep.subr.bf16.mxu1 %v14835_v27  ;;  %v851_v29 = vadd.f32 %v17269_v15, %v811_v40  ;;  %v14859_v15 = vld [vmem:[#allocation10 + $0x444] ss:$36 sps:$4 sm:$0xff]   ;;  %v14874_v1 = vld [vmem:[#allocation10 + $0x17c] ss:$36 sps:$4 sm:$0xff]   ;;  %v14878_v24 = vld [vmem:[#allocation10 + $0x130] ss:$36 sps:$4 sm:$0xff]  }
 0x230   : > { %2440 = vmatprep.subr.bf16.mxu0 %v14838_v4  ;;  %v17372_v49 = vpack.c.bf16 %v856_v23, %v853_v2  ;;  %v14872_v27 = vld [vmem:[#allocation10 + $0x178] ss:$36 sps:$4 sm:$0xff]   ;;  %v14886_v26 = vld [vmem:[#allocation10 + $0xec] ss:$36 sps:$4 sm:$0xff]   ;;  %v14890_v30 = vld [vmem:[#allocation10 + $0xa0] ss:$36 sps:$4 sm:$0xff]  }
 0x231   : > { %2339 = vmatmul.mubr.bf16.gmra.mxu1 %v17353_v3  ;;  %v17374_v52 = vpack.c.bf16 %v854_v22, %v851_v29  ;;  %v14880_v4 = vld [vmem:[#allocation10 + $0x134] ss:$36 sps:$4 sm:$0xff]   ;;  %v14884_v10 = vld [vmem:[#allocation10 + $0xe8] ss:$36 sps:$4 sm:$0xff]   ;;  %v14889_v13 = vld [vmem:[#allocation10 + $0x2dc] ss:$36 sps:$4 sm:$0xff]  }
 0x232   : > { %2368 = vmatpush1.bf16.msra.mxu1 %v14833_v7  ;;  %2266 = vmatmul.mubr.bf16.gmra.mxu0 %v17357_v17  ;;  %v14892_v7 = vld [vmem:[#allocation10 + $0xa4] ss:$36 sps:$4 sm:$0xff]   ;;  %v14895_v11 = vld [vmem:[#allocation10 + $0x294] ss:$36 sps:$4 sm:$0xff]   ;;  %v14898_v14 = vld [vmem:[#allocation10 + $0x5c] ss:$36 sps:$4 sm:$0xff]  }
 0x233   : > { %2441 = vmatpush1.bf16.msra.mxu0 %v14836_v0  ;;  %2275 = vmatprep.mubr.bf16.mxu0 %v17361_v39  ;;  %v14887_v0 = vld [vmem:[#allocation10 + $0x2d8] ss:$36 sps:$4 sm:$0xff]   ;;  %v14901_v21 = vld [vmem:[#allocation10 + $0x24c] ss:$36 sps:$4 sm:$0xff]   ;;  %v14916_v22 = vld [vmem:[#allocation10 + $0x404] ss:$36 sps:$4 sm:$0xff]  }
 0x234   : > { %2369 = vmatprep.subr.bf16.mxu1 %v14841_v36  ;;  %2442 = vmatprep.subr.bf16.mxu0 %v14844_v38  ;;  %v14893_v36 = vld [vmem:[#allocation10 + $0x290] ss:$36 sps:$4 sm:$0xff]   ;;  %v14896_v38 = vld [vmem:[#allocation10 + $0x58] ss:$36 sps:$4 sm:$0xff]   ;;  %v14899_v59 = vld [vmem:[#allocation10 + $0x248] ss:$36 sps:$4 sm:$0xff]  }
 0x235   : > { %2348 = vmatprep.mubr.bf16.mxu1 %v20001_v28  ;;  %v14904_v43 = vld [vmem:[#allocation10 + $0x14] ss:$36 sps:$4 sm:$0xff]   ;;  %v14910_v40 = vld [vmem:[#allocation10 + $0x44c] ss:$36 sps:$4 sm:$0xff]   ;;  %v14911_v2 = vld [vmem:[#allocation10 + $0x640] ss:$36 sps:$4 sm:$0xff]  }
 0x236   : > { %2370 = vmatpush1.bf16.msra.mxu1 %v14839_v37  ;;  %v14902_v37 = vld [vmem:[#allocation10 + $0x10] ss:$36 sps:$4 sm:$0xff]   ;;  %v14908_v23 = vld [vmem:[#allocation10 + $0x448] ss:$36 sps:$4 sm:$0xff]   ;;  %v14922_v29 = vld [vmem:[#allocation10 + $0x3bc] ss:$36 sps:$4 sm:$0xff]  }
 0x237   : > { %2443 = vmatpush1.bf16.msra.mxu0 %v14842_v31  ;;  %2371 = vmatprep.subr.bf16.mxu1 %v14847_v42  ;;  %v14907_v31 = vld [vmem:[#allocation10 + $0x68c] ss:$36 sps:$4 sm:$0xff]  }
 0x238   : > { %2444 = vmatprep.subr.bf16.mxu0 %v14850_v25  ;;  %v14905_v42 = vld [vmem:[#allocation10 + $0x688] ss:$36 sps:$4 sm:$0xff]  }
 0x239   : > { %2349 = vmatmul.mubr.bf16.gmra.mxu1 %v17372_v49  ;;  %v14913_v25 = vld [vmem:[#allocation10 + $0x644] ss:$36 sps:$4 sm:$0xff]  }
 0x23a   : > { %2372 = vmatpush1.bf16.msra.mxu1 %v14845_v45  ;;  %2276 = vmatmul.mubr.bf16.gmra.mxu0 %v17374_v52  ;;  %v14914_v45 = vld [vmem:[#allocation10 + $0x400] ss:$36 sps:$4 sm:$0xff]  }
 0x23b   : > { %2391 = vmatprep.mubr.bf16.mxu1 %v17287_v18  ;;  %2445 = vmatpush1.bf16.msra.mxu0 %v14848_v48  ;;  %v14919_v48 = vld [vmem:[#allocation10 + $0x5fc] ss:$36 sps:$4 sm:$0xff]  }
 0x23c   : > { %2373 = vmatprep.subr.bf16.mxu1 %v14853_v50  ;;  %2446 = vmatprep.subr.bf16.mxu0 %v14856_v51  ;;  %v14917_v50 = vld [vmem:[#allocation10 + $0x5f8] ss:$36 sps:$4 sm:$0xff]  }
 0x23d   : > { %2464 = vmatprep.mubr.bf16.mxu0 %v20001_v28  ;;  %v14920_v51 = vld [vmem:[#allocation10 + $0x3b8] ss:$36 sps:$4 sm:$0xff]  }
 0x23e   : > { %2374 = vmatpush1.bf16.msra.mxu1 %v14851_v32  ;;  %v14925_v32 = vld [vmem:[#allocation10 + $0x5b4] ss:$36 sps:$4 sm:$0xff]  }
 0x23f   : > { %2447 = vmatpush1.bf16.msra.mxu0 %v14854_v54  ;;  %2375 = vmatprep.subr.bf16.mxu1 %v14859_v15  ;;  %v14928_v54 = vld [vmem:[#allocation10 + $0x374] ss:$36 sps:$4 sm:$0xff]  }
 0x240   : > { %2505 = vmatprep.subr.bf16.mxu0 %v14862_v47  ;;  %v14923_v15 = vld [vmem:[#allocation10 + $0x5b0] ss:$36 sps:$4 sm:$0xff]  }
 0x241   : > { %v14926_v47 = vld [vmem:[#allocation10 + $0x370] ss:$36 sps:$4 sm:$0xff]  }
 0x242   : > { %2376 = vmatpush2.bf16.msra.mxu1 %v14857_v56  ;;  %2465 = vmatmul.mubr.bf16.vlgmr.msra.gmra.mxu0 %v17289_v63  ;;  %v14931_v56 = vld [vmem:[#allocation10 + $0x56c] ss:$36 sps:$4 sm:$0xff]  }
 0x243   : > { %2506 = vmatpush1.bf16.msra.mxu0 %v14860_v57  ;;  %2377 = vmatprep.subr.bf16.mxu1 %v14865_v41  ;;  %v14934_v57 = vld [vmem:[#allocation10 + $0x32c] ss:$36 sps:$4 sm:$0xff]  }
 0x244   : > { %2507 = vmatprep.subr.bf16.mxu0 %v14868_v60  ;;  %2474 = vmatprep.mubr.bf16.mxu0 %v20001_v28  ;;  %v14929_v41 = vld [vmem:[#allocation10 + $0x568] ss:$36 sps:$4 sm:$0xff]  }
 0x245   : > { %v14932_v60 = vld [vmem:[#allocation10 + $0x328] ss:$36 sps:$4 sm:$0xff]  }
 0x246   : > { %2378 = vmatpush2.bf16.msra.mxu1 %v14863_v20  ;;  %v14937_v20 = vld [vmem:[#allocation10 + $0x524] ss:$36 sps:$4 sm:$0xff]  }
 0x247   : > { %2508 = vmatpush1.bf16.msra.mxu0 %v14866_v46  ;;  %2379 = vmatprep.subr.bf16.mxu1 %v14871_v19  ;;  %v14940_v46 = vld [vmem:[#allocation10 + $0x2e4] ss:$36 sps:$4 sm:$0xff]  }
 0x248   : > { %2509 = vmatprep.subr.bf16.mxu0 %v14874_v1  ;;  %v14935_v19 = vld [vmem:[#allocation10 + $0x520] ss:$36 sps:$4 sm:$0xff]  }
 0x249   : > { %v14938_v1 = vld [vmem:[#allocation10 + $0x2e0] ss:$36 sps:$4 sm:$0xff]  }
 0x24a   : > { %2380 = vmatpush2.bf16.msra.mxu1 %v14869_v61  ;;  %2475 = vmatmul.mubr.bf16.gmra.mxu0 %v17320_v16  ;;  %v14943_v61 = vld [vmem:[#allocation10 + $0x4dc] ss:$36 sps:$4 sm:$0xff]  }
 0x24b   : > { %2510 = vmatpush1.bf16.msra.mxu0 %v14872_v27  ;;  %2381 = vmatprep.subr.bf16.mxu1 %v14877_v8  ;;  %v14946_v27 = vld [vmem:[#allocation10 + $0x29c] ss:$36 sps:$4 sm:$0xff]  }
 0x24c   : > { %2511 = vmatprep.subr.bf16.mxu0 %v14880_v4  ;;  %2484 = vmatprep.mubr.bf16.mxu0 %v20001_v28  ;;  %v14941_v8 = vld [vmem:[#allocation10 + $0x4d8] ss:$36 sps:$4 sm:$0xff]  }
 0x24d   : > { %v14944_v4 = vld [vmem:[#allocation10 + $0x298] ss:$36 sps:$4 sm:$0xff]  }
 0x24e   : > { %2382 = vmatpush2.bf16.msra.mxu1 %v14875_v6  ;;  %v14949_v6 = vld [vmem:[#allocation10 + $0x494] ss:$36 sps:$4 sm:$0xff]  }
 0x24f   : > { %2512 = vmatpush1.bf16.msra.mxu0 %v14878_v24  ;;  %2383 = vmatprep.subr.bf16.mxu1 %v14883_v12  ;;  %v14952_v24 = vld [vmem:[#allocation10 + $0x254] ss:$36 sps:$4 sm:$0xff]  }
 0x250   : > { %2513 = vmatprep.subr.bf16.mxu0 %v14886_v26  ;;  %v14947_v12 = vld [vmem:[#allocation10 + $0x490] ss:$36 sps:$4 sm:$0xff]  }
 0x251   : > { %v14950_v26 = vld [vmem:[#allocation10 + $0x250] ss:$36 sps:$4 sm:$0xff]  }
 0x252   : > { %2384 = vmatpush2.bf16.msra.mxu1 %v14881_v9  ;;  %2485 = vmatmul.mubr.bf16.gmra.mxu0 %v17353_v3  ;;  %v14955_v9 = vld [vmem:[#allocation10 + $0x214] ss:$36 sps:$4 sm:$0xff]  }
 0x253   : > { %2514 = vmatpush1.bf16.msra.mxu0 %v14884_v10  ;;  %2385 = vmatprep.subr.bf16.mxu1 %v14889_v13  ;;  %v14958_v10 = vld [vmem:[#allocation10 + $0x694] ss:$36 sps:$4 sm:$0xff]  }
 0x254   : > { %2515 = vmatprep.subr.bf16.mxu0 %v14892_v7  ;;  %2494 = vmatprep.mubr.bf16.mxu0 %v20001_v28  ;;  %v14953_v13 = vld [vmem:[#allocation10 + $0x210] ss:$36 sps:$4 sm:$0xff]  }
 0x255   : > { %v14956_v7 = vld [vmem:[#allocation10 + $0x690] ss:$36 sps:$4 sm:$0xff]  }
 0x256   : > { %2386 = vmatpush2.bf16.msra.mxu1 %v14887_v0  ;;  %v14961_v0 = vld [vmem:[#allocation10 + $0x1cc] ss:$36 sps:$4 sm:$0xff]  }
 0x257   : > { %2516 = vmatpush1.bf16.msra.mxu0 %v14890_v30  ;;  %2387 = vmatprep.subr.bf16.mxu1 %v14895_v11  ;;  %v14964_v30 = vld [vmem:[#allocation10 + $0x64c] ss:$36 sps:$4 sm:$0xff]  }
 0x258   : > { %2517 = vmatprep.subr.bf16.mxu0 %v14898_v14  ;;  %v14959_v11 = vld [vmem:[#allocation10 + $0x1c8] ss:$36 sps:$4 sm:$0xff]  }
 0x259   : > { %v14962_v14 = vld [vmem:[#allocation10 + $0x648] ss:$36 sps:$4 sm:$0xff]  }
 0x25a   : > { %2388 = vmatpush2.bf16.msra.mxu1 %v14893_v36  ;;  %2495 = vmatmul.mubr.bf16.gmra.mxu0 %v17372_v49  ;;  %v14967_v36 = vld [vmem:[#allocation10 + $0x184] ss:$36 sps:$4 sm:$0xff]  }
 0x25b   : > { %2518 = vmatpush1.bf16.msra.mxu0 %v14896_v38  ;;  %2537 = vmatprep.mubr.bf16.mxu0 %v17287_v18  ;;  %v14970_v38 = vld [vmem:[#allocation10 + $0x604] ss:$36 sps:$4 sm:$0xff]  }
 0x25c   : > { %2389 = vmatprep.subr.bf16.mxu1 %v14901_v21  ;;  %2519 = vmatprep.subr.bf16.mxu0 %v14904_v43  ;;  %v14965_v21 = vld [vmem:[#allocation10 + $0x180] ss:$36 sps:$4 sm:$0xff]  }
 0x25d   : > { %v14968_v43 = vld [vmem:[#allocation10 + $0x600] ss:$36 sps:$4 sm:$0xff]  }
 0x25e   : > { %2390 = vmatpush2.bf16.msra.mxu1 %v14899_v59  ;;  %v14973_v59 = vld [vmem:[#allocation10 + $0x13c] ss:$36 sps:$4 sm:$0xff]  }
 0x25f   : > { %2520 = vmatpush1.bf16.msra.mxu0 %v14902_v37  ;;  %2578 = vmatprep.subr.bf16.mxu1 %v14907_v31  ;;  %v14976_v37 = vld [vmem:[#allocation10 + $0x5bc] ss:$36 sps:$4 sm:$0xff]  }
 0x260   : > { %2521 = vmatprep.subr.bf16.mxu0 %v14910_v40  ;;  %v14971_v31 = vld [vmem:[#allocation10 + $0x138] ss:$36 sps:$4 sm:$0xff]  }
 0x261   : > { %2392 = vmatmul.mubr.bf16.vlgmr.msra.gmra.mxu1 %v17293_v5  ;;  %v14974_v40 = vld [vmem:[#allocation10 + $0x5b8] ss:$36 sps:$4 sm:$0xff]  }
 0x262   : > { %2401 = vmatprep.mubr.bf16.mxu1 %v17308_v33  ;;  %2579 = vmatpush1.bf16.msra.mxu1 %v14905_v42  ;;  %v14979_v42 = vld [vmem:[#allocation10 + $0xf4] ss:$36 sps:$4 sm:$0xff]  }
 0x263   : > { %2522 = vmatpush2.bf16.msra.mxu0 %v14908_v23  ;;  %2580 = vmatprep.subr.bf16.mxu1 %v14913_v25  ;;  %v14982_v23 = vld [vmem:[#allocation10 + $0x574] ss:$36 sps:$4 sm:$0xff]  }
 0x264   : > { %2523 = vmatprep.subr.bf16.mxu0 %v14916_v22  ;;  %v14977_v25 = vld [vmem:[#allocation10 + $0xf0] ss:$36 sps:$4 sm:$0xff]  }
 0x265   : > { %v14980_v22 = vld [vmem:[#allocation10 + $0x570] ss:$36 sps:$4 sm:$0xff]  }
 0x266   : > { %2581 = vmatpush1.bf16.msra.mxu1 %v14911_v2  ;;  %v14985_v2 = vld [vmem:[#allocation10 + $0xac] ss:$36 sps:$4 sm:$0xff]  }
 0x267   : > { %2524 = vmatpush2.bf16.msra.mxu0 %v14914_v45  ;;  %2582 = vmatprep.subr.bf16.mxu1 %v14919_v48  ;;  %v14988_v45 = vld [vmem:[#allocation10 + $0x52c] ss:$36 sps:$4 sm:$0xff]  }
 0x268   : > { %2525 = vmatprep.subr.bf16.mxu0 %v14922_v29  ;;  %v14983_v48 = vld [vmem:[#allocation10 + $0xa8] ss:$36 sps:$4 sm:$0xff]  }
 0x269   : > { %2402 = vmatmul.mubr.bf16.gmra.mxu1 %v17329_v58  ;;  %v14986_v29 = vld [vmem:[#allocation10 + $0x528] ss:$36 sps:$4 sm:$0xff]  }
 0x26a   : > { %2411 = vmatprep.mubr.bf16.mxu1 %v17333_v35  ;;  %2583 = vmatpush1.bf16.msra.mxu1 %v14917_v50  ;;  %v14991_v50 = vld [vmem:[#allocation10 + $0x64] ss:$36 sps:$4 sm:$0xff]  }
 0x26b   : > { %2526 = vmatpush2.bf16.msra.mxu0 %v14920_v51  ;;  %2584 = vmatprep.subr.bf16.mxu1 %v14925_v32  ;;  %v14994_v51 = vld [vmem:[#allocation10 + $0x4e4] ss:$36 sps:$4 sm:$0xff]  }
 0x26c   : > { %2527 = vmatprep.subr.bf16.mxu0 %v14928_v54  ;;  %v14989_v32 = vld [vmem:[#allocation10 + $0x60] ss:$36 sps:$4 sm:$0xff]  }
 0x26d   : > { %v14992_v54 = vld [vmem:[#allocation10 + $0x4e0] ss:$36 sps:$4 sm:$0xff]  }
 0x26e   : > { %2585 = vmatpush1.bf16.msra.mxu1 %v14923_v15  ;;  %v14997_v15 = vld [vmem:[#allocation10 + $0x1c] ss:$36 sps:$4 sm:$0xff]  }
 0x26f   : > { %2528 = vmatpush2.bf16.msra.mxu0 %v14926_v47  ;;  %2586 = vmatprep.subr.bf16.mxu1 %v14931_v56  ;;  %v15000_v47 = vld [vmem:[#allocation10 + $0x49c] ss:$36 sps:$4 sm:$0xff]  }
 0x270   : > { %2529 = vmatprep.subr.bf16.mxu0 %v14934_v57  ;;  %v14995_v56 = vld [vmem:[#allocation10 + $0x18] ss:$36 sps:$4 sm:$0xff]  }
 0x271   : > { %2412 = vmatmul.mubr.bf16.gmra.mxu1 %v17357_v17  ;;  %v14998_v57 = vld [vmem:[#allocation10 + $0x498] ss:$36 sps:$4 sm:$0xff]  }
 0x272   : > { %2421 = vmatprep.mubr.bf16.mxu1 %v17361_v39  ;;  %2587 = vmatpush1.bf16.msra.mxu1 %v14929_v41  ;;  %v15003_v41 = vld [vmem:[#allocation10 + $0x454] ss:$36 sps:$4 sm:$0xff]  }
 0x273   : > { %2530 = vmatpush2.bf16.msra.mxu0 %v14932_v60  ;;  %2588 = vmatprep.subr.bf16.mxu1 %v14937_v20  ;;  %v15004_v60 = vld [vmem:[#allocation10 + $0x458] ss:$36 sps:$4 sm:$0xff]   ;;  %v15001_v20 = vld [vmem:[#allocation10 + $0x450] ss:$36 sps:$4 sm:$0xff]  }
 0x274   : > { %2531 = vmatprep.subr.bf16.mxu0 %v14940_v46  ;;  %v15005_v46 = vld [vmem:[#allocation10 + $0x218] ss:$36 sps:$4 sm:$0xff]  }
 0x276   : > { %2589 = vmatpush1.bf16.msra.mxu1 %v14935_v19  ;;  %v15008_v19 = vld [vmem:[#allocation10 + $0x40c] ss:$36 sps:$4 sm:$0xff]  }
 0x277   : > { %2532 = vmatpush2.bf16.msra.mxu0 %v14938_v1  ;;  %2590 = vmatprep.subr.bf16.mxu1 %v14943_v61  ;;  %v15009_v1 = vld [vmem:[#allocation10 + $0x410] ss:$36 sps:$4 sm:$0xff]   ;;  %v15006_v61 = vld [vmem:[#allocation10 + $0x408] ss:$36 sps:$4 sm:$0xff]  }
 0x278   : > { %2533 = vmatprep.subr.bf16.mxu0 %v14946_v27  ;;  %v15010_v27 = vld [vmem:[#allocation10 + $0x1d0] ss:$36 sps:$4 sm:$0xff]  }
 0x279   : > { %2422 = vmatmul.mubr.bf16.gmra.mxu1 %v17374_v52 }
 0x27a   : > { %2591 = vmatpush1.bf16.msra.mxu1 %v14941_v8  ;;  %2610 = vmatprep.mubr.bf16.mxu1 %v20001_v28  ;;  %v15013_v8 = vld [vmem:[#allocation10 + $0x3c4] ss:$36 sps:$4 sm:$0xff]  }
 0x27b   : > { %2534 = vmatpush2.bf16.msra.mxu0 %v14944_v4  ;;  %2592 = vmatprep.subr.bf16.mxu1 %v14949_v6  ;;  %v15014_v4 = vld [vmem:[#allocation10 + $0x3c8] ss:$36 sps:$4 sm:$0xff]   ;;  %v15011_v6 = vld [vmem:[#allocation10 + $0x3c0] ss:$36 sps:$4 sm:$0xff]  }
 0x27c   : > { %2535 = vmatprep.subr.bf16.mxu0 %v14952_v24  ;;  %v15015_v24 = vld [vmem:[#allocation10 + $0x188] ss:$36 sps:$4 sm:$0xff]  }
 0x27e   : > { %2593 = vmatpush1.bf16.msra.mxu1 %v14947_v12  ;;  %v15018_v12 = vld [vmem:[#allocation10 + $0x37c] ss:$36 sps:$4 sm:$0xff]  }
 0x27f   : > { %2536 = vmatpush2.bf16.msra.mxu0 %v14950_v26  ;;  %2651 = vmatprep.subr.bf16.mxu1 %v14955_v9  ;;  %v15019_v26 = vld [vmem:[#allocation10 + $0x380] ss:$36 sps:$4 sm:$0xff]   ;;  %v15016_v9 = vld [vmem:[#allocation10 + $0x378] ss:$36 sps:$4 sm:$0xff]  }
 0x280   : > { %2724 = vmatprep.subr.bf16.mxu0 %v14958_v10  ;;  %v15020_v10 = vld [vmem:[#allocation10 + $0x140] ss:$36 sps:$4 sm:$0xff]  }
 0x281   : > { %2611 = vmatmul.mubr.bf16.vlgmr.msra.gmra.mxu1 %v17289_v63 }
 0x282   : > { %2538 = vmatmul.mubr.bf16.vlgmr.msra.gmra.mxu0 %v17293_v5  ;;  %2652 = vmatpush1.bf16.msra.mxu1 %v14953_v13  ;;  %v15023_v13 = vld [vmem:[#allocation10 + $0x334] ss:$36 sps:$4 sm:$0xff]  }
 0x283   : > { %2547 = vmatprep.mubr.bf16.mxu0 %v17308_v33  ;;  %2725 = vmatpush1.bf16.msra.mxu0 %v14956_v7  ;;  %v15024_v7 = vld [vmem:[#allocation10 + $0x338] ss:$36 sps:$4 sm:$0xff]  }
 0x284   : > { %2653 = vmatprep.subr.bf16.mxu1 %v14961_v0  ;;  %2726 = vmatprep.subr.bf16.mxu0 %v14964_v30  ;;  %v15021_v0 = vld [vmem:[#allocation10 + $0x330] ss:$36 sps:$4 sm:$0xff]   ;;  %v15025_v30 = vld [vmem:[#allocation10 + $0xf8] ss:$36 sps:$4 sm:$0xff]  }
 0x285   : > { %2620 = vmatprep.mubr.bf16.mxu1 %v20001_v28 }
 0x286   : > { %2654 = vmatpush1.bf16.msra.mxu1 %v14959_v11  ;;  %v15028_v11 = vld [vmem:[#allocation10 + $0x2ec] ss:$36 sps:$4 sm:$0xff]  }
 0x287   : > { %2727 = vmatpush1.bf16.msra.mxu0 %v14962_v14  ;;  %2655 = vmatprep.subr.bf16.mxu1 %v14967_v36  ;;  %v15029_v14 = vld [vmem:[#allocation10 + $0x2f0] ss:$36 sps:$4 sm:$0xff]   ;;  %v15026_v36 = vld [vmem:[#allocation10 + $0x2e8] ss:$36 sps:$4 sm:$0xff]  }
 0x288   : > { %2728 = vmatprep.subr.bf16.mxu0 %v14970_v38  ;;  %v15030_v38 = vld [vmem:[#allocation10 + $0xb0] ss:$36 sps:$4 sm:$0xff]  }
 0x289   : > { %2621 = vmatmul.mubr.bf16.gmra.mxu1 %v17320_v16 }
 0x28a   : > { %2548 = vmatmul.mubr.bf16.gmra.mxu0 %v17329_v58  ;;  %2656 = vmatpush1.bf16.msra.mxu1 %v14965_v21  ;;  %v15033_v21 = vld [vmem:[#allocation10 + $0x2a4] ss:$36 sps:$4 sm:$0xff]  }
 0x28b   : > { %2557 = vmatprep.mubr.bf16.mxu0 %v17333_v35  ;;  %2729 = vmatpush1.bf16.msra.mxu0 %v14968_v43  ;;  %v15034_v43 = vld [vmem:[#allocation10 + $0x2a8] ss:$36 sps:$4 sm:$0xff]  }
 0x28c   : > { %2657 = vmatprep.subr.bf16.mxu1 %v14973_v59  ;;  %2730 = vmatprep.subr.bf16.mxu0 %v14976_v37  ;;  %v15031_v59 = vld [vmem:[#allocation10 + $0x2a0] ss:$36 sps:$4 sm:$0xff]   ;;  %v15035_v37 = vld [vmem:[#allocation10 + $0x68] ss:$36 sps:$4 sm:$0xff]  }
 0x28d   : > { %2630 = vmatprep.mubr.bf16.mxu1 %v20001_v28 }
 0x28e   : > { %2658 = vmatpush1.bf16.msra.mxu1 %v14971_v31  ;;  %v15038_v31 = vld [vmem:[#allocation10 + $0x25c] ss:$36 sps:$4 sm:$0xff]  }
 0x28f   : > { %2731 = vmatpush1.bf16.msra.mxu0 %v14974_v40  ;;  %2659 = vmatprep.subr.bf16.mxu1 %v14979_v42  ;;  %v15039_v40 = vld [vmem:[#allocation10 + $0x260] ss:$36 sps:$4 sm:$0xff]   ;;  %v15036_v42 = vld [vmem:[#allocation10 + $0x258] ss:$36 sps:$4 sm:$0xff]  }
 0x290   : > { %2732 = vmatprep.subr.bf16.mxu0 %v14982_v23  ;;  %v15040_v23 = vld [vmem:[#allocation10 + $0x20] ss:$36 sps:$4 sm:$0xff]  }
 0x291   : > { %2631 = vmatmul.mubr.bf16.gmra.mxu1 %v17353_v3 }
 0x292   : > { %2558 = vmatmul.mubr.bf16.gmra.mxu0 %v17357_v17  ;;  %2660 = vmatpush1.bf16.msra.mxu1 %v14977_v25  ;;  %v15041_v25 = vld [vmem:[#allocation10 + $0x698] ss:$36 sps:$4 sm:$0xff]  }
 0x293   : > { %2567 = vmatprep.mubr.bf16.mxu0 %v17361_v39  ;;  %2733 = vmatpush1.bf16.msra.mxu0 %v14980_v22  ;;  %v15042_v22 = vld [vmem:[#allocation10 + $0x650] ss:$36 sps:$4 sm:$0xff]  }
 0x294   : > { %2661 = vmatprep.subr.bf16.mxu1 %v14985_v2  ;;  %2734 = vmatprep.subr.bf16.mxu0 %v14988_v45  ;;  %v15043_v2 = vld [vmem:[#allocation10 + $0x608] ss:$36 sps:$4 sm:$0xff]   ;;  %v15045_v45 = vld [vmem:[#allocation10 + $0x578] ss:$36 sps:$4 sm:$0xff]  }
 0x295   : > { %2640 = vmatprep.mubr.bf16.mxu1 %v20001_v28 }
 0x296   : > { %2662 = vmatpush1.bf16.msra.mxu1 %v14983_v48 }
 0x297   : > { %2735 = vmatpush1.bf16.msra.mxu0 %v14986_v29  ;;  %2663 = vmatprep.subr.bf16.mxu1 %v14991_v50 }
 0x298   : > { %2736 = vmatprep.subr.bf16.mxu0 %v14994_v51 }
 0x299   : > { %2641 = vmatmul.mubr.bf16.gmra.mxu1 %v17372_v49 }
 0x29a   : > { %2568 = vmatmul.mubr.bf16.gmra.mxu0 %v17374_v52  ;;  %2664 = vmatpush1.bf16.msra.mxu1 %v14989_v32 }
 0x29b   : > { %2683 = vmatprep.mubr.bf16.mxu1 %v17287_v18  ;;  %2737 = vmatpush1.bf16.msra.mxu0 %v14992_v54 }
 0x29c   : > { %2665 = vmatprep.subr.bf16.mxu1 %v14997_v15  ;;  %2738 = vmatprep.subr.bf16.mxu0 %v15000_v47 }
 0x29d   : > { %2756 = vmatprep.mubr.bf16.mxu0 %v20001_v28 }
 0x29e   : > { %2666 = vmatpush1.bf16.msra.mxu1 %v14995_v56 }
 0x29f   : > { %2739 = vmatpush1.bf16.msra.mxu0 %v14998_v57  ;;  %2667 = vmatprep.subr.bf16.mxu1 %v15003_v41 }
 0x2a0   : > { %13860 = vmatprep.subr.bf16.mxu0 %v15004_v60 }
 0x2a2   : > { %2668 = vmatpush2.bf16.msra.mxu1 %v15001_v20  ;;  %2757 = vmatmul.mubr.bf16.vlgmr.msra.gmra.mxu0 %v17289_v63 }
 0x2a3   : > { %13861 = vmatpush3.bf16.msra.mxu0 %v15005_v46  ;;  %2669 = vmatprep.subr.bf16.mxu1 %v15008_v19 }
 0x2a4   : > { %13862 = vmatprep.subr.bf16.mxu0 %v15009_v1  ;;  %2766 = vmatprep.mubr.bf16.mxu0 %v20001_v28 }
 0x2a6   : > { %2670 = vmatpush2.bf16.msra.mxu1 %v15006_v61 }
 0x2a7   : > { %13863 = vmatpush3.bf16.msra.mxu0 %v15010_v27  ;;  %2671 = vmatprep.subr.bf16.mxu1 %v15013_v8 }
 0x2a8   : > { %13864 = vmatprep.subr.bf16.mxu0 %v15014_v4 }
 0x2aa   : > { %2672 = vmatpush2.bf16.msra.mxu1 %v15011_v6  ;;  %2767 = vmatmul.mubr.bf16.gmra.mxu0 %v17320_v16 }
 0x2ab   : > { %13865 = vmatpush3.bf16.msra.mxu0 %v15015_v24  ;;  %2673 = vmatprep.subr.bf16.mxu1 %v15018_v12 }
 0x2ac   : > { %13866 = vmatprep.subr.bf16.mxu0 %v15019_v26  ;;  %2776 = vmatprep.mubr.bf16.mxu0 %v20001_v28 }
 0x2ae   : > { %2674 = vmatpush2.bf16.msra.mxu1 %v15016_v9 }
 0x2af   : > { %13867 = vmatpush3.bf16.msra.mxu0 %v15020_v10  ;;  %2675 = vmatprep.subr.bf16.mxu1 %v15023_v13 }
 0x2b0   : > { %13868 = vmatprep.subr.bf16.mxu0 %v15024_v7 }
 0x2b2   : > { %2676 = vmatpush2.bf16.msra.mxu1 %v15021_v0  ;;  %2777 = vmatmul.mubr.bf16.gmra.mxu0 %v17353_v3 }
 0x2b3   : > { %13869 = vmatpush3.bf16.msra.mxu0 %v15025_v30  ;;  %2677 = vmatprep.subr.bf16.mxu1 %v15028_v11 }
 0x2b4   : > { %13870 = vmatprep.subr.bf16.mxu0 %v15029_v14  ;;  %2786 = vmatprep.mubr.bf16.mxu0 %v20001_v28 }
 0x2b6   : > { %2678 = vmatpush2.bf16.msra.mxu1 %v15026_v36 }
 0x2b7   : > { %13871 = vmatpush3.bf16.msra.mxu0 %v15030_v38  ;;  %2679 = vmatprep.subr.bf16.mxu1 %v15033_v21 }
 0x2b8   : > { %13872 = vmatprep.subr.bf16.mxu0 %v15034_v43 }
 0x2ba   : > { %2680 = vmatpush2.bf16.msra.mxu1 %v15031_v59  ;;  %2787 = vmatmul.mubr.bf16.gmra.mxu0 %v17372_v49 }
 0x2bb   : > { %13873 = vmatpush3.bf16.msra.mxu0 %v15035_v37  ;;  %2829 = vmatprep.mubr.bf16.mxu0 %v17287_v18  ;;  %v15044_v18 = vld [vmem:[#allocation10 + $0x5c0] ss:$36 sps:$4 sm:$0xff]  }
 0x2bc   : > { %2681 = vmatprep.subr.bf16.mxu1 %v15038_v31  ;;  %13874 = vmatprep.subr.bf16.mxu0 %v15039_v40 }
 0x2be   : > { %2682 = vmatpush2.bf16.msra.mxu1 %v15036_v42 }
 0x2bf   : > { %13875 = vmatpush3.bf16.msra.mxu0 %v15040_v23  ;;  %14300 = vmatprep.subr.bf16.mxu1 %v15041_v25 }
 0x2c1   : > { %2684 = vmatmul.mubr.bf16.vlgmr.msra.gmra.mxu1 %v17293_v5 }
 0x2c2   : > { %2693 = vmatprep.mubr.bf16.mxu1 %v17308_v33  ;;  %2830 = vmatmul.mubr.bf16.vlgmr.msra.gmra.mxu0 %v17293_v5  ;;  %v15046_v5 = vld [vmem:[#allocation10 + $0x530] ss:$36 sps:$4 sm:$0xff]  }
 0x2c3   : > { %14301 = vmatpush3.bf16.msra.mxu1 %v15041_v25  ;;  %2837 = vmatprep.mubr.bf16.mxu0 %v17308_v33  ;;  %v15047_v33 = vld [vmem:[#allocation10 + $0x4e8] ss:$36 sps:$4 sm:$0xff]  }
 0x2c4   : > { %14302 = vmatprep.subr.bf16.mxu1 %v15042_v22 }
 0x2c7   : > { %14303 = vmatpush3.bf16.msra.mxu1 %v15042_v22 }
 0x2c8   : > { %14304 = vmatprep.subr.bf16.mxu1 %v15043_v2 }
 0x2c9   : > { %2694 = vmatmul.mubr.bf16.gmra.mxu1 %v17329_v58 }
 0x2ca   : > { %2703 = vmatprep.mubr.bf16.mxu1 %v17333_v35  ;;  %2838 = vmatmul.mubr.bf16.gmra.mxu0 %v17329_v58  ;;  %v15048_v58 = vld [vmem:[#allocation10 + $0x4a0] ss:$36 sps:$4 sm:$0xff]  }
 0x2cb   : > { %14305 = vmatpush3.bf16.msra.mxu1 %v15043_v2  ;;  %2845 = vmatprep.mubr.bf16.mxu0 %v17333_v35 }
 0x2cc   : > { %14306 = vmatprep.subr.bf16.mxu1 %v15044_v18 }
 0x2cf   : > { %14307 = vmatpush3.bf16.msra.mxu1 %v15044_v18 }
 0x2d0   : > { %14308 = vmatprep.subr.bf16.mxu1 %v15045_v45 }
 0x2d1   : > { %2704 = vmatmul.mubr.bf16.gmra.mxu1 %v17357_v17 }
 0x2d2   : > { %2713 = vmatprep.mubr.bf16.mxu1 %v17361_v39  ;;  %2846 = vmatmul.mubr.bf16.gmra.mxu0 %v17357_v17 }
 0x2d3   : > { %14309 = vmatpush3.bf16.msra.mxu1 %v15045_v45  ;;  %2853 = vmatprep.mubr.bf16.mxu0 %v17361_v39 }
 0x2d4   : > { %14310 = vmatprep.subr.bf16.mxu1 %v15046_v5 }
 0x2d7   : > { %14311 = vmatpush3.bf16.msra.mxu1 %v15046_v5 }
 0x2d8   : > { %14312 = vmatprep.subr.bf16.mxu1 %v15047_v33 }
 0x2d9   : > { %2714 = vmatmul.mubr.bf16.gmra.mxu1 %v17374_v52 }
 0x2da   : > { %2854 = vmatmul.mubr.bf16.gmra.mxu0 %v17374_v52  ;;  %14316 = vmatprep.mubr.bf16.mxu1 %v17289_v63 }
 0x2db   : > { %14313 = vmatpush3.bf16.msra.mxu1 %v15047_v33 }
 0x2dc   : > { %14314 = vmatprep.subr.bf16.mxu1 %v15048_v58 }
 0x2df   : > { %14315 = vmatpush3.bf16.msra.mxu1 %v15048_v58 }
 0x2e1   : > { %v2320_v35 = vpop.f32.mrf.mxu1 }
 0x2e2   : > { %14317 = vmatmul.mubr.bf16.vlgmr.msra.gmra.mxu1 %v17320_v16  ;;  %v2247_v17 = vpop.f32.mrf.mxu0 }
 0x2e3   : > { %14320 = vmatprep.mubr.bf16.mxu1 %v17353_v3  ;;  %v2322_v39 = vpop.f32.mrf.mxu1  ;;  %v2321_v29 = vadd.f32 %v2320_v35, %v2247_v17 }
 0x2e4   : > { %v2249_v48 = vpop.f32.mrf.mxu0 }
 0x2e5   : > { %v2323_v50 = vadd.f32 %v2322_v39, %v2249_v48  ;;  %v2324_v51 = vpop.f32.mrf.mxu1 }
 0x2e6   : > { %v2251_v32 = vpop.f32.mrf.mxu0 }
 0x2e7   : > { %v13772_v54 = vpack.c.bf16 %v2323_v50, %v2321_v29  ;;  %v2326_v15 = vpop.f32.mrf.mxu1  ;;  %v2325_v63 = vadd.f32 %v2324_v51, %v2251_v32 }
 0x2e8   : > { %v2253_v52 = vpop.f32.mrf.mxu0 }
 0x2e9   : > { %3151 = vst [vmem:[#allocation2] sm:$0xff] %v13772_v54  ;;  %v2327_v47 = vadd.f32 %v2326_v15, %v2253_v52  ;;  %v2330_v56 = vpop.f32.mrf.mxu1 }
 0x2ea   : > { %14321 = vmatmul.mubr.bf16.gmra.mxu1 %v17372_v49  ;;  %v2257_v57 = vpop.f32.mrf.mxu0 }
 0x2eb   : > { %v13777_v16 = vpack.c.bf16 %v2327_v47, %v2325_v63  ;;  %v2332_v41 = vpop.f32.mrf.mxu1  ;;  %v2331_v3 = vadd.f32 %v2330_v56, %v2257_v57 }
 0x2ec   : > { %v2259_v60 = vpop.f32.mrf.mxu0 }
 0x2ed   : > { %3156 = vst [vmem:[#allocation2 + $0x24] sm:$0xff] %v13777_v16  ;;  %v2333_v20 = vadd.f32 %v2332_v41, %v2259_v60  ;;  %v2334_v46 = vpop.f32.mrf.mxu1 }
 0x2ee   : > { %v2261_v19 = vpop.f32.mrf.mxu0 }
 0x2ef   : > { %v13782_v1 = vpack.c.bf16 %v2333_v20, %v2331_v3  ;;  %v2336_v61 = vpop.f32.mrf.mxu1  ;;  %v2335_v8 = vadd.f32 %v2334_v46, %v2261_v19 }
 0x2f0   : > { %v2263_v27 = vpop.f32.mrf.mxu0 }
 0x2f1   : > { %3161 = vst [vmem:[#allocation2 + $0x48] sm:$0xff] %v13782_v1  ;;  %v2337_v4 = vadd.f32 %v2336_v61, %v2263_v27  ;;  %v2340_v6 = vpop.f32.mrf.mxu1 }
 0x2f2   : > { %v2267_v24 = vpop.f32.mrf.mxu0 }
 0x2f3   : > { %v13787_v12 = vpack.c.bf16 %v2337_v4, %v2335_v8  ;;  %v2342_v26 = vpop.f32.mrf.mxu1  ;;  %v2341_v10 = vadd.f32 %v2340_v6, %v2267_v24 }
 0x2f4   : > { %v2269_v49 = vpop.f32.mrf.mxu0  ;;  %v15049_v9 = vld [vmem:[#allocation2] ss:$36 sps:$4 sm:$0xff]  }
 0x2f5   : > { %3166 = vst [vmem:[#allocation2 + $0x6c] sm:$0xff] %v13787_v12  ;;  %v2343_v13 = vadd.f32 %v2342_v26, %v2269_v49  ;;  %v2344_v7 = vpop.f32.mrf.mxu1  ;;  %14332 = vmatprep.mubr.msk.bf16.mxu0 %vm3274_vm0, %v15049_v9 }
 0x2f6   : > { %v2271_v0 = vpop.f32.mrf.mxu0 }
 0x2f7   : > { %v13792_v30 = vpack.c.bf16 %v2343_v13, %v2341_v10  ;;  %v2346_v11 = vpop.f32.mrf.mxu1  ;;  %v2345_v36 = vadd.f32 %v2344_v7, %v2271_v0 }
 0x2f8   : > { %v2273_v14 = vpop.f32.mrf.mxu0 }
 0x2f9   : > { %3171 = vst [vmem:[#allocation2 + $0x90] sm:$0xff] %v13792_v30  ;;  %v2347_v38 = vadd.f32 %v2346_v11, %v2273_v14  ;;  %v2350_v21 = vpop.f32.mrf.mxu1 }
 0x2fa   : > { %v2277_v43 = vpop.f32.mrf.mxu0 }
 0x2fb   : > { %v13797_v59 = vpack.c.bf16 %v2347_v38, %v2345_v36  ;;  %v2352_v37 = vpop.f32.mrf.mxu1  ;;  %v2351_v40 = vadd.f32 %v2350_v21, %v2277_v43 }
 0x2fc   : > { %v2279_v31 = vpop.f32.mrf.mxu0 }
 0x2fd   : > { %3176 = vst [vmem:[#allocation2 + $0xb4] sm:$0xff] %v13797_v59  ;;  %v2353_v42 = vadd.f32 %v2352_v37, %v2279_v31  ;;  %v2354_v23 = vpop.f32.mrf.mxu1 }
 0x2fe   : > { %v2281_v25 = vpop.f32.mrf.mxu0 }
 0x2ff   : > { %v13802_v22 = vpack.c.bf16 %v2353_v42, %v2351_v40  ;;  %v2356_v2 = vpop.f32.mrf.mxu1  ;;  %v2355_v45 = vadd.f32 %v2354_v23, %v2281_v25 }
 0x300   : > { %v2283_v18 = vpop.f32.mrf.mxu0 }
 0x301   : > { %3181 = vst [vmem:[#allocation2 + $0xd8] sm:$0xff] %v13802_v22  ;;  %v2357_v5 = vadd.f32 %v2356_v2, %v2283_v18 }
 0x302   : > { %v2466_v58 = vpop.f32.mrf.mxu0 }
 0x303   : > { %v13807_v33 = vpack.c.bf16 %v2357_v5, %v2355_v45 }
 0x304   : > { %v2468_v35 = vpop.f32.mrf.mxu0 }
 0x305   : > { %3186 = vst [vmem:[#allocation2 + $0xfc] sm:$0xff] %v13807_v33 }
 0x306   : > { %v2470_v17 = vpop.f32.mrf.mxu0 }
 0x308   : > { %v2472_v39 = vpop.f32.mrf.mxu0 }
 0x30a   : > { %v2476_v48 = vpop.f32.mrf.mxu0 }
 0x30c   : > { %v2478_v29 = vpop.f32.mrf.mxu0 }
 0x30e   : > { %v2480_v50 = vpop.f32.mrf.mxu0 }
 0x310   : > { %v2482_v51 = vpop.f32.mrf.mxu0 }
 0x312   : > { %v2486_v54 = vpop.f32.mrf.mxu0 }
 0x314   : > { %v2488_v57 = vpop.f32.mrf.mxu0 }
 0x316   : > { %v2490_v46 = vpop.f32.mrf.mxu0 }
 0x318   : > { %v2492_v4 = vpop.f32.mrf.mxu0 }
 0x31a   : > { %v2496_v9 = vpop.f32.mrf.mxu0 }
 0x31c   : > { %v2498_v11 = vpop.f32.mrf.mxu0 }
 0x31e   : > { %v2500_v59 = vpop.f32.mrf.mxu0 }
 0x320   : > { %v2502_v25 = vpop.f32.mrf.mxu0 }
 0x321   : > { %v2393_v32 = vpop.f32.mrf.mxu1 }
 0x322   : > { %v2467_v52 = vadd.f32 %v2466_v58, %v2393_v32 }
 0x323   : > { %v2395_v15 = vpop.f32.mrf.mxu1 }
 0x324   : > { %v2469_v63 = vadd.f32 %v2468_v35, %v2395_v15 }
 0x325   : > { %v2397_v47 = vpop.f32.mrf.mxu1 }
 0x326   : > { %v13773_v56 = vpack.c.bf16 %v2469_v63, %v2467_v52  ;;  %v2471_v41 = vadd.f32 %v2470_v17, %v2397_v47 }
 0x327   : > { %v2399_v16 = vpop.f32.mrf.mxu1 }
 0x328   : > { %3152 = vst [vmem:[#allocation2 + $0x8] sm:$0xff] %v13773_v56  ;;  %v2473_v60 = vadd.f32 %v2472_v39, %v2399_v16 }
 0x329   : > { %v2403_v3 = vpop.f32.mrf.mxu1 }
 0x32a   : > { %v13778_v20 = vpack.c.bf16 %v2473_v60, %v2471_v41  ;;  %v2477_v1 = vadd.f32 %v2476_v48, %v2403_v3 }
 0x32b   : > { %v2405_v19 = vpop.f32.mrf.mxu1 }
 0x32c   : > { %3157 = vst [vmem:[#allocation2 + $0x2c] sm:$0xff] %v13778_v20  ;;  %v2479_v61 = vadd.f32 %v2478_v29, %v2405_v19 }
 0x32d   : > { %v2407_v27 = vpop.f32.mrf.mxu1 }
 0x32e   : > { %v13783_v8 = vpack.c.bf16 %v2479_v61, %v2477_v1  ;;  %v2481_v24 = vadd.f32 %v2480_v50, %v2407_v27 }
 0x32f   : > { %v2409_v6 = vpop.f32.mrf.mxu1 }
 0x330   : > { %3162 = vst [vmem:[#allocation2 + $0x50] sm:$0xff] %v13783_v8  ;;  %v2483_v12 = vadd.f32 %v2482_v51, %v2409_v6 }
 0x331   : > { %v2413_v26 = vpop.f32.mrf.mxu1 }
 0x332   : > { %v13788_v49 = vpack.c.bf16 %v2483_v12, %v2481_v24  ;;  %v2487_v13 = vadd.f32 %v2486_v54, %v2413_v26 }
 0x333   : > { %v2415_v10 = vpop.f32.mrf.mxu1 }
 0x334   : > { %3167 = vst [vmem:[#allocation2 + $0x74] sm:$0xff] %v13788_v49  ;;  %v2489_v7 = vadd.f32 %v2488_v57, %v2415_v10 }
 0x335   : > { %v2417_v0 = vpop.f32.mrf.mxu1 }
 0x336   : > { %v13793_v30 = vpack.c.bf16 %v2489_v7, %v2487_v13  ;;  %v2491_v36 = vadd.f32 %v2490_v46, %v2417_v0 }
 0x337   : > { %v2419_v14 = vpop.f32.mrf.mxu1 }
 0x338   : > { %3172 = vst [vmem:[#allocation2 + $0x98] sm:$0xff] %v13793_v30  ;;  %v2493_v38 = vadd.f32 %v2492_v4, %v2419_v14 }
 0x339   : > { %v2423_v21 = vpop.f32.mrf.mxu1 }
 0x33a   : > { %v13798_v43 = vpack.c.bf16 %v2493_v38, %v2491_v36  ;;  %v2497_v31 = vadd.f32 %v2496_v9, %v2423_v21 }
 0x33b   : > { %v2425_v37 = vpop.f32.mrf.mxu1  ;;  %v15052_v0 = vld [vmem:[#allocation2 + $0x54] ss:$36 sps:$4 sm:$0xff]  }
 0x33c   : > { %3177 = vst [vmem:[#allocation2 + $0xbc] sm:$0xff] %v13798_v43  ;;  %v2499_v40 = vadd.f32 %v2498_v11, %v2425_v37 }
 0x33d   : > { %v2427_v42 = vpop.f32.mrf.mxu1 }
 0x33e   : > { %v13803_v23 = vpack.c.bf16 %v2499_v40, %v2497_v31  ;;  %v2501_v2 = vadd.f32 %v2500_v59, %v2427_v42 }
 0x33f   : > { %v2429_v22 = vpop.f32.mrf.mxu1 }
 0x340   : > { %3182 = vst [vmem:[#allocation2 + $0xe0] sm:$0xff] %v13803_v23  ;;  %v2503_v18 = vadd.f32 %v2502_v25, %v2429_v22  ;;  %v3291_v22 = vsel %vm3274_vm0, %v15052_v0, 0 }
 0x341   : > { %v2612_v45 = vpop.f32.mrf.mxu1 }
 0x342   : > { %v13808_v5 = vpack.c.bf16 %v2503_v18, %v2501_v2  ;;  %v2539_v33 = vpop.f32.mrf.mxu0  ;;  %v15053_v2 = vld [vmem:[#allocation2 + $0xc] ss:$36 sps:$4 sm:$0xff]  }
 0x343   : > { %v2614_v58 = vpop.f32.mrf.mxu1  ;;  %v2613_v17 = vadd.f32 %v2612_v45, %v2539_v33  ;;  %v15051_v46 = vld [vmem:[#allocation2 + $0x9c] ss:$36 sps:$4 sm:$0xff]  }
 0x344   : > { %3187 = vst [vmem:[#allocation2 + $0x104] sm:$0xff] %v13808_v5  ;;  %v2541_v35 = vpop.f32.mrf.mxu0  ;;  %v3294_v7 = vsel %vm3274_vm0, %v15051_v46, 0 }
 0x345   : > { %v2615_v39 = vadd.f32 %v2614_v58, %v2541_v35  ;;  %v2616_v48 = vpop.f32.mrf.mxu1 }
 0x346   : > { %v2543_v29 = vpop.f32.mrf.mxu0 }
 0x347   : > { %v13774_v50 = vpack.c.bf16 %v2615_v39, %v2613_v17  ;;  %v2618_v51 = vpop.f32.mrf.mxu1  ;;  %v2617_v54 = vadd.f32 %v2616_v48, %v2543_v29  ;;  %v3288_v29 = vsel %vm3274_vm0, %v15053_v2, 0 }
 0x348   : > { %v2545_v32 = vpop.f32.mrf.mxu0 }
 0x349   : > { %3153 = vst [vmem:[#allocation2 + $0x10] sm:$0xff] %v13774_v50  ;;  %v2619_v15 = vadd.f32 %v2618_v51, %v2545_v32  ;;  %v2622_v52 = vpop.f32.mrf.mxu1 }
 0x34a   : > { %v2549_v63 = vpop.f32.mrf.mxu0 }
 0x34b   : > { %v13779_v47 = vpack.c.bf16 %v2619_v15, %v2617_v54  ;;  %v2624_v56 = vpop.f32.mrf.mxu1  ;;  %v15050_v57 = vld [vmem:[#allocation2 + $0xe4] ss:$36 sps:$4 sm:$0xff]   ;;  %v2623_v41 = vadd.f32 %v2622_v52, %v2549_v63  ;;  %v15055_v15 = vld [vmem:[#allocation2 + $0x90] ss:$36 sps:$4 sm:$0xff]  }
 0x34c   : > { %v2551_v16 = vpop.f32.mrf.mxu0  ;;  %14540 = vmatprep.subr.msk.bf16.mxu0 %vm3274_vm0, %v15050_v57  ;;  %v3297_v20 = vsel %vm3274_vm0, %v15050_v57, 0  ;;  %v15054_v54 = vld [vmem:[#allocation2 + $0x48] ss:$36 sps:$4 sm:$0xff]  }
 0x34d   : > { %3158 = vst [vmem:[#allocation2 + $0x34] sm:$0xff] %v13779_v47  ;;  %v2625_v60 = vadd.f32 %v2624_v56, %v2551_v16  ;;  %v2626_v3 = vpop.f32.mrf.mxu1  ;;  %14325 = vmatpush3.bf16.xpose.msra.mxu0 %v3297_v20  ;;  %v15059_v20 = vld [vmem:[#allocation2 + $0x4] ss:$36 sps:$4 sm:$0xff]  }
 0x34e   : > { %v2553_v19 = vpop.f32.mrf.mxu0  ;;  %14541 = vmatprep.subr.msk.bf16.mxu0 %vm3274_vm0, %v15051_v46 }
 0x34f   : > { %v13784_v1 = vpack.c.bf16 %v2625_v60, %v2623_v41  ;;  %v2628_v61 = vpop.f32.mrf.mxu1  ;;  %v2627_v8 = vadd.f32 %v2626_v3, %v2553_v19  ;;  %v15058_v60 = vld [vmem:[#allocation2 + $0xd8] ss:$36 sps:$4 sm:$0xff]  }
 0x350   : > { %v2555_v27 = vpop.f32.mrf.mxu0 }
 0x351   : > { %3163 = vst [vmem:[#allocation2 + $0x58] sm:$0xff] %v13784_v1  ;;  %v2629_v4 = vadd.f32 %v2628_v61, %v2555_v27  ;;  %v2632_v6 = vpop.f32.mrf.mxu1 }
 0x352   : > { %v2559_v24 = vpop.f32.mrf.mxu0 }
 0x353   : > { %v13789_v12 = vpack.c.bf16 %v2629_v4, %v2627_v8  ;;  %v2634_v26 = vpop.f32.mrf.mxu1  ;;  %v2633_v9 = vadd.f32 %v2632_v6, %v2559_v24 }
 0x354   : > { %v2561_v49 = vpop.f32.mrf.mxu0  ;;  %v15061_v24 = vld [vmem:[#allocation2 + $0x10] ss:$36 sps:$4 sm:$0xff]  }
 0x355   : > { %3168 = vst [vmem:[#allocation2 + $0x7c] sm:$0xff] %v13789_v12  ;;  %v2635_v10 = vadd.f32 %v2634_v26, %v2561_v49  ;;  %v2636_v13 = vpop.f32.mrf.mxu1  ;;  %14327 = vmatpush3.bf16.xpose.msra.mxu0 %v3294_v7 }
 0x356   : > { %v2563_v30 = vpop.f32.mrf.mxu0  ;;  %14542 = vmatprep.subr.msk.bf16.mxu0 %vm3274_vm0, %v15052_v0 }
 0x357   : > { %v13794_v11 = vpack.c.bf16 %v2635_v10, %v2633_v9  ;;  %v2638_v14 = vpop.f32.mrf.mxu1  ;;  %v2637_v38 = vadd.f32 %v2636_v13, %v2563_v30 }
 0x358   : > { %v2565_v36 = vpop.f32.mrf.mxu0 }
 0x359   : > { %3173 = vst [vmem:[#allocation2 + $0xa0] sm:$0xff] %v13794_v11  ;;  %v2639_v21 = vadd.f32 %v2638_v14, %v2565_v36  ;;  %v2642_v43 = vpop.f32.mrf.mxu1  ;;  %v4118_v14 = vsel %vm3274_vm0, %v15061_v24, 0 }
 0x35a   : > { %v2569_v59 = vpop.f32.mrf.mxu0 }
 0x35b   : > { %v13799_v37 = vpack.c.bf16 %v2639_v21, %v2637_v38  ;;  %v2644_v31 = vpop.f32.mrf.mxu1  ;;  %v2643_v42 = vadd.f32 %v2642_v43, %v2569_v59 }
 0x35c   : > { %v2571_v40 = vpop.f32.mrf.mxu0  ;;  %v15060_v1 = vld [vmem:[#allocation2 + $0x58] ss:$36 sps:$4 sm:$0xff]  }
 0x35d   : > { %3178 = vst [vmem:[#allocation2 + $0xc4] sm:$0xff] %v13799_v37  ;;  %v2645_v23 = vadd.f32 %v2644_v31, %v2571_v40  ;;  %v2646_v25 = vpop.f32.mrf.mxu1  ;;  %14329 = vmatpush3.bf16.xpose.msra.mxu0 %v3291_v22  ;;  %v4121_v6 = vsel %vm3274_vm0, %v15060_v1, 0  ;;  %v15062_v22 = vld [vmem:[#allocation2 + $0x4c] ss:$36 sps:$4 sm:$0xff]  }
 0x35e   : > { %v2573_v18 = vpop.f32.mrf.mxu0  ;;  %14543 = vmatprep.subr.msk.bf16.mxu0 %vm3274_vm0, %v15053_v2 }
 0x35f   : > { %v13804_v45 = vpack.c.bf16 %v2645_v23, %v2643_v42  ;;  %v2648_v5 = vpop.f32.mrf.mxu1  ;;  %v2647_v58 = vadd.f32 %v2646_v25, %v2573_v18  ;;  %v15063_v18 = vld [vmem:[#allocation2 + $0x94] ss:$36 sps:$4 sm:$0xff]  }
 0x360   : > { %v2575_v33 = vpop.f32.mrf.mxu0 }
 0x361   : > { %3183 = vst [vmem:[#allocation2 + $0xe8] sm:$0xff] %v13804_v45  ;;  %v2649_v35 = vadd.f32 %v2648_v5, %v2575_v33 }
 0x362   : > { %v2758_v17 = vpop.f32.mrf.mxu0 }
 0x363   : > { %v13809_v39 = vpack.c.bf16 %v2649_v35, %v2647_v58 }
 0x364   : > { %v2760_v48 = vpop.f32.mrf.mxu0  ;;  %v15057_v57 = vld [vmem:[#allocation2 + $0xa0] ss:$36 sps:$4 sm:$0xff]  }
 0x365   : > { %3188 = vst [vmem:[#allocation2 + $0x10c] sm:$0xff] %v13809_v39  ;;  %14331 = vmatpush3.bf16.xpose.msra.mxu0 %v3288_v29  ;;  %v4124_v19 = vsel %vm3274_vm0, %v15057_v57, 0 }
 0x366   : > { %v2762_v50 = vpop.f32.mrf.mxu0 }
 0x368   : > { %v2764_v51 = vpop.f32.mrf.mxu0 }
 0x36a   : > { %v2768_v32 = vpop.f32.mrf.mxu0 }
 0x36c   : > { %v2770_v52 = vpop.f32.mrf.mxu0  ;;  %v15056_v63 = vld [vmem:[#allocation2 + $0xe8] ss:$36 sps:$4 sm:$0xff]   ;;  %14333 = vmatmul.mubr.msk.bf16.vlgmr.msra.gmra.mxu0 %vm3274_vm0, %v15054_v54 }
 0x36d   : > { %14336 = vmatprep.mubr.msk.bf16.mxu0 %vm3274_vm0, %v15055_v15  ;;  %14548 = vmatprep.subr.msk.bf16.mxu0 %vm3274_vm0, %v15056_v63  ;;  %v4127_v56 = vsel %vm3274_vm0, %v15056_v63, 0  ;;  %v15064_v15 = vld [vmem:[#allocation2 + $0xdc] ss:$36 sps:$4 sm:$0xff]  }
 0x36e   : > { %v2772_v47 = vpop.f32.mrf.mxu0  ;;  %14389 = vmatpush3.bf16.xpose.msra.mxu0 %v4127_v56 }
 0x36f   : > { %14549 = vmatprep.subr.msk.bf16.mxu0 %vm3274_vm0, %v15057_v57 }
 0x370   : > { %v2774_v16 = vpop.f32.mrf.mxu0 }
 0x372   : > { %v2778_v41 = vpop.f32.mrf.mxu0 }
 0x374   : > { %v2780_v3 = vpop.f32.mrf.mxu0  ;;  %14337 = vmatmul.mubr.msk.bf16.gmra.mxu0 %vm3274_vm0, %v15058_v60 }
 0x375   : > { %14396 = vmatprep.mubr.msk.bf16.mxu0 %vm3274_vm0, %v15059_v20 }
 0x376   : > { %v17453_v46 = vpop.f32.mrf.mxu0  ;;  %14391 = vmatpush3.bf16.xpose.msra.mxu0 %v4124_v19 }
 0x377   : > { %14550 = vmatprep.subr.msk.bf16.mxu0 %vm3274_vm0, %v15060_v1 }
 0x378   : > { %v2784_v61 = vpop.f32.mrf.mxu0 }
 0x37a   : > { %v17458_v27 = vpop.f32.mrf.mxu0 }
 0x37c   : > { %v17460_v8 = vpop.f32.mrf.mxu0 }
 0x37e   : > { %v17462_v4 = vpop.f32.mrf.mxu0  ;;  %14393 = vmatpush3.bf16.xpose.msra.mxu0 %v4121_v6 }
 0x37f   : > { %14551 = vmatprep.subr.msk.bf16.mxu0 %vm3274_vm0, %v15061_v24 }
 0x380   : > { %v17465_v12 = vpop.f32.mrf.mxu0 }
 0x381   : > { %v2685_v26 = vpop.f32.mrf.mxu1 }
 0x382   : > { %v17468_v49 = vpop.f32.mrf.mxu0  ;;  %v2759_v10 = vadd.f32 %v2758_v17, %v2685_v26 }
 0x383   : > { %v2687_v9 = vpop.f32.mrf.mxu1 }
 0x384   : > { %v2761_v13 = vadd.f32 %v2760_v48, %v2687_v9  ;;  %v17470_v7 = vpop.f32.mrf.mxu0 }
 0x385   : > { %v2689_v0 = vpop.f32.mrf.mxu1 }
 0x386   : > { %v13775_v30 = vpack.c.bf16 %v2761_v13, %v2759_v10  ;;  %v17472_v11 = vpop.f32.mrf.mxu0  ;;  %14395 = vmatpush3.bf16.xpose.msra.mxu0 %v4118_v14  ;;  %v2763_v38 = vadd.f32 %v2762_v50, %v2689_v0  ;;  %v13878_v14 = vadd.f32 %v17470_v7, %v17468_v49 }
 0x387   : > { %v2691_v36 = vpop.f32.mrf.mxu1 }
 0x388   : > { %3154 = vst [vmem:[#allocation2 + $0x18] sm:$0xff] %v13775_v30  ;;  %v2765_v21 = vadd.f32 %v2764_v51, %v2691_v36  ;;  %v17475_v43 = vpop.f32.mrf.mxu0 }
 0x389   : > { %v2695_v59 = vpop.f32.mrf.mxu1 }
 0x38a   : > { %v13780_v37 = vpack.c.bf16 %v2765_v21, %v2763_v38  ;;  %v13882_v31 = vpop.f32.mrf.mxu0  ;;  %v2769_v42 = vadd.f32 %v2768_v32, %v2695_v59 }
 0x38b   : > { %v2697_v40 = vpop.f32.mrf.mxu1 }
 0x38c   : > { %3159 = vst [vmem:[#allocation2 + $0x3c] sm:$0xff] %v13780_v37  ;;  %v2771_v23 = vadd.f32 %v2770_v52, %v2697_v40  ;;  %v13883_v25 = vpop.f32.mrf.mxu0 }
 0x38d   : > { %v2699_v2 = vpop.f32.mrf.mxu1  ;;  %14397 = vmatmul.mubr.msk.bf16.vlgmr.msra.gmra.mxu0 %vm3274_vm0, %v15062_v22 }
 0x38e   : > { %v13785_v45 = vpack.c.bf16 %v2771_v23, %v2769_v42  ;;  %v13885_v5 = vpop.f32.mrf.mxu0  ;;  %14400 = vmatprep.mubr.msk.bf16.mxu0 %vm3274_vm0, %v15063_v18  ;;  %v2773_v58 = vadd.f32 %v2772_v47, %v2699_v2 }
 0x38f   : > { %v2701_v33 = vpop.f32.mrf.mxu1 }
 0x390   : > { %3164 = vst [vmem:[#allocation2 + $0x60] sm:$0xff] %v13785_v45  ;;  %v2775_v35 = vadd.f32 %v2774_v16, %v2701_v33  ;;  %v13886_v17 = vpop.f32.mrf.mxu0 }
 0x391   : > { %v2705_v39 = vpop.f32.mrf.mxu1 }
 0x392   : > { %v13790_v48 = vpack.c.bf16 %v2775_v35, %v2773_v58  ;;  %v13888_v29 = vpop.f32.mrf.mxu0  ;;  %v2779_v51 = vadd.f32 %v2778_v41, %v2705_v39 }
 0x393   : > { %v2707_v50 = vpop.f32.mrf.mxu1 }
 0x394   : > { %3169 = vst [vmem:[#allocation2 + $0x84] sm:$0xff] %v13790_v48  ;;  %v2781_v32 = vadd.f32 %v2780_v3, %v2707_v50  ;;  %v13889_v54 = vpop.f32.mrf.mxu0 }
 0x395   : > { %v2709_v52 = vpop.f32.mrf.mxu1  ;;  %14401 = vmatmul.mubr.msk.bf16.gmra.mxu0 %vm3274_vm0, %v15064_v15  ;;  %v13890_v22 = vadd.f32 %v13889_v54, %v13888_v29  ;;  %v15068_v15 = vld [vmem:[#allocation2 + $0x18] ss:$36 sps:$4 sm:$0xff]  }
 0x396   : > { %v13795_v63 = vpack.c.bf16 %v2781_v32, %v2779_v51  ;;  %v13891_v56 = vpop.f32.mrf.mxu0  ;;  %v2783_v47 = vadd.f32 %v17453_v46, %v2709_v52  ;;  %v13884_v46 = vadd.f32 %v13883_v25, %v13882_v31  ;;  %v3194_v52 = vadd.s32 16, %v17233_v44 }
 0x397   : > { %v2711_v57 = vpop.f32.mrf.mxu1 }
 0x398   : > { %3174 = vst [vmem:[#allocation2 + $0xa8] sm:$0xff] %v13795_v63  ;;  %v2785_v16 = vadd.f32 %v2784_v61, %v2711_v57  ;;  %v13892_v19 = vpop.f32.mrf.mxu0  ;;  %v3201_v63 = vand.u32 127, %v778_v34 }
 0x399   : > { %v2715_v60 = vpop.f32.mrf.mxu1 }
 0x39a   : > { %v13800_v20 = vpack.c.bf16 %v2785_v16, %v2783_v47  ;;  %v2789_v41 = vadd.f32 %v17458_v27, %v2715_v60  ;;  %v13894_v24 = vpop.f32.mrf.mxu0  ;;  %vm17492_vm1 = vcmp.ge.s32.totalorder %v17233_v44, %v3201_v63  ;;  %v3193_v47 = vadd.s32 8, %v17233_v44 }
 0x39b   : > { %v2717_v1 = vpop.f32.mrf.mxu1  ;;  %v15067_v32 = vld [vmem:[#allocation2 + $0x60] ss:$36 sps:$4 sm:$0xff]   ;;  %vm17497_vm2 = vcmp.ge.s32.totalorder %v3194_v52, %v3201_v63 }
 0x39c   : > { %3179 = vst [vmem:[#allocation2 + $0xcc] sm:$0xff] %v13800_v20  ;;  %v2791_v3 = vadd.f32 %v17460_v8, %v2717_v1  ;;  %v13895_v61 = vpop.f32.mrf.mxu0  ;;  %v13887_v8 = vadd.f32 %v13886_v17, %v13885_v5  ;;  %v13893_v17 = vadd.f32 %v13892_v19, %v13891_v56  ;;  %v3195_v20 = vadd.s32 24, %v17233_v44 }
 0x39d   : > { %v2719_v6 = vpop.f32.mrf.mxu1  ;;  %v13896_v42 = vadd.f32 %v13895_v61, %v13894_v24  ;;  %vm17505_vm3 = vcmp.ge.s32.totalorder %v3193_v47, %v3201_v63 }
 0x39e   : > { %v13805_v26 = vpack.c.bf16 %v2791_v3, %v2789_v41  ;;  %v2793_v10 = vadd.f32 %v17462_v4, %v2719_v6  ;;  %v13897_v59 = vpop.f32.mrf.mxu0  ;;  %v13881_v4 = vadd.f32 %v17475_v43, %v17472_v11  ;;  %v3196_v3 = vadd.s32 32, %v17233_v44 }
 0x39f   : > { %v2721_v9 = vpop.f32.mrf.mxu1  ;;  %vm17512_vm4 = vcmp.ge.s32.totalorder %v3195_v20, %v3201_v63 }
 0x3a0   : > { %3184 = vst [vmem:[#allocation2 + $0xf0] sm:$0xff] %v13805_v26  ;;  %v2795_v13 = vadd.f32 %v17465_v12, %v2721_v9  ;;  %v13898_v49 = vpop.f32.mrf.mxu0  ;;  %v3198_v9 = vadd.s32 48, %v17233_v44  ;;  %vm17521_vm5 = vcmp.ge.s32.totalorder %v3196_v3, %v3201_v63 }
 0x3a1   : > { %v13899_v33 = vadd.f32 %v13898_v49, %v13897_v59 }
 0x3a2   : > { %v13810_v0 = vpack.c.bf16 %v2795_v13, %v2793_v10  ;;  %v14318_v30 = vpop.f32.mrf.mxu1  ;;  %vm17528_vm6 = vcmp.ge.s32.totalorder %v3198_v9, %v3201_v63  ;;  %v15070_v9 = vld [vmem:[#allocation2 + $0x54] ss:$36 sps:$4 sm:$0xff]  }
 0x3a3   : > { %v2905_v36 = vadd.f32 %v14318_v30, %v13884_v46  ;;  %v15066_v43 = vld [vmem:[#allocation2 + $0xa8] ss:$36 sps:$4 sm:$0xff]   ;;  %v3197_v30 = vadd.s32 40, %v17233_v44 }
 0x3a4   : > { %3189 = vst [vmem:[#allocation2 + $0x114] sm:$0xff] %v13810_v0  ;;  %v2896_v27 = vpop.f32.mrf.mxu1 }
 0x3a5   : > { %v13786_v38 = vpack.c.bf16 %v2905_v36, %v2905_v36  ;;  %v2897_v21 = vadd.f32 %v13878_v14, %v2896_v27  ;;  %vm17537_vm7 = vcmp.ge.s32.totalorder %v3197_v30, %v3201_v63 }
 0x3a6   : > { %v14319_v37 = vpop.f32.mrf.mxu1 }
 0x3a7   : > { %3165 = vst [vmem:[#allocation2 + $0x68] sm:$0xf] %v13786_v38  ;;  %v13776_v12 = vpack.c.bf16 %v2897_v21, %v2897_v21  ;;  %v2908_v31 = vadd.f32 %v14319_v37, %v13887_v8  ;;  %v3199_v8 = vadd.s32 56, %v17233_v44 }
 0x3a8   : > { %v2899_v40 = vpop.f32.mrf.mxu1 }
 0x3a9   : > { %3155 = vst [vmem:[#allocation2 + $0x20] sm:$0xf] %v13776_v12  ;;  %v13791_v23 = vpack.c.bf16 %v2908_v31, %v2908_v31  ;;  %v2900_v25 = vadd.f32 %v13881_v4, %v2899_v40  ;;  %vm17543_vm8 = vcmp.ge.s32.totalorder %v3199_v8, %v3201_v63 }
 0x3aa   : > { %v14322_v7 = vpop.f32.mrf.mxu1 }
 0x3ab   : > { %3170 = vst [vmem:[#allocation2 + $0x8c] sm:$0xf] %v13791_v23  ;;  %v13781_v2 = vpack.c.bf16 %v2900_v25, %v2900_v25  ;;  %v2921_v18 = vadd.f32 %v14322_v7, %v13896_v42  ;;  %v15065_v45 = vld [vmem:[#allocation2 + $0xf0] ss:$36 sps:$4 sm:$0xff]  }
 0x3ac   : > { %v2912_v5 = vpop.f32.mrf.mxu1  ;;  %14340 = vmatprep.subr.bf16.mxu1 %v15065_v45 }
 0x3ad   : > { %3160 = vst [vmem:[#allocation2 + $0x44] sm:$0xf] %v13781_v2  ;;  %v13806_v58 = vpack.c.bf16 %v2921_v18, %v2921_v18  ;;  %v2913_v11 = vadd.f32 %v13890_v22, %v2912_v5  ;;  %14341 = vmatpush3.bf16.msra.mxu1 %v15065_v45 }
 0x3ae   : > { %v14323_v35 = vpop.f32.mrf.mxu1  ;;  %14342 = vmatprep.subr.bf16.mxu1 %v15066_v43 }
 0x3af   : > { %3185 = vst [vmem:[#allocation2 + $0xf8] sm:$0xf] %v13806_v58  ;;  %v13796_v39 = vpack.c.bf16 %v2913_v11, %v2913_v11  ;;  %v2924_v48 = vadd.f32 %v14323_v35, %v13899_v33 }
 0x3b0   : > { %v2915_v50 = vpop.f32.mrf.mxu1 }
 0x3b1   : > { %3175 = vst [vmem:[#allocation2 + $0xb0] sm:$0xf] %v13796_v39  ;;  %v13811_v29 = vpack.c.bf16 %v2924_v48, %v2924_v48  ;;  %v2916_v51 = vadd.f32 %v13893_v17, %v2915_v50  ;;  %14343 = vmatpush3.bf16.msra.mxu1 %v15066_v43 }
 0x3b2   : > { %14344 = vmatprep.subr.bf16.mxu1 %v15067_v32 }
 0x3b3   : > { %3190 = vst [vmem:[#allocation2 + $0x11c] sm:$0xf] %v13811_v29  ;;  %v13801_v54 = vpack.c.bf16 %v2916_v51, %v2916_v51 }
 0x3b5   : > { %3180 = vst [vmem:[#allocation2 + $0xd4] sm:$0xf] %v13801_v54  ;;  %14345 = vmatpush3.bf16.msra.mxu1 %v15067_v32 }
 0x3b6   : > { %14346 = vmatprep.subr.bf16.mxu1 %v15068_v15 }
 0x3b9   : > { %14347 = vmatpush3.bf16.msra.mxu1 %v15068_v15 }
 0x3ba   : > { %v15117_v36 = vld [vmem:[#allocation2 + $0xf8] ss:$36 sps:$4 sm:$0xff]  }
 0x42c   : > { %v14334_v56 = vpop.f32.mrf.mxu0 }
 0x42d   : > { %v3366_v6 = vsel %vm17497_vm2, %v14334_v56, -1e+30 }
 0x42e   : > { %v3333_v60 = vpop.f32.mrf.mxu0  ;;  %v3378_v46 = vsel %vm3274_vm0, %v3366_v6, -inf }
 0x42f   : > { %v3364_v19 = vsel %vm17492_vm1, %v3333_v60, -1e+30 }
 0x430   : > { %v14335_v1 = vpop.f32.mrf.mxu0  ;;  %v3372_v34 = vsel %vm3274_vm0, %v3364_v19, -inf }
 0x431   : > { %3373 = vmax.xlane.f32.xlu0 %v3372_v34  ;;  %v3367_v14 = vsel %vm17512_vm4, %v14335_v1, -1e+30 }
 0x432   : > { %v3336_v26 = vpop.f32.mrf.mxu0  ;;  %v3381_v59 = vsel %vm3274_vm0, %v3367_v14, -inf }
 0x433   : > { %v3365_v10 = vsel %vm17505_vm3, %v3336_v26, -1e+30  ;;  %v15069_v26 = vld [vmem:[#allocation2 + $0x9c] ss:$36 sps:$4 sm:$0xff]  }
 0x434   : > { %v14338_v13 = vpop.f32.mrf.mxu0  ;;  %v3375_v61 = vsel %vm3274_vm0, %v3365_v10, -inf }
 0x435   : > { %3379 = vmax.xlane.f32.xlu0 %v3378_v46  ;;  %3376 = vmax.xlane.f32.xlu1 %v3375_v61  ;;  %v3370_v12 = vsel %vm17528_vm6, %v14338_v13, -1e+30  ;;  %v15071_v13 = vld [vmem:[#allocation2 + $0xe4] ss:$36 sps:$4 sm:$0xff]  }
 0x436   : > { %v3349_v27 = vpop.f32.mrf.mxu0  ;;  %v3390_v23 = vsel %vm3274_vm0, %v3370_v12, -inf  ;;  %v15072_v46 = vld [vmem:[#allocation2] ss:$36 sps:$4 sm:$0xff]  }
 0x437   : > { %v3368_v38 = vsel %vm17521_vm5, %v3349_v27, -1e+30 }
 0x438   : > { %v14339_v21 = vpop.f32.mrf.mxu0  ;;  %v3384_v37 = vsel %vm3274_vm0, %v3368_v38, -inf }
 0x439   : > { %3382 = vmax.xlane.f32.xlu1 %v3381_v59  ;;  %3385 = vmax.xlane.f32.xlu0 %v3384_v37  ;;  %v3371_v49 = vsel %vm17543_vm8, %v14339_v21, -1e+30 }
 0x43a   : > { %v3352_v40 = vpop.f32.mrf.mxu0  ;;  %v3393_v7 = vsel %vm3274_vm0, %v3371_v49, -inf }
 0x43b   : > { %v17549_v42 = vsel %vm17537_vm7, %v3352_v40, -1e+30 }
 0x43c   : > { %v3387_v25 = vsel %vm3274_vm0, %v17549_v42, -inf }
 0x43d   : > { %3391 = vmax.xlane.f32.xlu0 %v3390_v23  ;;  %3388 = vmax.xlane.f32.xlu1 %v3387_v25 }
 0x441   : > { %3394 = vmax.xlane.f32.xlu1 %v3393_v7  ;;  %v15075_v7 = vld [vmem:[#allocation2 + $0x48] ss:$36 sps:$4 sm:$0xff]  }
 0x44d   : > { %v17589_v59 = vpop.f32.mrf.mxu0 }
 0x44f   : > { %v4163_v40 = vpop.f32.mrf.mxu0 }
 0x4ba   : > { %v3374_v22 = vpop.xlane.xlu0 %3373 }
 0x4bb   : > { %v3396_v2 = vsub.f32 %v3364_v19, %v3374_v22  ;;  %v15076_v22 = vld [vmem:[#allocation2 + $0xd8] ss:$36 sps:$4 sm:$0xff]  }
 0x4bd   : > { %v3404_v33 = vmul.f32 1.442695, %v3396_v2 }
 0x4be   : > { %v3380_v18 = vpop.xlane.xlu0 %3379  ;;  %v3377_v45 = vpop.xlane.xlu1 %3376 }
 0x4bf   : > { %v3398_v5 = vsub.f32 %v3366_v6, %v3380_v18  ;;  %v3397_v11 = vsub.f32 %v3365_v10, %v3377_v45 }
 0x4c1   : > { %v3408_v58 = vmul.f32 1.442695, %v3398_v5  ;;  %v3406_v39 = vmul.f32 1.442695, %v3397_v11 }
 0x4c2   : > { %v3383_v43 = vpop.xlane.xlu1 %3382  ;;  %v3386_v35 = vpop.xlane.xlu0 %3385 }
 0x4c3   : > { %16065 = vpow2.f32 %v3408_v58  ;;  %v3399_v17 = vsub.f32 %v3367_v14, %v3383_v43  ;;  %v3400_v50 = vsub.f32 %v3368_v38, %v3386_v35  ;;  %v15073_v14 = vld [vmem:[#allocation2 + $0x90] ss:$36 sps:$4 sm:$0xff]  }
 0x4c4   : > { %16067 = vpow2.f32 %v3404_v33 }
 0x4c5   : > { %v3410_v48 = vmul.f32 1.442695, %v3399_v17  ;;  %v3412_v32 = vmul.f32 1.442695, %v3400_v50 }
 0x4c6   : > { %v3392_v29 = vpop.xlane.xlu0 %3391  ;;  %v3389_v10 = vpop.xlane.xlu1 %3388 }
 0x4c7   : > { %16069 = vpow2.f32 %v3410_v48  ;;  %v3402_v51 = vsub.f32 %v3370_v12, %v3392_v29  ;;  %v3401_v27 = vsub.f32 %v17549_v42, %v3389_v10  ;;  %v17599_v42 = vsel %vm17492_vm1, %v4163_v40, -1e+30 }
 0x4c8   : > { %16071 = vpow2.f32 %v3406_v39  ;;  %v4202_v25 = vsel %vm3274_vm0, %v17599_v42, -inf }
 0x4c9   : > { %v3416_v54 = vmul.f32 1.442695, %v3402_v51  ;;  %v3414_v38 = vmul.f32 1.442695, %v3401_v27 }
 0x4ca   : > { %v3395_v61 = vpop.xlane.xlu1 %3394 }
 0x4cb   : > { %16073 = vpow2.f32 %v3416_v54  ;;  %v3403_v30 = vsub.f32 %v3371_v49, %v3395_v61  ;;  %v15074_v49 = vld [vmem:[#allocation2 + $0xc] ss:$36 sps:$4 sm:$0xff]  }
 0x4cc   : > { %16075 = vpow2.f32 %v3412_v32 }
 0x4cd   : > { %v3418_v8 = vmul.f32 1.442695, %v3403_v30 }
 0x4cf   : > { %16077 = vpow2.f32 %v3418_v8 }
 0x4d0   : > { %v17557_v15 = vpop.eup %16065  ;;  %16079 = vpow2.f32 %v3414_v38 }
 0x4d1   : > { %v3426_v52 = vsel %vm3274_vm0, %v17557_v15, 0.0  ;;  %v17561_v63 = vpop.eup %16067 }
 0x4d2   : > { %3427 = vadd.xlane.f32.xlu0 %v3426_v52  ;;  %v3420_v47 = vsel %vm3274_vm0, %v17561_v63, 0.0 }
 0x4d4   : > { %v17563_v56 = vpop.eup %16069 }
 0x4d5   : > { %v3429_v60 = vsel %vm3274_vm0, %v17563_v56, 0.0  ;;  %v17569_v20 = vpop.eup %16071 }
 0x4d6   : > { %3421 = vadd.xlane.f32.xlu0 %v3420_v47  ;;  %3430 = vadd.xlane.f32.xlu1 %v3429_v60  ;;  %v3423_v34 = vsel %vm3274_vm0, %v17569_v20, 0.0 }
 0x4d8   : > { %v17571_v19 = vpop.eup %16073 }
 0x4d9   : > { %v3438_v1 = vsel %vm3274_vm0, %v17571_v19, 0.0  ;;  %v17577_v3 = vpop.eup %16075 }
 0x4da   : > { %3439 = vadd.xlane.f32.xlu0 %v3438_v1  ;;  %3424 = vadd.xlane.f32.xlu1 %v3423_v34  ;;  %v3432_v6 = vsel %vm3274_vm0, %v17577_v3, 0.0 }
 0x4dc   : > { %v17587_v21 = vpop.eup %16077 }
 0x4dd   : > { %v3441_v37 = vsel %vm3274_vm0, %v17587_v21, 0.0  ;;  %v17593_v12 = vpop.eup %16079 }
 0x4de   : > { %3433 = vadd.xlane.f32.xlu0 %v3432_v6  ;;  %v3435_v23 = vsel %vm3274_vm0, %v17593_v12, 0.0 }
 0x4eb   : > { %3682 = vrot.lane.b32.xlu1 %v15069_v26, %s16735_s2 }
 0x4ef   : > { %3680 = vrot.lane.b32.xlu1 %v15070_v9, %s16735_s2 }
 0x4f4   : > { %3684 = vrot.lane.b32.xlu0 %v15071_v13, %s16735_s2 }
 0x4f8   : > { %3650 = vrot.lane.b32.xlu0 %v15072_v46, %s16735_s2 }
 0x4fc   : > { %3654 = vrot.lane.b32.xlu0 %v15073_v14, %s16735_s2 }
 0x513   : > { %3442 = vadd.xlane.f32.xlu1 %v3441_v37 }
 0x517   : > { %3436 = vadd.xlane.f32.xlu1 %v3435_v23 }
 0x51b   : > { %4203 = vmax.xlane.f32.xlu0 %v4202_v25 }
 0x528   : > { %3678 = vrot.lane.b32.xlu1 %v15074_v49, %s16735_s2 }
 0x52c   : > { %3652 = vrot.lane.b32.xlu1 %v15075_v7, %s16735_s2 }
 0x530   : > { %3656 = vrot.lane.b32.xlu1 %v15076_v22, %s16735_s2 }
 0x55b   : > { %v3428_v2 = vpop.xlane.xlu0 %3427 }
 0x55f   : > { %v3422_v18 = vpop.xlane.xlu0 %3421  ;;  %v3431_v45 = vpop.xlane.xlu1 %3430 }
 0x560   : > { %16081 = vrcp.f32 %v3431_v45 }
 0x561   : > { %16083 = vrcp.f32 %v3422_v18 }
 0x562   : > { %16085 = vrcp.f32 %v3428_v2 }
 0x563   : > { %v3440_v5 = vpop.xlane.xlu0 %3439  ;;  %v3425_v33 = vpop.xlane.xlu1 %3424 }
 0x564   : > { %16087 = vrcp.f32 %v3425_v33 }
 0x567   : > { %v3434_v58 = vpop.xlane.xlu0 %3433  ;;  %v3683_v47 = vpop.permute.xlu1 %3682 }
 0x56b   : > { %v3685_v11 = vpop.permute.xlu0 %3684  ;;  %v3681_v60 = vpop.permute.xlu1 %3680 }
 0x56c   : > { %14544 = vmatprep.subr.msk.bf16.mxu1 %vm3274_vm0, %v3685_v11  ;;  %v3708_v52 = vsel %vm3274_vm0, %v3685_v11, 0 }
 0x56d   : > { %v16082_v43 = vpop.eup %16081 }
 0x56e   : > { %v16084_v35 = vpop.eup %16083  ;;  %v3455_v48 = vmul.f32 %v16082_v43, %v17563_v56  ;;  %v3705_v56 = vsel %vm3274_vm0, %v3683_v47, 0 }
 0x56f   : > { %v16086_v17 = vpop.eup %16085  ;;  %v3452_v50 = vmul.f32 %v16084_v35, %v17561_v63  ;;  %v3651_v8 = vpop.permute.xlu0 %3650 }
 0x570   : > { %v3454_v51 = vmul.f32 %v16086_v17, %v17557_v15  ;;  %v3702_v15 = vsel %vm3274_vm0, %v3681_v60, 0 }
 0x571   : > { %v16088_v39 = vpop.eup %16087 }
 0x572   : > { %v3453_v29 = vmul.f32 %v16088_v39, %v17569_v20  ;;  %v3461_v54 = vpack.c.bf16 %v3455_v48, %v3454_v51 }
 0x573   : > { %v3655_v37 = vpop.permute.xlu0 %3654 }
 0x574   : > { %v3460_v32 = vpack.c.bf16 %v3453_v29, %v3452_v50  ;;  %v14399_v50 = vpop.f32.mrf.mxu0 }
 0x576   : > { %14348 = vmatprep.mubr.msk.bf16.mxu1 %vm3274_vm0, %v3460_v32 }
 0x577   : > { %14349 = vmatmul.mubr.msk.bf16.vlgmr.msra.gmra.mxu1 %vm3274_vm0, %v3461_v54 }
 0x578   : > { %14357 = vmatpush3.bf16.xpose.msra.mxu1 %v3708_v52 }
 0x579   : > { %14545 = vmatprep.subr.msk.bf16.mxu1 %vm3274_vm0, %v3683_v47  ;;  %v4166_v47 = vpop.f32.mrf.mxu0 }
 0x580   : > { %14359 = vmatpush3.bf16.xpose.msra.mxu1 %v3705_v56 }
 0x581   : > { %14546 = vmatprep.subr.msk.bf16.mxu1 %vm3274_vm0, %v3681_v60 }
 0x588   : > { %14361 = vmatpush3.bf16.xpose.msra.mxu1 %v3702_v15 }
 0x59c   : > { %v3443_v63 = vpop.xlane.xlu1 %3442 }
 0x59d   : > { %16089 = vrcp.f32 %v3443_v63 }
 0x59e   : > { %16091 = vrcp.f32 %v3434_v58 }
 0x59f   : > { %16093 = vrcp.f32 %v3440_v5 }
 0x5a0   : > { %v3437_v20 = vpop.xlane.xlu1 %3436 }
 0x5a1   : > { %16095 = vrcp.f32 %v3437_v20 }
 0x5a4   : > { %v3679_v1 = vpop.permute.xlu1 %3678  ;;  %v4204_v20 = vpop.xlane.xlu0 %4203 }
 0x5a5   : > { %14547 = vmatprep.subr.msk.bf16.mxu1 %vm3274_vm0, %v3679_v1  ;;  %v3699_v34 = vsel %vm3274_vm0, %v3679_v1, 0 }
 0x5a6   : > { %14363 = vmatpush3.bf16.xpose.msra.mxu1 %v3699_v34  ;;  %v14402_v34 = vpop.f32.mrf.mxu0 }
 0x5a8   : > { %v3653_v38 = vpop.permute.xlu1 %3652 }
 0x5aa   : > { %v16090_v6 = vpop.eup %16089 }
 0x5ab   : > { %v16092_v26 = vpop.eup %16091  ;;  %v3459_v13 = vmul.f32 %v16090_v6, %v17587_v21 }
 0x5ac   : > { %v16094_v9 = vpop.eup %16093  ;;  %v3456_v46 = vmul.f32 %v16092_v26, %v17577_v3  ;;  %v3657_v3 = vpop.permute.xlu1 %3656 }
 0x5ad   : > { %v3458_v30 = vmul.f32 %v16094_v9, %v17571_v19  ;;  %v4226_v9 = vsub.f32 %v17599_v42, %v4204_v20 }
 0x5ae   : > { %v16096_v10 = vpop.eup %16095 }
 0x5af   : > { %v3457_v61 = vmul.f32 %v16096_v10, %v17593_v12  ;;  %v3463_v27 = vpack.c.bf16 %v3459_v13, %v3458_v30 }
 0x5b1   : > { %v3462_v14 = vpack.c.bf16 %v3457_v61, %v3456_v46 }
 0x5b3   : > { %14352 = vmatprep.mubr.msk.bf16.mxu1 %vm3274_vm0, %v3462_v14  ;;  %v4179_v14 = vpop.f32.mrf.mxu0 }
 0x5b4   : > { %14353 = vmatmul.mubr.msk.bf16.gmra.mxu1 %vm3274_vm0, %v3463_v27  ;;  %v4234_v27 = vmul.f32 1.442695, %v4226_v9 }
 0x5b5   : > { %14364 = vmatprep.mubr.msk.bf16.mxu1 %vm3274_vm0, %v3651_v8 }
 0x5b6   : > { %16097 = vpow2.f32 %v4234_v27 }
 0x5bc   : > { %14365 = vmatmul.mubr.msk.bf16.vlgmr.msra.gmra.mxu1 %vm3274_vm0, %v3653_v38  ;;  %v4196_v38 = vsel %vm17497_vm2, %v17589_v59, -1e+30 }
 0x5bd   : > { %14368 = vmatprep.mubr.msk.bf16.mxu1 %vm3274_vm0, %v3655_v37  ;;  %v4195_v37 = vsel %vm17505_vm3, %v4166_v47, -1e+30 }
 0x5c4   : > { %14369 = vmatmul.mubr.msk.bf16.gmra.mxu1 %vm3274_vm0, %v3657_v3  ;;  %v14403_v3 = vpop.f32.mrf.mxu0 }
 0x5c6   : > { %v4182_v59 = vpop.f32.mrf.mxu0 }
 0x637   : > { %v14350_v21 = vpop.f32.mrf.mxu1 }
 0x638   : > { %v13814_v19 = vpack.c.bf16 %v14350_v21, %v14350_v21  ;;  %v4208_v21 = vsel %vm3274_vm0, %v4196_v38, -inf }
 0x639   : > { %v3534_v12 = vpop.f32.mrf.mxu1 }
 0x63a   : > { %3600 = vst.msk [vmem:[#allocation3 + $0x18] sm:$0xf] %vm3597_vm9, %v13814_v19  ;;  %v13812_v40 = vpack.c.bf16 %v3534_v12, %v3534_v12  ;;  %v4205_v19 = vsel %vm3274_vm0, %v4195_v37, -inf  ;;  %v4197_v12 = vsel %vm17512_vm4, %v14399_v50, -1e+30 }
 0x63b   : > { %v14351_v23 = vpop.f32.mrf.mxu1 }
 0x63c   : > { %3598 = vst.msk [vmem:[#allocation3] sm:$0xf] %vm3597_vm9, %v13812_v40  ;;  %v13815_v25 = vpack.c.bf16 %v14351_v23, %v14351_v23  ;;  %v17692_v40 = vsel %vm17521_vm5, %v4179_v14, -1e+30 }
 0x63d   : > { %v3537_v49 = vpop.f32.mrf.mxu1  ;;  %v4214_v23 = vsel %vm3274_vm0, %v17692_v40, -inf }
 0x63e   : > { %3601 = vst.msk [vmem:[#allocation3 + $0x24] sm:$0xf] %vm3597_vm9, %v13815_v25  ;;  %v13813_v7 = vpack.c.bf16 %v3537_v49, %v3537_v49  ;;  %v4211_v25 = vsel %vm3274_vm0, %v4197_v12, -inf  ;;  %v17699_v49 = vsel %vm17528_vm6, %v14402_v34, -1e+30 }
 0x640   : > { %3599 = vst.msk [vmem:[#allocation3 + $0xc] sm:$0xf] %vm3597_vm9, %v13813_v7  ;;  %v17703_v7 = vsel %vm17537_vm7, %v4182_v59, -1e+30 }
 0x674   : > { %v14354_v22 = vpop.f32.mrf.mxu1 }
 0x675   : > { %v13818_v2 = vpack.c.bf16 %v14354_v22, %v14354_v22  ;;  %v4220_v22 = vsel %vm3274_vm0, %v17699_v49, -inf }
 0x676   : > { %v3550_v18 = vpop.f32.mrf.mxu1 }
 0x677   : > { %3604 = vst.msk [vmem:[#allocation3 + $0x48] sm:$0xf] %vm3597_vm9, %v13818_v2  ;;  %v13816_v45 = vpack.c.bf16 %v3550_v18, %v3550_v18  ;;  %v4217_v2 = vsel %vm3274_vm0, %v17703_v7, -inf  ;;  %v17711_v18 = vsel %vm17543_vm8, %v14403_v3, -1e+30 }
 0x678   : > { %v14355_v5 = vpop.f32.mrf.mxu1 }
 0x679   : > { %3602 = vst.msk [vmem:[#allocation3 + $0x30] sm:$0xf] %vm3597_vm9, %v13816_v45  ;;  %v13819_v33 = vpack.c.bf16 %v14355_v5, %v14355_v5  ;;  %v4223_v45 = vsel %vm3274_vm0, %v17711_v18, -inf  ;;  %v17715_v5 = vpop.eup %16097 }
 0x67a   : > { %v3553_v58 = vpop.f32.mrf.mxu1 }
 0x67b   : > { %3605 = vst.msk [vmem:[#allocation3 + $0x54] sm:$0xf] %vm3597_vm9, %v13819_v33  ;;  %v13817_v11 = vpack.c.bf16 %v3553_v58, %v3553_v58  ;;  %v4250_v33 = vsel %vm3274_vm0, %v17715_v5, 0.0  ;;  %v15077_v58 = vld [vmem:[#allocation2 + $0xf0] ss:$36 sps:$4 sm:$0xff]  }
 0x67c   : > { %v14366_v43 = vpop.f32.mrf.mxu1 }
 0x67d   : > { %3603 = vst.msk [vmem:[#allocation3 + $0x3c] sm:$0xf] %vm3597_vm9, %v13817_v11  ;;  %v17640_v35 = vsel %vm17497_vm2, %v14366_v43, -1e+30 }
 0x67e   : > { %v3744_v17 = vpop.f32.mrf.mxu1  ;;  %v3789_v39 = vsel %vm3274_vm0, %v17640_v35, -inf }
 0x67f   : > { %v17646_v48 = vsel %vm17492_vm1, %v3744_v17, -1e+30  ;;  %3790 = vmax.xlane.f32.xlu0 %v3789_v39 }
 0x680   : > { %v14367_v29 = vpop.f32.mrf.mxu1  ;;  %v3783_v32 = vsel %vm3274_vm0, %v17646_v48, -inf }
 0x681   : > { %v17652_v54 = vsel %vm17512_vm4, %v14367_v29, -1e+30 }
 0x682   : > { %v3747_v51 = vpop.f32.mrf.mxu1  ;;  %v3792_v63 = vsel %vm3274_vm0, %v17652_v54, -inf }
 0x683   : > { %3784 = vmax.xlane.f32.xlu0 %v3783_v32  ;;  %v17656_v52 = vsel %vm17505_vm3, %v3747_v51, -1e+30 }
 0x684   : > { %v14370_v56 = vpop.f32.mrf.mxu1  ;;  %v3786_v60 = vsel %vm3274_vm0, %v17656_v52, -inf }
 0x685   : > { %3787 = vmax.xlane.f32.xlu1 %v3786_v60  ;;  %v3781_v1 = vsel %vm17528_vm6, %v14370_v56, -1e+30 }
 0x686   : > { %v3760_v15 = vpop.f32.mrf.mxu1  ;;  %v3801_v13 = vsel %vm3274_vm0, %v3781_v1, -inf }
 0x687   : > { %3793 = vmax.xlane.f32.xlu0 %v3792_v63  ;;  %v3779_v61 = vsel %vm17521_vm5, %v3760_v15, -1e+30 }
 0x688   : > { %v14371_v6 = vpop.f32.mrf.mxu1  ;;  %v3795_v8 = vsel %vm3274_vm0, %v3779_v61, -inf }
 0x689   : > { %v17666_v26 = vsel %vm17543_vm8, %v14371_v6, -1e+30 }
 0x68a   : > { %v3763_v10 = vpop.f32.mrf.mxu1  ;;  %v3804_v46 = vsel %vm3274_vm0, %v17666_v26, -inf }
 0x68b   : > { %3802 = vmax.xlane.f32.xlu0 %v3801_v13  ;;  %3805 = vmax.xlane.f32.xlu1 %v3804_v46  ;;  %v17676_v30 = vsel %vm17537_vm7, %v3763_v10, -1e+30 }
 0x68c   : > { %v3798_v42 = vsel %vm3274_vm0, %v17676_v30, -inf }
 0x68f   : > { %3796 = vmax.xlane.f32.xlu0 %v3795_v8  ;;  %3799 = vmax.xlane.f32.xlu1 %v3798_v42 }
 0x693   : > { %4209 = vmax.xlane.f32.xlu0 %v4208_v21  ;;  %4206 = vmax.xlane.f32.xlu1 %v4205_v19 }
 0x697   : > { %4215 = vmax.xlane.f32.xlu0 %v4214_v23  ;;  %4212 = vmax.xlane.f32.xlu1 %v4211_v25 }
 0x69b   : > { %4221 = vmax.xlane.f32.xlu0 %v4220_v22  ;;  %4218 = vmax.xlane.f32.xlu1 %v4217_v2 }
 0x69f   : > { %4224 = vmax.xlane.f32.xlu1 %v4223_v45 }
 0x6a3   : > { %4251 = vadd.xlane.f32.xlu1 %v4250_v33 }
 0x6b1   : > { %3901 = vrot.lane.b32.xlu0 %v15077_v58, %s16735_s2 }
 0x708   : > { %v3791_v11 = vpop.xlane.xlu0 %3790 }
 0x709   : > { %v3809_v43 = vsub.f32 %v17640_v35, %v3791_v11 }
 0x70b   : > { %v3819_v17 = vmul.f32 1.442695, %v3809_v43 }
 0x70c   : > { %v3785_v39 = vpop.xlane.xlu0 %3784 }
 0x70d   : > { %16099 = vpow2.f32 %v3819_v17  ;;  %v3807_v50 = vsub.f32 %v17646_v48, %v3785_v39 }
 0x70e   : > { %v3788_v51 = vpop.xlane.xlu1 %3787 }
 0x70f   : > { %v3815_v29 = vmul.f32 1.442695, %v3807_v50 }
 0x710   : > { %v3794_v32 = vpop.xlane.xlu0 %3793 }
 0x711   : > { %16101 = vpow2.f32 %v3815_v29  ;;  %v3810_v21 = vsub.f32 %v17652_v54, %v3794_v32 }
 0x713   : > { %v3821_v25 = vmul.f32 1.442695, %v3810_v21 }
 0x714   : > { %v3803_v47 = vpop.xlane.xlu0 %3802  ;;  %v3806_v56 = vpop.xlane.xlu1 %3805 }
 0x715   : > { %v3813_v60 = vsub.f32 %v3781_v1, %v3803_v47  ;;  %v3814_v45 = vsub.f32 %v17666_v26, %v3806_v56  ;;  %v15078_v47 = vld [vmem:[#allocation2 + $0x60] ss:$36 sps:$4 sm:$0xff]  }
 0x717   : > { %v3827_v15 = vmul.f32 1.442695, %v3813_v60 }
 0x718   : > { %v3797_v63 = vpop.xlane.xlu0 %3796  ;;  %v3800_v20 = vpop.xlane.xlu1 %3799 }
 0x719   : > { %16103 = vpow2.f32 %v3827_v15  ;;  %v3811_v34 = vsub.f32 %v3779_v61, %v3797_v63  ;;  %v3812_v58 = vsub.f32 %v17676_v30, %v3800_v20  ;;  %v15079_v15 = vld [vmem:[#allocation2 + $0x18] ss:$36 sps:$4 sm:$0xff]  }
 0x71a   : > { %v17722_v6 = vpop.eup %16099 }
 0x71b   : > { %v3823_v35 = vmul.f32 1.442695, %v3811_v34  ;;  %v3837_v9 = vsel %vm3274_vm0, %v17722_v6, 0.0  ;;  %v3825_v17 = vmul.f32 1.442695, %v3812_v58 }
 0x71c   : > { %3838 = vadd.xlane.f32.xlu0 %v3837_v9  ;;  %v4210_v48 = vpop.xlane.xlu0 %4209  ;;  %v4207_v10 = vpop.xlane.xlu1 %4206 }
 0x71d   : > { %16105 = vpow2.f32 %v3823_v35  ;;  %v4228_v13 = vsub.f32 %v4196_v38, %v4210_v48  ;;  %v4227_v46 = vsub.f32 %v4195_v37, %v4207_v10  ;;  %v3808_v37 = vsub.f32 %v17656_v52, %v3788_v51 }
 0x71e   : > { %v17726_v14 = vpop.eup %16101  ;;  %v3829_v52 = vmul.f32 1.442695, %v3814_v45  ;;  %v15088_v45 = vld [vmem:[#allocation2 + $0xdc] ss:$36 sps:$4 sm:$0xff]  }
 0x71f   : > { %v4236_v1 = vmul.f32 1.442695, %v4227_v46  ;;  %v3831_v27 = vsel %vm3274_vm0, %v17726_v14, 0.0  ;;  %v4238_v8 = vmul.f32 1.442695, %v4228_v13 }
 0x720   : > { %3832 = vadd.xlane.f32.xlu0 %v3831_v27  ;;  %v4216_v61 = vpop.xlane.xlu0 %4215  ;;  %v4213_v42 = vpop.xlane.xlu1 %4212  ;;  %v15080_v27 = vld [vmem:[#allocation2 + $0xa8] ss:$36 sps:$4 sm:$0xff]  }
 0x721   : > { %v4229_v3 = vsub.f32 %v4197_v12, %v4213_v42  ;;  %16107 = vpow2.f32 %v4236_v1  ;;  %v3817_v12 = vmul.f32 1.442695, %v3808_v37  ;;  %v4230_v35 = vsub.f32 %v17692_v40, %v4216_v61  ;;  %v15083_v37 = vld [vmem:[#allocation2 + $0x94] ss:$36 sps:$4 sm:$0xff]  }
 0x722   : > { %16109 = vpow2.f32 %v4238_v8 }
 0x723   : > { %v4240_v19 = vmul.f32 1.442695, %v4229_v3  ;;  %v4242_v9 = vmul.f32 1.442695, %v4230_v35 }
 0x724   : > { %v4222_v59 = vpop.xlane.xlu0 %4221  ;;  %v4219_v34 = vpop.xlane.xlu1 %4218 }
 0x725   : > { %16111 = vpow2.f32 %v4240_v19  ;;  %v4232_v48 = vsub.f32 %v17699_v49, %v4222_v59  ;;  %v4231_v49 = vsub.f32 %v17703_v7, %v4219_v34  ;;  %v15081_v7 = vld [vmem:[#allocation2 + $0xe8] ss:$36 sps:$4 sm:$0xff]  }
 0x726   : > { %v17731_v23 = vpop.eup %16103  ;;  %16113 = vpow2.f32 %v3821_v25  ;;  %v15084_v25 = vld [vmem:[#allocation2 + $0xa0] ss:$36 sps:$4 sm:$0xff]  }
 0x727   : > { %v3849_v38 = vsel %vm3274_vm0, %v17731_v23, 0.0  ;;  %16115 = vpow2.f32 %v3817_v12  ;;  %v4246_v13 = vmul.f32 1.442695, %v4232_v48  ;;  %v4244_v3 = vmul.f32 1.442695, %v4231_v49 }
 0x728   : > { %3850 = vadd.xlane.f32.xlu0 %v3849_v38  ;;  %v3902_v22 = vpop.permute.xlu0 %3901  ;;  %16117 = vpow2.f32 %v3829_v52  ;;  %v4225_v10 = vpop.xlane.xlu1 %4224  ;;  %v15082_v38 = vld [vmem:[#allocation2 + $0x4] ss:$36 sps:$4 sm:$0xff]   ;;  %v15087_v12 = vld [vmem:[#allocation2 + $0x4c] ss:$36 sps:$4 sm:$0xff]  }
 0x729   : > { %14372 = vmatprep.subr.bf16.mxu1 %v3902_v22  ;;  %16119 = vpow2.f32 %v3825_v17  ;;  %v4233_v46 = vsub.f32 %v17711_v18, %v4225_v10 }
 0x72a   : > { %v17736_v2 = vpop.eup %16105  ;;  %14373 = vmatpush3.bf16.msra.mxu1 %v3902_v22  ;;  %16121 = vpow2.f32 %v4242_v9  ;;  %v15085_v22 = vld [vmem:[#allocation2 + $0x58] ss:$36 sps:$4 sm:$0xff]  }
 0x72b   : > { %v3843_v54 = vsel %vm3274_vm0, %v17736_v2, 0.0  ;;  %16123 = vpow2.f32 %v4246_v13  ;;  %v4248_v1 = vmul.f32 1.442695, %v4233_v46 }
 0x72c   : > { %3844 = vadd.xlane.f32.xlu0 %v3843_v54  ;;  %v15086_v54 = vld [vmem:[#allocation2 + $0x10] ss:$36 sps:$4 sm:$0xff]   ;;  %v4252_v52 = vpop.xlane.xlu1 %4251 }
 0x72d   : > { %16125 = vpow2.f32 %v4248_v1 }
 0x72e   : > { %v17741_v33 = vpop.eup %16107  ;;  %16127 = vpow2.f32 %v4244_v3 }
 0x72f   : > { %v4253_v11 = vsel %vm3274_vm0, %v17741_v33, 0.0  ;;  %v17746_v43 = vpop.eup %16109 }
 0x730   : > { %4254 = vadd.xlane.f32.xlu1 %v4253_v11  ;;  %v4256_v39 = vsel %vm3274_vm0, %v17746_v43, 0.0 }
 0x732   : > { %v17750_v50 = vpop.eup %16111 }
 0x733   : > { %v4259_v26 = vsel %vm3274_vm0, %v17750_v50, 0.0  ;;  %v17754_v29 = vpop.eup %16113 }
 0x734   : > { %4257 = vadd.xlane.f32.xlu1 %v4256_v39  ;;  %v3840_v30 = vsel %vm3274_vm0, %v17754_v29, 0.0  ;;  %v17758_v51 = vpop.eup %16115 }
 0x735   : > { %v3834_v32 = vsel %vm3274_vm0, %v17758_v51, 0.0  ;;  %v17762_v56 = vpop.eup %16117 }
 0x736   : > { %v3852_v60 = vsel %vm3274_vm0, %v17762_v56, 0.0  ;;  %v17767_v63 = vpop.eup %16119 }
 0x737   : > { %v3846_v20 = vsel %vm3274_vm0, %v17767_v63, 0.0  ;;  %v17776_v8 = vpop.eup %16121 }
 0x738   : > { %4260 = vadd.xlane.f32.xlu1 %v4259_v26  ;;  %v4262_v42 = vsel %vm3274_vm0, %v17776_v8, 0.0  ;;  %v17780_v40 = vpop.eup %16123 }
 0x739   : > { %v4268_v61 = vsel %vm3274_vm0, %v17780_v40, 0.0 }
 0x73a   : > { %v17785_v18 = vpop.eup %16125 }
 0x73b   : > { %v4271_v21 = vsel %vm3274_vm0, %v17785_v18, 0.0  ;;  %v17789_v19 = vpop.eup %16127 }
 0x73c   : > { %3841 = vadd.xlane.f32.xlu1 %v3840_v30  ;;  %v4265_v59 = vsel %vm3274_vm0, %v17789_v19, 0.0 }
 0x740   : > { %3835 = vadd.xlane.f32.xlu1 %v3834_v32 }
 0x742   : > { %3897 = vrot.lane.b32.xlu0 %v15078_v47, %s16735_s2 }
 0x744   : > { %3853 = vadd.xlane.f32.xlu1 %v3852_v60 }
 0x746   : > { %3895 = vrot.lane.b32.xlu0 %v15079_v15, %s16735_s2 }
 0x748   : > { %3847 = vadd.xlane.f32.xlu1 %v3846_v20 }
 0x759   : > { %3899 = vrot.lane.b32.xlu1 %v15080_v27, %s16735_s2 }
 0x765   : > { %4263 = vadd.xlane.f32.xlu0 %v4262_v42 }
 0x769   : > { %4269 = vadd.xlane.f32.xlu0 %v4268_v61 }
 0x76d   : > { %4272 = vadd.xlane.f32.xlu0 %v4271_v21  ;;  %v15089_v21 = vld [vmem:[#allocation2 + $0xf4] ss:$36 sps:$4 sm:$0xff]  }
 0x77d   : > { %4266 = vadd.xlane.f32.xlu1 %v4265_v59 }
 0x783   : > { %4513 = vrot.lane.b32.xlu0 %v15081_v7, %s16735_s2 }
 0x787   : > { %4479 = vrot.lane.b32.xlu0 %v15082_v38, %s16735_s2 }
 0x78b   : > { %4483 = vrot.lane.b32.xlu0 %v15083_v37, %s16735_s2 }
 0x78e   : > { %4511 = vrot.lane.b32.xlu1 %v15084_v25, %s16735_s2  ;;  %v15090_v25 = vld [vmem:[#allocation2 + $0xac] ss:$36 sps:$4 sm:$0xff]  }
 0x792   : > { %4509 = vrot.lane.b32.xlu1 %v15085_v22, %s16735_s2 }
 0x796   : > { %4507 = vrot.lane.b32.xlu1 %v15086_v54, %s16735_s2 }
 0x79a   : > { %4481 = vrot.lane.b32.xlu1 %v15087_v12, %s16735_s2 }
 0x79e   : > { %4485 = vrot.lane.b32.xlu1 %v15088_v45, %s16735_s2  ;;  %v15091_v45 = vld [vmem:[#allocation2 + $0x64] ss:$36 sps:$4 sm:$0xff]  }
 0x7a5   : > { %v3839_v11 = vpop.xlane.xlu0 %3838 }
 0x7a9   : > { %v3833_v26 = vpop.xlane.xlu0 %3832 }
 0x7aa   : > { %16129 = vrcp.f32 %v3833_v26 }
 0x7b1   : > { %v3851_v32 = vpop.xlane.xlu0 %3850 }
 0x7b5   : > { %v3845_v60 = vpop.xlane.xlu0 %3844 }
 0x7b7   : > { %v16130_v34 = vpop.eup %16129 }
 0x7b8   : > { %v3863_v10 = vmul.f32 %v16130_v34, %v17726_v14 }
 0x7b9   : > { %v4255_v58 = vpop.xlane.xlu1 %4254  ;;  %v3898_v35 = vpop.permute.xlu0 %3897 }
 0x7bd   : > { %v4258_v17 = vpop.xlane.xlu1 %4257  ;;  %v3896_v42 = vpop.permute.xlu0 %3895 }
 0x7c1   : > { %v4261_v39 = vpop.xlane.xlu1 %4260 }
 0x7c5   : > { %v3842_v30 = vpop.xlane.xlu1 %3841 }
 0x7c9   : > { %v3836_v47 = vpop.xlane.xlu1 %3835 }
 0x7ca   : > { %16131 = vrcp.f32 %v3836_v47 }
 0x7cb   : > { %16133 = vrcp.f32 %v3842_v30 }
 0x7cc   : > { %16135 = vrcp.f32 %v3839_v11 }
 0x7cd   : > { %v3854_v15 = vpop.xlane.xlu1 %3853  ;;  %16137 = vrcp.f32 %v3845_v60 }
 0x7d1   : > { %v3848_v20 = vpop.xlane.xlu1 %3847 }
 0x7d2   : > { %16139 = vrcp.f32 %v3848_v20 }
 0x7d3   : > { %16141 = vrcp.f32 %v3854_v15 }
 0x7d4   : > { %16143 = vrcp.f32 %v4255_v58 }
 0x7d5   : > { %v3900_v9 = vpop.permute.xlu1 %3899  ;;  %16145 = vrcp.f32 %v3851_v32 }
 0x7d6   : > { %14374 = vmatprep.subr.bf16.mxu1 %v3900_v9  ;;  %16147 = vrcp.f32 %v4252_v52 }
 0x7d7   : > { %v16132_v48 = vpop.eup %16131  ;;  %14375 = vmatpush3.bf16.msra.mxu1 %v3900_v9  ;;  %16149 = vrcp.f32 %v4261_v39 }
 0x7d8   : > { %14376 = vmatprep.subr.bf16.mxu1 %v3898_v35  ;;  %v3864_v13 = vmul.f32 %v16132_v48, %v17758_v51  ;;  %v16134_v46 = vpop.eup %16133  ;;  %16151 = vrcp.f32 %v4258_v17  ;;  %v15092_v17 = vld [vmem:[#allocation2 + $0x1c] ss:$36 sps:$4 sm:$0xff]  }
 0x7d9   : > { %v16136_v27 = vpop.eup %16135  ;;  %v3866_v49 = vmul.f32 %v16134_v46, %v17754_v29 }
 0x7da   : > { %v3871_v1 = vpack.c.bf16 %v3864_v13, %v3863_v10  ;;  %v16138_v61 = vpop.eup %16137  ;;  %v3865_v3 = vmul.f32 %v16136_v27, %v17722_v6 }
 0x7db   : > { %14377 = vmatpush3.bf16.msra.mxu1 %v3898_v35  ;;  %v3867_v51 = vmul.f32 %v16138_v61, %v17736_v2 }
 0x7dc   : > { %14378 = vmatprep.subr.bf16.mxu1 %v3896_v42  ;;  %14380 = vmatprep.mubr.msk.bf16.mxu1 %vm3274_vm0, %v3871_v1  ;;  %v3872_v14 = vpack.c.bf16 %v3866_v49, %v3865_v3 }
 0x7df   : > { %v16140_v59 = vpop.eup %16139  ;;  %14379 = vmatpush3.bf16.msra.mxu1 %v3896_v42 }
 0x7e0   : > { %14404 = vmatprep.subr.bf16.mxu1 %v15089_v21  ;;  %v3868_v7 = vmul.f32 %v16140_v59, %v17767_v63  ;;  %v16142_v38 = vpop.eup %16141 }
 0x7e1   : > { %v16144_v37 = vpop.eup %16143  ;;  %v3870_v6 = vmul.f32 %v16142_v38, %v17762_v56 }
 0x7e2   : > { %14381 = vmatmul.mubr.msk.bf16.vlgmr.msra.gmra.mxu1 %vm3274_vm0, %v3872_v14  ;;  %v3873_v29 = vpack.c.bf16 %v3868_v7, %v3867_v51  ;;  %v16146_v22 = vpop.eup %16145  ;;  %v4283_v12 = vmul.f32 %v16144_v37, %v17741_v33  ;;  %v15096_v14 = vld [vmem:[#allocation2 + $0x20] ss:$36 sps:$4 sm:$0xff]  }
 0x7e3   : > { %14405 = vmatpush3.bf16.msra.mxu1 %v15089_v21  ;;  %v16148_v54 = vpop.eup %16147  ;;  %v3869_v2 = vmul.f32 %v16146_v22, %v17731_v23 }
 0x7e4   : > { %14384 = vmatprep.mubr.msk.bf16.mxu1 %vm3274_vm0, %v3873_v29  ;;  %14406 = vmatprep.subr.bf16.mxu1 %v15090_v25  ;;  %v4282_v63 = vmul.f32 %v16148_v54, %v17715_v5  ;;  %v16150_v58 = vpop.eup %16149 }
 0x7e5   : > { %v3874_v52 = vpack.c.bf16 %v3870_v6, %v3869_v2  ;;  %v16152_v39 = vpop.eup %16151  ;;  %v4285_v56 = vmul.f32 %v16150_v58, %v17750_v50 }
 0x7e6   : > { %v4290_v11 = vpack.c.bf16 %v4283_v12, %v4282_v63  ;;  %v4284_v23 = vmul.f32 %v16152_v39, %v17746_v43 }
 0x7e7   : > { %14407 = vmatpush3.bf16.msra.mxu1 %v15090_v25 }
 0x7e8   : > { %14408 = vmatprep.subr.bf16.mxu1 %v15091_v45  ;;  %v4291_v26 = vpack.c.bf16 %v4285_v56, %v4284_v23 }
 0x7ea   : > { %14385 = vmatmul.mubr.msk.bf16.gmra.mxu1 %vm3274_vm0, %v3874_v52 }
 0x7eb   : > { %14409 = vmatpush3.bf16.msra.mxu1 %v15091_v45  ;;  %14412 = vmatprep.mubr.msk.bf16.mxu1 %vm3274_vm0, %v4290_v11 }
 0x7ec   : > { %14410 = vmatprep.subr.bf16.mxu1 %v15092_v17 }
 0x7ee   : > { %v4264_v33 = vpop.xlane.xlu0 %4263 }
 0x7ef   : > { %14411 = vmatpush3.bf16.msra.mxu1 %v15092_v17 }
 0x7f2   : > { %v4270_v5 = vpop.xlane.xlu0 %4269  ;;  %14413 = vmatmul.mubr.msk.bf16.vlgmr.msra.gmra.mxu1 %vm3274_vm0, %v4291_v26 }
 0x7f6   : > { %v4273_v30 = vpop.xlane.xlu0 %4272 }
 0x7f7   : > { %16153 = vrcp.f32 %v4273_v30 }
 0x7f8   : > { %16155 = vrcp.f32 %v4264_v33 }
 0x7f9   : > { %16157 = vrcp.f32 %v4270_v5 }
 0x7fa   : > { %v4514_v32 = vpop.permute.xlu0 %4513 }
 0x7fb   : > { %14552 = vmatprep.subr.msk.bf16.mxu1 %vm3274_vm0, %v4514_v32  ;;  %v4537_v47 = vsel %vm3274_vm0, %v4514_v32, 0 }
 0x7fc   : > { %14421 = vmatpush3.bf16.xpose.msra.mxu1 %v4537_v47 }
 0x7fe   : > { %v4480_v61 = vpop.permute.xlu0 %4479 }
 0x804   : > { %v16154_v20 = vpop.eup %16153 }
 0x805   : > { %v16156_v34 = vpop.eup %16155  ;;  %v4289_v13 = vmul.f32 %v16154_v20, %v17785_v18  ;;  %v15093_v18 = vld [vmem:[#allocation2 + $0xf8] ss:$36 sps:$4 sm:$0xff]  }
 0x806   : > { %v4267_v50 = vpop.xlane.xlu1 %4266  ;;  %v16158_v35 = vpop.eup %16157  ;;  %v4286_v46 = vmul.f32 %v16156_v34, %v17776_v8 }
 0x807   : > { %16159 = vrcp.f32 %v4267_v50  ;;  %v4288_v27 = vmul.f32 %v16158_v35, %v17780_v40  ;;  %v4484_v8 = vpop.permute.xlu0 %4483  ;;  %v15095_v40 = vld [vmem:[#allocation2 + $0x68] ss:$36 sps:$4 sm:$0xff]  }
 0x809   : > { %v4293_v49 = vpack.c.bf16 %v4289_v13, %v4288_v27 }
 0x80a   : > { %v4512_v60 = vpop.permute.xlu1 %4511 }
 0x80b   : > { %14553 = vmatprep.subr.msk.bf16.mxu1 %vm3274_vm0, %v4512_v60  ;;  %v4534_v43 = vsel %vm3274_vm0, %v4512_v60, 0 }
 0x80c   : > { %14423 = vmatpush3.bf16.xpose.msra.mxu1 %v4534_v43 }
 0x80e   : > { %v4510_v15 = vpop.permute.xlu1 %4509 }
 0x80f   : > { %14554 = vmatprep.subr.msk.bf16.mxu1 %vm3274_vm0, %v4510_v15  ;;  %v4531_v9 = vsel %vm3274_vm0, %v4510_v15, 0 }
 0x812   : > { %v4508_v10 = vpop.permute.xlu1 %4507 }
 0x813   : > { %v4528_v3 = vsel %vm3274_vm0, %v4508_v10, 0 }
 0x814   : > { %v16160_v48 = vpop.eup %16159  ;;  %14425 = vmatpush3.bf16.xpose.msra.mxu1 %v4531_v9 }
 0x815   : > { %14555 = vmatprep.subr.msk.bf16.mxu1 %vm3274_vm0, %v4508_v10  ;;  %v4287_v1 = vmul.f32 %v16160_v48, %v17789_v19  ;;  %v15094_v19 = vld [vmem:[#allocation2 + $0xb0] ss:$36 sps:$4 sm:$0xff]  }
 0x816   : > { %v4482_v21 = vpop.permute.xlu1 %4481 }
 0x817   : > { %v4292_v42 = vpack.c.bf16 %v4287_v1, %v4286_v46 }
 0x819   : > { %14416 = vmatprep.mubr.msk.bf16.mxu1 %vm3274_vm0, %v4292_v42 }
 0x81a   : > { %14417 = vmatmul.mubr.msk.bf16.gmra.mxu1 %vm3274_vm0, %v4293_v49  ;;  %v4486_v59 = vpop.permute.xlu1 %4485 }
 0x81b   : > { %14428 = vmatprep.mubr.msk.bf16.mxu1 %vm3274_vm0, %v4480_v61 }
 0x81c   : > { %14427 = vmatpush3.bf16.xpose.msra.mxu1 %v4528_v3 }
 0x81d   : > { %14468 = vmatprep.subr.bf16.mxu1 %v15093_v18 }
 0x823   : > { %14429 = vmatmul.mubr.msk.bf16.vlgmr.msra.gmra.mxu1 %vm3274_vm0, %v4482_v21 }
 0x824   : > { %14432 = vmatprep.mubr.msk.bf16.mxu1 %vm3274_vm0, %v4484_v8  ;;  %14469 = vmatpush3.bf16.msra.mxu1 %v15093_v18 }
 0x825   : > { %14470 = vmatprep.subr.bf16.mxu1 %v15094_v19 }
 0x828   : > { %14471 = vmatpush3.bf16.msra.mxu1 %v15094_v19 }
 0x829   : > { %14472 = vmatprep.subr.bf16.mxu1 %v15095_v40 }
 0x82b   : > { %14433 = vmatmul.mubr.msk.bf16.gmra.mxu1 %vm3274_vm0, %v4486_v59  ;;  %v15098_v59 = vld [vmem:[#allocation2 + $0x64] ss:$36 sps:$4 sm:$0xff]  }
 0x82c   : > { %14473 = vmatpush3.bf16.msra.mxu1 %v15095_v40  ;;  %v15097_v40 = vld [vmem:[#allocation2 + $0xac] ss:$36 sps:$4 sm:$0xff]  }
 0x82d   : > { %14474 = vmatprep.subr.bf16.mxu1 %v15096_v14 }
 0x830   : > { %14475 = vmatpush3.bf16.msra.mxu1 %v15096_v14 }
 0x8a2   : > { %v17837_v51 = vpop.f32.mrf.mxu1 }
 0x8a4   : > { %v17839_v7 = vpop.f32.mrf.mxu1 }
 0x8a6   : > { %v17841_v38 = vpop.f32.mrf.mxu1 }
 0x8a8   : > { %v17843_v37 = vpop.f32.mrf.mxu1 }
 0x8aa   : > { %v17845_v29 = vpop.f32.mrf.mxu1 }
 0x8ac   : > { %v17847_v25 = vpop.f32.mrf.mxu1 }
 0x8ae   : > { %v17849_v22 = vpop.f32.mrf.mxu1 }
 0x8b0   : > { %v17851_v54 = vpop.f32.mrf.mxu1 }
 0x8b2   : > { %v14414_v6 = vpop.f32.mrf.mxu1 }
 0x8b3   : > { %v13830_v12 = vpack.c.bf16 %v14414_v6, %v14414_v6 }
 0x8b4   : > { %v4364_v45 = vpop.f32.mrf.mxu1 }
 0x8b5   : > { %4429 = vst.msk [vmem:[#allocation3 + $0x1c] sm:$0xf] %vm3597_vm9, %v13830_v12  ;;  %v13828_v2 = vpack.c.bf16 %v4364_v45, %v4364_v45 }
 0x8b6   : > { %v14415_v63 = vpop.f32.mrf.mxu1 }
 0x8b7   : > { %4427 = vst.msk [vmem:[#allocation3 + $0x4] sm:$0xf] %vm3597_vm9, %v13828_v2  ;;  %v13831_v52 = vpack.c.bf16 %v14415_v63, %v14415_v63 }
 0x8b8   : > { %v4367_v58 = vpop.f32.mrf.mxu1 }
 0x8b9   : > { %4430 = vst.msk [vmem:[#allocation3 + $0x28] sm:$0xf] %vm3597_vm9, %v13831_v52  ;;  %v13829_v11 = vpack.c.bf16 %v4367_v58, %v4367_v58 }
 0x8bb   : > { %4428 = vst.msk [vmem:[#allocation3 + $0x10] sm:$0xf] %vm3597_vm9, %v13829_v11 }
 0x8da   : > { %v14418_v17 = vpop.f32.mrf.mxu1 }
 0x8db   : > { %v13834_v39 = vpack.c.bf16 %v14418_v17, %v14418_v17 }
 0x8dc   : > { %v4380_v56 = vpop.f32.mrf.mxu1 }
 0x8dd   : > { %4433 = vst.msk [vmem:[#allocation3 + $0x4c] sm:$0xf] %vm3597_vm9, %v13834_v39  ;;  %v13832_v33 = vpack.c.bf16 %v4380_v56, %v4380_v56 }
 0x8de   : > { %v14419_v23 = vpop.f32.mrf.mxu1 }
 0x8df   : > { %4431 = vst.msk [vmem:[#allocation3 + $0x34] sm:$0xf] %vm3597_vm9, %v13832_v33  ;;  %v13835_v26 = vpack.c.bf16 %v14419_v23, %v14419_v23 }
 0x8e0   : > { %v4383_v5 = vpop.f32.mrf.mxu1 }
 0x8e1   : > { %4434 = vst.msk [vmem:[#allocation3 + $0x58] sm:$0xf] %vm3597_vm9, %v13835_v26  ;;  %v13833_v30 = vpack.c.bf16 %v4383_v5, %v4383_v5 }
 0x8e3   : > { %4432 = vst.msk [vmem:[#allocation3 + $0x40] sm:$0xf] %vm3597_vm9, %v13833_v30  ;;  %v14430_v32 = vpop.f32.mrf.mxu1 }
 0x8e4   : > { %v4606_v15 = vsel %vm17497_vm2, %v14430_v32, -1e+30 }
 0x8e5   : > { %v4573_v47 = vpop.f32.mrf.mxu1  ;;  %v4618_v9 = vsel %vm3274_vm0, %v4606_v15, -inf }
 0x8e6   : > { %v4604_v50 = vsel %vm17492_vm1, %v4573_v47, -1e+30 }
 0x8e7   : > { %v14431_v60 = vpop.f32.mrf.mxu1  ;;  %v4612_v43 = vsel %vm3274_vm0, %v4604_v50, -inf }
 0x8e8   : > { %4613 = vmax.xlane.f32.xlu0 %v4612_v43  ;;  %v4607_v10 = vsel %vm17512_vm4, %v14431_v60, -1e+30 }
 0x8e9   : > { %v4576_v20 = vpop.f32.mrf.mxu1  ;;  %v4621_v1 = vsel %vm3274_vm0, %v4607_v10, -inf }
 0x8ea   : > { %v4605_v34 = vsel %vm17505_vm3, %v4576_v20, -1e+30 }
 0x8eb   : > { %v14434_v35 = vpop.f32.mrf.mxu1  ;;  %v4615_v48 = vsel %vm3274_vm0, %v4605_v34, -inf }
 0x8ec   : > { %4619 = vmax.xlane.f32.xlu0 %v4618_v9  ;;  %4616 = vmax.xlane.f32.xlu1 %v4615_v48  ;;  %v4610_v21 = vsel %vm17528_vm6, %v14434_v35, -1e+30  ;;  %v15099_v35 = vld [vmem:[#allocation2 + $0xf4] ss:$36 sps:$4 sm:$0xff]   ;;  %v15100_v48 = vld [vmem:[#allocation2 + $0x1c] ss:$36 sps:$4 sm:$0xff]  }
 0x8ed   : > { %v4589_v13 = vpop.f32.mrf.mxu1  ;;  %v4630_v19 = vsel %vm3274_vm0, %v4610_v21, -inf }
 0x8ee   : > { %v4608_v27 = vsel %vm17521_vm5, %v4589_v13, -1e+30 }
 0x8ef   : > { %v14435_v46 = vpop.f32.mrf.mxu1  ;;  %v4624_v18 = vsel %vm3274_vm0, %v4608_v27, -inf }
 0x8f0   : > { %v17877_v42 = vsel %vm17543_vm8, %v14435_v46, -1e+30  ;;  %4622 = vmax.xlane.f32.xlu0 %v4621_v1 }
 0x8f1   : > { %v4592_v49 = vpop.f32.mrf.mxu1  ;;  %v4633_v61 = vsel %vm3274_vm0, %v17877_v42, -inf }
 0x8f2   : > { %4634 = vmax.xlane.f32.xlu1 %v4633_v61  ;;  %v4609_v3 = vsel %vm17537_vm7, %v4592_v49, -1e+30 }
 0x8f3   : > { %v4627_v8 = vsel %vm3274_vm0, %v4609_v3, -inf }
 0x8f4   : > { %4625 = vmax.xlane.f32.xlu0 %v4624_v18 }
 0x8f6   : > { %4628 = vmax.xlane.f32.xlu1 %v4627_v8 }
 0x8f8   : > { %4631 = vmax.xlane.f32.xlu0 %v4630_v19 }
 0x907   : > { %4728 = vrot.lane.b32.xlu1 %v15097_v40, %s16735_s2 }
 0x90b   : > { %4726 = vrot.lane.b32.xlu1 %v15098_v59, %s16735_s2 }
 0x971   : > { %v4614_v14 = vpop.xlane.xlu0 %4613 }
 0x972   : > { %v4636_v6 = vsub.f32 %v4604_v50, %v4614_v14 }
 0x974   : > { %v4644_v63 = vmul.f32 1.442695, %v4636_v6 }
 0x975   : > { %v4620_v12 = vpop.xlane.xlu0 %4619  ;;  %v4617_v45 = vpop.xlane.xlu1 %4616 }
 0x976   : > { %v4638_v2 = vsub.f32 %v4606_v15, %v4620_v12  ;;  %v4637_v58 = vsub.f32 %v4605_v34, %v4617_v45 }
 0x978   : > { %v4648_v52 = vmul.f32 1.442695, %v4638_v2  ;;  %v4646_v39 = vmul.f32 1.442695, %v4637_v58 }
 0x979   : > { %v4623_v11 = vpop.xlane.xlu0 %4622 }
 0x97a   : > { %16161 = vpow2.f32 %v4648_v52  ;;  %v4639_v17 = vsub.f32 %v4607_v10, %v4623_v11 }
 0x97b   : > { %16163 = vpow2.f32 %v4644_v63  ;;  %v4635_v9 = vpop.xlane.xlu1 %4634 }
 0x97c   : > { %v4650_v56 = vmul.f32 1.442695, %v4639_v17  ;;  %v4643_v49 = vsub.f32 %v17877_v42, %v4635_v9  ;;  %v15103_v9 = vld [vmem:[#allocation2 + $0x5c] ss:$36 sps:$4 sm:$0xff]  }
 0x97d   : > { %v4626_v33 = vpop.xlane.xlu0 %4625 }
 0x97e   : > { %16165 = vpow2.f32 %v4650_v56  ;;  %v4640_v23 = vsub.f32 %v4608_v27, %v4626_v33  ;;  %v4658_v18 = vmul.f32 1.442695, %v4643_v49  ;;  %v15101_v56 = vld [vmem:[#allocation2 + $0xec] ss:$36 sps:$4 sm:$0xff]  }
 0x97f   : > { %16167 = vpow2.f32 %v4646_v39  ;;  %v4629_v46 = vpop.xlane.xlu1 %4628 }
 0x980   : > { %v4652_v26 = vmul.f32 1.442695, %v4640_v23  ;;  %v4641_v1 = vsub.f32 %v4609_v3, %v4629_v46 }
 0x981   : > { %v4632_v10 = vpop.xlane.xlu0 %4631 }
 0x982   : > { %16169 = vpow2.f32 %v4652_v26  ;;  %v4642_v13 = vsub.f32 %v4610_v21, %v4632_v10  ;;  %v4654_v61 = vmul.f32 1.442695, %v4641_v1 }
 0x983   : > { %v4729_v59 = vpop.permute.xlu1 %4728 }
 0x984   : > { %v4656_v27 = vmul.f32 1.442695, %v4642_v13 }
 0x986   : > { %16171 = vpow2.f32 %v4656_v27 }
 0x987   : > { %v17890_v5 = vpop.eup %16161  ;;  %16173 = vpow2.f32 %v4654_v61  ;;  %v4727_v14 = vpop.permute.xlu1 %4726 }
 0x988   : > { %v4666_v30 = vsel %vm3274_vm0, %v17890_v5, 0.0  ;;  %v17894_v32 = vpop.eup %16163  ;;  %16175 = vpow2.f32 %v4658_v18 }
 0x989   : > { %4667 = vadd.xlane.f32.xlu0 %v4666_v30  ;;  %v4660_v50 = vsel %vm3274_vm0, %v17894_v32, 0.0 }
 0x98b   : > { %v16166_v47 = vpop.eup %16165 }
 0x98c   : > { %v4669_v60 = vsel %vm3274_vm0, %v16166_v47, 0.0  ;;  %v16168_v43 = vpop.eup %16167 }
 0x98d   : > { %4661 = vadd.xlane.f32.xlu0 %v4660_v50  ;;  %4670 = vadd.xlane.f32.xlu1 %v4669_v60  ;;  %v4663_v15 = vsel %vm3274_vm0, %v16168_v43, 0.0 }
 0x98f   : > { %v17900_v20 = vpop.eup %16169 }
 0x990   : > { %v4672_v34 = vsel %vm3274_vm0, %v17900_v20, 0.0 }
 0x991   : > { %4664 = vadd.xlane.f32.xlu1 %v4663_v15 }
 0x993   : > { %v17907_v8 = vpop.eup %16171 }
 0x994   : > { %v4678_v19 = vsel %vm3274_vm0, %v17907_v8, 0.0  ;;  %v17911_v40 = vpop.eup %16173 }
 0x995   : > { %4673 = vadd.xlane.f32.xlu1 %v4672_v34  ;;  %v4675_v21 = vsel %vm3274_vm0, %v17911_v40, 0.0  ;;  %v17915_v3 = vpop.eup %16175  ;;  %v4955_v34 = vsel %vm3274_vm0, %v15101_v56, 0 }
 0x996   : > { %v4681_v42 = vsel %vm3274_vm0, %v17915_v3, 0.0 }
 0x9a3   : > { %4730 = vrot.lane.b32.xlu0 %v15099_v35, %s16735_s2  ;;  %v15102_v35 = vld [vmem:[#allocation2 + $0xa4] ss:$36 sps:$4 sm:$0xff]  }
 0x9a6   : > { %4724 = vrot.lane.b32.xlu1 %v15100_v48, %s16735_s2 }
 0x9c2   : > { %4679 = vadd.xlane.f32.xlu0 %v4678_v19 }
 0x9c6   : > { %4676 = vadd.xlane.f32.xlu0 %v4675_v21 }
 0x9ca   : > { %4682 = vadd.xlane.f32.xlu0 %v4681_v42 }
 0xa12   : > { %v4668_v6 = vpop.xlane.xlu0 %4667 }
 0xa16   : > { %v4662_v12 = vpop.xlane.xlu0 %4661  ;;  %v4671_v45 = vpop.xlane.xlu1 %4670 }
 0xa17   : > { %16177 = vrcp.f32 %v4671_v45 }
 0xa18   : > { %16179 = vrcp.f32 %v4662_v12  ;;  %v15107_v12 = vld [vmem:[#allocation2 + $0x98] ss:$36 sps:$4 sm:$0xff]  }
 0xa19   : > { %16181 = vrcp.f32 %v4668_v6  ;;  %v15106_v6 = vld [vmem:[#allocation2 + $0x50] ss:$36 sps:$4 sm:$0xff]  }
 0xa1a   : > { %v4731_v2 = vpop.permute.xlu0 %4730  ;;  %v4665_v63 = vpop.xlane.xlu1 %4664 }
 0xa1b   : > { %16183 = vrcp.f32 %v4665_v63  ;;  %14436 = vmatprep.subr.bf16.mxu0 %v4731_v2 }
 0xa1c   : > { %14437 = vmatpush3.bf16.msra.mxu0 %v4731_v2 }
 0xa1d   : > { %14438 = vmatprep.subr.bf16.mxu0 %v4729_v59 }
 0xa1e   : > { %v4674_v52 = vpop.xlane.xlu1 %4673 }
 0xa1f   : > { %16185 = vrcp.f32 %v4674_v52 }
 0xa20   : > { %14439 = vmatpush3.bf16.msra.mxu0 %v4729_v59 }
 0xa21   : > { %14440 = vmatprep.subr.bf16.mxu0 %v4727_v14 }
 0xa22   : > { %v4725_v58 = vpop.permute.xlu1 %4724 }
 0xa24   : > { %14441 = vmatpush3.bf16.msra.mxu0 %v4727_v14  ;;  %v16178_v11 = vpop.eup %16177  ;;  %v15105_v14 = vld [vmem:[#allocation2 + $0x8] ss:$36 sps:$4 sm:$0xff]  }
 0xa25   : > { %14442 = vmatprep.subr.bf16.mxu0 %v4725_v58  ;;  %v16180_v17 = vpop.eup %16179  ;;  %v4695_v23 = vmul.f32 %v16178_v11, %v16166_v47  ;;  %v4952_v47 = vsel %vm3274_vm0, %v15102_v35, 0 }
 0xa26   : > { %v16182_v39 = vpop.eup %16181  ;;  %v4692_v26 = vmul.f32 %v16180_v17, %v17894_v32  ;;  %v15104_v32 = vld [vmem:[#allocation2 + $0x14] ss:$36 sps:$4 sm:$0xff]  }
 0xa27   : > { %v4694_v50 = vmul.f32 %v16182_v39, %v17890_v5  ;;  %v4949_v5 = vsel %vm3274_vm0, %v15103_v9, 0 }
 0xa28   : > { %v16184_v33 = vpop.eup %16183  ;;  %14443 = vmatpush3.bf16.msra.mxu0 %v4725_v58 }
 0xa29   : > { %14556 = vmatprep.subr.msk.bf16.mxu0 %vm3274_vm0, %v15101_v56  ;;  %v4693_v30 = vmul.f32 %v16184_v33, %v16168_v43  ;;  %v4701_v15 = vpack.c.bf16 %v4695_v23, %v4694_v50  ;;  %v4946_v43 = vsel %vm3274_vm0, %v15104_v32, 0 }
 0xa2b   : > { %v4700_v60 = vpack.c.bf16 %v4693_v30, %v4692_v26 }
 0xa2c   : > { %v16186_v46 = vpop.eup %16185 }
 0xa2d   : > { %14444 = vmatprep.mubr.msk.bf16.mxu0 %vm3274_vm0, %v4700_v60  ;;  %v4696_v27 = vmul.f32 %v16186_v46, %v17900_v20  ;;  %v15108_v20 = vld [vmem:[#allocation2 + $0xe0] ss:$36 sps:$4 sm:$0xff]  }
 0xa2e   : > { %14445 = vmatmul.mubr.msk.bf16.vlgmr.msra.gmra.mxu0 %vm3274_vm0, %v4701_v15 }
 0xa2f   : > { %14453 = vmatpush3.bf16.xpose.msra.mxu0 %v4955_v34 }
 0xa30   : > { %14557 = vmatprep.subr.msk.bf16.mxu0 %vm3274_vm0, %v15102_v35 }
 0xa37   : > { %14455 = vmatpush3.bf16.xpose.msra.mxu0 %v4952_v47 }
 0xa38   : > { %14558 = vmatprep.subr.msk.bf16.mxu0 %vm3274_vm0, %v15103_v9 }
 0xa3f   : > { %14457 = vmatpush3.bf16.xpose.msra.mxu0 %v4949_v5 }
 0xa40   : > { %14559 = vmatprep.subr.msk.bf16.mxu0 %vm3274_vm0, %v15104_v32 }
 0xa47   : > { %14459 = vmatpush3.bf16.xpose.msra.mxu0 %v4946_v43 }
 0xa4b   : > { %v4680_v48 = vpop.xlane.xlu0 %4679 }
 0xa4f   : > { %v4677_v10 = vpop.xlane.xlu0 %4676 }
 0xa50   : > { %16187 = vrcp.f32 %v4677_v10 }
 0xa51   : > { %16189 = vrcp.f32 %v4680_v48 }
 0xa53   : > { %v4683_v13 = vpop.xlane.xlu0 %4682 }
 0xa54   : > { %16191 = vrcp.f32 %v4683_v13 }
 0xa5d   : > { %v16188_v1 = vpop.eup %16187 }
 0xa5e   : > { %v4697_v49 = vmul.f32 %v16188_v1, %v17911_v40  ;;  %v16190_v61 = vpop.eup %16189 }
 0xa5f   : > { %v4698_v21 = vmul.f32 %v16190_v61, %v17907_v8 }
 0xa60   : > { %v4702_v18 = vpack.c.bf16 %v4697_v49, %v4696_v27  ;;  %v15109_v49 = vld [vmem:[#allocation2 + $0xec] ss:$36 sps:$4 sm:$0xff]  }
 0xa61   : > { %v16192_v19 = vpop.eup %16191 }
 0xa62   : > { %14448 = vmatprep.mubr.msk.bf16.mxu0 %vm3274_vm0, %v4702_v18  ;;  %v4699_v42 = vmul.f32 %v16192_v19, %v17915_v3 }
 0xa64   : > { %v4703_v59 = vpack.c.bf16 %v4699_v42, %v4698_v21 }
 0xa66   : > { %14449 = vmatmul.mubr.msk.bf16.gmra.mxu0 %vm3274_vm0, %v4703_v59 }
 0xa67   : > { %14460 = vmatprep.mubr.msk.bf16.mxu0 %vm3274_vm0, %v15105_v14 }
 0xa6e   : > { %14461 = vmatmul.mubr.msk.bf16.vlgmr.msra.gmra.mxu0 %vm3274_vm0, %v15106_v6 }
 0xa6f   : > { %14464 = vmatprep.mubr.msk.bf16.mxu0 %vm3274_vm0, %v15107_v12 }
 0xa76   : > { %14465 = vmatmul.mubr.msk.bf16.gmra.mxu0 %vm3274_vm0, %v15108_v20 }
 0xaee   : > { %v17941_v40 = vpop.f32.mrf.mxu0 }
 0xaf0   : > { %v17943_v8 = vpop.f32.mrf.mxu0 }
 0xaf2   : > { %v17945_v3 = vpop.f32.mrf.mxu0 }
 0xaf4   : > { %v17947_v45 = vpop.f32.mrf.mxu0 }
 0xb26   : > { %v17949_v2 = vpop.f32.mrf.mxu0 }
 0xb28   : > { %v17951_v63 = vpop.f32.mrf.mxu0 }
 0xb2a   : > { %v17953_v52 = vpop.f32.mrf.mxu0 }
 0xb2c   : > { %v17955_v58 = vpop.f32.mrf.mxu0 }
 0xb2e   : > { %v14462_v11 = vpop.f32.mrf.mxu0 }
 0xb2f   : > { %v5024_v17 = vsel %vm17497_vm2, %v14462_v11, -1e+30 }
 0xb30   : > { %v5036_v39 = vsel %vm3274_vm0, %v5024_v17, -inf  ;;  %v4991_v56 = vpop.f32.mrf.mxu0 }
 0xb31   : > { %v5022_v33 = vsel %vm17492_vm1, %v4991_v56, -1e+30  ;;  %5037 = vmax.xlane.f32.xlu0 %v5036_v39 }
 0xb32   : > { %v14463_v23 = vpop.f32.mrf.mxu0  ;;  %v5030_v26 = vsel %vm3274_vm0, %v5022_v33, -inf }
 0xb33   : > { %v5025_v35 = vsel %vm17512_vm4, %v14463_v23, -1e+30 }
 0xb34   : > { %v4994_v30 = vpop.f32.mrf.mxu0  ;;  %v5039_v32 = vsel %vm3274_vm0, %v5025_v35, -inf }
 0xb35   : > { %v5023_v50 = vsel %vm17505_vm3, %v4994_v30, -1e+30  ;;  %5031 = vmax.xlane.f32.xlu0 %v5030_v26 }
 0xb36   : > { %v14466_v60 = vpop.f32.mrf.mxu0  ;;  %v5033_v34 = vsel %vm3274_vm0, %v5023_v50, -inf }
 0xb37   : > { %v5028_v43 = vsel %vm17528_vm6, %v14466_v60, -1e+30 }
 0xb38   : > { %v5007_v15 = vpop.f32.mrf.mxu0  ;;  %v5048_v10 = vsel %vm3274_vm0, %v5028_v43, -inf }
 0xb39   : > { %v5026_v47 = vsel %vm17521_vm5, %v5007_v15, -1e+30  ;;  %5034 = vmax.xlane.f32.xlu0 %v5033_v34 }
 0xb3a   : > { %v5042_v9 = vsel %vm3274_vm0, %v5026_v47, -inf  ;;  %v14467_v5 = vpop.f32.mrf.mxu0 }
 0xb3b   : > { %5043 = vmax.xlane.f32.xlu1 %v5042_v9  ;;  %v5029_v1 = vsel %vm17543_vm8, %v14467_v5, -1e+30 }
 0xb3c   : > { %v5010_v48 = vpop.f32.mrf.mxu0  ;;  %v5051_v27 = vsel %vm3274_vm0, %v5029_v1, -inf }
 0xb3d   : > { %5040 = vmax.xlane.f32.xlu0 %v5039_v32  ;;  %v5027_v13 = vsel %vm17537_vm7, %v5010_v48, -1e+30 }
 0xb3e   : > { %v5045_v46 = vsel %vm3274_vm0, %v5027_v13, -inf }
 0xb41   : > { %5049 = vmax.xlane.f32.xlu0 %v5048_v10 }
 0xb45   : > { %5046 = vmax.xlane.f32.xlu0 %v5045_v46 }
 0xb49   : > { %5052 = vmax.xlane.f32.xlu0 %v5051_v27 }
 0xb4c   : > { %5341 = vrot.lane.b32.xlu1 %v15109_v49, %s16735_s2 }
 0xbba   : > { %v5038_v61 = vpop.xlane.xlu0 %5037 }
 0xbbb   : > { %v5056_v18 = vsub.f32 %v5024_v17, %v5038_v61 }
 0xbbd   : > { %v5066_v19 = vmul.f32 1.442695, %v5056_v18 }
 0xbbe   : > { %v5032_v21 = vpop.xlane.xlu0 %5031 }
 0xbbf   : > { %16193 = vpow2.f32 %v5066_v19  ;;  %v5054_v42 = vsub.f32 %v5022_v33, %v5032_v21 }
 0xbc1   : > { %v5062_v59 = vmul.f32 1.442695, %v5054_v42 }
 0xbc2   : > { %v5035_v14 = vpop.xlane.xlu0 %5034 }
 0xbc3   : > { %16195 = vpow2.f32 %v5062_v59  ;;  %v5055_v12 = vsub.f32 %v5023_v50, %v5035_v14  ;;  %v15110_v14 = vld [vmem:[#allocation2 + $0x5c] ss:$36 sps:$4 sm:$0xff]  }
 0xbc4   : > { %v5044_v6 = vpop.xlane.xlu1 %5043 }
 0xbc5   : > { %v5064_v56 = vmul.f32 1.442695, %v5055_v12  ;;  %v5058_v23 = vsub.f32 %v5026_v47, %v5044_v6  ;;  %v15111_v6 = vld [vmem:[#allocation2 + $0x14] ss:$36 sps:$4 sm:$0xff]  }
 0xbc6   : > { %v5041_v20 = vpop.xlane.xlu0 %5040  ;;  %v15112_v12 = vld [vmem:[#allocation2 + $0x50] ss:$36 sps:$4 sm:$0xff]  }
 0xbc7   : > { %v5057_v11 = vsub.f32 %v5025_v35, %v5041_v20  ;;  %v5070_v33 = vmul.f32 1.442695, %v5058_v23  ;;  %v15113_v20 = vld [vmem:[#allocation2 + $0xe0] ss:$36 sps:$4 sm:$0xff]   ;;  %v15116_v23 = vld [vmem:[#allocation2 + $0x98] ss:$36 sps:$4 sm:$0xff]  }
 0xbc8   : > { %v17982_v39 = vpop.permute.xlu1 %5341 }
 0xbc9   : > { %v5068_v26 = vmul.f32 1.442695, %v5057_v11  ;;  %14560 = vmatprep.subr.msk.bf16.mxu1 %vm3274_vm0, %v17982_v39  ;;  %v15114_v11 = vld [vmem:[#allocation2 + $0xa4] ss:$36 sps:$4 sm:$0xff]  }
 0xbca   : > { %v5050_v17 = vpop.xlane.xlu0 %5049 }
 0xbcb   : > { %16197 = vpow2.f32 %v5068_v26  ;;  %v5060_v30 = vsub.f32 %v5028_v43, %v5050_v17 }
 0xbcc   : > { %v17986_v60 = vpop.eup %16193  ;;  %16199 = vpow2.f32 %v5064_v56  ;;  %v15115_v56 = vld [vmem:[#allocation2 + $0x8] ss:$36 sps:$4 sm:$0xff]  }
 0xbcd   : > { %v5074_v15 = vmul.f32 1.442695, %v5060_v30  ;;  %v5084_v50 = vsel %vm3274_vm0, %v17986_v60, 0.0 }
 0xbce   : > { %5085 = vadd.xlane.f32.xlu0 %v5084_v50  ;;  %v5047_v34 = vpop.xlane.xlu0 %5046 }
 0xbcf   : > { %16201 = vpow2.f32 %v5074_v15  ;;  %v5059_v47 = vsub.f32 %v5027_v13, %v5047_v34 }
 0xbd0   : > { %v17990_v35 = vpop.eup %16195  ;;  %16203 = vpow2.f32 %v5070_v33 }
 0xbd1   : > { %v5078_v9 = vsel %vm3274_vm0, %v17990_v35, 0.0  ;;  %v5072_v43 = vmul.f32 1.442695, %v5059_v47 }
 0xbd2   : > { %5079 = vadd.xlane.f32.xlu0 %v5078_v9  ;;  %v5053_v5 = vpop.xlane.xlu0 %5052 }
 0xbd3   : > { %v5061_v32 = vsub.f32 %v5029_v1, %v5053_v5 }
 0xbd5   : > { %v5076_v48 = vmul.f32 1.442695, %v5061_v32 }
 0xbd7   : > { %16205 = vpow2.f32 %v5076_v48 }
 0xbd8   : > { %v16198_v10 = vpop.eup %16197  ;;  %16207 = vpow2.f32 %v5072_v43 }
 0xbd9   : > { %v5087_v46 = vsel %vm3274_vm0, %v16198_v10, 0.0  ;;  %v16200_v27 = vpop.eup %16199 }
 0xbda   : > { %5088 = vadd.xlane.f32.xlu0 %v5087_v46  ;;  %v5081_v61 = vsel %vm3274_vm0, %v16200_v27, 0.0 }
 0xbdc   : > { %v17995_v49 = vpop.eup %16201 }
 0xbdd   : > { %v5096_v13 = vsel %vm3274_vm0, %v17995_v49, 0.0  ;;  %v16204_v18 = vpop.eup %16203 }
 0xbde   : > { %5097 = vadd.xlane.f32.xlu1 %v5096_v13  ;;  %5082 = vadd.xlane.f32.xlu0 %v5081_v61  ;;  %v5090_v1 = vsel %vm3274_vm0, %v16204_v18, 0.0 }
 0xbe2   : > { %5091 = vadd.xlane.f32.xlu0 %v5090_v1 }
 0xbe4   : > { %v16206_v19 = vpop.eup %16205 }
 0xbe5   : > { %v5099_v21 = vsel %vm3274_vm0, %v16206_v19, 0.0  ;;  %v16208_v42 = vpop.eup %16207 }
 0xbe6   : > { %5100 = vadd.xlane.f32.xlu0 %v5099_v21  ;;  %v5093_v59 = vsel %vm3274_vm0, %v16208_v42, 0.0 }
 0xbea   : > { %5094 = vadd.xlane.f32.xlu0 %v5093_v59  ;;  %v5365_v59 = vsel %vm3274_vm0, %v17982_v39, 0 }
 0xbef   : > { %5337 = vrot.lane.b32.xlu1 %v15110_v14, %s16735_s2 }
 0xbf3   : > { %5335 = vrot.lane.b32.xlu1 %v15111_v6, %s16735_s2 }
 0xbf7   : > { %5309 = vrot.lane.b32.xlu1 %v15112_v12, %s16735_s2 }
 0xbfb   : > { %5313 = vrot.lane.b32.xlu1 %v15113_v20, %s16735_s2 }
 0xc00   : > { %5339 = vrot.lane.b32.xlu0 %v15114_v11, %s16735_s2 }
 0xc04   : > { %5307 = vrot.lane.b32.xlu0 %v15115_v56, %s16735_s2 }
 0xc08   : > { %5311 = vrot.lane.b32.xlu0 %v15116_v23, %s16735_s2 }
 0xc57   : > { %v5086_v26 = vpop.xlane.xlu0 %5085 }
 0xc5b   : > { %v5080_v17 = vpop.xlane.xlu0 %5079 }
 0xc63   : > { %v5089_v30 = vpop.xlane.xlu0 %5088 }
 0xc64   : > { %16209 = vrcp.f32 %v5089_v30 }
 0xc65   : > { %16211 = vrcp.f32 %v5080_v17 }
 0xc66   : > { %16213 = vrcp.f32 %v5086_v26 }
 0xc67   : > { %v5083_v33 = vpop.xlane.xlu0 %5082  ;;  %v5098_v34 = vpop.xlane.xlu1 %5097 }
 0xc68   : > { %16215 = vrcp.f32 %v5083_v33 }
 0xc6b   : > { %v5092_v15 = vpop.xlane.xlu0 %5091  ;;  %v5338_v26 = vpop.permute.xlu1 %5337 }
 0xc6f   : > { %v5101_v50 = vpop.xlane.xlu0 %5100 }
 0xc70   : > { %16217 = vrcp.f32 %v5101_v50 }
 0xc71   : > { %16219 = vrcp.f32 %v5092_v15  ;;  %v16210_v47 = vpop.eup %16209 }
 0xc72   : > { %16221 = vrcp.f32 %v5098_v34  ;;  %v16212_v5 = vpop.eup %16211  ;;  %v5113_v48 = vmul.f32 %v16210_v47, %v16198_v10 }
 0xc73   : > { %v5095_v9 = vpop.xlane.xlu0 %5094  ;;  %v16214_v32 = vpop.eup %16213  ;;  %v5110_v46 = vmul.f32 %v16212_v5, %v17990_v35 }
 0xc74   : > { %16223 = vrcp.f32 %v5095_v9  ;;  %v5112_v61 = vmul.f32 %v16214_v32, %v17986_v60 }
 0xc75   : > { %v16216_v43 = vpop.eup %16215 }
 0xc76   : > { %v5111_v13 = vmul.f32 %v16216_v43, %v16200_v27  ;;  %v5119_v21 = vpack.c.bf16 %v5113_v48, %v5112_v61 }
 0xc77   : > { %v5340_v14 = vpop.permute.xlu0 %5339 }
 0xc78   : > { %v5118_v1 = vpack.c.bf16 %v5111_v13, %v5110_v46  ;;  %v5362_v56 = vsel %vm3274_vm0, %v5340_v14, 0 }
 0xc7a   : > { %14476 = vmatprep.mubr.msk.bf16.mxu1 %vm3274_vm0, %v5118_v1 }
 0xc7b   : > { %14477 = vmatmul.mubr.msk.bf16.vlgmr.msra.gmra.mxu1 %vm3274_vm0, %v5119_v21  ;;  %v5308_v17 = vpop.permute.xlu0 %5307 }
 0xc7c   : > { %14485 = vmatpush3.bf16.xpose.msra.mxu1 %v5365_v59 }
 0xc7d   : > { %v16218_v6 = vpop.eup %16217  ;;  %14561 = vmatprep.subr.msk.bf16.mxu1 %vm3274_vm0, %v5340_v14 }
 0xc7e   : > { %v16220_v10 = vpop.eup %16219  ;;  %v5117_v27 = vmul.f32 %v16218_v6, %v16206_v19  ;;  %v5336_v19 = vpop.permute.xlu1 %5335 }
 0xc7f   : > { %v16222_v12 = vpop.eup %16221  ;;  %v5114_v20 = vmul.f32 %v16220_v10, %v16204_v18  ;;  %v5359_v18 = vsel %vm3274_vm0, %v5338_v26, 0  ;;  %v5312_v30 = vpop.permute.xlu0 %5311 }
 0xc80   : > { %v5116_v11 = vmul.f32 %v16222_v12, %v17995_v49  ;;  %v5356_v49 = vsel %vm3274_vm0, %v5336_v19, 0 }
 0xc81   : > { %v16224_v35 = vpop.eup %16223 }
 0xc82   : > { %v5115_v60 = vmul.f32 %v16224_v35, %v16208_v42  ;;  %v5121_v39 = vpack.c.bf16 %v5117_v27, %v5116_v11  ;;  %v5310_v42 = vpop.permute.xlu1 %5309 }
 0xc84   : > { %v5120_v23 = vpack.c.bf16 %v5115_v60, %v5114_v20  ;;  %14487 = vmatpush3.bf16.xpose.msra.mxu1 %v5362_v56 }
 0xc85   : > { %14562 = vmatprep.subr.msk.bf16.mxu1 %vm3274_vm0, %v5338_v26 }
 0xc86   : > { %14480 = vmatprep.mubr.msk.bf16.mxu1 %vm3274_vm0, %v5120_v23  ;;  %v5314_v33 = vpop.permute.xlu1 %5313 }
 0xc87   : > { %14481 = vmatmul.mubr.msk.bf16.gmra.mxu1 %vm3274_vm0, %v5121_v39 }
 0xc88   : > { %14492 = vmatprep.mubr.msk.bf16.mxu1 %vm3274_vm0, %v5308_v17 }
 0xc8c   : > { %14489 = vmatpush3.bf16.xpose.msra.mxu1 %v5359_v18 }
 0xc8d   : > { %14563 = vmatprep.subr.msk.bf16.mxu1 %vm3274_vm0, %v5336_v19 }
 0xc94   : > { %14491 = vmatpush3.bf16.xpose.msra.mxu1 %v5356_v49 }
 0xc9b   : > { %14493 = vmatmul.mubr.msk.bf16.vlgmr.msra.gmra.mxu1 %vm3274_vm0, %v5310_v42 }
 0xc9c   : > { %14496 = vmatprep.mubr.msk.bf16.mxu1 %vm3274_vm0, %v5312_v30 }
 0xca3   : > { %14497 = vmatmul.mubr.msk.bf16.gmra.mxu1 %vm3274_vm0, %v5314_v33 }
 0xca4   : > { %6379 = vmatprep.mubr.bf16.mxu1 %v20001_v28 }
 0xd3b   : > { %v14478_v15 = vpop.f32.mrf.mxu1 }
 0xd3c   : > { %v13846_v50 = vpack.c.bf16 %v14478_v15, %v14478_v15  ;;  %v15118_v15 = vld [vmem:[#allocation2 + $0xb0] ss:$36 sps:$4 sm:$0xff]  }
 0xd3d   : > { %v5192_v34 = vpop.f32.mrf.mxu1 }
 0xd3e   : > { %5257 = vst.msk [vmem:[#allocation3 + $0x20] sm:$0xf] %vm3597_vm9, %v13846_v50  ;;  %v13844_v47 = vpack.c.bf16 %v5192_v34, %v5192_v34 }
 0xd3f   : > { %v14479_v9 = vpop.f32.mrf.mxu1 }
 0xd40   : > { %5255 = vst.msk [vmem:[#allocation3 + $0x8] sm:$0xf] %vm3597_vm9, %v13844_v47  ;;  %v13847_v5 = vpack.c.bf16 %v14479_v9, %v14479_v9 }
 0xd41   : > { %v5195_v32 = vpop.f32.mrf.mxu1 }
 0xd42   : > { %5258 = vst.msk [vmem:[#allocation3 + $0x2c] sm:$0xf] %vm3597_vm9, %v13847_v5  ;;  %v13845_v43 = vpack.c.bf16 %v5195_v32, %v5195_v32 }
 0xd44   : > { %5256 = vst.msk [vmem:[#allocation3 + $0x14] sm:$0xf] %vm3597_vm9, %v13845_v43 }
 0xd47   : > { %v14482_v48 = vpop.f32.mrf.mxu1 }
 0xd48   : > { %v13850_v46 = vpack.c.bf16 %v14482_v48, %v14482_v48 }
 0xd49   : > { %v5208_v13 = vpop.f32.mrf.mxu1 }
 0xd4a   : > { %5261 = vst.msk [vmem:[#allocation3 + $0x50] sm:$0xf] %vm3597_vm9, %v13850_v46  ;;  %v13848_v61 = vpack.c.bf16 %v5208_v13, %v5208_v13 }
 0xd4b   : > { %v14483_v1 = vpop.f32.mrf.mxu1 }
 0xd4c   : > { %5259 = vst.msk [vmem:[#allocation3 + $0x38] sm:$0xf] %vm3597_vm9, %v13848_v61  ;;  %v13851_v21 = vpack.c.bf16 %v14483_v1, %v14483_v1 }
 0xd4d   : > { %v5211_v59 = vpop.f32.mrf.mxu1 }
 0xd4e   : > { %5262 = vst.msk [vmem:[#allocation3 + $0x5c] sm:$0xf] %vm3597_vm9, %v13851_v21  ;;  %v13849_v14 = vpack.c.bf16 %v5211_v59, %v5211_v59 }
 0xd50   : > { %5260 = vst.msk [vmem:[#allocation3 + $0x44] sm:$0xf] %vm3597_vm9, %v13849_v14 }
 0xd5b   : > { %v14494_v6 = vpop.f32.mrf.mxu1 }
 0xd5c   : > { %v5434_v20 = vsel %vm17497_vm2, %v14494_v6, -1e+30 }
 0xd5d   : > { %v5401_v10 = vpop.f32.mrf.mxu1  ;;  %v5446_v56 = vsel %vm3274_vm0, %v5434_v20, -inf }
 0xd5e   : > { %v5432_v12 = vsel %vm17492_vm1, %v5401_v10, -1e+30 }
 0xd5f   : > { %v5440_v35 = vsel %vm3274_vm0, %v5432_v12, -inf  ;;  %v14495_v27 = vpop.f32.mrf.mxu1 }
 0xd60   : > { %5441 = vmax.xlane.f32.xlu0 %v5440_v35  ;;  %v5435_v57 = vsel %vm17512_vm4, %v14495_v27, -1e+30 }
 0xd61   : > { %v5404_v60 = vpop.f32.mrf.mxu1  ;;  %v5449_v17 = vsel %vm3274_vm0, %v5435_v57, -inf }
 0xd62   : > { %v5433_v11 = vsel %vm17505_vm3, %v5404_v60, -1e+30 }
 0xd63   : > { %v14498_v23 = vpop.f32.mrf.mxu1  ;;  %v5443_v26 = vsel %vm3274_vm0, %v5433_v11, -inf }
 0xd64   : > { %5447 = vmax.xlane.f32.xlu0 %v5446_v56  ;;  %5444 = vmax.xlane.f32.xlu1 %v5443_v26  ;;  %v5438_v19 = vsel %vm17528_vm6, %v14498_v23, -1e+30 }
 0xd65   : > { %v5417_v39 = vpop.f32.mrf.mxu1  ;;  %v5458_v42 = vsel %vm3274_vm0, %v5438_v19, -inf }
 0xd66   : > { %v5436_v16 = vsel %vm17521_vm5, %v5417_v39, -1e+30 }
 0xd67   : > { %v5452_v18 = vsel %vm3274_vm0, %v5436_v16, -inf  ;;  %v14499_v41 = vpop.f32.mrf.mxu1 }
 0xd68   : > { %5450 = vmax.xlane.f32.xlu0 %v5449_v17  ;;  %5453 = vmax.xlane.f32.xlu1 %v5452_v18  ;;  %v5439_v0 = vsel %vm17543_vm8, %v14499_v41, -1e+30 }
 0xd69   : > { %v5420_v49 = vpop.f32.mrf.mxu1  ;;  %v5461_v33 = vsel %vm3274_vm0, %v5439_v0, -inf }
 0xd6a   : > { %v5437_v24 = vsel %vm17537_vm7, %v5420_v49, -1e+30 }
 0xd6b   : > { %v5455_v30 = vsel %vm3274_vm0, %v5437_v24, -inf }
 0xd6c   : > { %5459 = vmax.xlane.f32.xlu1 %v5458_v42  ;;  %5456 = vmax.xlane.f32.xlu0 %v5455_v30 }
 0xd70   : > { %5462 = vmax.xlane.f32.xlu0 %v5461_v33  ;;  %v15119_v33 = vld [vmem:[#allocation2 + $0x20] ss:$36 sps:$4 sm:$0xff]  }
 0xd7d   : > { %5558 = vrot.lane.b32.xlu1 %v15117_v36, %s16735_s2 }
 0xd81   : > { %5556 = vrot.lane.b32.xlu1 %v15118_v15, %s16735_s2  ;;  %v13820_v15 = vpack.c.bf16 %v17839_v7, %v17839_v7  ;;  %v15120_v7 = vld [vmem:[#allocation2 + $0x68] ss:$36 sps:$4 sm:$0xff]  }
 0xde9   : > { %v5442_v4 = vpop.xlane.xlu0 %5441 }
 0xdea   : > { %v5464_v50 = vsub.f32 %v5432_v12, %v5442_v4 }
 0xdec   : > { %v5472_v32 = vmul.f32 1.442695, %v5464_v50  ;;  %v13821_v50 = vpack.c.bf16 %v17843_v37, %v17843_v37  ;;  %v13822_v37 = vpack.c.bf16 %v17837_v51, %v17837_v51 }
 0xded   : > { %v5445_v34 = vpop.xlane.xlu1 %5444  ;;  %v5448_v47 = vpop.xlane.xlu0 %5447 }
 0xdee   : > { %v5466_v9 = vsub.f32 %v5434_v20, %v5448_v47  ;;  %v5465_v31 = vsub.f32 %v5433_v11, %v5445_v34  ;;  %v13837_v34 = vpack.c.bf16 %v17947_v45, %v17947_v45  ;;  %v13823_v47 = vpack.c.bf16 %v17841_v38, %v17841_v38 }
 0xdef   : > { %v13838_v45 = vpack.c.bf16 %v17941_v40, %v17941_v40 }
 0xdf0   : > { %v5476_v5 = vmul.f32 1.442695, %v5466_v9  ;;  %v5474_v61 = vmul.f32 1.442695, %v5465_v31  ;;  %v13836_v9 = vpack.c.bf16 %v17943_v8, %v17943_v8 }
 0xdf1   : > { %v5454_v43 = vpop.xlane.xlu1 %5453  ;;  %v5451_v48 = vpop.xlane.xlu0 %5450 }
 0xdf2   : > { %v5467_v46 = vsub.f32 %v5435_v57, %v5451_v48  ;;  %16225 = vpow2.f32 %v5476_v5  ;;  %v5468_v14 = vsub.f32 %v5436_v16, %v5454_v43 }
 0xdf3   : > { %16227 = vpow2.f32 %v5472_v32 }
 0xdf4   : > { %v5478_v13 = vmul.f32 1.442695, %v5467_v46  ;;  %v5480_v35 = vmul.f32 1.442695, %v5468_v14 }
 0xdf5   : > { %v5460_v1 = vpop.xlane.xlu1 %5459  ;;  %v5457_v21 = vpop.xlane.xlu0 %5456 }
 0xdf6   : > { %v5470_v59 = vsub.f32 %v5438_v19, %v5460_v1  ;;  %16229 = vpow2.f32 %v5478_v13  ;;  %v5469_v11 = vsub.f32 %v5437_v24, %v5457_v21 }
 0xdf7   : > { %16231 = vpow2.f32 %v5474_v61 }
 0xdf8   : > { %v5484_v6 = vmul.f32 1.442695, %v5470_v59  ;;  %v5482_v39 = vmul.f32 1.442695, %v5469_v11  ;;  %v15123_v11 = vld [vmem:[#allocation12 + $0xac] ss:$12 sps:$4 sm:$0xff]  }
 0xdf9   : > { %v5559_v10 = vpop.permute.xlu1 %5558  ;;  %v5463_v12 = vpop.xlane.xlu0 %5462 }
 0xdfa   : > { %14500 = vmatprep.subr.bf16.mxu0 %v5559_v10  ;;  %16233 = vpow2.f32 %v5484_v6  ;;  %v5471_v27 = vsub.f32 %v5439_v0, %v5463_v12 }
 0xdfb   : > { %14501 = vmatpush3.bf16.msra.mxu0 %v5559_v10  ;;  %16235 = vpow2.f32 %v5480_v35 }
 0xdfc   : > { %v5486_v56 = vmul.f32 1.442695, %v5471_v27 }
 0xdfd   : > { %v5557_v20 = vpop.permute.xlu1 %5556 }
 0xdfe   : > { %14502 = vmatprep.subr.bf16.mxu0 %v5557_v20  ;;  %16237 = vpow2.f32 %v5486_v56 }
 0xdff   : > { %14503 = vmatpush3.bf16.msra.mxu0 %v5557_v20  ;;  %v18064_v60 = vpop.eup %16225  ;;  %16239 = vpow2.f32 %v5482_v39 }
 0xe00   : > { %v5494_v23 = vsel %vm3274_vm0, %v18064_v60, 0.0  ;;  %v18068_v26 = vpop.eup %16227 }
 0xe01   : > { %5495 = vadd.xlane.f32.xlu1 %v5494_v23  ;;  %v5488_v16 = vsel %vm3274_vm0, %v18068_v26, 0.0 }
 0xe03   : > { %v18070_v57 = vpop.eup %16229 }
 0xe04   : > { %v5497_v17 = vsel %vm3274_vm0, %v18070_v57, 0.0  ;;  %v16232_v18 = vpop.eup %16231 }
 0xe05   : > { %5489 = vadd.xlane.f32.xlu1 %v5488_v16  ;;  %5498 = vadd.xlane.f32.xlu0 %v5497_v17  ;;  %v5491_v41 = vsel %vm3274_vm0, %v16232_v18, 0.0  ;;  %v15126_v17 = vld [vmem:[#allocation12 + $0x94] ss:$12 sps:$4 sm:$0xff]  }
 0xe07   : > { %v18077_v19 = vpop.eup %16233 }
 0xe08   : > { %v5506_v49 = vsel %vm3274_vm0, %v18077_v19, 0.0  ;;  %v18081_v24 = vpop.eup %16235 }
 0xe09   : > { %5492 = vadd.xlane.f32.xlu0 %v5491_v41  ;;  %v5500_v42 = vsel %vm3274_vm0, %v18081_v24, 0.0 }
 0xe0b   : > { %v18085_v30 = vpop.eup %16237 }
 0xe0c   : > { %v5509_v0 = vsel %vm3274_vm0, %v18085_v30, 0.0  ;;  %v18089_v36 = vpop.eup %16239 }
 0xe0d   : > { %5507 = vadd.xlane.f32.xlu0 %v5506_v49  ;;  %v5503_v4 = vsel %vm3274_vm0, %v18089_v36, 0.0 }
 0xe11   : > { %5501 = vadd.xlane.f32.xlu0 %v5500_v42  ;;  %v15124_v42 = vld [vmem:[#allocation12 + $0x90] ss:$12 sps:$4 sm:$0xff]  }
 0xe15   : > { %5510 = vadd.xlane.f32.xlu0 %v5509_v0 }
 0xe16   : > { %5552 = vrot.lane.b32.xlu1 %v15119_v33, %s16735_s2 }
 0xe19   : > { %5504 = vadd.xlane.f32.xlu0 %v5503_v4 }
 0xe1a   : > { %4008 = vrot.lane.b32.xlu1 %v13820_v15, %s16735_s2  ;;  %v15129_v15 = vld [vmem:[#allocation12 + $0x7c] ss:$12 sps:$4 sm:$0xff]  }
 0xe1e   : > { %4010 = vrot.lane.b32.xlu1 %v13821_v50, %s16735_s2 }
 0xe22   : > { %4839 = vrot.lane.b32.xlu1 %v13837_v34, %s16735_s2 }
 0xe26   : > { %4014 = vrot.lane.b32.xlu1 %v13823_v47, %s16735_s2  ;;  %v15127_v47 = vld [vmem:[#allocation12 + $0x78] ss:$12 sps:$4 sm:$0xff]  }
 0xe2f   : > { %5554 = vrot.lane.b32.xlu0 %v15120_v7, %s16735_s2 }
 0xe33   : > { %4837 = vrot.lane.b32.xlu0 %v13836_v9, %s16735_s2  ;;  %v15135_v9 = vld [vmem:[#allocation12 + $0x64] ss:$12 sps:$4 sm:$0xff]  }
 0xe37   : > { %4012 = vrot.lane.b32.xlu0 %v13822_v37, %s16735_s2 }
 0xe3b   : > { %4841 = vrot.lane.b32.xlu0 %v13838_v45, %s16735_s2  ;;  %v15139_v45 = vld [vmem:[#allocation12 + $0x30] ss:$12 sps:$4 sm:$0xff]  }
 0xe8a   : > { %v5496_v38 = vpop.xlane.xlu1 %5495 }
 0xe8e   : > { %v5490_v5 = vpop.xlane.xlu1 %5489  ;;  %v5499_v32 = vpop.xlane.xlu0 %5498 }
 0xe8f   : > { %16241 = vrcp.f32 %v5490_v5  ;;  %v15142_v5 = vld [vmem:[#allocation12 + $0x18] ss:$12 sps:$4 sm:$0xff]  }
 0xe92   : > { %v5553_v31 = vpop.permute.xlu1 %5552  ;;  %v5493_v43 = vpop.xlane.xlu0 %5492 }
 0xe93   : > { %16243 = vrcp.f32 %v5493_v43  ;;  %v15150_v43 = vld [vmem:[#allocation12 + $0x16c] ss:$12 sps:$4 sm:$0xff]  }
 0xe94   : > { %16245 = vrcp.f32 %v5499_v32  ;;  %v15147_v32 = vld [vmem:[#allocation12 + $0x4] ss:$12 sps:$4 sm:$0xff]  }
 0xe95   : > { %16247 = vrcp.f32 %v5496_v38  ;;  %v15144_v38 = vld [vmem:[#allocation12 + $0x1c] ss:$12 sps:$4 sm:$0xff]  }
 0xe96   : > { %v4009_v8 = vpop.permute.xlu1 %4008  ;;  %v5508_v48 = vpop.xlane.xlu0 %5507 }
 0xe97   : > { %4033 = vst.msk [vmem:[#allocation3] sm:$0xf] %vm4032_vm10, %v4009_v8  ;;  %v15148_v8 = vld [vmem:[#allocation12 + $0x168] ss:$12 sps:$4 sm:$0xff]  }
 0xe9a   : > { %v4011_v51 = vpop.permute.xlu1 %4010  ;;  %v5502_v46 = vpop.xlane.xlu0 %5501 }
 0xe9b   : > { %4034 = vst.msk [vmem:[#allocation3 + $0xc] sm:$0xf] %vm4032_vm10, %v4011_v51  ;;  %16249 = vrcp.f32 %v5502_v46  ;;  %v15151_v51 = vld [vmem:[#allocation12 + $0x150] ss:$12 sps:$4 sm:$0xff]  }
 0xe9c   : > { %v16242_v40 = vpop.eup %16241  ;;  %v15156_v46 = vld [vmem:[#allocation12 + $0x13c] ss:$12 sps:$4 sm:$0xff]  }
 0xe9d   : > { %v5520_v21 = vmul.f32 %v16242_v40, %v18068_v26  ;;  %v15121_v26 = vld [vmem:[#allocation12 + $0xa8] ss:$12 sps:$4 sm:$0xff]   ;;  %v15154_v40 = vld [vmem:[#allocation12 + $0x138] ss:$12 sps:$4 sm:$0xff]  }
 0xe9e   : > { %v4840_v13 = vpop.permute.xlu1 %4839  ;;  %v5511_v61 = vpop.xlane.xlu0 %5510 }
 0xe9f   : > { %4862 = vst.msk [vmem:[#allocation3 + $0x10] sm:$0xf] %vm4032_vm10, %v4840_v13  ;;  %16251 = vrcp.f32 %v5511_v61  ;;  %v15159_v13 = vld [vmem:[#allocation12 + $0x124] ss:$12 sps:$4 sm:$0xff]   ;;  %v15157_v61 = vld [vmem:[#allocation12 + $0x120] ss:$12 sps:$4 sm:$0xff]  }
 0xea0   : > { %v16244_v1 = vpop.eup %16243  ;;  %16253 = vrcp.f32 %v5508_v48  ;;  %v15153_v48 = vld [vmem:[#allocation12 + $0x154] ss:$12 sps:$4 sm:$0xff]  }
 0xea1   : > { %v5521_v59 = vmul.f32 %v16244_v1, %v16232_v18  ;;  %v16246_v12 = vpop.eup %16245  ;;  %v15162_v1 = vld [vmem:[#allocation12 + $0x10c] ss:$12 sps:$4 sm:$0xff]  }
 0xea2   : > { %v4015_v14 = vpop.permute.xlu1 %4014  ;;  %v5505_v6 = vpop.xlane.xlu0 %5504  ;;  %v5523_v20 = vmul.f32 %v16246_v12, %v18070_v57  ;;  %v15171_v12 = vld [vmem:[#allocation12 + $0xc4] ss:$12 sps:$4 sm:$0xff]  }
 0xea3   : > { %4036 = vst.msk [vmem:[#allocation3 + $0x24] sm:$0xf] %vm4032_vm10, %v4015_v14  ;;  %16255 = vrcp.f32 %v5505_v6  ;;  %v5528_v10 = vpack.c.bf16 %v5521_v59, %v5520_v21  ;;  %v16248_v27 = vpop.eup %16247  ;;  %v15160_v21 = vld [vmem:[#allocation12 + $0x108] ss:$12 sps:$4 sm:$0xff]   ;;  %v15163_v14 = vld [vmem:[#allocation12 + $0xf0] ss:$12 sps:$4 sm:$0xff]  }
 0xea4   : > { %v5522_v23 = vmul.f32 %v16248_v27, %v18064_v60  ;;  %v15165_v59 = vld [vmem:[#allocation12 + $0xf4] ss:$12 sps:$4 sm:$0xff]   ;;  %v15168_v6 = vld [vmem:[#allocation12 + $0xdc] ss:$12 sps:$4 sm:$0xff]   ;;  %v18137_v27 = vld [vmem:[#allocation3] ss:$12 sps:$4 sm:$0xff]  }
 0xea5   : > { %14508 = vmatprep.mubr.msk.bf16.mxu0 %vm3274_vm0, %v5528_v10  ;;  %v15166_v10 = vld [vmem:[#allocation12 + $0xd8] ss:$12 sps:$4 sm:$0xff]  }
 0xea6   : > { %v5555_v35 = vpop.permute.xlu0 %5554  ;;  %v5529_v16 = vpack.c.bf16 %v5523_v20, %v5522_v23  ;;  %v15172_v20 = vld [vmem:[#allocation12 + $0x228] ss:$12 sps:$4 sm:$0xff]   ;;  %v15175_v23 = vld [vmem:[#allocation12 + $0x210] ss:$12 sps:$4 sm:$0xff]  }
 0xea7   : > { %14504 = vmatprep.subr.bf16.mxu0 %v5555_v35 }
 0xea8   : > { %14505 = vmatpush3.bf16.msra.mxu0 %v5555_v35  ;;  %v16250_v39 = vpop.eup %16249  ;;  %v15169_v35 = vld [vmem:[#allocation12 + $0xc0] ss:$12 sps:$4 sm:$0xff]  }
 0xea9   : > { %14506 = vmatprep.subr.bf16.mxu0 %v5553_v31  ;;  %v5524_v60 = vmul.f32 %v16250_v39, %v18081_v24  ;;  %v15133_v24 = vld [vmem:[#allocation12 + $0x60] ss:$12 sps:$4 sm:$0xff]   ;;  %v15178_v39 = vld [vmem:[#allocation12 + $0x1f8] ss:$12 sps:$4 sm:$0xff]  }
 0xeaa   : > { %v4838_v56 = vpop.permute.xlu0 %4837 }
 0xeab   : > { %4861 = vst.msk [vmem:[#allocation3 + $0x4] sm:$0xf] %vm4032_vm10, %v4838_v56  ;;  %v15177_v56 = vld [vmem:[#allocation12 + $0x214] ss:$12 sps:$4 sm:$0xff]  }
 0xeac   : > { %14507 = vmatpush3.bf16.msra.mxu0 %v5553_v31  ;;  %v16252_v18 = vpop.eup %16251  ;;  %v15145_v31 = vld [vmem:[#allocation12] ss:$12 sps:$4 sm:$0xff]  }
 0xead   : > { %6274 = vmatprep.subr.bf16.mxu0 %v15123_v11  ;;  %v16254_v49 = vpop.eup %16253  ;;  %v5527_v33 = vmul.f32 %v16252_v18, %v18085_v30  ;;  %v15138_v30 = vld [vmem:[#allocation12 + $0x4c] ss:$12 sps:$4 sm:$0xff]   ;;  %v15184_v18 = vld [vmem:[#allocation12 + $0x1c8] ss:$12 sps:$4 sm:$0xff]  }
 0xeae   : > { %v4013_v41 = vpop.permute.xlu0 %4012  ;;  %v5526_v34 = vmul.f32 %v16254_v49, %v18077_v19  ;;  %v15141_v19 = vld [vmem:[#allocation12 + $0x34] ss:$12 sps:$4 sm:$0xff]   ;;  %v15174_v11 = vld [vmem:[#allocation12 + $0x22c] ss:$12 sps:$4 sm:$0xff]   ;;  %v15187_v49 = vld [vmem:[#allocation12 + $0x1b0] ss:$12 sps:$4 sm:$0xff]  }
 0xeaf   : > { %4035 = vst.msk [vmem:[#allocation3 + $0x18] sm:$0xf] %vm4032_vm10, %v4013_v41  ;;  %14509 = vmatmul.mubr.msk.bf16.vlgmr.msra.gmra.mxu0 %vm3274_vm0, %v5529_v16  ;;  %6347 = vmatprep.subr.bf16.mxu1 %v15174_v11  ;;  %v15181_v16 = vld [vmem:[#allocation12 + $0x1e0] ss:$12 sps:$4 sm:$0xff]  }
 0xeb0   : > { %v16256_v57 = vpop.eup %16255  ;;  %6275 = vmatpush1.bf16.msra.mxu0 %v15121_v26  ;;  %v5531_v7 = vpack.c.bf16 %v5527_v33, %v5526_v34  ;;  %6348 = vmatpush1.bf16.msra.mxu1 %v15172_v20  ;;  %v15180_v26 = vld [vmem:[#allocation12 + $0x1fc] ss:$12 sps:$4 sm:$0xff]   ;;  %v15186_v41 = vld [vmem:[#allocation12 + $0x1cc] ss:$12 sps:$4 sm:$0xff]   ;;  %v13824_v34 = vpack.c.bf16 %v17847_v25, %v17847_v25 }
 0xeb1   : > { %6276 = vmatprep.subr.bf16.mxu0 %v15126_v17  ;;  %v5525_v0 = vmul.f32 %v16256_v57, %v18089_v36  ;;  %v15136_v36 = vld [vmem:[#allocation12 + $0x48] ss:$12 sps:$4 sm:$0xff]   ;;  %6349 = vmatprep.subr.bf16.mxu1 %v15177_v56  ;;  %v15183_v17 = vld [vmem:[#allocation12 + $0x1e4] ss:$12 sps:$4 sm:$0xff]  }
 0xeb2   : > { %v4842_v4 = vpop.permute.xlu0 %4841  ;;  %v18133_v37 = vld [vmem:[#allocation3 + $0x4] ss:$12 sps:$4 sm:$0xff]   ;;  %v15189_v57 = vld [vmem:[#allocation12 + $0x1b4] ss:$12 sps:$4 sm:$0xff]   ;;  %v15190_v33 = vld [vmem:[#allocation12 + $0x198] ss:$12 sps:$4 sm:$0xff]  }
 0xeb3   : > { %4863 = vst.msk [vmem:[#allocation3 + $0x1c] sm:$0xf] %vm4032_vm10, %v4842_v4  ;;  %v5530_v50 = vpack.c.bf16 %v5525_v0, %v5524_v60  ;;  %v15198_v56 = vld [vmem:[#allocation12 + $0xb0] ss:$12 sps:$4 sm:$0xff]  }
 0xeb4   : > { %6277 = vmatpush1.bf16.msra.mxu0 %v15124_v42  ;;  %6350 = vmatpush1.bf16.msra.mxu1 %v15175_v23 }
 0xeb5   : > { %14512 = vmatprep.mubr.msk.bf16.mxu0 %vm3274_vm0, %v5530_v50  ;;  %6278 = vmatprep.subr.bf16.mxu0 %v15129_v15  ;;  %v15192_v15 = vld [vmem:[#allocation12 + $0x19c] ss:$12 sps:$4 sm:$0xff]  }
 0xeb6   : > { %6351 = vmatprep.subr.bf16.mxu1 %v15180_v26 }
 0xeb7   : > { %14513 = vmatmul.mubr.msk.bf16.gmra.mxu0 %vm3274_vm0, %v5531_v7  ;;  %v15193_v7 = vld [vmem:[#allocation12 + $0x180] ss:$12 sps:$4 sm:$0xff]  }
 0xeb8   : > { %6279 = vmatpush1.bf16.msra.mxu0 %v15127_v47  ;;  %6306 = vmatprep.mubr.bf16.mxu0 %v18133_v37 }
 0xeb9   : > { %6280 = vmatprep.subr.bf16.mxu0 %v15135_v9  ;;  %6352 = vmatpush1.bf16.msra.mxu1 %v15178_v39  ;;  %v15195_v9 = vld [vmem:[#allocation12 + $0x184] ss:$12 sps:$4 sm:$0xff]  }
 0xeba   : > { %6353 = vmatprep.subr.bf16.mxu1 %v15183_v17  ;;  %v15202_v39 = vld [vmem:[#allocation12 + $0x158] ss:$12 sps:$4 sm:$0xff]  }
 0xebb   : > { %v15203_v17 = vld [vmem:[#allocation12 + $0x98] ss:$12 sps:$4 sm:$0xff]  }
 0xebc   : > { %6281 = vmatpush1.bf16.msra.mxu0 %v15133_v24 }
 0xebd   : > { %6282 = vmatprep.subr.bf16.mxu0 %v15138_v30  ;;  %6354 = vmatpush1.bf16.msra.mxu1 %v15181_v16 }
 0xebe   : > { %6355 = vmatprep.subr.bf16.mxu1 %v15186_v41 }
 0xec0   : > { %6283 = vmatpush1.bf16.msra.mxu0 %v15136_v36  ;;  %v13840_v36 = vpack.c.bf16 %v17951_v63, %v17951_v63 }
 0xec1   : > { %6284 = vmatprep.subr.bf16.mxu0 %v15141_v19  ;;  %6356 = vmatpush1.bf16.msra.mxu1 %v15184_v18  ;;  %v15206_v18 = vld [vmem:[#allocation12 + $0x140] ss:$12 sps:$4 sm:$0xff]  }
 0xec2   : > { %6357 = vmatprep.subr.bf16.mxu1 %v15189_v57 }
 0xec4   : > { %6285 = vmatpush1.bf16.msra.mxu0 %v15139_v45  ;;  %v15197_v45 = vld [vmem:[#allocation12 + $0x170] ss:$12 sps:$4 sm:$0xff]  }
 0xec5   : > { %6286 = vmatprep.subr.bf16.mxu0 %v15144_v38  ;;  %6358 = vmatpush1.bf16.msra.mxu1 %v15187_v49  ;;  %v15199_v49 = vld [vmem:[#allocation3 + $0x18] ss:$12 sps:$4 sm:$0xff]  }
 0xec6   : > { %6359 = vmatprep.subr.bf16.mxu1 %v15192_v15  ;;  %v15212_v15 = vld [vmem:[#allocation12 + $0x128] ss:$12 sps:$4 sm:$0xff]  }
 0xec8   : > { %6287 = vmatpush1.bf16.msra.mxu0 %v15142_v5  ;;  %v15204_v5 = vld [vmem:[#allocation12 + $0x230] ss:$12 sps:$4 sm:$0xff]  }
 0xec9   : > { %6288 = vmatprep.subr.bf16.mxu0 %v15147_v32  ;;  %6360 = vmatpush1.bf16.msra.mxu1 %v15190_v33  ;;  %v13839_v32 = vpack.c.bf16 %v17945_v3, %v17945_v3  ;;  %v15214_v3 = vld [vmem:[#allocation12 + $0x200] ss:$12 sps:$4 sm:$0xff]  }
 0xeca   : > { %6361 = vmatprep.subr.bf16.mxu1 %v15195_v9  ;;  %v15217_v9 = vld [vmem:[#allocation12 + $0x50] ss:$12 sps:$4 sm:$0xff]  }
 0xecc   : > { %6289 = vmatpush1.bf16.msra.mxu0 %v15145_v31  ;;  %v15208_v31 = vld [vmem:[#allocation12 + $0x218] ss:$12 sps:$4 sm:$0xff]  }
 0xecd   : > { %6290 = vmatprep.subr.bf16.mxu0 %v15150_v43  ;;  %6362 = vmatpush1.bf16.msra.mxu1 %v15193_v7  ;;  %v13825_v43 = vpack.c.bf16 %v17851_v54, %v17851_v54  ;;  %v13842_v54 = vpack.c.bf16 %v17949_v2, %v17949_v2  ;;  %v13827_v2 = vpack.c.bf16 %v17849_v22, %v17849_v22 }
 0xece   : > { %14008 = vmatprep.subr.bf16.mxu1 %v15197_v45 }
 0xed0   : > { %6291 = vmatpush2.bf16.msra.mxu0 %v15148_v8 }
 0xed1   : > { %6292 = vmatprep.subr.bf16.mxu0 %v15153_v48  ;;  %v13826_v48 = vpack.c.bf16 %v17845_v29, %v17845_v29  ;;  %v15221_v29 = vld [vmem:[#allocation12 + $0x1d0] ss:$12 sps:$4 sm:$0xff]  }
 0xed4   : > { %6293 = vmatpush2.bf16.msra.mxu0 %v15151_v51  ;;  %v13841_v51 = vpack.c.bf16 %v17955_v58, %v17955_v58 }
 0xed5   : > { %6294 = vmatprep.subr.bf16.mxu0 %v15156_v46 }
 0xed8   : > { %6295 = vmatpush2.bf16.msra.mxu0 %v15154_v40  ;;  %v15218_v40 = vld [vmem:[#allocation12 + $0x1e8] ss:$12 sps:$4 sm:$0xff]  }
 0xed9   : > { %6296 = vmatprep.subr.bf16.mxu0 %v15159_v13 }
 0xedc   : > { %6297 = vmatpush2.bf16.msra.mxu0 %v15157_v61  ;;  %v15225_v61 = vld [vmem:[#allocation12 + $0x1b8] ss:$12 sps:$4 sm:$0xff]  }
 0xedd   : > { %6298 = vmatprep.subr.bf16.mxu0 %v15162_v1  ;;  %v15231_v1 = vld [vmem:[#allocation12 + $0x1a0] ss:$12 sps:$4 sm:$0xff]  }
 0xee0   : > { %6299 = vmatpush2.bf16.msra.mxu0 %v15160_v21  ;;  %v13843_v21 = vpack.c.bf16 %v17953_v52, %v17953_v52 }
 0xee1   : > { %6300 = vmatprep.subr.bf16.mxu0 %v15165_v59  ;;  %v15232_v59 = vld [vmem:[#allocation12 + $0x188] ss:$12 sps:$4 sm:$0xff]  }
 0xee4   : > { %6301 = vmatpush2.bf16.msra.mxu0 %v15163_v14 }
 0xee5   : > { %6302 = vmatprep.subr.bf16.mxu0 %v15168_v6 }
 0xee8   : > { %6303 = vmatpush2.bf16.msra.mxu0 %v15166_v10 }
 0xee9   : > { %6304 = vmatprep.subr.bf16.mxu0 %v15171_v12 }
 0xeec   : > { %6305 = vmatpush2.bf16.msra.mxu0 %v15169_v35 }
 0xeed   : > { %14516 = vmatprep.subr.bf16.mxu0 %v15204_v5 }
 0xeef   : > { %6307 = vmatmul.mubr.bf16.vlgmr.msra.gmra.mxu0 %v18137_v27 }
 0xef0   : > { %14517 = vmatpush3.bf16.msra.mxu0 %v15204_v5 }
 0xef1   : > { %14518 = vmatprep.subr.bf16.mxu0 %v15208_v31 }
 0xef4   : > { %14519 = vmatpush3.bf16.msra.mxu0 %v15208_v31 }
 0xef5   : > { %14520 = vmatprep.subr.bf16.mxu0 %v15214_v3 }
 0xef8   : > { %14521 = vmatpush3.bf16.msra.mxu0 %v15214_v3 }
 0xef9   : > { %14522 = vmatprep.subr.bf16.mxu0 %v15218_v40 }
 0xefc   : > { %14523 = vmatpush3.bf16.msra.mxu0 %v15218_v40 }
 0xefd   : > { %14524 = vmatprep.subr.bf16.mxu0 %v15221_v29 }
 0xf00   : > { %14525 = vmatpush3.bf16.msra.mxu0 %v15221_v29 }
 0xf01   : > { %14526 = vmatprep.subr.bf16.mxu0 %v15225_v61 }
 0xf04   : > { %14527 = vmatpush3.bf16.msra.mxu0 %v15225_v61 }
 0xf05   : > { %14528 = vmatprep.subr.bf16.mxu0 %v15231_v1 }
 0xf08   : > { %14529 = vmatpush3.bf16.msra.mxu0 %v15231_v1 }
 0xf09   : > { %14530 = vmatprep.subr.bf16.mxu0 %v15232_v59 }
 0xf0c   : > { %14531 = vmatpush3.bf16.msra.mxu0 %v15232_v59 }
 0xf6f   : > { %v14510_v42 = vpop.f32.mrf.mxu0 }
 0xf70   : > { %v13854_v60 = vpack.c.bf16 %v14510_v42, %v14510_v42 }
 0xf71   : > { %v5610_v0 = vpop.f32.mrf.mxu0 }
 0xf72   : > { %v13852_v4 = vpack.c.bf16 %v5610_v0, %v5610_v0  ;;  %5669 = vrot.lane.b32.xlu0 %v13854_v60, %s16735_s2  ;;  %v15207_v60 = vld [vmem:[#allocation12 + $0x80] ss:$12 sps:$4 sm:$0xff]  }
 0xf73   : > { %v14511_v50 = vpop.f32.mrf.mxu0 }
 0xf74   : > { %5665 = vrot.lane.b32.xlu1 %v13852_v4, %s16735_s2  ;;  %v13855_v24 = vpack.c.bf16 %v14511_v50, %v14511_v50  ;;  %v15213_v4 = vld [vmem:[#allocation12 + $0x68] ss:$12 sps:$4 sm:$0xff]   ;;  %v15216_v50 = vld [vmem:[#allocation12 + $0x110] ss:$12 sps:$4 sm:$0xff]  }
 0xf75   : > { %v5613_v47 = vpop.f32.mrf.mxu0 }
 0xf76   : > { %4016 = vrot.lane.b32.xlu0 %v13824_v34, %s16735_s2  ;;  %v13853_v25 = vpack.c.bf16 %v5613_v47, %v5613_v47 }
 0xf77   : > { %v14514_v30 = vpop.f32.mrf.mxu0 }
 0xf78   : > { %5671 = vrot.lane.b32.xlu1 %v13855_v24, %s16735_s2  ;;  %v13858_v63 = vpack.c.bf16 %v14514_v30, %v14514_v30 }
 0xf79   : > { %v5626_v19 = vpop.f32.mrf.mxu0 }
 0xf7a   : > { %4845 = vrot.lane.b32.xlu0 %v13840_v36, %s16735_s2  ;;  %v13856_v38 = vpack.c.bf16 %v5626_v19, %v5626_v19  ;;  %v15219_v36 = vld [vmem:[#allocation12 + $0xf8] ss:$12 sps:$4 sm:$0xff]  }
 0xf7b   : > { %v14515_v8 = vpop.f32.mrf.mxu0  ;;  %v15220_v19 = vld [vmem:[#allocation12 + $0x38] ss:$12 sps:$4 sm:$0xff]  }
 0xf7c   : > { %5667 = vrot.lane.b32.xlu1 %v13853_v25, %s16735_s2  ;;  %v13859_v58 = vpack.c.bf16 %v14515_v8, %v14515_v8  ;;  %v15223_v25 = vld [vmem:[#allocation12 + $0xe0] ss:$12 sps:$4 sm:$0xff]  }
 0xf7d   : > { %v5629_v46 = vpop.f32.mrf.mxu0 }
 0xf7e   : > { %5673 = vrot.lane.b32.xlu0 %v13856_v38, %s16735_s2  ;;  %v13857_v13 = vpack.c.bf16 %v5629_v46, %v5629_v46  ;;  %v15224_v38 = vld [vmem:[#allocation12 + $0x20] ss:$12 sps:$4 sm:$0xff]  }
 0xf80   : > { %4843 = vrot.lane.b32.xlu1 %v13839_v32, %s16735_s2  ;;  %v15229_v32 = vld [vmem:[#allocation12 + $0xc8] ss:$12 sps:$4 sm:$0xff]  }
 0xf82   : > { %5677 = vrot.lane.b32.xlu0 %v13858_v63, %s16735_s2  ;;  %v15230_v63 = vld [vmem:[#allocation12 + $0x8] ss:$12 sps:$4 sm:$0xff]  }
 0xf84   : > { %4018 = vrot.lane.b32.xlu1 %v13825_v43, %s16735_s2 }
 0xf86   : > { %4020 = vrot.lane.b32.xlu0 %v13826_v48, %s16735_s2 }
 0xf88   : > { %4847 = vrot.lane.b32.xlu1 %v13841_v51, %s16735_s2 }
 0xf8a   : > { %4849 = vrot.lane.b32.xlu0 %v13842_v54, %s16735_s2 }
 0xf8c   : > { %5675 = vrot.lane.b32.xlu1 %v13857_v13, %s16735_s2 }
 0xf90   : > { %5679 = vrot.lane.b32.xlu1 %v13859_v58, %s16735_s2 }
 0xf94   : > { %4022 = vrot.lane.b32.xlu1 %v13827_v2, %s16735_s2 }
 0xf98   : > { %4851 = vrot.lane.b32.xlu1 %v13843_v21, %s16735_s2 }
 0xfe4   : > { %v5670_v14 = vpop.permute.xlu0 %5669 }
 0xfe5   : > { %5691 = vst.msk [vmem:[#allocation3 + $0x20] sm:$0xf] %vm4032_vm10, %v5670_v14 }
 0xfe6   : > { %v5666_v6 = vpop.permute.xlu1 %5665 }
 0xfe7   : > { %5689 = vst.msk [vmem:[#allocation3 + $0x8] sm:$0xf] %vm4032_vm10, %v5666_v6 }
 0xfe8   : > { %v4017_v22 = vpop.permute.xlu0 %4016 }
 0xfe9   : > { %4037 = vst.msk [vmem:[#allocation3 + $0x30] sm:$0xf] %vm4032_vm10, %v4017_v22 }
 0xfea   : > { %v5672_v10 = vpop.permute.xlu1 %5671 }
 0xfeb   : > { %5692 = vst.msk [vmem:[#allocation3 + $0x2c] sm:$0xf] %vm4032_vm10, %v5672_v10 }
 0xfec   : > { %v4846_v52 = vpop.permute.xlu0 %4845 }
 0xfed   : > { %4865 = vst.msk [vmem:[#allocation3 + $0x34] sm:$0xf] %vm4032_vm10, %v4846_v52 }
 0xfee   : > { %v5668_v12 = vpop.permute.xlu1 %5667 }
 0xfef   : > { %5690 = vst.msk [vmem:[#allocation3 + $0x14] sm:$0xf] %vm4032_vm10, %v5668_v12 }
 0xff0   : > { %v5674_v35 = vpop.permute.xlu0 %5673 }
 0xff1   : > { %5693 = vst.msk [vmem:[#allocation3 + $0x38] sm:$0xf] %vm4032_vm10, %v5674_v35 }
 0xff2   : > { %v4844_v20 = vpop.permute.xlu1 %4843  ;;  %v15205_v33 = vld [vmem:[#allocation3 + $0x20] ss:$12 sps:$4 sm:$0xff]  }
 0xff3   : > { %4864 = vst.msk [vmem:[#allocation3 + $0x28] sm:$0xf] %vm4032_vm10, %v4844_v20 }
 0xff4   : > { %v5678_v11 = vpop.permute.xlu0 %5677 }
 0xff5   : > { %5695 = vst.msk [vmem:[#allocation3 + $0x50] sm:$0xf] %vm4032_vm10, %v5678_v11  ;;  %v5809_v11 = vld [vmem:[#allocation13] sm:$0x7] }
 0xff6   : > { %v4019_v23 = vpop.permute.xlu1 %4018  ;;  %v18184_v26 = vld [vmem:[#allocation3 + $0x8] ss:$12 sps:$4 sm:$0xff]  }
 0xff7   : > { %4038 = vst.msk [vmem:[#allocation3 + $0x3c] sm:$0xf] %vm4032_vm10, %v4019_v23  ;;  %6380 = vmatmul.mubr.bf16.vlgmr.msra.gmra.mxu1 %v18184_v26  ;;  %v18225_v23 = vrot.slane %v5809_v11, %v17236_v53 }
 0xff8   : > { %v4021_v16 = vpop.permute.xlu0 %4020  ;;  %14009 = vmatpush3.bf16.msra.mxu1 %v15198_v56  ;;  %6389 = vmatprep.mubr.bf16.mxu1 %v20001_v28 }
 0xff9   : > { %4039 = vst.msk [vmem:[#allocation3 + $0x48] sm:$0xf] %vm4032_vm10, %v4021_v16  ;;  %14010 = vmatprep.subr.bf16.mxu1 %v15202_v39  ;;  %v18232_v16 = vrot.slane %v5809_v11, %v17242_v62 }
 0xffa   : > { %v4848_v41 = vpop.permute.xlu1 %4847  ;;  %v15201_v57 = vld [vmem:[#allocation3 + $0x1c] ss:$12 sps:$4 sm:$0xff]  }
 0xffb   : > { %4866 = vst.msk [vmem:[#allocation3 + $0x40] sm:$0xf] %vm4032_vm10, %v4848_v41  ;;  %6316 = vmatprep.mubr.bf16.mxu0 %v15201_v57 }
 0xffc   : > { %v4850_v42 = vpop.permute.xlu0 %4849  ;;  %6317 = vmatmul.mubr.bf16.gmra.mxu0 %v15199_v49  ;;  %14011 = vmatpush3.bf16.msra.mxu1 %v15203_v17 }
 0xffd   : > { %4867 = vst.msk [vmem:[#allocation3 + $0x4c] sm:$0xf] %vm4032_vm10, %v4850_v42  ;;  %14012 = vmatprep.subr.bf16.mxu1 %v15206_v18  ;;  %v18242_v42 = vrot.slane %v5809_v11, %v17239_v55 }
 0xffe   : > { %v5676_v0 = vpop.permute.xlu1 %5675  ;;  %v15209_v47 = vld [vmem:[#allocation3 + $0x30] ss:$12 sps:$4 sm:$0xff]  }
 0xfff   : > { %5694 = vst.msk [vmem:[#allocation3 + $0x44] sm:$0xf] %vm4032_vm10, %v5676_v0  ;;  %6390 = vmatmul.mubr.bf16.gmra.mxu1 %v15205_v33 }
0x1000   : > { %14013 = vmatpush3.bf16.msra.mxu1 %v15207_v60  ;;  %6399 = vmatprep.mubr.bf16.mxu1 %v20001_v28 }
0x1001   : > { %14014 = vmatprep.subr.bf16.mxu1 %v15212_v15 }
0x1002   : > { %v5680_v34 = vpop.permute.xlu1 %5679  ;;  %v15211_v7 = vld [vmem:[#allocation3 + $0x34] ss:$12 sps:$4 sm:$0xff]  }
0x1003   : > { %5696 = vst.msk [vmem:[#allocation3 + $0x5c] sm:$0xf] %vm4032_vm10, %v5680_v34  ;;  %6326 = vmatprep.mubr.bf16.mxu0 %v15211_v7 }
0x1004   : > { %6327 = vmatmul.mubr.bf16.gmra.mxu0 %v15209_v47  ;;  %14015 = vmatpush3.bf16.msra.mxu1 %v15213_v4 }
0x1005   : > { %14016 = vmatprep.subr.bf16.mxu1 %v15216_v50 }
0x1006   : > { %v4023_v24 = vpop.permute.xlu1 %4022  ;;  %v15215_v30 = vld [vmem:[#allocation3 + $0x38] ss:$12 sps:$4 sm:$0xff]  }
0x1007   : > { %4040 = vst.msk [vmem:[#allocation3 + $0x54] sm:$0xf] %vm4032_vm10, %v4023_v24  ;;  %6400 = vmatmul.mubr.bf16.gmra.mxu1 %v15215_v30 }
0x1008   : > { %14017 = vmatpush3.bf16.msra.mxu1 %v15217_v9  ;;  %6409 = vmatprep.mubr.bf16.mxu1 %v20001_v28 }
0x1009   : > { %14018 = vmatprep.subr.bf16.mxu1 %v15219_v36  ;;  %v16285_v36 = vld [vmem:[%s17021_s14 + $0x8] sm:$0xff] }
0x100a   : > { %v4852_v45 = vpop.permute.xlu1 %4851  ;;  %v15222_v5 = vld [vmem:[#allocation3 + $0x50] ss:$12 sps:$4 sm:$0xff]  }
0x100b   : > { %4868 = vst.msk [vmem:[#allocation3 + $0x58] sm:$0xf] %vm4032_vm10, %v4852_v45 }
0x100c   : > { %14019 = vmatpush3.bf16.msra.mxu1 %v15220_v19 }
0x100d   : > { %14020 = vmatprep.subr.bf16.mxu1 %v15223_v25 }
0x100e   : > { %v15226_v31 = vld [vmem:[#allocation3 + $0x48] ss:$12 sps:$4 sm:$0xff]  }
0x100f   : > { %6410 = vmatmul.mubr.bf16.gmra.mxu1 %v15222_v5 }
0x1010   : > { %14021 = vmatpush3.bf16.msra.mxu1 %v15224_v38  ;;  %6452 = vmatprep.mubr.bf16.mxu1 %v18133_v37  ;;  %v6308_v37 = vpop.f32.mrf.mxu0 }
0x1011   : > { %14022 = vmatprep.subr.bf16.mxu1 %v15229_v32  ;;  %v6309_v60 = vadd.f32 %v6308_v37, %v18232_v16 }
0x1012   : > { %v15228_v43 = vld [vmem:[#allocation3 + $0x4c] ss:$12 sps:$4 sm:$0xff]   ;;  %v6310_v8 = vpop.f32.mrf.mxu0 }
0x1013   : > { %6336 = vmatprep.mubr.bf16.mxu0 %v15228_v43  ;;  %v6311_v41 = vadd.f32 %v6310_v8, %v18225_v23 }
0x1014   : > { %6337 = vmatmul.mubr.bf16.gmra.mxu0 %v15226_v31  ;;  %14023 = vmatpush3.bf16.msra.mxu1 %v15230_v63  ;;  %v6312_v48 = vpop.f32.mrf.mxu0  ;;  %v16286_v63 = vld [vmem:[%s17021_s14] sm:$0xff] }
0x1015   : > { %14532 = vmatprep.mubr.bf16.mxu0 %v18184_v26 }
0x1016   : > { %v6314_v46 = vpop.f32.mrf.mxu0 }
0x1017   : > { %6453 = vmatmul.mubr.bf16.vlgmr.msra.gmra.mxu1 %v18137_v27  ;;  %v6315_v50 = vadd.f32 %v6314_v46, %v18225_v23 }
0x1018   : > { %6460 = vmatprep.mubr.bf16.mxu1 %v15201_v57 }
0x101c   : > { %14533 = vmatmul.mubr.bf16.vlgmr.msra.gmra.mxu0 %v15205_v33 }
0x101d   : > { %14536 = vmatprep.mubr.bf16.mxu0 %v15215_v30  ;;  %v6313_v30 = vadd.f32 %v6312_v48, %v18232_v16 }
0x101f   : > { %6461 = vmatmul.mubr.bf16.gmra.mxu1 %v15199_v49 }
0x1020   : > { %6468 = vmatprep.mubr.bf16.mxu1 %v15211_v7 }
0x1024   : > { %14537 = vmatmul.mubr.bf16.gmra.mxu0 %v15222_v5 }
0x1025   : > { %8733 = vmatprep.mubr.bf16.mxu0 %v20001_v28 }
0x1027   : > { %6469 = vmatmul.mubr.bf16.gmra.mxu1 %v15209_v47 }
0x1028   : > { %6476 = vmatprep.mubr.bf16.mxu1 %v15228_v43 }
0x102f   : > { %6477 = vmatmul.mubr.bf16.gmra.mxu1 %v15226_v31 }
0x10b7   : > { %v6381_v3 = vpop.f32.mrf.mxu1 }
0x10b8   : > { %v6382_v34 = vadd.f32 %v6381_v3, %v6309_v60 }
0x10b9   : > { %v6383_v51 = vpop.f32.mrf.mxu1 }
0x10ba   : > { %v6384_v0 = vadd.f32 %v6383_v51, %v6311_v41  ;;  %v18256_v31 = vadd.f32 %v16286_v63, %v6382_v34 }
0x10bb   : > { %v6385_v54 = vpop.f32.mrf.mxu1 }
0x10bc   : > { %v6318_v40 = vpop.f32.mrf.mxu0  ;;  %v18252_v19 = vadd.f32 %v16285_v36, %v6384_v0  ;;  %20100 = vst [vmem:[#allocation37_spill] sm:$0xff] %v18256_v31  ;;  %v6386_v43 = vadd.f32 %v6385_v54, %v6313_v30  ;;  %v16289_v0 = vld [vmem:[%s17021_s14 + $0x18] sm:$0xff]  ;;  %v16291_v36 = vld [vmem:[%s17021_s14 + $0x28] sm:$0xff] }
0x10bd   : > { %v6387_v27 = vpop.f32.mrf.mxu1  ;;  %v6319_v38 = vadd.f32 %v6318_v40, %v18232_v16  ;;  %v16288_v40 = vld [vmem:[%s17021_s14 + $0x10] sm:$0xff] }
0x10be   : > { %v6320_v13 = vpop.f32.mrf.mxu0  ;;  %20099 = vst [vmem:[#allocation36_spill] sm:$0xff] %v18252_v19  ;;  %v6388_v45 = vadd.f32 %v6387_v27, %v6315_v50  ;;  %v16287_v27 = vld [vmem:[%s17021_s14 + $0x20] sm:$0xff]  ;;  %v6576_v54 = vadd.f32 %v18252_v19, %v18256_v31 }
0x10bf   : > { %v6391_v29 = vpop.f32.mrf.mxu1  ;;  %v6321_v7 = vadd.f32 %v6320_v13, %v18225_v23 }
0x10c0   : > { %v6322_v58 = vpop.f32.mrf.mxu0  ;;  %v18261_v13 = vadd.f32 %v16287_v27, %v6388_v45  ;;  %v16294_v27 = vld [vmem:[%s17021_s14 + $0x40] sm:$0xff] }
0x10c1   : > { %v6393_v61 = vpop.f32.mrf.mxu1 }
0x10c2   : > { %v6324_v2 = vpop.f32.mrf.mxu0  ;;  %v6394_v3 = vadd.f32 %v6393_v61, %v6321_v7  ;;  %20101 = vst [vmem:[#allocation38_spill] sm:$0xff] %v18261_v13  ;;  %v6323_v61 = vadd.f32 %v6322_v58, %v18232_v16  ;;  %v16290_v7 = vld [vmem:[%s17021_s14 + $0x38] sm:$0xff] }
0x10c3   : > { %v18202_v1 = vpop.f32.mrf.mxu1  ;;  %v6325_v48 = vadd.f32 %v6324_v2, %v18225_v23 }
0x10c4   : > { %v18206_v59 = vpop.f32.mrf.mxu0 }
0x10c5   : > { %v18204_v21 = vpop.f32.mrf.mxu1  ;;  %v6329_v58 = vadd.f32 %v18206_v59, %v18232_v16 }
0x10c6   : > { %v6330_v22 = vpop.f32.mrf.mxu0  ;;  %v6398_v30 = vadd.f32 %v18204_v21, %v6325_v48  ;;  %v6396_v21 = vadd.f32 %v18202_v1, %v6323_v61  ;;  %v16293_v48 = vld [vmem:[%s17021_s14 + $0x50] sm:$0xff] }
0x10c7   : > { %v18208_v14 = vpop.f32.mrf.mxu1 }
0x10c8   : > { %v18216_v12 = vpop.f32.mrf.mxu0 }
0x10c9   : > { %v18210_v6 = vpop.f32.mrf.mxu1 }
0x10ca   : > { %v18222_v56 = vpop.f32.mrf.mxu0 }
0x10cb   : > { %v18212_v10 = vpop.f32.mrf.mxu1 }
0x10cd   : > { %v18214_v52 = vpop.f32.mrf.mxu1 }
0x10cf   : > { %v18218_v35 = vpop.f32.mrf.mxu1 }
0x10d1   : > { %v18220_v20 = vpop.f32.mrf.mxu1 }
0x10d3   : > { %v18227_v26 = vpop.f32.mrf.mxu1 }
0x10d4   : > { %v18229_v39 = vpop.f32.mrf.mxu0 }
0x10d5   : > { %v18234_v17 = vpop.f32.mrf.mxu1 }
0x10d6   : > { %v18236_v18 = vpop.f32.mrf.mxu0 }
0x10d7   : > { %v14024_v49 = vpop.f32.mrf.mxu1 }
0x10d8   : > { %v18239_v57 = vpop.f32.mrf.mxu0 }
0x10d9   : > { %v14025_v33 = vpop.f32.mrf.mxu1 }
0x10da   : > { %v14026_v15 = vadd.f32 %v14025_v33, %v14024_v49  ;;  %v18245_v4 = vpop.f32.mrf.mxu0  ;;  %v6392_v49 = vadd.f32 %v6391_v29, %v6319_v38  ;;  %v18270_v33 = vadd.f32 %v16289_v0, %v6386_v43 }
0x10db   : > { %v14027_v47 = vpop.f32.mrf.mxu1 }
0x10dc   : > { %v14534_v9 = vpop.f32.mrf.mxu0  ;;  %v6455_v24 = vadd.f32 %v14026_v15, %v18242_v42  ;;  %20103 = vst [vmem:[#allocation40_spill] sm:$0xff] %v18270_v33  ;;  %v6331_v15 = vadd.f32 %v6330_v22, %v18225_v23  ;;  %v6580_v38 = vadd.f32 %v18261_v13, %v18270_v33 }
0x10dd   : > { %v14028_v25 = vpop.f32.mrf.mxu1 }
0x10de   : > { %v14029_v5 = vadd.f32 %v14028_v25, %v14027_v47  ;;  %v6519_v32 = vpop.f32.mrf.mxu0  ;;  %v6404_v59 = vadd.f32 %v18210_v6, %v6331_v15  ;;  %v6402_v6 = vadd.f32 %v18208_v14, %v6329_v58  ;;  %v16296_v15 = vld [vmem:[%s17021_s14 + $0x68] sm:$0xff] }
0x10df   : > { %v6520_v37 = vadd.f32 %v6519_v32, %v6455_v24  ;;  %v14030_v8 = vpop.f32.mrf.mxu1  ;;  %v18275_v24 = vadd.f32 %v16290_v7, %v6394_v3 }
0x10e0   : > { %v14535_v51 = vpop.f32.mrf.mxu0  ;;  %v6458_v46 = vadd.f32 %v14029_v5, %v18242_v42  ;;  %v16292_v5 = vld [vmem:[%s17021_s14 + $0x30] sm:$0xff] }
0x10e1   : > { %v18264_v11 = vadd.f32 %v16288_v40, %v6520_v37  ;;  %v14031_v41 = vpop.f32.mrf.mxu1  ;;  %20104 = vst [vmem:[#allocation41_spill] sm:$0xff] %v18275_v24  ;;  %v18289_v32 = vadd.f32 %v16292_v5, %v6392_v49  ;;  %v6335_v37 = vadd.f32 %v18222_v56, %v18225_v23  ;;  %v6333_v56 = vadd.f32 %v18216_v12, %v18232_v16  ;;  %v16295_v49 = vld [vmem:[%s17021_s14 + $0x48] sm:$0xff] }
0x10e2   : > { %v14032_v60 = vadd.f32 %v14031_v41, %v14030_v8  ;;  %v6522_v2 = vpop.f32.mrf.mxu0  ;;  %v18309_v61 = vadd.f32 %v16295_v49, %v6396_v21  ;;  %v6341_v12 = vadd.f32 %v18236_v18, %v18225_v23 }
0x10e3   : > { %20102 = vst [vmem:[#allocation39_spill] sm:$0xff] %v18264_v11  ;;  %v6523_v50 = vadd.f32 %v6522_v2, %v6458_v46  ;;  %v14033_v34 = vpop.f32.mrf.mxu1  ;;  %v6577_v47 = vadd.f32 %v6576_v54, %v18264_v11  ;;  %20106 = vst [vmem:[#allocation43_spill] sm:$0xff] %v18289_v32  ;;  %v18297_v46 = vadd.f32 %v16293_v48, %v6398_v30 }
0x10e4   : > { %v6463_v29 = vadd.f32 %v14032_v60, %v18242_v42  ;;  %v18284_v22 = vpop.f32.mrf.mxu0  ;;  %20109 = vst [vmem:[#allocation46_spill] sm:$0xff] %v18309_v61 }
0x10e5   : > { %v18282_v45 = vadd.f32 %v16291_v36, %v6523_v50  ;;  %v14034_v25 = vpop.f32.mrf.mxu1  ;;  %6578 = vadd.xlane.f32.xlu0 %v6577_v47  ;;  %20107 = vst [vmem:[#allocation44_spill] sm:$0xff] %v18297_v46  ;;  %v18313_v50 = vadd.f32 %v16296_v15, %v6404_v59  ;;  %v16297_v47 = vld [vmem:[%s17021_s14 + $0x58] sm:$0xff]  ;;  %v6339_v36 = vadd.f32 %v18229_v39, %v18232_v16  ;;  %v16300_v39 = vld [vmem:[%s17021_s14 + $0x70] sm:$0xff] }
0x10e6   : > { %v6528_v63 = vadd.f32 %v14534_v9, %v6463_v29  ;;  %v14035_v43 = vadd.f32 %v14034_v25, %v14033_v34  ;;  %v6584_v9 = vadd.f32 %v18275_v24, %v18289_v32  ;;  %v6535_v41 = vpop.f32.mrf.mxu0  ;;  %v6408_v34 = vadd.f32 %v18214_v52, %v6335_v37  ;;  %v16298_v29 = vld [vmem:[%s17021_s14 + $0x60] sm:$0xff] }
0x10e7   : > { %20105 = vst [vmem:[#allocation42_spill] sm:$0xff] %v18282_v45  ;;  %v14036_v8 = vpop.f32.mrf.mxu1  ;;  %v6581_v3 = vadd.f32 %v6580_v38, %v18282_v45  ;;  %20110 = vst [vmem:[#allocation47_spill] sm:$0xff] %v18313_v50  ;;  %v18325_v58 = vadd.f32 %v16298_v29, %v6402_v6  ;;  %v6406_v52 = vadd.f32 %v18212_v10, %v6333_v56 }
0x10e8   : > { %v18300_v40 = vadd.f32 %v16294_v27, %v6528_v63  ;;  %v6466_v1 = vadd.f32 %v14035_v43, %v18242_v42  ;;  %v14539_v18 = vpop.f32.mrf.mxu0  ;;  %v16299_v63 = vld [vmem:[%s17021_s14 + $0x80] sm:$0xff]  ;;  %v6345_v10 = vadd.f32 %v18245_v4, %v18225_v23  ;;  %v16301_v27 = vld [vmem:[%s17021_s14 + $0x78] sm:$0xff] }
0x10e9   : > { %v14037_v54 = vpop.f32.mrf.mxu1  ;;  %6582 = vadd.xlane.f32.xlu1 %v6581_v3  ;;  %20112 = vst [vmem:[#allocation49_spill] sm:$0xff] %v18325_v58  ;;  %v18332_v43 = vadd.f32 %v16299_v63, %v6408_v34  ;;  %v6592_v37 = vadd.f32 %v18313_v50, %v18325_v58  ;;  %v16308_v63 = vld [vmem:[%s17021_s14 + $0xb8] sm:$0xff] }
0x10ea   : > { %20108 = vst [vmem:[#allocation45_spill] sm:$0xff] %v18300_v40  ;;  %v6531_v60 = vadd.f32 %v14535_v51, %v6466_v1  ;;  %v14038_v2 = vadd.f32 %v14037_v54, %v14036_v8  ;;  %v6585_v0 = vadd.f32 %v6584_v9, %v18300_v40  ;;  %v6588_v51 = vadd.f32 %v18297_v46, %v18309_v61  ;;  %v6538_v6 = vpop.f32.mrf.mxu0 }
0x10eb   : > { %v14039_v14 = vpop.f32.mrf.mxu1  ;;  %20113 = vst [vmem:[#allocation50_spill] sm:$0xff] %v18332_v43  ;;  %v6414_v8 = vadd.f32 %v18220_v20, %v6341_v12  ;;  %v18344_v1 = vadd.f32 %v16301_v27, %v6406_v52  ;;  %v6412_v9 = vadd.f32 %v18218_v35, %v6339_v36  ;;  %v6343_v20 = vadd.f32 %v18239_v57, %v18232_v16  ;;  %v16304_v57 = vld [vmem:[%s17021_s14 + $0x90] sm:$0xff]  ;;  %v16306_v52 = vld [vmem:[%s17021_s14 + $0xa0] sm:$0xff] }
0x10ec   : > { %v18319_v7 = vadd.f32 %v16297_v47, %v6531_v60  ;;  %v6471_v30 = vadd.f32 %v14038_v2, %v18242_v42  ;;  %6586 = vadd.xlane.f32.xlu0 %v6585_v0  ;;  %v16302_v60 = vld [vmem:[%s17021_s14 + $0x98] sm:$0xff]  ;;  %v6418_v35 = vadd.f32 %v18234_v17, %v6345_v10  ;;  %v16303_v0 = vld [vmem:[%s17021_s14 + $0x88] sm:$0xff]  ;;  %v16305_v17 = vld [vmem:[%s17021_s14 + $0xb0] sm:$0xff] }
0x10ed   : > { %v14040_v25 = vpop.f32.mrf.mxu1  ;;  %20115 = vst [vmem:[#allocation52_spill] sm:$0xff] %v18344_v1  ;;  %v6596_v49 = vadd.f32 %v18332_v43, %v18344_v1  ;;  %v18353_v2 = vadd.f32 %v16302_v60, %v6414_v8  ;;  %v18361_v34 = vadd.f32 %v16304_v57, %v6412_v9  ;;  %v6416_v12 = vadd.f32 %v18227_v26, %v6343_v20  ;;  %v15235_v10 = vld [vmem:[#allocation18 + $0x2a4] ss:$48 sps:$4 sm:$0xff]   ;;  %v15257_v27 = vld [vmem:[#allocation18 + $0x8a0] ss:$48 sps:$4 sm:$0xff]  }
0x10ee   : > { %20111 = vst [vmem:[#allocation48_spill] sm:$0xff] %v18319_v7  ;;  %v6536_v38 = vadd.f32 %v6535_v41, %v6471_v30  ;;  %v14041_v5 = vadd.f32 %v14040_v25, %v14039_v14  ;;  %v6589_v21 = vadd.f32 %v6588_v51, %v18319_v7  ;;  %v18367_v29 = vadd.f32 %v16305_v17, %v6418_v35  ;;  %v15259_v9 = vld [vmem:[#allocation18 + $0x8a4] ss:$48 sps:$4 sm:$0xff]   ;;  %v15242_v20 = vld [vmem:[#allocation18 + $0x180] ss:$48 sps:$4 sm:$0xff]  }
0x10ef   : > { %v14042_v59 = vpop.f32.mrf.mxu1  ;;  %20116 = vst [vmem:[#allocation53_spill] sm:$0xff] %v18353_v2  ;;  %20118 = vst [vmem:[#allocation55_spill] sm:$0xff] %v18361_v34  ;;  %8628 = vmatprep.subr.bf16.mxu1 %v15235_v10  ;;  %8701 = vmatprep.subr.bf16.mxu0 %v15259_v9  ;;  %v15251_v60 = vld [vmem:[#allocation18 + $0x60] ss:$48 sps:$4 sm:$0xff]   ;;  %v15256_v35 = vld [vmem:[#allocation18 + $0x4] ss:$48 sps:$4 sm:$0xff]  }
0x10f0   : > { %v18340_v3 = vadd.f32 %v16300_v39, %v6536_v38  ;;  %v6474_v48 = vadd.f32 %v14041_v5, %v18242_v42  ;;  %6590 = vadd.xlane.f32.xlu0 %v6589_v21  ;;  %20119 = vst [vmem:[#allocation56_spill] sm:$0xff] %v18367_v29  ;;  %v6600_v38 = vadd.f32 %v18353_v2, %v18361_v34  ;;  %v16307_v5 = vld [vmem:[%s17021_s14 + $0xa8] sm:$0xff]  ;;  %v15260_v57 = vld [vmem:[#allocation18 + $0x5a0] ss:$48 sps:$4 sm:$0xff]  }
0x10f1   : > { %v14043_v56 = vpop.f32.mrf.mxu1  ;;  %v18376_v21 = vadd.f32 %v16307_v5, %v6416_v12  ;;  %v15238_v39 = vld [vmem:[#allocation18 + $0x244] ss:$48 sps:$4 sm:$0xff]   ;;  %8702 = vmatpush1.bf16.msra.mxu0 %v15257_v27 }
0x10f2   : > { %20114 = vst [vmem:[#allocation51_spill] sm:$0xff] %v18340_v3  ;;  %v6539_v23 = vadd.f32 %v6538_v6, %v6474_v48  ;;  %v14044_v4 = vadd.f32 %v14043_v56, %v14042_v59  ;;  %v6593_v41 = vadd.f32 %v6592_v37, %v18340_v3  ;;  %v15236_v48 = vld [vmem:[#allocation18 + $0x240] ss:$48 sps:$4 sm:$0xff]   ;;  %v15244_v56 = vld [vmem:[#allocation18 + $0x184] ss:$48 sps:$4 sm:$0xff]  }
0x10f3   : > { %v14045_v54 = vpop.f32.mrf.mxu1  ;;  %20121 = vst [vmem:[#allocation58_spill] sm:$0xff] %v18376_v21  ;;  %v6604_v37 = vadd.f32 %v18367_v29, %v18376_v21  ;;  %v15239_v6 = vld [vmem:[#allocation18 + $0x1e0] ss:$48 sps:$4 sm:$0xff]  }
0x10f4   : > { %v18357_v15 = vadd.f32 %v16303_v0, %v6539_v23  ;;  %v6479_v16 = vadd.f32 %v14044_v4, %v18242_v42  ;;  %6594 = vadd.xlane.f32.xlu1 %v6593_v41  ;;  %v15247_v23 = vld [vmem:[#allocation18 + $0x124] ss:$48 sps:$4 sm:$0xff]   ;;  %v15245_v4 = vld [vmem:[#allocation18 + $0x120] ss:$48 sps:$4 sm:$0xff]  }
0x10f5   : > { %v14046_v14 = vpop.f32.mrf.mxu1  ;;  %v15250_v41 = vld [vmem:[#allocation18 + $0xc4] ss:$48 sps:$4 sm:$0xff]   ;;  %v15254_v0 = vld [vmem:[#allocation18] ss:$48 sps:$4 sm:$0xff]  }
0x10f6   : > { %20117 = vst [vmem:[#allocation54_spill] sm:$0xff] %v18357_v15  ;;  %v6544_v47 = vadd.f32 %v18284_v22, %v6479_v16  ;;  %v14047_v30 = vadd.f32 %v14046_v14, %v14045_v54  ;;  %v6597_v51 = vadd.f32 %v6596_v49, %v18357_v15  ;;  %v15248_v54 = vld [vmem:[#allocation18 + $0xc0] ss:$48 sps:$4 sm:$0xff]   ;;  %v15253_v49 = vld [vmem:[#allocation18 + $0x64] ss:$48 sps:$4 sm:$0xff]  }
0x10f7   : > { %v15262_v16 = vld [vmem:[#allocation18 + $0x5a4] ss:$48 sps:$4 sm:$0xff]  }
0x10f8   : > { %v18370_v36 = vadd.f32 %v16306_v52, %v6544_v47  ;;  %v6482_v25 = vadd.f32 %v14047_v30, %v18242_v42  ;;  %6598 = vadd.xlane.f32.xlu0 %v6597_v51  ;;  %v15233_v42 = vld [vmem:[#allocation18 + $0x2a0] ss:$48 sps:$4 sm:$0xff]  }
0x10f9   : > { %8629 = vmatpush1.bf16.msra.mxu1 %v15233_v42 }
0x10fa   : > { %20120 = vst [vmem:[#allocation57_spill] sm:$0xff] %v18370_v36  ;;  %v6547_v26 = vadd.f32 %v14539_v18, %v6482_v25  ;;  %v6601_v22 = vadd.f32 %v6600_v38, %v18370_v36  ;;  %8630 = vmatprep.subr.bf16.mxu1 %v15238_v39  ;;  %v15241_v18 = vld [vmem:[#allocation18 + $0x1e4] ss:$48 sps:$4 sm:$0xff]  }
0x10fc   : > { %v18380_v59 = vadd.f32 %v16308_v63, %v6547_v26  ;;  %6602 = vadd.xlane.f32.xlu1 %v6601_v22 }
0x10fd   : > { %8631 = vmatpush1.bf16.msra.mxu1 %v15236_v48 }
0x10fe   : > { %20122 = vst [vmem:[#allocation59_spill] sm:$0xff] %v18380_v59  ;;  %v6605_v8 = vadd.f32 %v6604_v37, %v18380_v59  ;;  %8632 = vmatprep.subr.bf16.mxu1 %v15241_v18 }
0x1100   : > { %6606 = vadd.xlane.f32.xlu0 %v6605_v8 }
0x1101   : > { %8633 = vmatpush1.bf16.msra.mxu1 %v15239_v6 }
0x1102   : > { %8634 = vmatprep.subr.bf16.mxu1 %v15244_v56 }
0x1105   : > { %8635 = vmatpush1.bf16.msra.mxu1 %v15242_v20 }
0x1106   : > { %8636 = vmatprep.subr.bf16.mxu1 %v15247_v23 }
0x1109   : > { %8637 = vmatpush1.bf16.msra.mxu1 %v15245_v4 }
0x110a   : > { %8638 = vmatprep.subr.bf16.mxu1 %v15250_v41 }
0x110d   : > { %8639 = vmatpush1.bf16.msra.mxu1 %v15248_v54 }
0x110e   : > { %8640 = vmatprep.subr.bf16.mxu1 %v15253_v49 }
0x1111   : > { %8641 = vmatpush1.bf16.msra.mxu1 %v15251_v60 }
0x1112   : > { %8642 = vmatprep.subr.bf16.mxu1 %v15256_v35 }
0x1115   : > { %8643 = vmatpush1.bf16.msra.mxu1 %v15254_v0 }
0x1116   : > { %8644 = vmatprep.subr.bf16.mxu1 %v15262_v16 }
0x1119   : > { %8645 = vmatpush2.bf16.msra.mxu1 %v15260_v57 }
0x116e   : > { %v6579_v14 = vpop.xlane.xlu0 %6578 }
0x116f   : > { %v6608_v12 = vmul.f32 0.0026041667, %v6579_v14 }
0x1171   : > { %v18386_v47 = vsub.f32 %v18256_v31, %v6608_v12  ;;  %v18389_v30 = vsub.f32 %v18252_v19, %v6608_v12  ;;  %v18392_v51 = vsub.f32 %v18264_v11, %v6608_v12  ;;  %v15701_v31 = vld [vmem:[#allocation21 + $0x1f8] ss:$12 sps:$4 sm:$0xff]  }
0x1172   : > { %v6583_v17 = vpop.xlane.xlu1 %6582 }
0x1173   : > { %v6640_v52 = vmul.f32 %v18386_v47, %v18386_v47  ;;  %v6641_v25 = vmul.f32 %v18389_v30, %v18389_v30  ;;  %v6609_v38 = vmul.f32 0.0026041667, %v6583_v17  ;;  %v6642_v5 = vmul.f32 %v18392_v51, %v18392_v51 }
0x1175   : > { %v18401_v26 = vsub.f32 %v18270_v33, %v6609_v38  ;;  %v18404_v22 = vsub.f32 %v18261_v13, %v6609_v38  ;;  %v18407_v63 = vsub.f32 %v18282_v45, %v6609_v38  ;;  %v6587_v37 = vpop.xlane.xlu0 %6586  ;;  %v6664_v8 = vadd.f32 %v6641_v25, %v6640_v52  ;;  %v15706_v33 = vld [vmem:[#allocation21 + $0x13c] ss:$12 sps:$4 sm:$0xff]  }
0x1176   : > { %v6610_v42 = vmul.f32 0.0026041667, %v6587_v37 }
0x1177   : > { %v6643_v10 = vmul.f32 %v18401_v26, %v18401_v26  ;;  %v6644_v39 = vmul.f32 %v18404_v22, %v18404_v22  ;;  %v6665_v48 = vadd.f32 %v6664_v8, %v6642_v5  ;;  %v6645_v56 = vmul.f32 %v18407_v63, %v18407_v63 }
0x1178   : > { %v18414_v18 = vsub.f32 %v18289_v32, %v6610_v42  ;;  %v18417_v27 = vsub.f32 %v18275_v24, %v6610_v42  ;;  %v18420_v9 = vsub.f32 %v18300_v40, %v6610_v42  ;;  %v15280_v40 = vld [vmem:[#allocation18 + $0x484] ss:$48 sps:$4 sm:$0xff]  }
0x1179   : > { %v6591_v6 = vpop.xlane.xlu0 %6590  ;;  %6666 = vadd.xlane.f32.xlu1 %v6665_v48  ;;  %v6668_v20 = vadd.f32 %v6644_v39, %v6643_v10 }
0x117a   : > { %v6646_v23 = vmul.f32 %v18414_v18, %v18414_v18  ;;  %v6647_v4 = vmul.f32 %v18417_v27, %v18417_v27  ;;  %v6611_v41 = vmul.f32 0.0026041667, %v6591_v6  ;;  %v6648_v49 = vmul.f32 %v18420_v9, %v18420_v9 }
0x117b   : > { %v6669_v54 = vadd.f32 %v6668_v20, %v6645_v56 }
0x117c   : > { %v18431_v60 = vsub.f32 %v18309_v61, %v6611_v41  ;;  %v18434_v35 = vsub.f32 %v18297_v46, %v6611_v41  ;;  %v18437_v0 = vsub.f32 %v18319_v7, %v6611_v41  ;;  %v6672_v16 = vadd.f32 %v6647_v4, %v6646_v23  ;;  %v15278_v7 = vld [vmem:[#allocation18 + $0x480] ss:$48 sps:$4 sm:$0xff]  }
0x117d   : > { %v6595_v57 = vpop.xlane.xlu1 %6594  ;;  %6670 = vadd.xlane.f32.xlu0 %v6669_v54 }
0x117e   : > { %v6649_v14 = vmul.f32 %v18431_v60, %v18431_v60  ;;  %v6650_v12 = vmul.f32 %v18434_v35, %v18434_v35  ;;  %v6612_v17 = vmul.f32 0.0026041667, %v6595_v57  ;;  %v6673_v52 = vadd.f32 %v6672_v16, %v6648_v49 }
0x117f   : > { %v6651_v25 = vmul.f32 %v18437_v0, %v18437_v0 }
0x1180   : > { %v18446_v38 = vsub.f32 %v18325_v58, %v6612_v17  ;;  %v18449_v5 = vsub.f32 %v18313_v50, %v6612_v17  ;;  %v18452_v37 = vsub.f32 %v18340_v3, %v6612_v17  ;;  %6674 = vadd.xlane.f32.xlu1 %v6673_v52  ;;  %v6676_v8 = vadd.f32 %v6650_v12, %v6649_v14  ;;  %v15263_v17 = vld [vmem:[#allocation18 + $0x840] ss:$48 sps:$4 sm:$0xff]   ;;  %v15265_v52 = vld [vmem:[#allocation18 + $0x844] ss:$48 sps:$4 sm:$0xff]  }
0x1181   : > { %v6599_v42 = vpop.xlane.xlu0 %6598  ;;  %8703 = vmatprep.subr.bf16.mxu0 %v15265_v52  ;;  %v15275_v3 = vld [vmem:[#allocation18 + $0x780] ss:$48 sps:$4 sm:$0xff]  }
0x1182   : > { %v6652_v10 = vmul.f32 %v18446_v38, %v18446_v38  ;;  %v6653_v39 = vmul.f32 %v18449_v5, %v18449_v5  ;;  %v6613_v48 = vmul.f32 0.0026041667, %v6599_v42  ;;  %v6677_v6 = vadd.f32 %v6676_v8, %v6651_v25  ;;  %v15266_v25 = vld [vmem:[#allocation18 + $0x540] ss:$48 sps:$4 sm:$0xff]   ;;  %8704 = vmatpush1.bf16.msra.mxu0 %v15263_v17 }
0x1183   : > { %v6654_v56 = vmul.f32 %v18452_v37, %v18452_v37 }
0x1184   : > { %v18461_v20 = vsub.f32 %v18344_v1, %v6613_v48  ;;  %v18464_v23 = vsub.f32 %v18332_v43, %v6613_v48  ;;  %v18467_v4 = vsub.f32 %v18357_v15, %v6613_v48  ;;  %6678 = vadd.xlane.f32.xlu0 %v6677_v6  ;;  %v6680_v41 = vadd.f32 %v6653_v39, %v6652_v10  ;;  %v15268_v48 = vld [vmem:[#allocation18 + $0x544] ss:$48 sps:$4 sm:$0xff]  }
0x1185   : > { %v6603_v54 = vpop.xlane.xlu1 %6602  ;;  %8646 = vmatprep.subr.bf16.mxu1 %v15268_v48 }
0x1186   : > { %v6655_v49 = vmul.f32 %v18461_v20, %v18461_v20  ;;  %v6656_v16 = vmul.f32 %v18464_v23, %v18464_v23  ;;  %v6614_v57 = vmul.f32 0.0026041667, %v6603_v54  ;;  %v6681_v14 = vadd.f32 %v6680_v41, %v6654_v56  ;;  %8647 = vmatpush2.bf16.msra.mxu1 %v15266_v25 }
0x1187   : > { %v6657_v12 = vmul.f32 %v18467_v4, %v18467_v4 }
0x1188   : > { %v18476_v8 = vsub.f32 %v18361_v34, %v6614_v57  ;;  %v18479_v42 = vsub.f32 %v18353_v2, %v6614_v57  ;;  %v18482_v10 = vsub.f32 %v18370_v36, %v6614_v57  ;;  %6682 = vadd.xlane.f32.xlu1 %v6681_v14  ;;  %v6684_v39 = vadd.f32 %v6656_v16, %v6655_v49  ;;  %v15269_v57 = vld [vmem:[#allocation18 + $0x7e0] ss:$48 sps:$4 sm:$0xff]   ;;  %v15271_v14 = vld [vmem:[#allocation18 + $0x7e4] ss:$48 sps:$4 sm:$0xff]   ;;  %v15655_v2 = vld [vmem:[#allocation18 + $0x50c] ss:$48 sps:$4 sm:$0xff]  }
0x1189   : > { %v6607_v6 = vpop.xlane.xlu0 %6606  ;;  %v15272_v49 = vld [vmem:[#allocation18 + $0x4e0] ss:$48 sps:$4 sm:$0xff]   ;;  %8705 = vmatprep.subr.bf16.mxu0 %v15271_v14 }
0x118a   : > { %v6658_v56 = vmul.f32 %v18476_v8, %v18476_v8  ;;  %v6659_v41 = vmul.f32 %v18479_v42, %v18479_v42  ;;  %v6615_v54 = vmul.f32 0.0026041667, %v6607_v6  ;;  %v6685_v28 = vadd.f32 %v6684_v39, %v6657_v12  ;;  %v15274_v39 = vld [vmem:[#allocation18 + $0x4e4] ss:$48 sps:$4 sm:$0xff]   ;;  %8706 = vmatpush1.bf16.msra.mxu0 %v15269_v57  ;;  %v15281_v14 = vld [vmem:[#allocation18 + $0x720] ss:$48 sps:$4 sm:$0xff]  }
0x118b   : > { %v6660_v15 = vmul.f32 %v18482_v10, %v18482_v10  ;;  %8648 = vmatprep.subr.bf16.mxu1 %v15274_v39  ;;  %v15277_v6 = vld [vmem:[#allocation18 + $0x784] ss:$48 sps:$4 sm:$0xff]   ;;  %v15290_v39 = vld [vmem:[#allocation18 + $0x3c0] ss:$48 sps:$4 sm:$0xff]  }
0x118c   : > { %v18491_v16 = vsub.f32 %v18376_v21, %v6615_v54  ;;  %v18494_v52 = vsub.f32 %v18367_v29, %v6615_v54  ;;  %v18497_v36 = vsub.f32 %v18380_v59, %v6615_v54  ;;  %6686 = vadd.xlane.f32.xlu0 %v6685_v28  ;;  %v6688_v12 = vadd.f32 %v6659_v41, %v6658_v56  ;;  %v15283_v54 = vld [vmem:[#allocation18 + $0x724] ss:$48 sps:$4 sm:$0xff]   ;;  %v15308_v29 = vld [vmem:[#allocation18 + $0x8a8] ss:$48 sps:$4 sm:$0xff]  }
0x118d   : > { %8649 = vmatpush2.bf16.msra.mxu1 %v15272_v49  ;;  %8707 = vmatprep.subr.bf16.mxu0 %v15277_v6  ;;  %v15289_v57 = vld [vmem:[#allocation18 + $0x6c4] ss:$48 sps:$4 sm:$0xff]   ;;  %v15287_v49 = vld [vmem:[#allocation18 + $0x6c0] ss:$48 sps:$4 sm:$0xff]  }
0x118e   : > { %v6661_v17 = vmul.f32 %v18491_v16, %v18491_v16  ;;  %v6662_v25 = vmul.f32 %v18494_v52, %v18494_v52  ;;  %v6689_v48 = vadd.f32 %v6688_v12, %v6660_v15  ;;  %v6663_v28 = vmul.f32 %v18497_v36, %v18497_v36  ;;  %8650 = vmatprep.subr.bf16.mxu1 %v15280_v40  ;;  %v15284_v15 = vld [vmem:[#allocation18 + $0x420] ss:$48 sps:$4 sm:$0xff]   ;;  %v15286_v12 = vld [vmem:[#allocation18 + $0x424] ss:$48 sps:$4 sm:$0xff]  }
0x118f   : > { %8708 = vmatpush1.bf16.msra.mxu0 %v15275_v3  ;;  %v15293_v40 = vld [vmem:[#allocation18 + $0x660] ss:$48 sps:$4 sm:$0xff]  }
0x1190   : > { %6690 = vadd.xlane.f32.xlu1 %v6689_v48  ;;  %v6692_v56 = vadd.f32 %v6662_v25, %v6661_v17  ;;  %8709 = vmatprep.subr.bf16.mxu0 %v15283_v54  ;;  %v15292_v48 = vld [vmem:[#allocation18 + $0x3c4] ss:$48 sps:$4 sm:$0xff]   ;;  %v15296_v3 = vld [vmem:[#allocation18 + $0x360] ss:$48 sps:$4 sm:$0xff]   ;;  %v15310_v54 = vld [vmem:[#allocation18 + $0x8ac] ss:$48 sps:$4 sm:$0xff]  }
0x1191   : > { %8651 = vmatpush2.bf16.msra.mxu1 %v15278_v7  ;;  %v15295_v17 = vld [vmem:[#allocation18 + $0x664] ss:$48 sps:$4 sm:$0xff]   ;;  %v15299_v6 = vld [vmem:[#allocation18 + $0x600] ss:$48 sps:$4 sm:$0xff]  }
0x1192   : > { %v6693_v41 = vadd.f32 %v6692_v56, %v6663_v28  ;;  %8652 = vmatprep.subr.bf16.mxu1 %v15286_v12  ;;  %v15298_v7 = vld [vmem:[#allocation18 + $0x364] ss:$48 sps:$4 sm:$0xff]   ;;  %v15302_v28 = vld [vmem:[#allocation18 + $0x300] ss:$48 sps:$4 sm:$0xff]  }
0x1193   : > { %8710 = vmatpush1.bf16.msra.mxu0 %v15281_v14  ;;  %v15301_v25 = vld [vmem:[#allocation18 + $0x604] ss:$48 sps:$4 sm:$0xff]  }
0x1194   : > { %6694 = vadd.xlane.f32.xlu0 %v6693_v41  ;;  %8711 = vmatprep.subr.bf16.mxu0 %v15289_v57  ;;  %v15304_v56 = vld [vmem:[#allocation18 + $0x304] ss:$48 sps:$4 sm:$0xff]   ;;  %v15307_v41 = vld [vmem:[#allocation18 + $0x2ac] ss:$48 sps:$4 sm:$0xff]  }
0x1195   : > { %8653 = vmatpush2.bf16.msra.mxu1 %v15284_v15 }
0x1196   : > { %8654 = vmatprep.subr.bf16.mxu1 %v15292_v48 }
0x1197   : > { %8712 = vmatpush1.bf16.msra.mxu0 %v15287_v49 }
0x1198   : > { %8713 = vmatprep.subr.bf16.mxu0 %v15295_v17 }
0x1199   : > { %8655 = vmatpush2.bf16.msra.mxu1 %v15290_v39 }
0x119a   : > { %8656 = vmatprep.subr.bf16.mxu1 %v15298_v7 }
0x119b   : > { %8714 = vmatpush1.bf16.msra.mxu0 %v15293_v40 }
0x119c   : > { %8715 = vmatprep.subr.bf16.mxu0 %v15301_v25 }
0x119d   : > { %8657 = vmatpush2.bf16.msra.mxu1 %v15296_v3 }
0x119e   : > { %8658 = vmatprep.subr.bf16.mxu1 %v15304_v56 }
0x119f   : > { %8716 = vmatpush1.bf16.msra.mxu0 %v15299_v6  ;;  %v6574_v6 = vld [vmem:[#allocation15] sm:$0x7] }
0x11a0   : > { %8774 = vmatprep.subr.bf16.mxu0 %v15307_v41  ;;  %v18506_v41 = vrot.slane %v6574_v6, %v17236_v53 }
0x11a1   : > { %8659 = vmatpush2.bf16.msra.mxu1 %v15302_v28 }
0x11a2   : > { %8847 = vmatprep.subr.bf16.mxu1 %v15310_v54 }
0x1202   : > { %v6667_v14 = vpop.xlane.xlu1 %6666 }
0x1203   : > { %v6696_v15 = vmul.f32 0.0026041667, %v6667_v14 }
0x1205   : > { %v6704_v12 = vadd.f32 1e-05, %v6696_v15  ;;  %v6575_v15 = vld [vmem:[#allocation16] sm:$0x7] }
0x1206   : > { %v6671_v57 = vpop.xlane.xlu0 %6670 }
0x1207   : > { %16257 = vrsqrt.f32 %v6704_v12  ;;  %v6697_v49 = vmul.f32 0.0026041667, %v6671_v57  ;;  %v18509_v12 = vrot.slane %v6574_v6, %v17239_v55 }
0x1209   : > { %v6705_v39 = vadd.f32 1e-05, %v6697_v49  ;;  %v6675_v48 = vpop.xlane.xlu1 %6674 }
0x120a   : > { %v6698_v17 = vmul.f32 0.0026041667, %v6675_v48 }
0x120b   : > { %16259 = vrsqrt.f32 %v6705_v39 }
0x120c   : > { %v6706_v40 = vadd.f32 1e-05, %v6698_v17  ;;  %v18515_v17 = vrot.slane %v6574_v6, %v17242_v62 }
0x120d   : > { %v6679_v3 = vpop.xlane.xlu0 %6678 }
0x120e   : > { %16261 = vrsqrt.f32 %v6706_v40  ;;  %v6699_v7 = vmul.f32 0.0026041667, %v6679_v3 }
0x1210   : > { %v6707_v25 = vadd.f32 1e-05, %v6699_v7  ;;  %v18519_v7 = vrot.slane %v6575_v15, %v17236_v53 }
0x1211   : > { %v6683_v28 = vpop.xlane.xlu1 %6682 }
0x1212   : > { %16263 = vrsqrt.f32 %v6707_v25  ;;  %v6700_v56 = vmul.f32 0.0026041667, %v6683_v28 }
0x1214   : > { %v16258_v54 = vpop.eup %16257  ;;  %v6708_v14 = vadd.f32 1e-05, %v6700_v56 }
0x1215   : > { %v6687_v57 = vpop.xlane.xlu0 %6686  ;;  %v6721_v49 = vmul.f32 %v16258_v54, %v18389_v30  ;;  %v6722_v39 = vmul.f32 %v16258_v54, %v18392_v51  ;;  %v6720_v48 = vmul.f32 %v16258_v54, %v18386_v47  ;;  %v18523_v30 = vrot.slane %v6575_v15, %v17239_v55 }
0x1216   : > { %16265 = vrsqrt.f32 %v6708_v14  ;;  %v6701_v40 = vmul.f32 0.0026041667, %v6687_v57  ;;  %v18529_v14 = vrot.slane %v6575_v15, %v17242_v62 }
0x1217   : > { %v6761_v3 = vmul.f32 %v18506_v41, %v6721_v49  ;;  %v6762_v56 = vmul.f32 %v18509_v12, %v6722_v39  ;;  %v6760_v54 = vmul.f32 %v18515_v17, %v6720_v48 }
0x1218   : > { %v16260_v25 = vpop.eup %16259  ;;  %v6709_v28 = vadd.f32 1e-05, %v6701_v40 }
0x1219   : > { %v6691_v51 = vpop.xlane.xlu1 %6690  ;;  %v6724_v47 = vmul.f32 %v16260_v25, %v18404_v22  ;;  %v6725_v6 = vmul.f32 %v16260_v25, %v18407_v63  ;;  %v6723_v49 = vmul.f32 %v16260_v25, %v18401_v26  ;;  %v6801_v59 = vadd.f32 %v18519_v7, %v6761_v3 }
0x121a   : > { %16267 = vrsqrt.f32 %v6709_v28  ;;  %v6702_v57 = vmul.f32 0.0026041667, %v6691_v51  ;;  %v6802_v22 = vadd.f32 %v18523_v30, %v6762_v56  ;;  %v6800_v26 = vadd.f32 %v18529_v14, %v6760_v54 }
0x121b   : > { %v16262_v40 = vpop.eup %16261  ;;  %v6764_v39 = vmul.f32 %v18506_v41, %v6724_v47  ;;  %v6765_v45 = vmul.f32 %v18509_v12, %v6725_v6  ;;  %v6763_v63 = vmul.f32 %v18515_v17, %v6723_v49  ;;  %v15305_v47 = vld [vmem:[#allocation18 + $0x2a8] ss:$48 sps:$4 sm:$0xff]  }
0x121c   : > { %v6710_v11 = vadd.f32 1e-05, %v6702_v57  ;;  %v6727_v48 = vmul.f32 %v16262_v40, %v18417_v27  ;;  %v6728_v25 = vmul.f32 %v16262_v40, %v18420_v9  ;;  %v6726_v56 = vmul.f32 %v16262_v40, %v18414_v18  ;;  %v15316_v9 = vld [vmem:[#allocation18 + $0x84c] ss:$48 sps:$4 sm:$0xff]  }
0x121d   : > { %v6695_v15 = vpop.xlane.xlu0 %6694  ;;  %v6804_v28 = vadd.f32 %v18519_v7, %v6764_v39  ;;  %v6805_v51 = vadd.f32 %v18523_v30, %v6765_v45  ;;  %v6803_v6 = vadd.f32 %v18529_v14, %v6763_v63  ;;  %v15313_v39 = vld [vmem:[#allocation18 + $0x24c] ss:$48 sps:$4 sm:$0xff]  }
0x121e   : > { %16269 = vrsqrt.f32 %v6710_v11  ;;  %v6703_v3 = vmul.f32 0.0026041667, %v6695_v15  ;;  %v6767_v45 = vmul.f32 %v18506_v41, %v6727_v48  ;;  %v6766_v48 = vmul.f32 %v18515_v17, %v6726_v56  ;;  %v15314_v15 = vld [vmem:[#allocation18 + $0x848] ss:$48 sps:$4 sm:$0xff]  }
0x121f   : > { %v16264_v57 = vpop.eup %16263  ;;  %v18544_v49 = vpack.c.bf16 %v6804_v28, %v6801_v59  ;;  %v18546_v27 = vpack.c.bf16 %v6805_v51, %v6802_v22  ;;  %v18549_v54 = vpack.c.bf16 %v6803_v6, %v6800_v26  ;;  %v6768_v59 = vmul.f32 %v18509_v12, %v6728_v25  ;;  %v15311_v22 = vld [vmem:[#allocation18 + $0x248] ss:$48 sps:$4 sm:$0xff]   ;;  %v15322_v25 = vld [vmem:[#allocation18 + $0x7ec] ss:$48 sps:$4 sm:$0xff]  }
0x1220   : > { %v6711_v21 = vadd.f32 1e-05, %v6703_v3  ;;  %v6730_v11 = vmul.f32 %v16264_v57, %v18434_v35  ;;  %v6731_v18 = vmul.f32 %v16264_v57, %v18437_v0  ;;  %v6729_v40 = vmul.f32 %v16264_v57, %v18431_v60  ;;  %v15319_v0 = vld [vmem:[#allocation18 + $0x1ec] ss:$48 sps:$4 sm:$0xff]  }
0x1221   : > { %8660 = vmatprep.mubr.bf16.mxu1 %v18544_v49  ;;  %8734 = vmatmul.mubr.bf16.vlgmr.msra.gmra.mxu0 %v18546_v27  ;;  %v6807_v28 = vadd.f32 %v18519_v7, %v6767_v45  ;;  %v20123_v26 = vmov 0   ;;  %v15317_v45 = vld [vmem:[#allocation18 + $0x1e8] ss:$48 sps:$4 sm:$0xff]  }
0x1222   : > { %16271 = vrsqrt.f32 %v6711_v21  ;;  %8775 = vmatpush1.bf16.msra.mxu0 %v15305_v47  ;;  %8661 = vmatmul.mubr.bf16.vlgmr.msra.gmra.mxu1 %v18549_v54  ;;  %v6770_v63 = vmul.f32 %v18506_v41, %v6730_v11  ;;  %v6771_v51 = vmul.f32 %v18509_v12, %v6731_v18  ;;  %v6769_v60 = vmul.f32 %v18515_v17, %v6729_v40  ;;  %v15325_v18 = vld [vmem:[#allocation18 + $0x18c] ss:$48 sps:$4 sm:$0xff]  }
0x1223   : > { %v16266_v35 = vpop.eup %16265  ;;  %8848 = vmatpush1.bf16.msra.mxu1 %v15308_v29  ;;  %8776 = vmatprep.subr.bf16.mxu0 %v15313_v39  ;;  %v6808_v29 = vadd.f32 %v18523_v30, %v6768_v59 }
0x1224   : > { %8849 = vmatprep.subr.bf16.mxu1 %v15316_v9  ;;  %v6810_v21 = vadd.f32 %v18519_v7, %v6770_v63  ;;  %8743 = vmatprep.mubr.bf16.mxu0 %v20123_v26  ;;  %v6733_v3 = vmul.f32 %v16266_v35, %v18449_v5  ;;  %v6734_v47 = vmul.f32 %v16266_v35, %v18452_v37  ;;  %v15320_v37 = vld [vmem:[#allocation18 + $0x7e8] ss:$48 sps:$4 sm:$0xff]  }
0x1225   : > { %v6811_v6 = vadd.f32 %v18523_v30, %v6771_v51  ;;  %v6809_v56 = vadd.f32 %v18529_v14, %v6769_v60  ;;  %v6732_v57 = vmul.f32 %v16266_v35, %v18446_v38  ;;  %v6806_v9 = vadd.f32 %v18529_v14, %v6766_v48 }
0x1226   : > { %8777 = vmatpush1.bf16.msra.mxu0 %v15311_v22  ;;  %v18571_v39 = vpack.c.bf16 %v6810_v21, %v6807_v28  ;;  %v6773_v59 = vmul.f32 %v18506_v41, %v6733_v3  ;;  %v6774_v40 = vmul.f32 %v18509_v12, %v6734_v47  ;;  %v15328_v22 = vld [vmem:[#allocation18 + $0x78c] ss:$48 sps:$4 sm:$0xff]   ;;  %v15323_v28 = vld [vmem:[#allocation18 + $0x188] ss:$48 sps:$4 sm:$0xff]  }
0x1227   : > { %v16268_v11 = vpop.eup %16267  ;;  %8850 = vmatpush1.bf16.msra.mxu1 %v15314_v15  ;;  %8778 = vmatprep.subr.bf16.mxu0 %v15319_v0  ;;  %v18574_v5 = vpack.c.bf16 %v6811_v6, %v6808_v29  ;;  %v18579_v38 = vpack.c.bf16 %v6809_v56, %v6806_v9  ;;  %v6772_v15 = vmul.f32 %v18515_v17, %v6732_v57  ;;  %v15331_v21 = vld [vmem:[#allocation18 + $0x12c] ss:$48 sps:$4 sm:$0xff]  }
0x1228   : > { %8670 = vmatprep.mubr.bf16.mxu1 %v18571_v39  ;;  %8851 = vmatprep.subr.bf16.mxu1 %v15322_v25  ;;  %v6736_v63 = vmul.f32 %v16268_v11, %v18464_v23  ;;  %v6737_v48 = vmul.f32 %v16268_v11, %v18467_v4  ;;  %v6735_v35 = vmul.f32 %v16268_v11, %v18461_v20  ;;  %v15326_v23 = vld [vmem:[#allocation18 + $0x788] ss:$48 sps:$4 sm:$0xff]   ;;  %v15334_v29 = vld [vmem:[#allocation18 + $0x72c] ss:$48 sps:$4 sm:$0xff]  }
0x1229   : > { %8744 = vmatmul.mubr.bf16.gmra.mxu0 %v18574_v5  ;;  %v6813_v4 = vadd.f32 %v18519_v7, %v6773_v59  ;;  %v6814_v25 = vadd.f32 %v18523_v30, %v6774_v40  ;;  %v6812_v56 = vadd.f32 %v18529_v14, %v6772_v15  ;;  %v15329_v11 = vld [vmem:[#allocation18 + $0x128] ss:$48 sps:$4 sm:$0xff]  }
0x122a   : > { %8779 = vmatpush1.bf16.msra.mxu0 %v15317_v45  ;;  %8671 = vmatmul.mubr.bf16.gmra.mxu1 %v18579_v38  ;;  %v6776_v0 = vmul.f32 %v18506_v41, %v6736_v63  ;;  %v6777_v51 = vmul.f32 %v18509_v12, %v6737_v48  ;;  %v6775_v20 = vmul.f32 %v18515_v17, %v6735_v35  ;;  %v15332_v40 = vld [vmem:[#allocation18 + $0x728] ss:$48 sps:$4 sm:$0xff]  }
0x122b   : > { %v16270_v60 = vpop.eup %16269  ;;  %8852 = vmatpush1.bf16.msra.mxu1 %v15320_v37  ;;  %8780 = vmatprep.subr.bf16.mxu0 %v15325_v18 }
0x122c   : > { %8853 = vmatprep.subr.bf16.mxu1 %v15328_v22  ;;  %v6816_v3 = vadd.f32 %v18519_v7, %v6776_v0  ;;  %8753 = vmatprep.mubr.bf16.mxu0 %v20123_v26  ;;  %v6817_v47 = vadd.f32 %v18523_v30, %v6777_v51  ;;  %v6739_v6 = vmul.f32 %v16270_v60, %v18479_v42  ;;  %v15337_v42 = vld [vmem:[#allocation18 + $0xcc] ss:$48 sps:$4 sm:$0xff]  }
0x122d   : > { %v6815_v57 = vadd.f32 %v18529_v14, %v6775_v20  ;;  %v6740_v45 = vmul.f32 %v16270_v60, %v18482_v10  ;;  %v6738_v18 = vmul.f32 %v16270_v60, %v18476_v8  ;;  %v15340_v10 = vld [vmem:[#allocation18 + $0x6cc] ss:$48 sps:$4 sm:$0xff]  }
0x122e   : > { %8781 = vmatpush1.bf16.msra.mxu0 %v15323_v28  ;;  %v18599_v9 = vpack.c.bf16 %v6816_v3, %v6813_v4  ;;  %v18601_v37 = vpack.c.bf16 %v6817_v47, %v6814_v25  ;;  %v6779_v63 = vmul.f32 %v18506_v41, %v6739_v6  ;;  %v15335_v28 = vld [vmem:[#allocation18 + $0xc8] ss:$48 sps:$4 sm:$0xff]   ;;  %v15352_v6 = vld [vmem:[#allocation18 + $0x60c] ss:$48 sps:$4 sm:$0xff]  }
0x122f   : > { %v16272_v59 = vpop.eup %16271  ;;  %8854 = vmatpush1.bf16.msra.mxu1 %v15326_v23  ;;  %8782 = vmatprep.subr.bf16.mxu0 %v15331_v21  ;;  %v18604_v22 = vpack.c.bf16 %v6815_v57, %v6812_v56  ;;  %v6780_v15 = vmul.f32 %v18509_v12, %v6740_v45  ;;  %v6778_v60 = vmul.f32 %v18515_v17, %v6738_v18  ;;  %v15343_v23 = vld [vmem:[#allocation18 + $0x6c] ss:$48 sps:$4 sm:$0xff]   ;;  %v15341_v3 = vld [vmem:[#allocation18 + $0x68] ss:$48 sps:$4 sm:$0xff]   ;;  %v15358_v45 = vld [vmem:[#allocation18 + $0x2b4] ss:$48 sps:$4 sm:$0xff]  }
0x1230   : > { %8680 = vmatprep.mubr.bf16.mxu1 %v18599_v9  ;;  %8855 = vmatprep.subr.bf16.mxu1 %v15334_v29  ;;  %v6742_v48 = vmul.f32 %v16272_v59, %v18494_v52  ;;  %v6743_v35 = vmul.f32 %v16272_v59, %v18497_v36  ;;  %v6741_v8 = vmul.f32 %v16272_v59, %v18491_v16  ;;  %v15338_v52 = vld [vmem:[#allocation18 + $0x6c8] ss:$48 sps:$4 sm:$0xff]   ;;  %v15355_v57 = vld [vmem:[#allocation18 + $0x5ac] ss:$48 sps:$4 sm:$0xff]   ;;  %v15356_v18 = vld [vmem:[#allocation18 + $0x2b0] ss:$48 sps:$4 sm:$0xff]  }
0x1231   : > { %8754 = vmatmul.mubr.bf16.gmra.mxu0 %v18601_v37  ;;  %v6819_v36 = vadd.f32 %v18519_v7, %v6779_v63  ;;  %v6820_v21 = vadd.f32 %v18523_v30, %v6780_v15  ;;  %v15347_v56 = vld [vmem:[#allocation18 + $0x8] ss:$48 sps:$4 sm:$0xff]   ;;  %v15361_v59 = vld [vmem:[#allocation18 + $0x54c] ss:$48 sps:$4 sm:$0xff]   ;;  %v15362_v63 = vld [vmem:[#allocation18 + $0x250] ss:$48 sps:$4 sm:$0xff]  }
0x1232   : > { %8783 = vmatpush1.bf16.msra.mxu0 %v15329_v11  ;;  %8681 = vmatmul.mubr.bf16.gmra.mxu1 %v18604_v22  ;;  %v6782_v0 = vmul.f32 %v18506_v41, %v6742_v48  ;;  %v6783_v51 = vmul.f32 %v18509_v12, %v6743_v35  ;;  %v6781_v4 = vmul.f32 %v18515_v17, %v6741_v8  ;;  %v15346_v12 = vld [vmem:[#allocation18 + $0x66c] ss:$48 sps:$4 sm:$0xff]   ;;  %v15353_v11 = vld [vmem:[#allocation18 + $0x5a8] ss:$48 sps:$4 sm:$0xff]   ;;  %v15370_v48 = vld [vmem:[#allocation18 + $0x1f4] ss:$48 sps:$4 sm:$0xff]  }
0x1233   : > { %8856 = vmatpush1.bf16.msra.mxu1 %v15332_v40  ;;  %8784 = vmatprep.subr.bf16.mxu0 %v15337_v42  ;;  %v6818_v17 = vadd.f32 %v18529_v14, %v6778_v60  ;;  %v15364_v40 = vld [vmem:[#allocation18 + $0x254] ss:$48 sps:$4 sm:$0xff]   ;;  %v15359_v42 = vld [vmem:[#allocation18 + $0x548] ss:$48 sps:$4 sm:$0xff]   ;;  %v15368_v15 = vld [vmem:[#allocation18 + $0x1f0] ss:$48 sps:$4 sm:$0xff]  }
0x1234   : > { %8857 = vmatprep.subr.bf16.mxu1 %v15340_v10  ;;  %v6822_v16 = vadd.f32 %v18519_v7, %v6782_v0  ;;  %8763 = vmatprep.mubr.bf16.mxu0 %v20123_v26  ;;  %v6823_v41 = vadd.f32 %v18523_v30, %v6783_v51  ;;  %v6821_v25 = vadd.f32 %v18529_v14, %v6781_v4  ;;  %v15344_v7 = vld [vmem:[#allocation18 + $0x668] ss:$48 sps:$4 sm:$0xff]   ;;  %v15349_v30 = vld [vmem:[#allocation18 + $0xc] ss:$48 sps:$4 sm:$0xff]   ;;  %v15374_v51 = vld [vmem:[#allocation18 + $0x190] ss:$48 sps:$4 sm:$0xff]  }
0x1235   : > { %v15350_v14 = vld [vmem:[#allocation18 + $0x608] ss:$48 sps:$4 sm:$0xff]   ;;  %v15367_v10 = vld [vmem:[#allocation18 + $0x4ec] ss:$48 sps:$4 sm:$0xff]  }
0x1236   : > { %8785 = vmatpush1.bf16.msra.mxu0 %v15335_v28  ;;  %v18624_v20 = vpack.c.bf16 %v6822_v16, %v6819_v36  ;;  %v18626_v47 = vpack.c.bf16 %v6823_v41, %v6820_v21  ;;  %v18630_v29 = vpack.c.bf16 %v6821_v25, %v6818_v17  ;;  %v15365_v35 = vld [vmem:[#allocation18 + $0x4e8] ss:$48 sps:$4 sm:$0xff]   ;;  %v15373_v8 = vld [vmem:[#allocation18 + $0x48c] ss:$48 sps:$4 sm:$0xff]   ;;  %v15376_v28 = vld [vmem:[#allocation18 + $0x194] ss:$48 sps:$4 sm:$0xff]  }
0x1237   : > { %8858 = vmatpush1.bf16.msra.mxu1 %v15338_v52  ;;  %8786 = vmatprep.subr.bf16.mxu0 %v15343_v23  ;;  %v15371_v0 = vld [vmem:[#allocation18 + $0x488] ss:$48 sps:$4 sm:$0xff]   ;;  %v15379_v60 = vld [vmem:[#allocation18 + $0x42c] ss:$48 sps:$4 sm:$0xff]   ;;  %v15382_v52 = vld [vmem:[#allocation18 + $0x134] ss:$48 sps:$4 sm:$0xff]  }
0x1238   : > { %8690 = vmatprep.mubr.bf16.mxu1 %v18624_v20  ;;  %8859 = vmatprep.subr.bf16.mxu1 %v15346_v12  ;;  %v15377_v36 = vld [vmem:[#allocation18 + $0x428] ss:$48 sps:$4 sm:$0xff]   ;;  %v15380_v23 = vld [vmem:[#allocation18 + $0x130] ss:$48 sps:$4 sm:$0xff]   ;;  %v15385_v4 = vld [vmem:[#allocation18 + $0x3cc] ss:$48 sps:$4 sm:$0xff]  }
0x1239   : > { %8764 = vmatmul.mubr.bf16.gmra.mxu0 %v18626_v47  ;;  %v15388_v16 = vld [vmem:[#allocation18 + $0xd4] ss:$48 sps:$4 sm:$0xff]   ;;  %v15383_v21 = vld [vmem:[#allocation18 + $0x3c8] ss:$48 sps:$4 sm:$0xff]   ;;  %v15386_v41 = vld [vmem:[#allocation18 + $0xd0] ss:$48 sps:$4 sm:$0xff]  }
0x123a   : > { %8787 = vmatpush1.bf16.msra.mxu0 %v15341_v3  ;;  %8691 = vmatmul.mubr.bf16.gmra.mxu1 %v18630_v29  ;;  %v15391_v12 = vld [vmem:[#allocation18 + $0x36c] ss:$48 sps:$4 sm:$0xff]   ;;  %v15394_v25 = vld [vmem:[#allocation18 + $0x74] ss:$48 sps:$4 sm:$0xff]   ;;  %v15389_v3 = vld [vmem:[#allocation18 + $0x368] ss:$48 sps:$4 sm:$0xff]  }
0x123b   : > { %8806 = vmatprep.mubr.bf16.mxu0 %v18544_v49  ;;  %8860 = vmatpush1.bf16.msra.mxu1 %v15344_v7  ;;  %v15392_v17 = vld [vmem:[#allocation18 + $0x70] ss:$48 sps:$4 sm:$0xff]   ;;  %v15397_v7 = vld [vmem:[#allocation18 + $0x30c] ss:$48 sps:$4 sm:$0xff]  }
0x123c   : > { %8788 = vmatprep.subr.bf16.mxu0 %v15349_v30  ;;  %8861 = vmatprep.subr.bf16.mxu1 %v15352_v6  ;;  %v15400_v30 = vld [vmem:[#allocation18 + $0x14] ss:$48 sps:$4 sm:$0xff]   ;;  %v15395_v6 = vld [vmem:[#allocation18 + $0x308] ss:$48 sps:$4 sm:$0xff]  }
0x123d   : > { %8879 = vmatprep.mubr.bf16.mxu1 %v20123_v26 }
0x123e   : > { %8789 = vmatpush1.bf16.msra.mxu0 %v15347_v56  ;;  %v15398_v56 = vld [vmem:[#allocation18 + $0x10] ss:$48 sps:$4 sm:$0xff]  }
0x123f   : > { %8862 = vmatpush1.bf16.msra.mxu1 %v15350_v14  ;;  %8790 = vmatprep.subr.bf16.mxu0 %v15355_v57  ;;  %v15403_v14 = vld [vmem:[#allocation18 + $0x8b4] ss:$48 sps:$4 sm:$0xff]  }
0x1240   : > { %8920 = vmatprep.subr.bf16.mxu1 %v15358_v45  ;;  %v15406_v57 = vld [vmem:[#allocation18 + $0x5b4] ss:$48 sps:$4 sm:$0xff]   ;;  %v15401_v45 = vld [vmem:[#allocation18 + $0x8b0] ss:$48 sps:$4 sm:$0xff]  }
0x1242   : > { %8791 = vmatpush2.bf16.msra.mxu0 %v15353_v11  ;;  %8880 = vmatmul.mubr.bf16.vlgmr.msra.gmra.mxu1 %v18546_v27  ;;  %v15404_v11 = vld [vmem:[#allocation18 + $0x5b0] ss:$48 sps:$4 sm:$0xff]  }
0x1243   : > { %8921 = vmatpush1.bf16.msra.mxu1 %v15356_v18  ;;  %8792 = vmatprep.subr.bf16.mxu0 %v15361_v59  ;;  %v15409_v18 = vld [vmem:[#allocation18 + $0x854] ss:$48 sps:$4 sm:$0xff]  }
0x1244   : > { %8922 = vmatprep.subr.bf16.mxu1 %v15364_v40  ;;  %8889 = vmatprep.mubr.bf16.mxu1 %v20123_v26  ;;  %v15412_v59 = vld [vmem:[#allocation18 + $0x554] ss:$48 sps:$4 sm:$0xff]   ;;  %v15407_v40 = vld [vmem:[#allocation18 + $0x850] ss:$48 sps:$4 sm:$0xff]  }
0x1246   : > { %8793 = vmatpush2.bf16.msra.mxu0 %v15359_v42  ;;  %v15410_v42 = vld [vmem:[#allocation18 + $0x550] ss:$48 sps:$4 sm:$0xff]  }
0x1247   : > { %8923 = vmatpush1.bf16.msra.mxu1 %v15362_v63  ;;  %8794 = vmatprep.subr.bf16.mxu0 %v15367_v10  ;;  %v15415_v63 = vld [vmem:[#allocation18 + $0x7f4] ss:$48 sps:$4 sm:$0xff]  }
0x1248   : > { %8924 = vmatprep.subr.bf16.mxu1 %v15370_v48  ;;  %v15418_v10 = vld [vmem:[#allocation18 + $0x4f4] ss:$48 sps:$4 sm:$0xff]   ;;  %v15413_v48 = vld [vmem:[#allocation18 + $0x7f0] ss:$48 sps:$4 sm:$0xff]  }
0x124a   : > { %8795 = vmatpush2.bf16.msra.mxu0 %v15365_v35  ;;  %8890 = vmatmul.mubr.bf16.gmra.mxu1 %v18574_v5  ;;  %v15416_v35 = vld [vmem:[#allocation18 + $0x4f0] ss:$48 sps:$4 sm:$0xff]  }
0x124b   : > { %8925 = vmatpush1.bf16.msra.mxu1 %v15368_v15  ;;  %8796 = vmatprep.subr.bf16.mxu0 %v15373_v8  ;;  %v15421_v15 = vld [vmem:[#allocation18 + $0x794] ss:$48 sps:$4 sm:$0xff]  }
0x124c   : > { %8926 = vmatprep.subr.bf16.mxu1 %v15376_v28  ;;  %8899 = vmatprep.mubr.bf16.mxu1 %v20123_v26  ;;  %v15424_v8 = vld [vmem:[#allocation18 + $0x494] ss:$48 sps:$4 sm:$0xff]   ;;  %v15419_v28 = vld [vmem:[#allocation18 + $0x790] ss:$48 sps:$4 sm:$0xff]  }
0x124e   : > { %8797 = vmatpush2.bf16.msra.mxu0 %v15371_v0  ;;  %v15422_v0 = vld [vmem:[#allocation18 + $0x490] ss:$48 sps:$4 sm:$0xff]  }
0x124f   : > { %8927 = vmatpush1.bf16.msra.mxu1 %v15374_v51  ;;  %8798 = vmatprep.subr.bf16.mxu0 %v15379_v60  ;;  %v15427_v51 = vld [vmem:[#allocation18 + $0x734] ss:$48 sps:$4 sm:$0xff]  }
0x1250   : > { %8928 = vmatprep.subr.bf16.mxu1 %v15382_v52  ;;  %v15430_v60 = vld [vmem:[#allocation18 + $0x434] ss:$48 sps:$4 sm:$0xff]   ;;  %v15425_v52 = vld [vmem:[#allocation18 + $0x730] ss:$48 sps:$4 sm:$0xff]  }
0x1252   : > { %8799 = vmatpush2.bf16.msra.mxu0 %v15377_v36  ;;  %8900 = vmatmul.mubr.bf16.gmra.mxu1 %v18601_v37  ;;  %v15428_v36 = vld [vmem:[#allocation18 + $0x430] ss:$48 sps:$4 sm:$0xff]  }
0x1253   : > { %8929 = vmatpush1.bf16.msra.mxu1 %v15380_v23  ;;  %8800 = vmatprep.subr.bf16.mxu0 %v15385_v4  ;;  %v15433_v23 = vld [vmem:[#allocation18 + $0x6d4] ss:$48 sps:$4 sm:$0xff]  }
0x1254   : > { %8930 = vmatprep.subr.bf16.mxu1 %v15388_v16  ;;  %8909 = vmatprep.mubr.bf16.mxu1 %v20123_v26  ;;  %v15436_v4 = vld [vmem:[#allocation18 + $0x3d4] ss:$48 sps:$4 sm:$0xff]   ;;  %v15431_v16 = vld [vmem:[#allocation18 + $0x6d0] ss:$48 sps:$4 sm:$0xff]  }
0x1256   : > { %8801 = vmatpush2.bf16.msra.mxu0 %v15383_v21  ;;  %v15434_v21 = vld [vmem:[#allocation18 + $0x3d0] ss:$48 sps:$4 sm:$0xff]  }
0x1257   : > { %8931 = vmatpush1.bf16.msra.mxu1 %v15386_v41  ;;  %8802 = vmatprep.subr.bf16.mxu0 %v15391_v12  ;;  %v15439_v41 = vld [vmem:[#allocation18 + $0x674] ss:$48 sps:$4 sm:$0xff]  }
0x1258   : > { %8932 = vmatprep.subr.bf16.mxu1 %v15394_v25  ;;  %v15442_v12 = vld [vmem:[#allocation18 + $0x374] ss:$48 sps:$4 sm:$0xff]   ;;  %v15437_v25 = vld [vmem:[#allocation18 + $0x670] ss:$48 sps:$4 sm:$0xff]  }
0x125a   : > { %8803 = vmatpush2.bf16.msra.mxu0 %v15389_v3  ;;  %8910 = vmatmul.mubr.bf16.gmra.mxu1 %v18626_v47  ;;  %v15440_v3 = vld [vmem:[#allocation18 + $0x370] ss:$48 sps:$4 sm:$0xff]  }
0x125b   : > { %8933 = vmatpush1.bf16.msra.mxu1 %v15392_v17  ;;  %8952 = vmatprep.mubr.bf16.mxu1 %v18544_v49  ;;  %v15445_v17 = vld [vmem:[#allocation18 + $0x614] ss:$48 sps:$4 sm:$0xff]  }
0x125c   : > { %8804 = vmatprep.subr.bf16.mxu0 %v15397_v7  ;;  %8934 = vmatprep.subr.bf16.mxu1 %v15400_v30  ;;  %v15448_v7 = vld [vmem:[#allocation18 + $0x314] ss:$48 sps:$4 sm:$0xff]   ;;  %v15443_v30 = vld [vmem:[#allocation18 + $0x610] ss:$48 sps:$4 sm:$0xff]  }
0x125e   : > { %8805 = vmatpush2.bf16.msra.mxu0 %v15395_v6  ;;  %v15446_v6 = vld [vmem:[#allocation18 + $0x310] ss:$48 sps:$4 sm:$0xff]  }
0x125f   : > { %8935 = vmatpush1.bf16.msra.mxu1 %v15398_v56  ;;  %8993 = vmatprep.subr.bf16.mxu0 %v15403_v14  ;;  %v15451_v56 = vld [vmem:[#allocation18 + $0x2bc] ss:$48 sps:$4 sm:$0xff]  }
0x1260   : > { %8936 = vmatprep.subr.bf16.mxu1 %v15406_v57  ;;  %v15454_v14 = vld [vmem:[#allocation18 + $0x8bc] ss:$48 sps:$4 sm:$0xff]   ;;  %v15449_v57 = vld [vmem:[#allocation18 + $0x2b8] ss:$48 sps:$4 sm:$0xff]  }
0x1261   : > { %8807 = vmatmul.mubr.bf16.vlgmr.msra.gmra.mxu0 %v18549_v54 }
0x1262   : > { %8816 = vmatprep.mubr.bf16.mxu0 %v18571_v39  ;;  %8994 = vmatpush1.bf16.msra.mxu0 %v15401_v45  ;;  %v15452_v45 = vld [vmem:[#allocation18 + $0x8b8] ss:$48 sps:$4 sm:$0xff]  }
0x1263   : > { %8937 = vmatpush2.bf16.msra.mxu1 %v15404_v11  ;;  %8995 = vmatprep.subr.bf16.mxu0 %v15409_v18  ;;  %v15457_v11 = vld [vmem:[#allocation18 + $0x25c] ss:$48 sps:$4 sm:$0xff]  }
0x1264   : > { %8938 = vmatprep.subr.bf16.mxu1 %v15412_v59  ;;  %v15460_v18 = vld [vmem:[#allocation18 + $0x85c] ss:$48 sps:$4 sm:$0xff]   ;;  %v15455_v59 = vld [vmem:[#allocation18 + $0x258] ss:$48 sps:$4 sm:$0xff]  }
0x1266   : > { %8996 = vmatpush1.bf16.msra.mxu0 %v15407_v40  ;;  %v15458_v40 = vld [vmem:[#allocation18 + $0x858] ss:$48 sps:$4 sm:$0xff]  }
0x1267   : > { %8939 = vmatpush2.bf16.msra.mxu1 %v15410_v42  ;;  %8997 = vmatprep.subr.bf16.mxu0 %v15415_v63  ;;  %v15463_v42 = vld [vmem:[#allocation18 + $0x1fc] ss:$48 sps:$4 sm:$0xff]  }
0x1268   : > { %8940 = vmatprep.subr.bf16.mxu1 %v15418_v10  ;;  %v15466_v63 = vld [vmem:[#allocation18 + $0x7fc] ss:$48 sps:$4 sm:$0xff]   ;;  %v15461_v10 = vld [vmem:[#allocation18 + $0x1f8] ss:$48 sps:$4 sm:$0xff]  }
0x1269   : > { %8817 = vmatmul.mubr.bf16.gmra.mxu0 %v18579_v38 }
0x126a   : > { %8826 = vmatprep.mubr.bf16.mxu0 %v18599_v9  ;;  %8998 = vmatpush1.bf16.msra.mxu0 %v15413_v48  ;;  %v15464_v48 = vld [vmem:[#allocation18 + $0x7f8] ss:$48 sps:$4 sm:$0xff]  }
0x126b   : > { %8941 = vmatpush2.bf16.msra.mxu1 %v15416_v35  ;;  %8999 = vmatprep.subr.bf16.mxu0 %v15421_v15  ;;  %v15469_v35 = vld [vmem:[#allocation18 + $0x19c] ss:$48 sps:$4 sm:$0xff]  }
0x126c   : > { %8942 = vmatprep.subr.bf16.mxu1 %v15424_v8  ;;  %v15472_v15 = vld [vmem:[#allocation18 + $0x79c] ss:$48 sps:$4 sm:$0xff]   ;;  %v15467_v8 = vld [vmem:[#allocation18 + $0x198] ss:$48 sps:$4 sm:$0xff]  }
0x126e   : > { %9000 = vmatpush1.bf16.msra.mxu0 %v15419_v28  ;;  %v15470_v28 = vld [vmem:[#allocation18 + $0x798] ss:$48 sps:$4 sm:$0xff]  }
0x126f   : > { %8943 = vmatpush2.bf16.msra.mxu1 %v15422_v0  ;;  %9001 = vmatprep.subr.bf16.mxu0 %v15427_v51  ;;  %v15475_v0 = vld [vmem:[#allocation18 + $0x13c] ss:$48 sps:$4 sm:$0xff]  }
0x1270   : > { %8944 = vmatprep.subr.bf16.mxu1 %v15430_v60  ;;  %v15478_v51 = vld [vmem:[#allocation18 + $0x73c] ss:$48 sps:$4 sm:$0xff]   ;;  %v15473_v60 = vld [vmem:[#allocation18 + $0x138] ss:$48 sps:$4 sm:$0xff]  }
0x1271   : > { %8827 = vmatmul.mubr.bf16.gmra.mxu0 %v18604_v22 }
0x1272   : > { %8836 = vmatprep.mubr.bf16.mxu0 %v18624_v20  ;;  %9002 = vmatpush1.bf16.msra.mxu0 %v15425_v52  ;;  %v15476_v52 = vld [vmem:[#allocation18 + $0x738] ss:$48 sps:$4 sm:$0xff]  }
0x1273   : > { %8945 = vmatpush2.bf16.msra.mxu1 %v15428_v36  ;;  %9003 = vmatprep.subr.bf16.mxu0 %v15433_v23  ;;  %v15481_v36 = vld [vmem:[#allocation18 + $0xdc] ss:$48 sps:$4 sm:$0xff]  }
0x1274   : > { %8946 = vmatprep.subr.bf16.mxu1 %v15436_v4  ;;  %v15484_v23 = vld [vmem:[#allocation18 + $0x6dc] ss:$48 sps:$4 sm:$0xff]   ;;  %v15479_v4 = vld [vmem:[#allocation18 + $0xd8] ss:$48 sps:$4 sm:$0xff]  }
0x1276   : > { %9004 = vmatpush1.bf16.msra.mxu0 %v15431_v16  ;;  %v15482_v16 = vld [vmem:[#allocation18 + $0x6d8] ss:$48 sps:$4 sm:$0xff]  }
0x1277   : > { %8947 = vmatpush2.bf16.msra.mxu1 %v15434_v21  ;;  %9005 = vmatprep.subr.bf16.mxu0 %v15439_v41  ;;  %v15487_v21 = vld [vmem:[#allocation18 + $0x7c] ss:$48 sps:$4 sm:$0xff]  }
0x1278   : > { %8948 = vmatprep.subr.bf16.mxu1 %v15442_v12  ;;  %v15490_v41 = vld [vmem:[#allocation18 + $0x67c] ss:$48 sps:$4 sm:$0xff]   ;;  %v15485_v12 = vld [vmem:[#allocation18 + $0x78] ss:$48 sps:$4 sm:$0xff]  }
0x1279   : > { %8837 = vmatmul.mubr.bf16.gmra.mxu0 %v18630_v29 }
0x127a   : > { %9006 = vmatpush1.bf16.msra.mxu0 %v15437_v25  ;;  %9025 = vmatprep.mubr.bf16.mxu0 %v20123_v26  ;;  %v15488_v25 = vld [vmem:[#allocation18 + $0x678] ss:$48 sps:$4 sm:$0xff]  }
0x127b   : > { %8949 = vmatpush2.bf16.msra.mxu1 %v15440_v3  ;;  %9007 = vmatprep.subr.bf16.mxu0 %v15445_v17  ;;  %v15493_v3 = vld [vmem:[#allocation18 + $0x1c] ss:$48 sps:$4 sm:$0xff]  }
0x127c   : > { %8950 = vmatprep.subr.bf16.mxu1 %v15448_v7  ;;  %v15496_v17 = vld [vmem:[#allocation18 + $0x61c] ss:$48 sps:$4 sm:$0xff]   ;;  %v15491_v7 = vld [vmem:[#allocation18 + $0x18] ss:$48 sps:$4 sm:$0xff]  }
0x127e   : > { %9008 = vmatpush1.bf16.msra.mxu0 %v15443_v30  ;;  %v15494_v30 = vld [vmem:[#allocation18 + $0x618] ss:$48 sps:$4 sm:$0xff]  }
0x127f   : > { %8951 = vmatpush2.bf16.msra.mxu1 %v15446_v6  ;;  %9066 = vmatprep.subr.bf16.mxu0 %v15451_v56  ;;  %v15499_v6 = vld [vmem:[#allocation18 + $0x5bc] ss:$48 sps:$4 sm:$0xff]   ;;  %v15502_v56 = vld [vmem:[#allocation18 + $0x2c4] ss:$48 sps:$4 sm:$0xff]  }
0x1280   : > { %9139 = vmatprep.subr.bf16.mxu1 %v15454_v14  ;;  %v15497_v14 = vld [vmem:[#allocation18 + $0x5b8] ss:$48 sps:$4 sm:$0xff]  }
0x1281   : > { %9026 = vmatmul.mubr.bf16.vlgmr.msra.gmra.mxu0 %v18546_v27 }
0x1282   : > { %8953 = vmatmul.mubr.bf16.vlgmr.msra.gmra.mxu1 %v18549_v54  ;;  %9067 = vmatpush1.bf16.msra.mxu0 %v15449_v57  ;;  %v15500_v57 = vld [vmem:[#allocation18 + $0x2c0] ss:$48 sps:$4 sm:$0xff]  }
0x1283   : > { %8962 = vmatprep.mubr.bf16.mxu1 %v18571_v39  ;;  %9140 = vmatpush1.bf16.msra.mxu1 %v15452_v45  ;;  %v15505_v45 = vld [vmem:[#allocation18 + $0x55c] ss:$48 sps:$4 sm:$0xff]  }
0x1284   : > { %9068 = vmatprep.subr.bf16.mxu0 %v15457_v11  ;;  %9141 = vmatprep.subr.bf16.mxu1 %v15460_v18  ;;  %v15508_v11 = vld [vmem:[#allocation18 + $0x264] ss:$48 sps:$4 sm:$0xff]   ;;  %v15503_v18 = vld [vmem:[#allocation18 + $0x558] ss:$48 sps:$4 sm:$0xff]  }
0x1285   : > { %9035 = vmatprep.mubr.bf16.mxu0 %v20123_v26 }
0x1286   : > { %9069 = vmatpush1.bf16.msra.mxu0 %v15455_v59  ;;  %v15506_v59 = vld [vmem:[#allocation18 + $0x260] ss:$48 sps:$4 sm:$0xff]  }
0x1287   : > { %9142 = vmatpush1.bf16.msra.mxu1 %v15458_v40  ;;  %9070 = vmatprep.subr.bf16.mxu0 %v15463_v42  ;;  %v15511_v40 = vld [vmem:[#allocation18 + $0x4fc] ss:$48 sps:$4 sm:$0xff]   ;;  %v15514_v42 = vld [vmem:[#allocation18 + $0x204] ss:$48 sps:$4 sm:$0xff]  }
0x1288   : > { %9143 = vmatprep.subr.bf16.mxu1 %v15466_v63  ;;  %v15509_v63 = vld [vmem:[#allocation18 + $0x4f8] ss:$48 sps:$4 sm:$0xff]  }
0x1289   : > { %9036 = vmatmul.mubr.bf16.gmra.mxu0 %v18574_v5 }
0x128a   : > { %8963 = vmatmul.mubr.bf16.gmra.mxu1 %v18579_v38  ;;  %9071 = vmatpush1.bf16.msra.mxu0 %v15461_v10  ;;  %v15512_v10 = vld [vmem:[#allocation18 + $0x200] ss:$48 sps:$4 sm:$0xff]  }
0x128b   : > { %8972 = vmatprep.mubr.bf16.mxu1 %v18599_v9  ;;  %9144 = vmatpush1.bf16.msra.mxu1 %v15464_v48  ;;  %v15517_v48 = vld [vmem:[#allocation18 + $0x49c] ss:$48 sps:$4 sm:$0xff]  }
0x128c   : > { %9072 = vmatprep.subr.bf16.mxu0 %v15469_v35  ;;  %9145 = vmatprep.subr.bf16.mxu1 %v15472_v15  ;;  %v15520_v35 = vld [vmem:[#allocation18 + $0x1a4] ss:$48 sps:$4 sm:$0xff]   ;;  %v15515_v15 = vld [vmem:[#allocation18 + $0x498] ss:$48 sps:$4 sm:$0xff]  }
0x128d   : > { %9045 = vmatprep.mubr.bf16.mxu0 %v20123_v26 }
0x128e   : > { %9073 = vmatpush1.bf16.msra.mxu0 %v15467_v8  ;;  %v15518_v8 = vld [vmem:[#allocation18 + $0x1a0] ss:$48 sps:$4 sm:$0xff]  }
0x128f   : > { %9146 = vmatpush1.bf16.msra.mxu1 %v15470_v28  ;;  %9074 = vmatprep.subr.bf16.mxu0 %v15475_v0  ;;  %v15523_v28 = vld [vmem:[#allocation18 + $0x43c] ss:$48 sps:$4 sm:$0xff]   ;;  %v15526_v0 = vld [vmem:[#allocation18 + $0x144] ss:$48 sps:$4 sm:$0xff]  }
0x1290   : > { %9147 = vmatprep.subr.bf16.mxu1 %v15478_v51  ;;  %v15521_v51 = vld [vmem:[#allocation18 + $0x438] ss:$48 sps:$4 sm:$0xff]  }
0x1291   : > { %9046 = vmatmul.mubr.bf16.gmra.mxu0 %v18601_v37 }
0x1292   : > { %8973 = vmatmul.mubr.bf16.gmra.mxu1 %v18604_v22  ;;  %9075 = vmatpush1.bf16.msra.mxu0 %v15473_v60  ;;  %v15524_v60 = vld [vmem:[#allocation18 + $0x140] ss:$48 sps:$4 sm:$0xff]  }
0x1293   : > { %8982 = vmatprep.mubr.bf16.mxu1 %v18624_v20  ;;  %9148 = vmatpush1.bf16.msra.mxu1 %v15476_v52  ;;  %v15529_v52 = vld [vmem:[#allocation18 + $0x3dc] ss:$48 sps:$4 sm:$0xff]  }
0x1294   : > { %9076 = vmatprep.subr.bf16.mxu0 %v15481_v36  ;;  %9149 = vmatprep.subr.bf16.mxu1 %v15484_v23  ;;  %v15532_v36 = vld [vmem:[#allocation18 + $0xe4] ss:$48 sps:$4 sm:$0xff]   ;;  %v15527_v23 = vld [vmem:[#allocation18 + $0x3d8] ss:$48 sps:$4 sm:$0xff]  }
0x1295   : > { %9055 = vmatprep.mubr.bf16.mxu0 %v20123_v26 }
0x1296   : > { %9077 = vmatpush1.bf16.msra.mxu0 %v15479_v4  ;;  %v15530_v4 = vld [vmem:[#allocation18 + $0xe0] ss:$48 sps:$4 sm:$0xff]  }
0x1297   : > { %9150 = vmatpush1.bf16.msra.mxu1 %v15482_v16  ;;  %9078 = vmatprep.subr.bf16.mxu0 %v15487_v21  ;;  %v15535_v16 = vld [vmem:[#allocation18 + $0x37c] ss:$48 sps:$4 sm:$0xff]   ;;  %v15538_v21 = vld [vmem:[#allocation18 + $0x84] ss:$48 sps:$4 sm:$0xff]  }
0x1298   : > { %9151 = vmatprep.subr.bf16.mxu1 %v15490_v41  ;;  %v15533_v41 = vld [vmem:[#allocation18 + $0x378] ss:$48 sps:$4 sm:$0xff]  }
0x1299   : > { %9056 = vmatmul.mubr.bf16.gmra.mxu0 %v18626_v47 }
0x129a   : > { %8983 = vmatmul.mubr.bf16.gmra.mxu1 %v18630_v29  ;;  %9079 = vmatpush1.bf16.msra.mxu0 %v15485_v12  ;;  %v15536_v12 = vld [vmem:[#allocation18 + $0x80] ss:$48 sps:$4 sm:$0xff]  }
0x129b   : > { %9098 = vmatprep.mubr.bf16.mxu0 %v18544_v49  ;;  %9152 = vmatpush1.bf16.msra.mxu1 %v15488_v25  ;;  %v15541_v25 = vld [vmem:[#allocation18 + $0x31c] ss:$48 sps:$4 sm:$0xff]  }
0x129c   : > { %9080 = vmatprep.subr.bf16.mxu0 %v15493_v3  ;;  %9153 = vmatprep.subr.bf16.mxu1 %v15496_v17  ;;  %v15544_v3 = vld [vmem:[#allocation18 + $0x24] ss:$48 sps:$4 sm:$0xff]   ;;  %v15539_v17 = vld [vmem:[#allocation18 + $0x318] ss:$48 sps:$4 sm:$0xff]  }
0x129d   : > { %9171 = vmatprep.mubr.bf16.mxu1 %v20123_v26 }
0x129e   : > { %9081 = vmatpush1.bf16.msra.mxu0 %v15491_v7  ;;  %v15542_v7 = vld [vmem:[#allocation18 + $0x20] ss:$48 sps:$4 sm:$0xff]  }
0x129f   : > { %9154 = vmatpush1.bf16.msra.mxu1 %v15494_v30  ;;  %9082 = vmatprep.subr.bf16.mxu0 %v15499_v6  ;;  %v15547_v30 = vld [vmem:[#allocation18 + $0x8c4] ss:$48 sps:$4 sm:$0xff]  }
0x12a0   : > { %9212 = vmatprep.subr.bf16.mxu1 %v15502_v56  ;;  %v15550_v6 = vld [vmem:[#allocation18 + $0x5c4] ss:$48 sps:$4 sm:$0xff]   ;;  %v15545_v56 = vld [vmem:[#allocation18 + $0x8c0] ss:$48 sps:$4 sm:$0xff]  }
0x12a2   : > { %9083 = vmatpush2.bf16.msra.mxu0 %v15497_v14  ;;  %9172 = vmatmul.mubr.bf16.vlgmr.msra.gmra.mxu1 %v18546_v27  ;;  %v15548_v14 = vld [vmem:[#allocation18 + $0x5c0] ss:$48 sps:$4 sm:$0xff]  }
0x12a3   : > { %9213 = vmatpush1.bf16.msra.mxu1 %v15500_v57  ;;  %9084 = vmatprep.subr.bf16.mxu0 %v15505_v45  ;;  %v15553_v57 = vld [vmem:[#allocation18 + $0x864] ss:$48 sps:$4 sm:$0xff]  }
0x12a4   : > { %9214 = vmatprep.subr.bf16.mxu1 %v15508_v11  ;;  %9181 = vmatprep.mubr.bf16.mxu1 %v20123_v26  ;;  %v15556_v45 = vld [vmem:[#allocation18 + $0x564] ss:$48 sps:$4 sm:$0xff]   ;;  %v15551_v11 = vld [vmem:[#allocation18 + $0x860] ss:$48 sps:$4 sm:$0xff]  }
0x12a6   : > { %9085 = vmatpush2.bf16.msra.mxu0 %v15503_v18  ;;  %v15554_v18 = vld [vmem:[#allocation18 + $0x560] ss:$48 sps:$4 sm:$0xff]  }
0x12a7   : > { %9215 = vmatpush1.bf16.msra.mxu1 %v15506_v59  ;;  %9086 = vmatprep.subr.bf16.mxu0 %v15511_v40  ;;  %v15559_v59 = vld [vmem:[#allocation18 + $0x804] ss:$48 sps:$4 sm:$0xff]  }
0x12a8   : > { %9216 = vmatprep.subr.bf16.mxu1 %v15514_v42  ;;  %v15562_v40 = vld [vmem:[#allocation18 + $0x504] ss:$48 sps:$4 sm:$0xff]   ;;  %v15557_v42 = vld [vmem:[#allocation18 + $0x800] ss:$48 sps:$4 sm:$0xff]  }
0x12aa   : > { %9087 = vmatpush2.bf16.msra.mxu0 %v15509_v63  ;;  %9182 = vmatmul.mubr.bf16.gmra.mxu1 %v18574_v5  ;;  %v15560_v63 = vld [vmem:[#allocation18 + $0x500] ss:$48 sps:$4 sm:$0xff]  }
0x12ab   : > { %9217 = vmatpush1.bf16.msra.mxu1 %v15512_v10  ;;  %9088 = vmatprep.subr.bf16.mxu0 %v15517_v48  ;;  %v15565_v10 = vld [vmem:[#allocation18 + $0x7a4] ss:$48 sps:$4 sm:$0xff]  }
0x12ac   : > { %9218 = vmatprep.subr.bf16.mxu1 %v15520_v35  ;;  %9191 = vmatprep.mubr.bf16.mxu1 %v20123_v26  ;;  %v15568_v48 = vld [vmem:[#allocation18 + $0x4a4] ss:$48 sps:$4 sm:$0xff]   ;;  %v15563_v35 = vld [vmem:[#allocation18 + $0x7a0] ss:$48 sps:$4 sm:$0xff]  }
0x12ae   : > { %9089 = vmatpush2.bf16.msra.mxu0 %v15515_v15  ;;  %v15566_v15 = vld [vmem:[#allocation18 + $0x4a0] ss:$48 sps:$4 sm:$0xff]  }
0x12af   : > { %9219 = vmatpush1.bf16.msra.mxu1 %v15518_v8  ;;  %9090 = vmatprep.subr.bf16.mxu0 %v15523_v28  ;;  %v15571_v8 = vld [vmem:[#allocation18 + $0x744] ss:$48 sps:$4 sm:$0xff]  }
0x12b0   : > { %9220 = vmatprep.subr.bf16.mxu1 %v15526_v0  ;;  %v15574_v28 = vld [vmem:[#allocation18 + $0x444] ss:$48 sps:$4 sm:$0xff]   ;;  %v15569_v0 = vld [vmem:[#allocation18 + $0x740] ss:$48 sps:$4 sm:$0xff]  }
0x12b2   : > { %9091 = vmatpush2.bf16.msra.mxu0 %v15521_v51  ;;  %9192 = vmatmul.mubr.bf16.gmra.mxu1 %v18601_v37  ;;  %v15572_v51 = vld [vmem:[#allocation18 + $0x440] ss:$48 sps:$4 sm:$0xff]  }
0x12b3   : > { %9221 = vmatpush1.bf16.msra.mxu1 %v15524_v60  ;;  %9092 = vmatprep.subr.bf16.mxu0 %v15529_v52  ;;  %v15577_v60 = vld [vmem:[#allocation18 + $0x6e4] ss:$48 sps:$4 sm:$0xff]  }
0x12b4   : > { %9222 = vmatprep.subr.bf16.mxu1 %v15532_v36  ;;  %9201 = vmatprep.mubr.bf16.mxu1 %v20123_v26  ;;  %v15580_v52 = vld [vmem:[#allocation18 + $0x3e4] ss:$48 sps:$4 sm:$0xff]   ;;  %v15575_v36 = vld [vmem:[#allocation18 + $0x6e0] ss:$48 sps:$4 sm:$0xff]  }
0x12b6   : > { %9093 = vmatpush2.bf16.msra.mxu0 %v15527_v23  ;;  %v15578_v23 = vld [vmem:[#allocation18 + $0x3e0] ss:$48 sps:$4 sm:$0xff]  }
0x12b7   : > { %9223 = vmatpush1.bf16.msra.mxu1 %v15530_v4  ;;  %9094 = vmatprep.subr.bf16.mxu0 %v15535_v16  ;;  %v15583_v4 = vld [vmem:[#allocation18 + $0x684] ss:$48 sps:$4 sm:$0xff]  }
0x12b8   : > { %9224 = vmatprep.subr.bf16.mxu1 %v15538_v21  ;;  %v15586_v16 = vld [vmem:[#allocation18 + $0x384] ss:$48 sps:$4 sm:$0xff]   ;;  %v15581_v21 = vld [vmem:[#allocation18 + $0x680] ss:$48 sps:$4 sm:$0xff]  }
0x12ba   : > { %9095 = vmatpush2.bf16.msra.mxu0 %v15533_v41  ;;  %9202 = vmatmul.mubr.bf16.gmra.mxu1 %v18626_v47  ;;  %v15584_v41 = vld [vmem:[#allocation18 + $0x380] ss:$48 sps:$4 sm:$0xff]  }
0x12bb   : > { %9225 = vmatpush1.bf16.msra.mxu1 %v15536_v12  ;;  %9244 = vmatprep.mubr.bf16.mxu1 %v18544_v49  ;;  %v15589_v12 = vld [vmem:[#allocation18 + $0x624] ss:$48 sps:$4 sm:$0xff]  }
0x12bc   : > { %9096 = vmatprep.subr.bf16.mxu0 %v15541_v25  ;;  %9226 = vmatprep.subr.bf16.mxu1 %v15544_v3  ;;  %v15592_v25 = vld [vmem:[#allocation18 + $0x324] ss:$48 sps:$4 sm:$0xff]   ;;  %v15587_v3 = vld [vmem:[#allocation18 + $0x620] ss:$48 sps:$4 sm:$0xff]  }
0x12be   : > { %9097 = vmatpush2.bf16.msra.mxu0 %v15539_v17  ;;  %v15590_v17 = vld [vmem:[#allocation18 + $0x320] ss:$48 sps:$4 sm:$0xff]  }
0x12bf   : > { %9227 = vmatpush1.bf16.msra.mxu1 %v15542_v7  ;;  %9285 = vmatprep.subr.bf16.mxu0 %v15547_v30  ;;  %v15595_v7 = vld [vmem:[#allocation18 + $0x2cc] ss:$48 sps:$4 sm:$0xff]  }
0x12c0   : > { %9228 = vmatprep.subr.bf16.mxu1 %v15550_v6  ;;  %v15598_v30 = vld [vmem:[#allocation18 + $0x8cc] ss:$48 sps:$4 sm:$0xff]   ;;  %v15593_v6 = vld [vmem:[#allocation18 + $0x2c8] ss:$48 sps:$4 sm:$0xff]  }
0x12c1   : > { %9099 = vmatmul.mubr.bf16.vlgmr.msra.gmra.mxu0 %v18549_v54 }
0x12c2   : > { %9108 = vmatprep.mubr.bf16.mxu0 %v18571_v39  ;;  %9286 = vmatpush1.bf16.msra.mxu0 %v15545_v56  ;;  %v15596_v56 = vld [vmem:[#allocation18 + $0x8c8] ss:$48 sps:$4 sm:$0xff]  }
0x12c3   : > { %9229 = vmatpush2.bf16.msra.mxu1 %v15548_v14  ;;  %9287 = vmatprep.subr.bf16.mxu0 %v15553_v57  ;;  %v15601_v14 = vld [vmem:[#allocation18 + $0x26c] ss:$48 sps:$4 sm:$0xff]  }
0x12c4   : > { %9230 = vmatprep.subr.bf16.mxu1 %v15556_v45  ;;  %v15604_v57 = vld [vmem:[#allocation18 + $0x86c] ss:$48 sps:$4 sm:$0xff]  }
0x12c6   : > { %9288 = vmatpush1.bf16.msra.mxu0 %v15551_v11  ;;  %v15599_v11 = vld [vmem:[#allocation18 + $0x268] ss:$48 sps:$4 sm:$0xff]  }
0x12c7   : > { %9231 = vmatpush2.bf16.msra.mxu1 %v15554_v18  ;;  %9289 = vmatprep.subr.bf16.mxu0 %v15559_v59  ;;  %v15602_v59 = vld [vmem:[#allocation18 + $0x868] ss:$48 sps:$4 sm:$0xff]  }
0x12c8   : > { %9232 = vmatprep.subr.bf16.mxu1 %v15562_v40  ;;  %v15607_v40 = vld [vmem:[#allocation18 + $0x20c] ss:$48 sps:$4 sm:$0xff]  }
0x12c9   : > { %9109 = vmatmul.mubr.bf16.gmra.mxu0 %v18579_v38 }
0x12ca   : > { %9118 = vmatprep.mubr.bf16.mxu0 %v18599_v9  ;;  %9290 = vmatpush1.bf16.msra.mxu0 %v15557_v42 }
0x12cb   : > { %9233 = vmatpush2.bf16.msra.mxu1 %v15560_v63  ;;  %9291 = vmatprep.subr.bf16.mxu0 %v15565_v10  ;;  %v15610_v63 = vld [vmem:[#allocation18 + $0x80c] ss:$48 sps:$4 sm:$0xff]  }
0x12cc   : > { %9234 = vmatprep.subr.bf16.mxu1 %v15568_v48  ;;  %v15605_v48 = vld [vmem:[#allocation18 + $0x208] ss:$48 sps:$4 sm:$0xff]  }
0x12ce   : > { %9292 = vmatpush1.bf16.msra.mxu0 %v15563_v35 }
0x12cf   : > { %9235 = vmatpush2.bf16.msra.mxu1 %v15566_v15  ;;  %9293 = vmatprep.subr.bf16.mxu0 %v15571_v8  ;;  %v15608_v15 = vld [vmem:[#allocation18 + $0x808] ss:$48 sps:$4 sm:$0xff]  }
0x12d0   : > { %9236 = vmatprep.subr.bf16.mxu1 %v15574_v28  ;;  %v15613_v28 = vld [vmem:[#allocation18 + $0x1ac] ss:$48 sps:$4 sm:$0xff]  }
0x12d1   : > { %9119 = vmatmul.mubr.bf16.gmra.mxu0 %v18604_v22 }
0x12d2   : > { %9128 = vmatprep.mubr.bf16.mxu0 %v18624_v20  ;;  %9294 = vmatpush1.bf16.msra.mxu0 %v15569_v0  ;;  %v15616_v0 = vld [vmem:[#allocation18 + $0x7ac] ss:$48 sps:$4 sm:$0xff]  }
0x12d3   : > { %9237 = vmatpush2.bf16.msra.mxu1 %v15572_v51  ;;  %9295 = vmatprep.subr.bf16.mxu0 %v15577_v60  ;;  %v15611_v60 = vld [vmem:[#allocation18 + $0x1a8] ss:$48 sps:$4 sm:$0xff]  }
0x12d4   : > { %9238 = vmatprep.subr.bf16.mxu1 %v15580_v52 }
0x12d6   : > { %9296 = vmatpush1.bf16.msra.mxu0 %v15575_v36  ;;  %v15614_v36 = vld [vmem:[#allocation18 + $0x7a8] ss:$48 sps:$4 sm:$0xff]  }
0x12d7   : > { %9239 = vmatpush2.bf16.msra.mxu1 %v15578_v23  ;;  %9297 = vmatprep.subr.bf16.mxu0 %v15583_v4  ;;  %v15619_v23 = vld [vmem:[#allocation18 + $0x14c] ss:$48 sps:$4 sm:$0xff]  }
0x12d8   : > { %9240 = vmatprep.subr.bf16.mxu1 %v15586_v16  ;;  %v15622_v16 = vld [vmem:[#allocation18 + $0x74c] ss:$48 sps:$4 sm:$0xff]  }
0x12d9   : > { %9129 = vmatmul.mubr.bf16.gmra.mxu0 %v18630_v29 }
0x12da   : > { %9298 = vmatpush1.bf16.msra.mxu0 %v15581_v21  ;;  %9317 = vmatprep.mubr.bf16.mxu0 %v20123_v26 }
0x12db   : > { %9241 = vmatpush2.bf16.msra.mxu1 %v15584_v41  ;;  %9299 = vmatprep.subr.bf16.mxu0 %v15589_v12  ;;  %v15617_v41 = vld [vmem:[#allocation18 + $0x148] ss:$48 sps:$4 sm:$0xff]  }
0x12dc   : > { %9242 = vmatprep.subr.bf16.mxu1 %v15592_v25  ;;  %v15620_v25 = vld [vmem:[#allocation18 + $0x748] ss:$48 sps:$4 sm:$0xff]  }
0x12de   : > { %9300 = vmatpush1.bf16.msra.mxu0 %v15587_v3 }
0x12df   : > { %9243 = vmatpush2.bf16.msra.mxu1 %v15590_v17  ;;  %9358 = vmatprep.subr.bf16.mxu0 %v15595_v7  ;;  %v15625_v17 = vld [vmem:[#allocation18 + $0xec] ss:$48 sps:$4 sm:$0xff]  }
0x12e0   : > { %9431 = vmatprep.subr.bf16.mxu1 %v15598_v30  ;;  %v15628_v7 = vld [vmem:[#allocation18 + $0x6ec] ss:$48 sps:$4 sm:$0xff]  }
0x12e1   : > { %9318 = vmatmul.mubr.bf16.vlgmr.msra.gmra.mxu0 %v18546_v27  ;;  %v18688_v18 = vpop.f32.mrf.mxu0 }
0x12e2   : > { %9245 = vmatmul.mubr.bf16.vlgmr.msra.gmra.mxu1 %v18549_v54  ;;  %9359 = vmatpush1.bf16.msra.mxu0 %v15593_v6  ;;  %v18686_v45 = vpop.f32.mrf.mxu1  ;;  %v15623_v6 = vld [vmem:[#allocation18 + $0xe8] ss:$48 sps:$4 sm:$0xff]  }
0x12e3   : > { %9254 = vmatprep.mubr.bf16.mxu1 %v18571_v39  ;;  %9432 = vmatpush1.bf16.msra.mxu1 %v15596_v56  ;;  %v18696_v35 = vpop.f32.mrf.mxu0 }
0x12e4   : > { %v18691_v42 = vpop.f32.mrf.mxu1  ;;  %9360 = vmatprep.subr.bf16.mxu0 %v15601_v14  ;;  %9433 = vmatprep.subr.bf16.mxu1 %v15604_v57  ;;  %v15626_v14 = vld [vmem:[#allocation18 + $0x6e8] ss:$48 sps:$4 sm:$0xff]   ;;  %v15631_v57 = vld [vmem:[#allocation18 + $0x8c] ss:$48 sps:$4 sm:$0xff]  }
0x12e5   : > { %9327 = vmatprep.mubr.bf16.mxu0 %v20123_v26  ;;  %v18704_v52 = vpop.f32.mrf.mxu0 }
0x12e6   : > { %9361 = vmatpush1.bf16.msra.mxu0 %v15599_v11  ;;  %v18694_v10 = vpop.f32.mrf.mxu1 }
0x12e7   : > { %9434 = vmatpush1.bf16.msra.mxu1 %v15602_v59  ;;  %9362 = vmatprep.subr.bf16.mxu0 %v15607_v40  ;;  %v18712_v12 = vpop.f32.mrf.mxu0  ;;  %v15634_v59 = vld [vmem:[#allocation18 + $0x68c] ss:$48 sps:$4 sm:$0xff]  }
0x12e8   : > { %v18698_v8 = vpop.f32.mrf.mxu1  ;;  %9435 = vmatprep.subr.bf16.mxu1 %v15610_v63  ;;  %v15629_v63 = vld [vmem:[#allocation18 + $0x88] ss:$48 sps:$4 sm:$0xff]  }
0x12e9   : > { %9328 = vmatmul.mubr.bf16.gmra.mxu0 %v18574_v5  ;;  %v18720_v56 = vpop.f32.mrf.mxu0 }
0x12ea   : > { %9255 = vmatmul.mubr.bf16.gmra.mxu1 %v18579_v38  ;;  %9363 = vmatpush1.bf16.msra.mxu0 %v15605_v48  ;;  %v18702_v51 = vpop.f32.mrf.mxu1 }
0x12eb   : > { %9264 = vmatprep.mubr.bf16.mxu1 %v18599_v9  ;;  %9436 = vmatpush1.bf16.msra.mxu1 %v15608_v15  ;;  %v18728_v48 = vpop.f32.mrf.mxu0  ;;  %v15632_v15 = vld [vmem:[#allocation18 + $0x688] ss:$48 sps:$4 sm:$0xff]  }
0x12ec   : > { %v18707_v4 = vpop.f32.mrf.mxu1  ;;  %9364 = vmatprep.subr.bf16.mxu0 %v15613_v28  ;;  %9437 = vmatprep.subr.bf16.mxu1 %v15616_v0  ;;  %v15637_v0 = vld [vmem:[#allocation18 + $0x2c] ss:$48 sps:$4 sm:$0xff]  }
0x12ed   : > { %9337 = vmatprep.mubr.bf16.mxu0 %v20123_v26 }
0x12ee   : > { %9365 = vmatpush1.bf16.msra.mxu0 %v15611_v60  ;;  %v18710_v21 = vpop.f32.mrf.mxu1  ;;  %v15640_v60 = vld [vmem:[#allocation18 + $0x62c] ss:$48 sps:$4 sm:$0xff]  }
0x12ef   : > { %9438 = vmatpush1.bf16.msra.mxu1 %v15614_v36  ;;  %9366 = vmatprep.subr.bf16.mxu0 %v15619_v23  ;;  %v15635_v23 = vld [vmem:[#allocation18 + $0x28] ss:$48 sps:$4 sm:$0xff]  }
0x12f0   : > { %v18714_v3 = vpop.f32.mrf.mxu1  ;;  %9439 = vmatprep.subr.bf16.mxu1 %v15622_v16  ;;  %v18736_v16 = vpop.f32.mrf.mxu0 }
0x12f1   : > { %9338 = vmatmul.mubr.bf16.gmra.mxu0 %v18601_v37 }
0x12f2   : > { %9265 = vmatmul.mubr.bf16.gmra.mxu1 %v18604_v22  ;;  %9367 = vmatpush1.bf16.msra.mxu0 %v15617_v41  ;;  %v18718_v30 = vpop.f32.mrf.mxu1  ;;  %v15638_v41 = vld [vmem:[#allocation18 + $0x628] ss:$48 sps:$4 sm:$0xff]  }
0x12f3   : > { %9274 = vmatprep.mubr.bf16.mxu1 %v18624_v20  ;;  %9440 = vmatpush1.bf16.msra.mxu1 %v15620_v25  ;;  %v15643_v25 = vld [vmem:[#allocation18 + $0x5cc] ss:$48 sps:$4 sm:$0xff]  }
0x12f4   : > { %v18723_v11 = vpop.f32.mrf.mxu1  ;;  %9368 = vmatprep.subr.bf16.mxu0 %v15625_v17  ;;  %9441 = vmatprep.subr.bf16.mxu1 %v15628_v7  ;;  %v15646_v7 = vld [vmem:[#allocation21 + $0xac] ss:$12 sps:$4 sm:$0xff]  }
0x12f5   : > { %9347 = vmatprep.mubr.bf16.mxu0 %v20123_v26 }
0x12f6   : > { %9369 = vmatpush1.bf16.msra.mxu0 %v15623_v6  ;;  %v18726_v40 = vpop.f32.mrf.mxu1 }
0x12f7   : > { %9442 = vmatpush1.bf16.msra.mxu1 %v15626_v14  ;;  %9370 = vmatprep.subr.bf16.mxu0 %v15631_v57  ;;  %v15641_v14 = vld [vmem:[#allocation18 + $0x5c8] ss:$48 sps:$4 sm:$0xff]   ;;  %v18744_v57 = vpop.f32.mrf.mxu0 }
0x12f8   : > { %v18730_v28 = vpop.f32.mrf.mxu1  ;;  %9443 = vmatprep.subr.bf16.mxu1 %v15634_v59  ;;  %v15644_v59 = vld [vmem:[#allocation21 + $0xa8] ss:$12 sps:$4 sm:$0xff]  }
0x12f9   : > { %9348 = vmatmul.mubr.bf16.gmra.mxu0 %v18626_v47 }
0x12fa   : > { %9275 = vmatmul.mubr.bf16.gmra.mxu1 %v18630_v29  ;;  %9371 = vmatpush1.bf16.msra.mxu0 %v15629_v63  ;;  %v18734_v36 = vpop.f32.mrf.mxu1 }
0x12fb   : > { %9390 = vmatprep.mubr.bf16.mxu0 %v18544_v49  ;;  %9444 = vmatpush1.bf16.msra.mxu1 %v15632_v15  ;;  %v15649_v49 = vld [vmem:[#allocation18 + $0x56c] ss:$48 sps:$4 sm:$0xff]  }
0x12fc   : > { %v18739_v17 = vpop.f32.mrf.mxu1  ;;  %9372 = vmatprep.subr.bf16.mxu0 %v15637_v0  ;;  %9445 = vmatprep.subr.bf16.mxu1 %v15640_v60  ;;  %v15652_v15 = vld [vmem:[#allocation21 + $0x94] ss:$12 sps:$4 sm:$0xff]   ;;  %v15647_v0 = vld [vmem:[#allocation18 + $0x568] ss:$48 sps:$4 sm:$0xff]   ;;  %v18749_v60 = vpop.f32.mrf.mxu0 }
0x12fd   : > { %9463 = vmatprep.mubr.bf16.mxu1 %v20123_v26 }
0x12fe   : > { %9373 = vmatpush1.bf16.msra.mxu0 %v15635_v23  ;;  %v18742_v6 = vpop.f32.mrf.mxu1  ;;  %v15650_v23 = vld [vmem:[#allocation21 + $0x90] ss:$12 sps:$4 sm:$0xff]  }
0x12ff   : > { %9446 = vmatpush1.bf16.msra.mxu1 %v15638_v41  ;;  %9374 = vmatprep.subr.bf16.mxu0 %v15643_v25  ;;  %v15658_v41 = vld [vmem:[#allocation21 + $0x7c] ss:$12 sps:$4 sm:$0xff]  }
0x1300   : > { %v18746_v63 = vpop.f32.mrf.mxu1  ;;  %11585 = vmatprep.subr.bf16.mxu1 %v15646_v7  ;;  %v15653_v25 = vld [vmem:[#allocation18 + $0x508] ss:$48 sps:$4 sm:$0xff]   ;;  %v18754_v7 = vpop.f32.mrf.mxu0 }
0x1302   : > { %9375 = vmatpush2.bf16.msra.mxu0 %v15641_v14  ;;  %9464 = vmatmul.mubr.bf16.vlgmr.msra.gmra.mxu1 %v18546_v27  ;;  %v18751_v34 = vpop.f32.mrf.mxu1  ;;  %v15656_v27 = vld [vmem:[#allocation21 + $0x78] ss:$12 sps:$4 sm:$0xff]   ;;  %v15661_v14 = vld [vmem:[#allocation18 + $0x4ac] ss:$48 sps:$4 sm:$0xff]   ;;  %v18765_v1 = vpop.f32.mrf.mxu0 }
0x1303   : > { %11586 = vmatpush1.bf16.msra.mxu1 %v15644_v59  ;;  %9376 = vmatprep.subr.bf16.mxu0 %v15649_v49  ;;  %v15664_v59 = vld [vmem:[#allocation21 + $0x64] ss:$12 sps:$4 sm:$0xff]   ;;  %v18758_v49 = vld [vmem:[#allocation19] sm:$0xff] }
0x1304   : > { %11587 = vmatprep.subr.bf16.mxu1 %v15652_v15  ;;  %9473 = vmatprep.mubr.bf16.mxu1 %v20123_v26  ;;  %v18756_v43 = vpop.f32.mrf.mxu1  ;;  %v15659_v15 = vld [vmem:[#allocation18 + $0x4a8] ss:$48 sps:$4 sm:$0xff]   ;;  %v18774_v46 = vpop.f32.mrf.mxu0 }
0x1306   : > { %9377 = vmatpush2.bf16.msra.mxu0 %v15647_v0  ;;  %v18763_v0 = vrot.slane %v18758_v49, %v17236_v53  ;;  %v18767_v50 = vpop.f32.mrf.mxu1  ;;  %v18781_v32 = vpop.f32.mrf.mxu0 }
0x1307   : > { %11588 = vmatpush1.bf16.msra.mxu1 %v15650_v23  ;;  %9378 = vmatprep.subr.bf16.mxu0 %v15655_v2  ;;  %v15662_v2 = vld [vmem:[#allocation21 + $0x60] ss:$12 sps:$4 sm:$0xff]  }
0x1308   : > { %11589 = vmatprep.subr.bf16.mxu1 %v15658_v41  ;;  %v15667_v23 = vld [vmem:[#allocation18 + $0x44c] ss:$48 sps:$4 sm:$0xff]   ;;  %v15670_v41 = vld [vmem:[#allocation21 + $0x4c] ss:$12 sps:$4 sm:$0xff]   ;;  %v8665_v58 = vadd.f32 %v18691_v42, %v18763_v0  ;;  %v18776_v61 = vpop.f32.mrf.mxu1 }
0x1309   : > { %v15674_v42 = vld [vmem:[#allocation21 + $0x30] ss:$12 sps:$4 sm:$0xff]  }
0x130a   : > { %9379 = vmatpush2.bf16.msra.mxu0 %v15653_v25  ;;  %9474 = vmatmul.mubr.bf16.gmra.mxu1 %v18574_v5  ;;  %v8669_v5 = vadd.f32 %v18698_v8, %v18763_v0  ;;  %v15665_v25 = vld [vmem:[#allocation18 + $0x448] ss:$48 sps:$4 sm:$0xff]  }
0x130b   : > { %11590 = vmatpush1.bf16.msra.mxu1 %v15656_v27  ;;  %9380 = vmatprep.subr.bf16.mxu0 %v15661_v14  ;;  %v15668_v27 = vld [vmem:[#allocation21 + $0x48] ss:$12 sps:$4 sm:$0xff]   ;;  %v15673_v14 = vld [vmem:[#allocation18 + $0x3ec] ss:$48 sps:$4 sm:$0xff]   ;;  %v15671_v8 = vld [vmem:[#allocation18 + $0x3e8] ss:$48 sps:$4 sm:$0xff]  }
0x130c   : > { %11591 = vmatprep.subr.bf16.mxu1 %v15664_v59  ;;  %9483 = vmatprep.mubr.bf16.mxu1 %v20123_v26  ;;  %v15676_v59 = vld [vmem:[#allocation21 + $0x34] ss:$12 sps:$4 sm:$0xff]   ;;  %v8742_v24 = vadd.f32 %v18712_v12, %v8669_v5  ;;  %v15677_v12 = vld [vmem:[#allocation18 + $0x388] ss:$48 sps:$4 sm:$0xff]  }
0x130e   : > { %9381 = vmatpush2.bf16.msra.mxu0 %v15659_v15  ;;  %v8738_v15 = vadd.f32 %v18696_v35, %v8665_v58  ;;  %v9517_v13 = vmax.f32 %v8742_v24, 0.0  ;;  %v15680_v58 = vld [vmem:[#allocation21 + $0x18] ss:$12 sps:$4 sm:$0xff]  }
0x130f   : > { %11592 = vmatpush1.bf16.msra.mxu1 %v15662_v2  ;;  %9382 = vmatprep.subr.bf16.mxu0 %v15667_v23  ;;  %v15679_v2 = vld [vmem:[#allocation18 + $0x38c] ss:$48 sps:$4 sm:$0xff]   ;;  %v18783_v23 = vpop.f32.mrf.mxu1 }
0x1310   : > { %11593 = vmatprep.subr.bf16.mxu1 %v15670_v41  ;;  %20124 = vst [vmem:[#allocation60_spill] sm:$0xff] %v18783_v23  ;;  %v15682_v41 = vld [vmem:[#allocation21 + $0x1c] ss:$12 sps:$4 sm:$0xff]   ;;  %v9505_v5 = vmax.f32 %v8738_v15, 0.0 }
0x1311   : > { %v18788_v35 = vpop.f32.mrf.mxu1 }
0x1312   : > { %9383 = vmatpush2.bf16.msra.mxu0 %v15665_v25  ;;  %9484 = vmatmul.mubr.bf16.gmra.mxu1 %v18601_v37  ;;  %v18786_v37 = vpop.f32.mrf.mxu0  ;;  %v15685_v25 = vld [vmem:[#allocation18 + $0x32c] ss:$48 sps:$4 sm:$0xff]  }
0x1313   : > { %11594 = vmatpush1.bf16.msra.mxu1 %v15668_v27  ;;  %9384 = vmatprep.subr.bf16.mxu0 %v15673_v14  ;;  %v15688_v27 = vld [vmem:[#allocation21 + $0x4] ss:$12 sps:$4 sm:$0xff]   ;;  %v18790_v14 = vpack.c.bf16 %v9517_v13, %v9505_v5  ;;  %v18796_v15 = vpop.f32.mrf.mxu1  ;;  %v15700_v5 = vld [vmem:[#allocation21 + $0x154] ss:$12 sps:$4 sm:$0xff]  }
0x1314   : > { %11595 = vmatprep.subr.bf16.mxu1 %v15676_v59  ;;  %9493 = vmatprep.mubr.bf16.mxu1 %v20123_v26  ;;  %v15683_v26 = vld [vmem:[#allocation18 + $0x328] ss:$48 sps:$4 sm:$0xff]   ;;  %v18793_v24 = vpop.f32.mrf.mxu0 }
0x1315   : > { %20125 = vst [vmem:[#allocation61_spill] sm:$0xff] %v18790_v14  ;;  %v15686_v59 = vld [vmem:[#allocation21] ss:$12 sps:$4 sm:$0xff]  }
0x1316   : > { %9385 = vmatpush2.bf16.msra.mxu0 %v15671_v8  ;;  %v15691_v8 = vld [vmem:[#allocation21 + $0x22c] ss:$12 sps:$4 sm:$0xff]   ;;  %v18798_v13 = vpop.f32.mrf.mxu0 }
0x1317   : > { %11596 = vmatpush1.bf16.msra.mxu1 %v15674_v42  ;;  %9386 = vmatprep.subr.bf16.mxu0 %v15679_v2  ;;  %v15694_v42 = vld [vmem:[#allocation21 + $0x16c] ss:$12 sps:$4 sm:$0xff]   ;;  %v15689_v2 = vld [vmem:[#allocation21 + $0x228] ss:$12 sps:$4 sm:$0xff]  }
0x1318   : > { %11597 = vmatprep.subr.bf16.mxu1 %v15682_v41  ;;  %v15697_v41 = vld [vmem:[#allocation21 + $0x214] ss:$12 sps:$4 sm:$0xff]  }
0x131a   : > { %9387 = vmatpush2.bf16.msra.mxu0 %v15677_v12  ;;  %9494 = vmatmul.mubr.bf16.gmra.mxu1 %v18626_v47  ;;  %v15692_v47 = vld [vmem:[#allocation21 + $0x168] ss:$12 sps:$4 sm:$0xff]   ;;  %v18800_v12 = vpop.f32.mrf.mxu1 }
0x131b   : > { %11598 = vmatpush1.bf16.msra.mxu1 %v15680_v58  ;;  %11617 = vmatprep.mubr.bf16.mxu1 %v18790_v14 }
0x131c   : > { %9388 = vmatprep.subr.bf16.mxu0 %v15685_v25  ;;  %11599 = vmatprep.subr.bf16.mxu1 %v15688_v27  ;;  %v15695_v25 = vld [vmem:[#allocation21 + $0x210] ss:$12 sps:$4 sm:$0xff]  }
0x131e   : > { %9389 = vmatpush2.bf16.msra.mxu0 %v15683_v26  ;;  %v15698_v26 = vld [vmem:[#allocation21 + $0x150] ss:$12 sps:$4 sm:$0xff]  }
0x131f   : > { %11600 = vmatpush1.bf16.msra.mxu1 %v15686_v59  ;;  %11658 = vmatprep.subr.bf16.mxu0 %v15691_v8  ;;  %v15703_v59 = vld [vmem:[#allocation21 + $0x1fc] ss:$12 sps:$4 sm:$0xff]   ;;  %v18806_v8 = vpop.f32.mrf.mxu1 }
0x1320   : > { %11601 = vmatprep.subr.bf16.mxu1 %v15694_v42  ;;  %20126 = vst [vmem:[#allocation62_spill] sm:$0xff] %v18806_v8  ;;  %v20030_v42 = vsub.s32 3, %v17233_v44 }
0x1321   : > { %v18802_v58 = vpop.f32.mrf.mxu0  ;;  %9391 = vmatmul.mubr.bf16.vlgmr.msra.gmra.mxu0 %v18549_v54  ;;  %v18811_v14 = vpop.f32.mrf.mxu1 }
0x1322   : > { %9400 = vmatprep.mubr.bf16.mxu0 %v18571_v39  ;;  %11659 = vmatpush1.bf16.msra.mxu0 %v15689_v2  ;;  %v15704_v39 = vld [vmem:[#allocation21 + $0x138] ss:$12 sps:$4 sm:$0xff]   ;;  %20127 = vst [vmem:[#allocation63_spill] sm:$0xff] %v18811_v14 }
0x1323   : > { %v8810_v27 = vpop.f32.mrf.mxu0  ;;  %11602 = vmatpush2.bf16.msra.mxu1 %v15692_v47  ;;  %11660 = vmatprep.subr.bf16.mxu0 %v15697_v41  ;;  %v15709_v2 = vld [vmem:[#allocation21 + $0x1e4] ss:$12 sps:$4 sm:$0xff]   ;;  %v18824_v53 = vpop.f32.mrf.mxu1 }
0x1324   : > { %11603 = vmatprep.subr.bf16.mxu1 %v15700_v5  ;;  %v15712_v47 = vld [vmem:[#allocation21 + $0x124] ss:$12 sps:$4 sm:$0xff]   ;;  %v18819_v5 = vrot.slane %v18758_v49, %v20030_v42  ;;  %20128 = vst [vmem:[#allocation64_spill] sm:$0xff] %v18824_v53 }
0x1325   : > { %v18808_v19 = vpop.f32.mrf.mxu0  ;;  %v18832_v23 = vpop.f32.mrf.mxu1 }
0x1326   : > { %11661 = vmatpush1.bf16.msra.mxu0 %v15695_v25  ;;  %v15707_v25 = vld [vmem:[#allocation21 + $0x1e0] ss:$12 sps:$4 sm:$0xff]   ;;  %v8811_v42 = vadd.f32 %v8810_v27, %v18819_v5  ;;  %v18840_v27 = vrot.slane %v18758_v49, %v17242_v62  ;;  %v15730_v62 = vld [vmem:[#allocation21 + $0xdc] ss:$12 sps:$4 sm:$0xff]  }
0x1327   : > { %v8814_v54 = vpop.f32.mrf.mxu0  ;;  %11604 = vmatpush2.bf16.msra.mxu1 %v15698_v26  ;;  %11662 = vmatprep.subr.bf16.mxu0 %v15703_v59  ;;  %v15710_v59 = vld [vmem:[#allocation21 + $0x120] ss:$12 sps:$4 sm:$0xff]  }
0x1328   : > { %11605 = vmatprep.subr.bf16.mxu1 %v15706_v33  ;;  %v15715_v33 = vld [vmem:[#allocation21 + $0x1cc] ss:$12 sps:$4 sm:$0xff]   ;;  %v8815_v8 = vadd.f32 %v8814_v54, %v18819_v5  ;;  %v15724_v54 = vld [vmem:[#allocation21 + $0xf4] ss:$12 sps:$4 sm:$0xff]  }
0x1329   : > { %v18813_v41 = vpop.f32.mrf.mxu0  ;;  %9401 = vmatmul.mubr.bf16.gmra.mxu0 %v18579_v38  ;;  %v15718_v38 = vld [vmem:[#allocation21 + $0x10c] ss:$12 sps:$4 sm:$0xff]  }
0x132a   : > { %9410 = vmatprep.mubr.bf16.mxu0 %v18599_v9  ;;  %11663 = vmatpush1.bf16.msra.mxu0 %v15701_v31  ;;  %v15713_v9 = vld [vmem:[#allocation21 + $0x1c8] ss:$12 sps:$4 sm:$0xff]   ;;  %v8888_v53 = vadd.f32 %v18776_v61, %v8815_v8  ;;  %v15722_v61 = vld [vmem:[#allocation21 + $0xf0] ss:$12 sps:$4 sm:$0xff]  }
0x132b   : > { %v18822_v26 = vpop.f32.mrf.mxu0  ;;  %11606 = vmatpush2.bf16.msra.mxu1 %v15704_v39  ;;  %11664 = vmatprep.subr.bf16.mxu0 %v15709_v2  ;;  %v15716_v39 = vld [vmem:[#allocation21 + $0x108] ss:$12 sps:$4 sm:$0xff]  }
0x132c   : > { %11607 = vmatprep.subr.bf16.mxu1 %v15712_v47  ;;  %v15721_v2 = vld [vmem:[#allocation21 + $0x1b4] ss:$12 sps:$4 sm:$0xff]   ;;  %v15727_v8 = vld [vmem:[#allocation21 + $0x19c] ss:$12 sps:$4 sm:$0xff]  }
0x132d   : > { %v18827_v14 = vpop.f32.mrf.mxu0 }
0x132e   : > { %11665 = vmatpush1.bf16.msra.mxu0 %v15707_v25  ;;  %v8884_v25 = vadd.f32 %v18756_v43, %v8811_v42  ;;  %v8679_v43 = vadd.f32 %v18714_v3, %v18763_v0  ;;  %v8663_v42 = vadd.f32 %v18686_v45, %v18840_v27  ;;  %v15736_v45 = vld [vmem:[#allocation21 + $0xc4] ss:$12 sps:$4 sm:$0xff]  }
0x132f   : > { %v18830_v31 = vpop.f32.mrf.mxu0  ;;  %11608 = vmatpush2.bf16.msra.mxu1 %v15710_v59  ;;  %11666 = vmatprep.subr.bf16.mxu0 %v15715_v33  ;;  %v15719_v59 = vld [vmem:[#allocation21 + $0x1b0] ss:$12 sps:$4 sm:$0xff]  }
0x1330   : > { %11609 = vmatprep.subr.bf16.mxu1 %v15718_v38  ;;  %v8667_v38 = vadd.f32 %v18694_v10, %v18840_v27 }
0x1331   : > { %v18835_v47 = vpop.f32.mrf.mxu0  ;;  %9411 = vmatmul.mubr.bf16.gmra.mxu0 %v18604_v22  ;;  %v18848_v22 = vpop.f32.mrf.mxu1 }
0x1332   : > { %20129 = vst [vmem:[#allocation65_spill] sm:$0xff] %v18835_v47  ;;  %9420 = vmatprep.mubr.bf16.mxu0 %v18624_v20  ;;  %11667 = vmatpush1.bf16.msra.mxu0 %v15713_v9  ;;  %20130 = vst [vmem:[#allocation66_spill] sm:$0xff] %v18848_v22  ;;  %v9519_v47 = vmax.f32 %v8888_v53, 0.0  ;;  %v9507_v9 = vmax.f32 %v8884_v25, 0.0  ;;  %v15728_v53 = vld [vmem:[#allocation21 + $0xd8] ss:$12 sps:$4 sm:$0xff]   ;;  %v8740_v22 = vadd.f32 %v18704_v52, %v8667_v38 }
0x1333   : > { %v18844_v33 = vpop.f32.mrf.mxu0  ;;  %11610 = vmatpush2.bf16.msra.mxu1 %v15716_v39  ;;  %11668 = vmatprep.subr.bf16.mxu0 %v15721_v2  ;;  %v15725_v39 = vld [vmem:[#allocation21 + $0x198] ss:$12 sps:$4 sm:$0xff]   ;;  %v8675_v2 = vadd.f32 %v18707_v4, %v18763_v0  ;;  %v18861_v3 = vpop.f32.mrf.mxu1  ;;  %v8752_v25 = vadd.f32 %v18744_v57, %v8679_v43  ;;  %v8736_v4 = vadd.f32 %v18688_v18, %v8663_v42 }
0x1334   : > { %11611 = vmatprep.subr.bf16.mxu1 %v15724_v54  ;;  %v15733_v54 = vld [vmem:[#allocation21 + $0x184] ss:$12 sps:$4 sm:$0xff]   ;;  %v9516_v38 = vmax.f32 %v8740_v22, 0.0  ;;  %v8677_v57 = vadd.f32 %v18710_v21, %v18840_v27  ;;  %v8689_v42 = vadd.f32 %v18730_v28, %v18763_v0  ;;  %v8685_v21 = vadd.f32 %v18723_v11, %v18763_v0 }
0x1335   : > { %v18852_v20 = vpop.f32.mrf.mxu0  ;;  %v8748_v52 = vadd.f32 %v18728_v48, %v8675_v2  ;;  %v18876_v43 = vpop.f32.mrf.mxu1  ;;  %v9541_v18 = vmax.f32 %v8752_v25, 0.0  ;;  %v9504_v48 = vmax.f32 %v8736_v4, 0.0  ;;  %v15737_v2 = vld [vmem:[#allocation21 + $0x2e8] ss:$12 sps:$4 sm:$0xff]  }
0x1336   : > { %20131 = vst [vmem:[#allocation67_spill] sm:$0xff] %v18852_v20  ;;  %11669 = vmatpush1.bf16.msra.mxu0 %v15719_v59  ;;  %v18863_v20 = vpack.c.bf16 %v9519_v47, %v9507_v9  ;;  %v15739_v47 = vld [vmem:[#allocation21 + $0x2ec] ss:$12 sps:$4 sm:$0xff]   ;;  %v8750_v28 = vadd.f32 %v18736_v16, %v8677_v57  ;;  %v15745_v4 = vld [vmem:[#allocation21 + $0x2d4] ss:$12 sps:$4 sm:$0xff]  }
0x1337   : > { %v18858_v10 = vpop.f32.mrf.mxu0  ;;  %11612 = vmatpush2.bf16.msra.mxu1 %v15722_v61  ;;  %11670 = vmatprep.subr.bf16.mxu0 %v15727_v8  ;;  %v15731_v61 = vld [vmem:[#allocation21 + $0x180] ss:$12 sps:$4 sm:$0xff]   ;;  %v9529_v22 = vmax.f32 %v8748_v52, 0.0  ;;  %v18891_v25 = vpop.f32.mrf.mxu1  ;;  %v15751_v57 = vld [vmem:[#allocation21 + $0x2bc] ss:$12 sps:$4 sm:$0xff]  }
0x1338   : > { %11613 = vmatprep.subr.bf16.mxu1 %v15730_v62  ;;  %20132 = vst [vmem:[#allocation68_spill] sm:$0xff] %v18863_v20  ;;  %v15734_v62 = vld [vmem:[#allocation21 + $0xc0] ss:$12 sps:$4 sm:$0xff]  }
0x1339   : > { %v18866_v59 = vpop.f32.mrf.mxu0  ;;  %9421 = vmatmul.mubr.bf16.gmra.mxu0 %v18630_v29  ;;  %v15742_v29 = vld [vmem:[#allocation21 + $0x3ac] ss:$12 sps:$4 sm:$0xff]   ;;  %v18894_v52 = vpack.c.bf16 %v9541_v18, %v9529_v22  ;;  %v15754_v18 = vld [vmem:[#allocation21 + $0x37c] ss:$12 sps:$4 sm:$0xff]  }
0x133a   : > { %11671 = vmatpush1.bf16.msra.mxu0 %v15725_v39  ;;  %11690 = vmatprep.mubr.bf16.mxu0 %v18863_v20  ;;  %v8673_v39 = vadd.f32 %v18702_v51, %v18840_v27  ;;  %v15748_v51 = vld [vmem:[#allocation21 + $0x394] ss:$12 sps:$4 sm:$0xff]   ;;  %v15749_v22 = vld [vmem:[#allocation21 + $0x2b8] ss:$12 sps:$4 sm:$0xff]  }
0x133b   : > { %v18872_v8 = vpop.f32.mrf.mxu0  ;;  %11614 = vmatpush2.bf16.msra.mxu1 %v15728_v53  ;;  %11672 = vmatprep.subr.bf16.mxu0 %v15733_v54  ;;  %v15740_v54 = vld [vmem:[#allocation21 + $0x3a8] ss:$12 sps:$4 sm:$0xff]  }
0x133c   : > { %11615 = vmatprep.subr.bf16.mxu1 %v15736_v45  ;;  %v18888_v45 = vpack.c.bf16 %v9516_v38, %v9504_v48  ;;  %v8746_v11 = vadd.f32 %v18720_v56, %v8673_v39  ;;  %v15746_v38 = vld [vmem:[#allocation21 + $0x390] ss:$12 sps:$4 sm:$0xff]   ;;  %v8699_v48 = vadd.f32 %v18746_v63, %v18763_v0  ;;  %v8683_v39 = vadd.f32 %v18718_v30, %v18840_v27 }
0x133d   : > { %v18880_v9 = vpop.f32.mrf.mxu0  ;;  %v15757_v30 = vld [vmem:[#allocation21 + $0x2a4] ss:$12 sps:$4 sm:$0xff]  }
0x133e   : > { %11673 = vmatpush1.bf16.msra.mxu0 %v15731_v61  ;;  %v8762_v61 = vadd.f32 %v18774_v46, %v8689_v42  ;;  %v9540_v46 = vmax.f32 %v8750_v28, 0.0  ;;  %v7150_v28 = vsub.s32 5, %v17233_v44 }
0x133f   : > { %v18886_v53 = vpop.f32.mrf.mxu0  ;;  %11616 = vmatpush2.bf16.msra.mxu1 %v15734_v62  ;;  %11674 = vmatprep.subr.bf16.mxu0 %v15739_v47  ;;  %v15743_v62 = vld [vmem:[#allocation21 + $0x2d0] ss:$12 sps:$4 sm:$0xff]   ;;  %v8758_v47 = vadd.f32 %v18754_v7, %v8685_v21  ;;  %v9528_v7 = vmax.f32 %v8746_v11, 0.0 }
0x1340   : > { %11731 = vmatprep.subr.bf16.mxu1 %v15742_v29  ;;  %v8687_v29 = vadd.f32 %v18726_v40, %v18840_v27  ;;  %v9565_v42 = vmax.f32 %v8762_v61, 0.0  ;;  %v8695_v40 = vadd.f32 %v18739_v17, %v18763_v0  ;;  %v15760_v11 = vld [vmem:[#allocation21 + $0x364] ss:$12 sps:$4 sm:$0xff]   ;;  %v8756_v17 = vadd.f32 %v18749_v60, %v8683_v39 }
0x1341   : > { %v18901_v16 = vpop.f32.mrf.mxu0  ;;  %v9553_v21 = vmax.f32 %v8758_v47, 0.0  ;;  %v8697_v60 = vadd.f32 %v18742_v6, %v18840_v27 }
0x1342   : > { %v18897_v20 = vpop.f32.mrf.mxu1  ;;  %11618 = vmatmul.mubr.bf16.vlgmr.msra.gmra.mxu1 %v18888_v45  ;;  %11675 = vmatpush2.bf16.msra.mxu0 %v15737_v2  ;;  %v8760_v63 = vadd.f32 %v18765_v1, %v8687_v29  ;;  %v18927_v1 = vrot.slane %v18758_v49, %v7150_v28  ;;  %v15763_v29 = vld [vmem:[#allocation21 + $0x28c] ss:$12 sps:$4 sm:$0xff]   ;;  %v9552_v39 = vmax.f32 %v8756_v17, 0.0 }
0x1343   : > { %11627 = vmatprep.mubr.bf16.mxu1 %v18894_v52  ;;  %11732 = vmatpush1.bf16.msra.mxu1 %v15740_v54  ;;  %v9029_v54 = vpop.f32.mrf.mxu0  ;;  %v18919_v47 = vpack.c.bf16 %v9565_v42, %v9553_v21 }
0x1344   : > { %v8956_v56 = vpop.f32.mrf.mxu1  ;;  %11676 = vmatprep.subr.bf16.mxu0 %v15745_v4  ;;  %11733 = vmatprep.subr.bf16.mxu1 %v15748_v51  ;;  %v15752_v4 = vld [vmem:[#allocation21 + $0x378] ss:$12 sps:$4 sm:$0xff]   ;;  %v18915_v51 = vpack.c.bf16 %v9540_v46, %v9528_v7 }
0x1345   : > { %v18929_v46 = vpop.f32.mrf.mxu0 }
0x1346   : > { %v18910_v2 = vpop.f32.mrf.mxu1  ;;  %11677 = vmatpush2.bf16.msra.mxu0 %v15743_v62  ;;  %v8772_v62 = vadd.f32 %v18798_v13, %v8699_v48  ;;  %v15758_v13 = vld [vmem:[#allocation21 + $0x360] ss:$12 sps:$4 sm:$0xff]  }
0x1347   : > { %11734 = vmatpush1.bf16.msra.mxu1 %v15746_v38  ;;  %11678 = vmatprep.subr.bf16.mxu0 %v15751_v57  ;;  %v15755_v38 = vld [vmem:[#allocation21 + $0x2a0] ss:$12 sps:$4 sm:$0xff]   ;;  %v8768_v57 = vadd.f32 %v18786_v37, %v8695_v40  ;;  %v15761_v40 = vld [vmem:[#allocation21 + $0x288] ss:$12 sps:$4 sm:$0xff]   ;;  %v9033_v6 = vpop.f32.mrf.mxu0 }
0x1348   : > { %v8960_v61 = vpop.f32.mrf.mxu1  ;;  %11735 = vmatprep.subr.bf16.mxu1 %v15754_v18  ;;  %v9564_v18 = vmax.f32 %v8760_v63, 0.0  ;;  %v15766_v48 = vld [vmem:[#allocation21 + $0x34c] ss:$12 sps:$4 sm:$0xff]   ;;  %v9589_v37 = vmax.f32 %v8772_v62, 0.0  ;;  %v15764_v63 = vld [vmem:[#allocation21 + $0x348] ss:$12 sps:$4 sm:$0xff]  }
0x1349   : > { %v8961_v7 = vadd.f32 %v8960_v61, %v18927_v1  ;;  %v9577_v28 = vmax.f32 %v8768_v57, 0.0  ;;  %v15769_v62 = vld [vmem:[#allocation21 + $0x274] ss:$12 sps:$4 sm:$0xff]  }
0x134a   : > { %v18922_v0 = vpop.f32.mrf.mxu1  ;;  %11628 = vmatmul.mubr.bf16.gmra.mxu1 %v18915_v51  ;;  %11679 = vmatpush2.bf16.msra.mxu0 %v15749_v22  ;;  %v8693_v22 = vadd.f32 %v18734_v36, %v18840_v27  ;;  %v15772_v36 = vld [vmem:[#allocation21 + $0x334] ss:$12 sps:$4 sm:$0xff]   ;;  %v18949_v27 = vrot.slane %v18758_v49, %v17239_v55 }
0x134b   : > { %11637 = vmatprep.mubr.bf16.mxu1 %v18919_v47  ;;  %11736 = vmatpush1.bf16.msra.mxu1 %v15752_v4  ;;  %v8957_v4 = vadd.f32 %v8956_v56, %v18927_v1  ;;  %v9034_v17 = vadd.f32 %v9033_v6, %v8961_v7 }
0x134c   : > { %v18934_v42 = vpop.f32.mrf.mxu1  ;;  %11680 = vmatprep.subr.bf16.mxu0 %v15757_v30  ;;  %11737 = vmatprep.subr.bf16.mxu1 %v15760_v11  ;;  %v18942_v30 = vpack.c.bf16 %v9564_v18, %v9552_v39  ;;  %v8770_v11 = vadd.f32 %v18793_v24, %v8697_v60  ;;  %v8766_v56 = vadd.f32 %v18781_v32, %v8693_v22  ;;  %v15767_v24 = vld [vmem:[#allocation21 + $0x270] ss:$12 sps:$4 sm:$0xff]   ;;  %v18959_v18 = vpop.f32.mrf.mxu0 }
0x134d   : > { %v15770_v60 = vld [vmem:[#allocation21 + $0x330] ss:$12 sps:$4 sm:$0xff]   ;;  %v8825_v32 = vadd.f32 %v18830_v31, %v18819_v5 }
0x134e   : > { %v18939_v21 = vpop.f32.mrf.mxu1  ;;  %11681 = vmatpush2.bf16.msra.mxu0 %v15755_v38  ;;  %v18951_v38 = vpack.c.bf16 %v9589_v37, %v9577_v28  ;;  %v9588_v37 = vmax.f32 %v8770_v11, 0.0  ;;  %v15778_v39 = vld [vmem:[#allocation21 + $0x31c] ss:$12 sps:$4 sm:$0xff]   ;;  %v9576_v22 = vmax.f32 %v8766_v56, 0.0  ;;  %v15776_v11 = vld [vmem:[#allocation21 + $0x318] ss:$12 sps:$4 sm:$0xff]  }
0x134f   : > { %11738 = vmatpush1.bf16.msra.mxu1 %v15758_v13  ;;  %11682 = vmatprep.subr.bf16.mxu0 %v15763_v29  ;;  %v8813_v13 = vadd.f32 %v18808_v19, %v18949_v27  ;;  %v9030_v29 = vadd.f32 %v9029_v54, %v8957_v4  ;;  %v8809_v19 = vadd.f32 %v18802_v58, %v18949_v27  ;;  %v9521_v54 = vmax.f32 %v9034_v17, 0.0  ;;  %v15773_v4 = vld [vmem:[#allocation21 + $0x258] ss:$12 sps:$4 sm:$0xff]  }
0x1350   : > { %v18945_v61 = vpop.f32.mrf.mxu1  ;;  %11739 = vmatprep.subr.bf16.mxu1 %v15766_v48  ;;  %v15775_v48 = vld [vmem:[#allocation21 + $0x25c] ss:$12 sps:$4 sm:$0xff]   ;;  %v8898_v58 = vadd.f32 %v18800_v12, %v8825_v32  ;;  %v15784_v17 = vld [vmem:[#allocation21 + $0x304] ss:$12 sps:$4 sm:$0xff]   ;;  %v8823_v12 = vadd.f32 %v18827_v14, %v18949_v27  ;;  %v8819_v14 = vadd.f32 %v18813_v41, %v18949_v27 }
0x1351   : > { %v8886_v6 = vadd.f32 %v18767_v50, %v8813_v13  ;;  %v9509_v31 = vmax.f32 %v9030_v29, 0.0  ;;  %v8882_v56 = vadd.f32 %v18751_v34, %v8809_v19  ;;  %v15779_v29 = vld [vmem:[#allocation21 + $0x240] ss:$12 sps:$4 sm:$0xff]  }
0x1352   : > { %v18954_v57 = vpop.f32.mrf.mxu1  ;;  %11638 = vmatmul.mubr.bf16.gmra.mxu1 %v18942_v30  ;;  %11683 = vmatpush2.bf16.msra.mxu0 %v15761_v40  ;;  %v8821_v40 = vadd.f32 %v18822_v26, %v18819_v5  ;;  %v15781_v26 = vld [vmem:[#allocation21 + $0x244] ss:$12 sps:$4 sm:$0xff]   ;;  %v15782_v34 = vld [vmem:[#allocation21 + $0x300] ss:$12 sps:$4 sm:$0xff]   ;;  %v9543_v32 = vmax.f32 %v8898_v58, 0.0 }
0x1353   : > { %11647 = vmatprep.mubr.bf16.mxu1 %v18951_v38  ;;  %11740 = vmatpush1.bf16.msra.mxu1 %v15764_v63  ;;  %v18973_v63 = vpop.f32.mrf.mxu0  ;;  %v15790_v19 = vld [vmem:[#allocation21 + $0x46c] ss:$12 sps:$4 sm:$0xff]   ;;  %v15788_v58 = vld [vmem:[#allocation21 + $0x468] ss:$12 sps:$4 sm:$0xff]  }
0x1354   : > { %v18964_v7 = vpop.f32.mrf.mxu1  ;;  %11684 = vmatprep.subr.bf16.mxu0 %v15769_v62  ;;  %11741 = vmatprep.subr.bf16.mxu1 %v15772_v36  ;;  %v18975_v62 = vpack.c.bf16 %v9588_v37, %v9576_v22  ;;  %v8894_v50 = vadd.f32 %v18788_v35, %v8821_v40  ;;  %v15787_v37 = vld [vmem:[#allocation21 + $0x52c] ss:$12 sps:$4 sm:$0xff]   ;;  %v8835_v35 = vadd.f32 %v18858_v10, %v18819_v5 }
0x1355   : > { %v8831_v40 = vadd.f32 %v18844_v33, %v18819_v5  ;;  %v8896_v10 = vadd.f32 %v18796_v15, %v8823_v12  ;;  %v15796_v33 = vld [vmem:[#allocation21 + $0x454] ss:$12 sps:$4 sm:$0xff]   ;;  %v15791_v12 = vld [vmem:[#allocation21 + $0x510] ss:$12 sps:$4 sm:$0xff]  }
0x1356   : > { %v18970_v28 = vpop.f32.mrf.mxu1  ;;  %11685 = vmatpush2.bf16.msra.mxu0 %v15767_v24  ;;  %v18981_v24 = vpack.c.bf16 %v9521_v54, %v9509_v31  ;;  %v9506_v54 = vmax.f32 %v8882_v56, 0.0  ;;  %v9531_v22 = vmax.f32 %v8894_v50, 0.0  ;;  %v8908_v41 = vadd.f32 %v18832_v23, %v8835_v35  ;;  %v20136_v50 = vld [vmem:[#allocation60_spill] sm:$0xff] }
0x1357   : > { %11742 = vmatpush1.bf16.msra.mxu1 %v15770_v60  ;;  %11686 = vmatprep.subr.bf16.mxu0 %v15775_v48  ;;  %v9518_v60 = vmax.f32 %v8886_v6, 0.0  ;;  %v18989_v48 = vpop.f32.mrf.mxu0  ;;  %v15785_v6 = vld [vmem:[#allocation21 + $0x528] ss:$12 sps:$4 sm:$0xff]  }
0x1358   : > { %v18978_v36 = vpop.f32.mrf.mxu1  ;;  %11743 = vmatprep.subr.bf16.mxu1 %v15778_v39  ;;  %20133 = vst [vmem:[#allocation69_spill] sm:$0xff] %v18981_v24  ;;  %v19010_v56 = vpack.c.bf16 %v9543_v32, %v9531_v22  ;;  %v15794_v32 = vld [vmem:[#allocation21 + $0x450] ss:$12 sps:$4 sm:$0xff]  }
0x1359   : > { %v19002_v31 = vpack.c.bf16 %v9518_v60, %v9506_v54  ;;  %v20137_v60 = vld [vmem:[#allocation63_spill] sm:$0xff]  ;;  %v9567_v54 = vmax.f32 %v8908_v41, 0.0  ;;  %v20140_v41 = vld [vmem:[#allocation64_spill] sm:$0xff] }
0x135a   : > { %v18984_v13 = vpop.f32.mrf.mxu1  ;;  %11648 = vmatmul.mubr.bf16.gmra.mxu1 %v18975_v62  ;;  %11687 = vmatpush2.bf16.msra.mxu0 %v15773_v4  ;;  %20135 = vst [vmem:[#allocation71_spill] sm:$0xff] %v19010_v56  ;;  %v8904_v15 = vadd.f32 %v20137_v60, %v8831_v40  ;;  %v15802_v40 = vld [vmem:[#allocation21 + $0x43c] ss:$12 sps:$4 sm:$0xff]  }
0x135b   : > { %11744 = vmatpush1.bf16.msra.mxu1 %v15776_v11  ;;  %11763 = vmatprep.mubr.bf16.mxu1 %v18981_v24  ;;  %20134 = vst [vmem:[#allocation70_spill] sm:$0xff] %v19002_v31  ;;  %v19005_v11 = vpop.f32.mrf.mxu0 }
0x135c   : > { %v18994_v39 = vpop.f32.mrf.mxu1  ;;  %11688 = vmatprep.subr.bf16.mxu0 %v15781_v26  ;;  %11745 = vmatprep.subr.bf16.mxu1 %v15784_v17  ;;  %v15793_v26 = vld [vmem:[#allocation21 + $0x514] ss:$12 sps:$4 sm:$0xff]   ;;  %v9555_v60 = vmax.f32 %v8904_v15, 0.0 }
0x135d   : > { %v19018_v35 = vpop.f32.mrf.mxu0 }
0x135e   : > { %v19000_v4 = vpop.f32.mrf.mxu1  ;;  %11689 = vmatpush2.bf16.msra.mxu0 %v15779_v29  ;;  %v8892_v29 = vadd.f32 %v20136_v50, %v8819_v14  ;;  %v8845_v14 = vadd.f32 %v18886_v53, %v18819_v5  ;;  %v15800_v53 = vld [vmem:[#allocation21 + $0x438] ss:$12 sps:$4 sm:$0xff]   ;;  %v19036_v15 = vpack.c.bf16 %v9567_v54, %v9555_v60  ;;  %v15806_v54 = vld [vmem:[#allocation21 + $0x420] ss:$12 sps:$4 sm:$0xff]  }
0x135f   : > { %11746 = vmatpush1.bf16.msra.mxu1 %v15782_v34  ;;  %11804 = vmatprep.subr.bf16.mxu0 %v15787_v37  ;;  %v9542_v34 = vmax.f32 %v8896_v10, 0.0  ;;  %v20138_v37 = vld [vmem:[#allocation67_spill] sm:$0xff]  ;;  %v20139_v10 = vld [vmem:[#allocation65_spill] sm:$0xff] }
0x1360   : > { %v19008_v17 = vpop.f32.mrf.mxu1  ;;  %11747 = vmatprep.subr.bf16.mxu1 %v15790_v19  ;;  %v8833_v23 = vadd.f32 %v20138_v37, %v18949_v27  ;;  %v15799_v19 = vld [vmem:[#allocation21 + $0x4fc] ss:$12 sps:$4 sm:$0xff]   ;;  %v8829_v50 = vadd.f32 %v20139_v10, %v18949_v27  ;;  %v8841_v37 = vadd.f32 %v18872_v8, %v18819_v5  ;;  %v15808_v5 = vld [vmem:[#allocation21 + $0x424] ss:$12 sps:$4 sm:$0xff]   ;;  %v15814_v10 = vld [vmem:[#allocation21 + $0x40c] ss:$12 sps:$4 sm:$0xff]  }
0x1361   : > { %11691 = vmatmul.mubr.bf16.vlgmr.msra.gmra.mxu0 %v19002_v31  ;;  %v19031_v31 = vpop.f32.mrf.mxu0  ;;  %v20141_v8 = vld [vmem:[#allocation62_spill] sm:$0xff] }
0x1362   : > { %11700 = vmatprep.mubr.bf16.mxu0 %v19010_v56  ;;  %11805 = vmatpush1.bf16.msra.mxu0 %v15785_v6  ;;  %v19022_v22 = vpop.f32.mrf.mxu1  ;;  %v9530_v6 = vmax.f32 %v8892_v29, 0.0  ;;  %v8906_v56 = vadd.f32 %v20140_v41, %v8833_v23  ;;  %v8918_v29 = vadd.f32 %v18891_v25, %v8845_v14  ;;  %v15803_v23 = vld [vmem:[#allocation21 + $0x4e0] ss:$12 sps:$4 sm:$0xff]   ;;  %v8843_v25 = vadd.f32 %v18880_v9, %v18949_v27  ;;  %v15809_v9 = vld [vmem:[#allocation21 + $0x4c8] ss:$12 sps:$4 sm:$0xff]  }
0x1363   : > { %11748 = vmatpush2.bf16.msra.mxu1 %v15788_v58  ;;  %11806 = vmatprep.subr.bf16.mxu0 %v15793_v26  ;;  %v15797_v58 = vld [vmem:[#allocation21 + $0x4f8] ss:$12 sps:$4 sm:$0xff]  }
0x1364   : > { %11749 = vmatprep.subr.bf16.mxu1 %v15796_v33  ;;  %v19028_v26 = vpack.c.bf16 %v9542_v34, %v9530_v6  ;;  %v15805_v33 = vld [vmem:[#allocation21 + $0x4e4] ss:$12 sps:$4 sm:$0xff]   ;;  %v19034_v24 = vpop.f32.mrf.mxu1  ;;  %v8914_v34 = vadd.f32 %v18861_v3, %v8841_v37  ;;  %v15811_v14 = vld [vmem:[#allocation21 + $0x4cc] ss:$12 sps:$4 sm:$0xff]  }
0x1366   : > { %11807 = vmatpush1.bf16.msra.mxu0 %v15791_v12  ;;  %v8902_v12 = vadd.f32 %v20141_v8, %v8829_v50  ;;  %v19046_v6 = vpop.f32.mrf.mxu1  ;;  %v8839_v50 = vadd.f32 %v18866_v59, %v18949_v27  ;;  %v9579_v60 = vmax.f32 %v8914_v34, 0.0  ;;  %v15820_v59 = vld [vmem:[#allocation21 + $0x3f4] ss:$12 sps:$4 sm:$0xff]   ;;  %v20142_v27 = vld [vmem:[#allocation66_spill] sm:$0xff] }
0x1367   : > { %11750 = vmatpush2.bf16.msra.mxu1 %v15794_v32  ;;  %11808 = vmatprep.subr.bf16.mxu0 %v15799_v19  ;;  %v9566_v32 = vmax.f32 %v8906_v56, 0.0  ;;  %v19044_v19 = vpop.f32.mrf.mxu0  ;;  %v7146_v56 = vsub.s32 4, %v17233_v44 }
0x1368   : > { %11751 = vmatprep.subr.bf16.mxu1 %v15802_v40  ;;  %v9591_v40 = vmax.f32 %v8918_v29, 0.0  ;;  %v9554_v3 = vmax.f32 %v8902_v12, 0.0  ;;  %v19056_v29 = vpop.f32.mrf.mxu1  ;;  %v8912_v8 = vadd.f32 %v20142_v27, %v8839_v50 }
0x1369   : > { %11701 = vmatmul.mubr.bf16.gmra.mxu0 %v19028_v26  ;;  %v19054_v41 = vpop.f32.mrf.mxu0  ;;  %v19063_v12 = vrot.slane %v18758_v49, %v7146_v56 }
0x136a   : > { %11710 = vmatprep.mubr.bf16.mxu0 %v19036_v15  ;;  %11809 = vmatpush1.bf16.msra.mxu0 %v15797_v58  ;;  %v19051_v37 = vpack.c.bf16 %v9566_v32, %v9554_v3  ;;  %v8916_v58 = vadd.f32 %v18876_v43, %v8843_v25  ;;  %v15815_v43 = vld [vmem:[#allocation21 + $0x4b0] ss:$12 sps:$4 sm:$0xff]   ;;  %v8971_v3 = vadd.f32 %v18945_v61, %v18927_v1 }
0x136b   : > { %11752 = vmatpush2.bf16.msra.mxu1 %v15800_v53  ;;  %11810 = vmatprep.subr.bf16.mxu0 %v15805_v33  ;;  %v15812_v53 = vld [vmem:[#allocation21 + $0x408] ss:$12 sps:$4 sm:$0xff]   ;;  %v15818_v32 = vld [vmem:[#allocation21 + $0x3f0] ss:$12 sps:$4 sm:$0xff]   ;;  %v8955_v50 = vadd.f32 %v18897_v20, %v19063_v12 }
0x136c   : > { %11753 = vmatprep.subr.bf16.mxu1 %v15808_v5  ;;  %v15817_v33 = vld [vmem:[#allocation21 + $0x4b4] ss:$12 sps:$4 sm:$0xff]   ;;  %v19058_v5 = vpack.c.bf16 %v9591_v40, %v9579_v60  ;;  %v9590_v34 = vmax.f32 %v8916_v58, 0.0  ;;  %v15823_v25 = vld [vmem:[#allocation21 + $0x49c] ss:$12 sps:$4 sm:$0xff]   ;;  %v9044_v20 = vadd.f32 %v19005_v11, %v8971_v3  ;;  %v8965_v3 = vadd.f32 %v18922_v0, %v19063_v12 }
0x136d   : > { %v15826_v40 = vld [vmem:[#allocation21 + $0x3dc] ss:$12 sps:$4 sm:$0xff]   ;;  %v15821_v60 = vld [vmem:[#allocation21 + $0x498] ss:$12 sps:$4 sm:$0xff]   ;;  %v9028_v27 = vadd.f32 %v18901_v16, %v8955_v50  ;;  %v7158_v16 = vsub.s32 7, %v17233_v44 }
0x136e   : > { %11811 = vmatpush1.bf16.msra.mxu0 %v15803_v23  ;;  %v19066_v23 = vpop.f32.mrf.mxu0  ;;  %v15832_v61 = vld [vmem:[#allocation21 + $0x3c4] ss:$12 sps:$4 sm:$0xff]   ;;  %v15838_v11 = vld [vmem:[#allocation21 + $0x6ac] ss:$12 sps:$4 sm:$0xff]   ;;  %v15833_v50 = vld [vmem:[#allocation21 + $0x5e8] ss:$12 sps:$4 sm:$0xff]  }
0x136f   : > { %11754 = vmatpush2.bf16.msra.mxu1 %v15806_v54  ;;  %11812 = vmatprep.subr.bf16.mxu0 %v15811_v14  ;;  %v8959_v54 = vadd.f32 %v18910_v2, %v19063_v12  ;;  %v19070_v14 = vpop.f32.mrf.mxu1  ;;  %v15824_v2 = vld [vmem:[#allocation21 + $0x3d8] ss:$12 sps:$4 sm:$0xff]   ;;  %v15841_v0 = vld [vmem:[#allocation21 + $0x5d4] ss:$12 sps:$4 sm:$0xff]  }
0x1370   : > { %11755 = vmatprep.subr.bf16.mxu1 %v15814_v10  ;;  %v9578_v10 = vmax.f32 %v8912_v8, 0.0  ;;  %v19080_v58 = vpop.f32.mrf.mxu0 }
0x1371   : > { %11711 = vmatmul.mubr.bf16.gmra.mxu0 %v19051_v37 }
0x1372   : > { %11720 = vmatprep.mubr.bf16.mxu0 %v19058_v5  ;;  %11813 = vmatpush1.bf16.msra.mxu0 %v15809_v9  ;;  %v19076_v56 = vpack.c.bf16 %v9590_v34, %v9578_v10  ;;  %v8967_v9 = vadd.f32 %v18934_v42, %v18927_v1  ;;  %v15827_v42 = vld [vmem:[#allocation21 + $0x480] ss:$12 sps:$4 sm:$0xff]   ;;  %v9508_v10 = vmax.f32 %v9028_v27, 0.0 }
0x1373   : > { %11756 = vmatpush2.bf16.msra.mxu1 %v15812_v53  ;;  %11814 = vmatprep.subr.bf16.mxu0 %v15817_v33  ;;  %v15829_v53 = vld [vmem:[#allocation21 + $0x484] ss:$12 sps:$4 sm:$0xff]   ;;  %v9032_v33 = vadd.f32 %v18929_v46, %v8959_v54  ;;  %v15830_v34 = vld [vmem:[#allocation21 + $0x3c0] ss:$12 sps:$4 sm:$0xff]  }
0x1374   : > { %11757 = vmatprep.subr.bf16.mxu1 %v15820_v59  ;;  %v19083_v59 = vpop.f32.mrf.mxu1  ;;  %v9040_v8 = vadd.f32 %v18973_v63, %v8967_v9  ;;  %v15835_v46 = vld [vmem:[#allocation21 + $0x5ec] ss:$12 sps:$4 sm:$0xff]   ;;  %v8981_v63 = vadd.f32 %v18978_v36, %v18927_v1  ;;  %v19108_v36 = vrot.slane %v18758_v49, %v7158_v16  ;;  %v15842_v49 = vld [vmem:[#allocation21 + $0x690] ss:$12 sps:$4 sm:$0xff]  }
0x1375   : > { %v15850_v16 = vld [vmem:[#allocation21 + $0x67c] ss:$12 sps:$4 sm:$0xff]  }
0x1376   : > { %11815 = vmatpush1.bf16.msra.mxu0 %v15815_v43  ;;  %v19089_v43 = vpop.f32.mrf.mxu0  ;;  %v19093_v54 = vpop.f32.mrf.mxu1  ;;  %v9054_v27 = vadd.f32 %v19054_v41, %v8981_v63  ;;  %v8979_v41 = vadd.f32 %v18970_v28, %v19063_v12 }
0x1377   : > { %11758 = vmatpush2.bf16.msra.mxu1 %v15818_v32  ;;  %11816 = vmatprep.subr.bf16.mxu0 %v15823_v25  ;;  %v9520_v32 = vmax.f32 %v9032_v33, 0.0  ;;  %v8969_v25 = vadd.f32 %v18939_v21, %v19063_v12  ;;  %v8977_v21 = vadd.f32 %v18964_v7, %v18927_v1 }
0x1378   : > { %11759 = vmatprep.subr.bf16.mxu1 %v15826_v40  ;;  %v9545_v40 = vmax.f32 %v9044_v20, 0.0  ;;  %v9063_v9 = vpop.f32.mrf.mxu0  ;;  %v15844_v20 = vld [vmem:[#allocation21 + $0x694] ss:$12 sps:$4 sm:$0xff]  }
0x1379   : > { %11721 = vmatmul.mubr.bf16.gmra.mxu0 %v19076_v56  ;;  %v9042_v33 = vadd.f32 %v18989_v48, %v8969_v25  ;;  %v15839_v48 = vld [vmem:[#allocation21 + $0x5d0] ss:$12 sps:$4 sm:$0xff]  }
0x137a   : > { %11817 = vmatpush1.bf16.msra.mxu0 %v15821_v60  ;;  %v9533_v60 = vmax.f32 %v9040_v8, 0.0  ;;  %v9038_v8 = vadd.f32 %v18959_v18, %v8965_v3  ;;  %v8975_v3 = vadd.f32 %v18954_v57, %v19063_v12 }
0x137b   : > { %11760 = vmatpush2.bf16.msra.mxu1 %v15824_v2  ;;  %11818 = vmatprep.subr.bf16.mxu0 %v15829_v53  ;;  %v15836_v2 = vld [vmem:[#allocation21 + $0x6a8] ss:$12 sps:$4 sm:$0xff]   ;;  %v19102_v53 = vpack.c.bf16 %v9520_v32, %v9508_v10  ;;  %v9544_v25 = vmax.f32 %v9042_v33, 0.0 }
0x137c   : > { %11761 = vmatprep.subr.bf16.mxu1 %v15832_v61  ;;  %v19105_v61 = vpop.f32.mrf.mxu1  ;;  %v19113_v7 = vpack.c.bf16 %v9545_v40, %v9533_v60  ;;  %v15847_v32 = vld [vmem:[#allocation21 + $0x5bc] ss:$12 sps:$4 sm:$0xff]   ;;  %v9569_v40 = vmax.f32 %v9054_v27, 0.0  ;;  %v9532_v10 = vmax.f32 %v9038_v8, 0.0  ;;  %v8987_v60 = vadd.f32 %v18994_v39, %v18927_v1  ;;  %v15853_v27 = vld [vmem:[#allocation21 + $0x5a4] ss:$12 sps:$4 sm:$0xff]  }
0x137d   : > { %v15856_v8 = vld [vmem:[#allocation21 + $0x664] ss:$12 sps:$4 sm:$0xff]   ;;  %v9048_v39 = vadd.f32 %v19018_v35, %v8975_v3  ;;  %v8985_v3 = vadd.f32 %v18984_v13, %v19063_v12  ;;  %v15868_v13 = vld [vmem:[#allocation21 + $0x634] ss:$12 sps:$4 sm:$0xff]  }
0x137e   : > { %11819 = vmatpush1.bf16.msra.mxu0 %v15827_v42  ;;  %v19132_v33 = vpack.c.bf16 %v9544_v25, %v9532_v10 }
0x137f   : > { %11762 = vmatpush2.bf16.msra.mxu1 %v15830_v34  ;;  %11820 = vmatprep.subr.bf16.mxu0 %v15835_v46  ;;  %v9050_v34 = vadd.f32 %v19031_v31, %v8977_v21  ;;  %v8991_v31 = vadd.f32 %v19008_v17, %v18927_v1  ;;  %v9052_v17 = vadd.f32 %v19044_v19, %v8979_v41  ;;  %v15851_v19 = vld [vmem:[#allocation21 + $0x5a0] ss:$12 sps:$4 sm:$0xff]   ;;  %v9556_v10 = vmax.f32 %v9048_v39, 0.0 }
0x1380   : > { %11877 = vmatprep.subr.bf16.mxu1 %v15838_v11  ;;  %v19121_v11 = vpop.f32.mrf.mxu1  ;;  %v8989_v41 = vadd.f32 %v19000_v4, %v19063_v12  ;;  %v16309_v12 = vld [vmem:[#allocation19] sm:$0xff]  ;;  %v9058_v39 = vadd.f32 %v19066_v23, %v8985_v3  ;;  %v15874_v23 = vld [vmem:[#allocation21 + $0x61c] ss:$12 sps:$4 sm:$0xff]  }
0x1381   : > { %v19111_v42 = vpop.f32.mrf.mxu0  ;;  %v9557_v28 = vmax.f32 %v9050_v34, 0.0  ;;  %v9568_v25 = vmax.f32 %v9052_v17, 0.0  ;;  %v15872_v3 = vld [vmem:[#allocation21 + $0x618] ss:$12 sps:$4 sm:$0xff]  }
0x1382   : > { %11764 = vmatmul.mubr.bf16.vlgmr.msra.gmra.mxu1 %v19102_v53  ;;  %11821 = vmatpush2.bf16.msra.mxu0 %v15833_v50  ;;  %v15845_v50 = vld [vmem:[#allocation21 + $0x5b8] ss:$12 sps:$4 sm:$0xff]   ;;  %v9062_v17 = vadd.f32 %v19089_v43, %v8989_v41  ;;  %v15863_v43 = vld [vmem:[#allocation21 + $0x570] ss:$12 sps:$4 sm:$0xff]  }
0x1383   : > { %v9102_v46 = vpop.f32.mrf.mxu0  ;;  %11773 = vmatprep.mubr.bf16.mxu1 %v19113_v7  ;;  %11878 = vmatpush1.bf16.msra.mxu1 %v15836_v2  ;;  %v15848_v2 = vld [vmem:[#allocation21 + $0x678] ss:$12 sps:$4 sm:$0xff]   ;;  %v19141_v1 = vpack.c.bf16 %v9569_v40, %v9557_v28  ;;  %v15857_v28 = vld [vmem:[#allocation21 + $0x588] ss:$12 sps:$4 sm:$0xff]  }
0x1384   : > { %v9103_v18 = vadd.f32 %v9102_v46, %v19108_v36  ;;  %11822 = vmatprep.subr.bf16.mxu0 %v15841_v0  ;;  %11879 = vmatprep.subr.bf16.mxu1 %v15844_v20  ;;  %v19135_v0 = vpop.f32.mrf.mxu1 }
0x1385   : > { %v19126_v63 = vpop.f32.mrf.mxu0 }
0x1386   : > { %11823 = vmatpush2.bf16.msra.mxu0 %v15839_v48  ;;  %v9176_v20 = vadd.f32 %v19034_v24, %v9103_v18  ;;  %v9064_v48 = vadd.f32 %v9063_v9, %v8991_v31  ;;  %v9060_v24 = vadd.f32 %v19080_v58, %v8987_v60  ;;  %v15859_v9 = vld [vmem:[#allocation21 + $0x58c] ss:$12 sps:$4 sm:$0xff]   ;;  %v19150_v18 = vpop.f32.mrf.mxu1  ;;  %v7154_v58 = vsub.s32 6, %v17233_v44 }
0x1387   : > { %v9106_v21 = vpop.f32.mrf.mxu0  ;;  %11880 = vmatpush1.bf16.msra.mxu1 %v15842_v49  ;;  %11824 = vmatprep.subr.bf16.mxu0 %v15847_v32  ;;  %v15854_v32 = vld [vmem:[#allocation21 + $0x660] ss:$12 sps:$4 sm:$0xff]  }
0x1388   : > { %v9107_v57 = vadd.f32 %v9106_v21, %v19108_v36  ;;  %11881 = vmatprep.subr.bf16.mxu1 %v15850_v16  ;;  %v9511_v35 = vmax.f32 %v9176_v20, 0.0  ;;  %v15862_v16 = vld [vmem:[#allocation21 + $0x64c] ss:$12 sps:$4 sm:$0xff]   ;;  %v9593_v40 = vmax.f32 %v9064_v48, 0.0  ;;  %v9581_v4 = vmax.f32 %v9060_v24, 0.0  ;;  %v19160_v20 = vpop.f32.mrf.mxu1 }
0x1389   : > { %v19139_v34 = vpop.f32.mrf.mxu0  ;;  %v15860_v21 = vld [vmem:[#allocation21 + $0x648] ss:$12 sps:$4 sm:$0xff]   ;;  %v15866_v24 = vld [vmem:[#allocation21 + $0x630] ss:$12 sps:$4 sm:$0xff]  }
0x138a   : > { %v9180_v46 = vadd.f32 %v19056_v29, %v9107_v57  ;;  %11774 = vmatmul.mubr.bf16.gmra.mxu1 %v19132_v33  ;;  %11825 = vmatpush2.bf16.msra.mxu0 %v15845_v50  ;;  %v15865_v57 = vld [vmem:[#allocation21 + $0x574] ss:$12 sps:$4 sm:$0xff]   ;;  %v19167_v48 = vpack.c.bf16 %v9593_v40, %v9581_v4  ;;  %v15869_v40 = vld [vmem:[#allocation21 + $0x558] ss:$12 sps:$4 sm:$0xff]  }
0x138b   : > { %v9112_v49 = vpop.f32.mrf.mxu0  ;;  %11783 = vmatprep.mubr.bf16.mxu1 %v19141_v1  ;;  %11882 = vmatpush1.bf16.msra.mxu1 %v15848_v2  ;;  %v19157_v2 = vpack.c.bf16 %v9568_v25, %v9556_v10  ;;  %v19174_v25 = vpop.f32.mrf.mxu1 }
0x138c   : > { %v9523_v29 = vmax.f32 %v9180_v46, 0.0  ;;  %11826 = vmatprep.subr.bf16.mxu0 %v15853_v27  ;;  %11883 = vmatprep.subr.bf16.mxu1 %v15856_v8  ;;  %v19163_v27 = vrot.slane %v16309_v12, %v7154_v58 }
0x138d   : > { %v9114_v31 = vpop.f32.mrf.mxu0 }
0x138e   : > { %11827 = vmatpush2.bf16.msra.mxu0 %v15851_v19  ;;  %v19155_v50 = vpack.c.bf16 %v9523_v29, %v9511_v35  ;;  %v9105_v46 = vadd.f32 %v19126_v63, %v19163_v27  ;;  %v9101_v35 = vadd.f32 %v19111_v42, %v19163_v27  ;;  %v9580_v63 = vmax.f32 %v9058_v39, 0.0 }
0x138f   : > { %v9116_v60 = vpop.f32.mrf.mxu0  ;;  %11884 = vmatpush1.bf16.msra.mxu1 %v15854_v32  ;;  %11828 = vmatprep.subr.bf16.mxu0 %v15859_v9  ;;  %v15871_v32 = vld [vmem:[#allocation21 + $0x55c] ss:$12 sps:$4 sm:$0xff]   ;;  %v9592_v9 = vmax.f32 %v9062_v17, 0.0  ;;  %v9115_v12 = vadd.f32 %v9114_v31, %v19163_v27 }
0x1390   : > { %11836 = vmatprep.mubr.bf16.mxu0 %v19155_v50  ;;  %11885 = vmatprep.subr.bf16.mxu1 %v15862_v16  ;;  %v9117_v41 = vadd.f32 %v9116_v60, %v19108_v36  ;;  %v9113_v16 = vadd.f32 %v9112_v49, %v19108_v36  ;;  %v9178_v58 = vadd.f32 %v19046_v6, %v9105_v46  ;;  %v19185_v60 = vpop.f32.mrf.mxu1  ;;  %v15875_v6 = vld [vmem:[#allocation21 + $0x540] ss:$12 sps:$4 sm:$0xff]  }
0x1391   : > { %v19165_v8 = vpop.f32.mrf.mxu0  ;;  %v19183_v4 = vpack.c.bf16 %v9592_v9, %v9580_v63  ;;  %v9174_v17 = vadd.f32 %v19022_v22, %v9101_v35  ;;  %v9111_v9 = vadd.f32 %v19139_v34, %v19163_v27  ;;  %v15893_v35 = vld [vmem:[#allocation21 + $0x828] ss:$12 sps:$4 sm:$0xff]   ;;  %v19206_v34 = vld [vmem:[#allocation19 + $0x8] sm:$0xf] }
0x1392   : > { %11784 = vmatmul.mubr.bf16.gmra.mxu1 %v19157_v2  ;;  %11829 = vmatpush2.bf16.msra.mxu0 %v15857_v28  ;;  %v15877_v28 = vld [vmem:[#allocation21 + $0x544] ss:$12 sps:$4 sm:$0xff]   ;;  %v9190_v42 = vadd.f32 %v19105_v61, %v9117_v41  ;;  %v15895_v61 = vld [vmem:[#allocation21 + $0x82c] ss:$12 sps:$4 sm:$0xff]   ;;  %v19194_v46 = vpop.f32.mrf.mxu1 }
0x1393   : > { %v9122_v19 = vpop.f32.mrf.mxu0  ;;  %11793 = vmatprep.mubr.bf16.mxu1 %v19167_v48  ;;  %11886 = vmatpush1.bf16.msra.mxu1 %v15860_v21  ;;  %v15880_v21 = vld [vmem:[#allocation21 + $0x604] ss:$12 sps:$4 sm:$0xff]  }
0x1394   : > { %11830 = vmatprep.subr.bf16.mxu0 %v15865_v57  ;;  %11887 = vmatprep.subr.bf16.mxu1 %v15868_v13  ;;  %v9186_v57 = vadd.f32 %v19083_v59, %v9113_v16  ;;  %v9522_v13 = vmax.f32 %v9178_v58, 0.0  ;;  %v9510_v59 = vmax.f32 %v9174_v17, 0.0  ;;  %v9123_v31 = vadd.f32 %v9122_v19, %v19108_v36  ;;  %v15881_v58 = vld [vmem:[#allocation21 + $0x768] ss:$12 sps:$4 sm:$0xff]  }
0x1395   : > { %v19179_v29 = vpop.f32.mrf.mxu0  ;;  %v9188_v16 = vadd.f32 %v19093_v54, %v9115_v12  ;;  %v15886_v19 = vld [vmem:[#allocation21 + $0x754] ss:$12 sps:$4 sm:$0xff]   ;;  %v20144_v54 = vld [vmem:[#allocation33_spill] sm:$0xff] }
0x1396   : > { %11831 = vmatpush2.bf16.msra.mxu0 %v15863_v43  ;;  %v15878_v43 = vld [vmem:[#allocation21 + $0x600] ss:$12 sps:$4 sm:$0xff]   ;;  %v19202_v63 = vpack.c.bf16 %v9522_v13, %v9510_v59 }
0x1397   : > { %v9126_v10 = vpop.f32.mrf.mxu0  ;;  %11888 = vmatpush1.bf16.msra.mxu1 %v15866_v24  ;;  %11832 = vmatprep.subr.bf16.mxu0 %v15871_v32  ;;  %v9547_v24 = vmax.f32 %v9190_v42, 0.0  ;;  %v15883_v32 = vld [vmem:[#allocation21 + $0x76c] ss:$12 sps:$4 sm:$0xff]   ;;  %v9546_v12 = vmax.f32 %v9188_v16, 0.0 }
0x1398   : > { %11889 = vmatprep.subr.bf16.mxu1 %v15874_v23  ;;  %v9127_v22 = vadd.f32 %v9126_v10, %v19108_v36  ;;  %v9535_v23 = vmax.f32 %v9186_v57, 0.0  ;;  %v15901_v10 = vld [vmem:[#allocation21 + $0x814] ss:$12 sps:$4 sm:$0xff]   ;;  %v19216_v57 = vrot.slane %v19206_v34, %v20144_v54 }
0x1399   : > { %v19189_v49 = vpop.f32.mrf.mxu0 }
0x139a   : > { %11794 = vmatmul.mubr.bf16.gmra.mxu1 %v19183_v4  ;;  %11833 = vmatpush2.bf16.msra.mxu0 %v15869_v40  ;;  %v19208_v42 = vpack.c.bf16 %v9547_v24, %v9535_v23  ;;  %v15907_v24 = vld [vmem:[#allocation21 + $0x7fc] ss:$12 sps:$4 sm:$0xff]   ;;  %v9121_v23 = vadd.f32 %v19165_v8, %v19163_v27  ;;  %v15913_v8 = vld [vmem:[#allocation21 + $0x7e4] ss:$12 sps:$4 sm:$0xff]  }
0x139b   : > { %v9132_v39 = vpop.f32.mrf.mxu0  ;;  %11890 = vmatpush1.bf16.msra.mxu1 %v15872_v3  ;;  %11834 = vmatprep.subr.bf16.mxu0 %v15877_v28  ;;  %v9209_v3 = vpop.f32.mrf.mxu1  ;;  %v9200_v28 = vadd.f32 %v19160_v20, %v9127_v22  ;;  %v15899_v20 = vld [vmem:[#allocation21 + $0x810] ss:$12 sps:$4 sm:$0xff]  }
0x139c   : > { %11891 = vmatprep.subr.bf16.mxu1 %v15880_v21  ;;  %20143 = vst [vmem:[#allocation60_spill] sm:$0xff] %v19208_v42  ;;  %v9184_v21 = vadd.f32 %v19070_v14, %v9111_v9  ;;  %v9125_v14 = vadd.f32 %v19179_v29, %v19163_v27  ;;  %v9133_v16 = vadd.f32 %v9132_v39, %v19108_v36 }
0x139d   : > { %v19199_v41 = vpop.f32.mrf.mxu0  ;;  %v9571_v22 = vmax.f32 %v9200_v28, 0.0 }
0x139e   : > { %11835 = vmatpush2.bf16.msra.mxu0 %v15875_v6  ;;  %v9196_v6 = vadd.f32 %v19135_v0, %v9123_v31  ;;  %v15889_v0 = vld [vmem:[#allocation21 + $0x73c] ss:$12 sps:$4 sm:$0xff]   ;;  %v9534_v9 = vmax.f32 %v9184_v21, 0.0  ;;  %v15887_v21 = vld [vmem:[#allocation21 + $0x738] ss:$12 sps:$4 sm:$0xff]  }
0x139f   : > { %v9136_v40 = vpop.f32.mrf.mxu0  ;;  %11892 = vmatpush1.bf16.msra.mxu1 %v15878_v43  ;;  %11950 = vmatprep.subr.bf16.mxu0 %v15895_v61  ;;  %v15884_v61 = vld [vmem:[#allocation21 + $0x750] ss:$12 sps:$4 sm:$0xff]  }
0x13a0   : > { %11893 = vmatprep.subr.bf16.mxu1 %v15883_v32  ;;  %v9137_v32 = vadd.f32 %v9136_v40, %v19108_v36  ;;  %v9559_v29 = vmax.f32 %v9196_v6, 0.0  ;;  %v19233_v28 = vpack.c.bf16 %v9546_v12, %v9534_v9  ;;  %v9198_v40 = vadd.f32 %v19150_v18, %v9125_v14  ;;  %v15892_v6 = vld [vmem:[#allocation21 + $0x724] ss:$12 sps:$4 sm:$0xff]  }
0x13a1   : > { %v19211_v17 = vpop.f32.mrf.mxu0  ;;  %11837 = vmatmul.mubr.bf16.vlgmr.msra.gmra.mxu0 %v19202_v63  ;;  %v9194_v36 = vadd.f32 %v19121_v11, %v9121_v23  ;;  %v9206_v18 = vadd.f32 %v19185_v60, %v9133_v16  ;;  %v15898_v60 = vld [vmem:[#allocation21 + $0x70c] ss:$12 sps:$4 sm:$0xff]  }
0x13a2   : > { %v19219_v13 = vpop.f32.mrf.mxu1  ;;  %11846 = vmatprep.mubr.bf16.mxu0 %v19208_v42  ;;  %11951 = vmatpush1.bf16.msra.mxu0 %v15893_v35  ;;  %v9210_v54 = vadd.f32 %v9209_v3, %v9137_v32  ;;  %v19236_v42 = vpack.c.bf16 %v9571_v22, %v9559_v29  ;;  %v15911_v3 = vld [vmem:[#allocation21 + $0x7e0] ss:$12 sps:$4 sm:$0xff]  }
0x13a3   : > { %v9321_v43 = vpop.f32.mrf.mxu0  ;;  %11894 = vmatpush2.bf16.msra.mxu1 %v15881_v58  ;;  %11952 = vmatprep.subr.bf16.mxu0 %v15901_v10  ;;  %v15905_v10 = vld [vmem:[#allocation21 + $0x7f8] ss:$12 sps:$4 sm:$0xff]   ;;  %v15890_v22 = vld [vmem:[#allocation21 + $0x720] ss:$12 sps:$4 sm:$0xff]   ;;  %v9558_v23 = vmax.f32 %v9194_v36, 0.0 }
0x13a4   : > { %v9248_v59 = vpop.f32.mrf.mxu1  ;;  %11895 = vmatprep.subr.bf16.mxu1 %v15886_v19  ;;  %20145 = vst [vmem:[#allocation63_spill] sm:$0xff] %v19236_v42  ;;  %v15919_v32 = vld [vmem:[#allocation21 + $0x7cc] ss:$12 sps:$4 sm:$0xff]  }
0x13a5   : > { %v9249_v31 = vadd.f32 %v9248_v59, %v19216_v57  ;;  %v19228_v35 = vpop.f32.mrf.mxu0 }
0x13a6   : > { %v19231_v58 = vpop.f32.mrf.mxu1  ;;  %11953 = vmatpush1.bf16.msra.mxu0 %v15899_v20 }
0x13a7   : > { %v9325_v19 = vpop.f32.mrf.mxu0  ;;  %11896 = vmatpush2.bf16.msra.mxu1 %v15884_v61  ;;  %11954 = vmatprep.subr.bf16.mxu0 %v15907_v24  ;;  %v9322_v39 = vadd.f32 %v9321_v43, %v9249_v31  ;;  %v9570_v61 = vmax.f32 %v9198_v40, 0.0  ;;  %v9135_v24 = vadd.f32 %v19199_v41, %v19163_v27  ;;  %v9131_v31 = vadd.f32 %v19189_v49, %v19163_v27  ;;  %v15924_v27 = vld [vmem:[#allocation21 + $0x7b4] ss:$12 sps:$4 sm:$0xff]  }
0x13a8   : > { %v9252_v59 = vpop.f32.mrf.mxu1  ;;  %11897 = vmatprep.subr.bf16.mxu1 %v15889_v0  ;;  %v9595_v0 = vmax.f32 %v9210_v54, 0.0  ;;  %v9583_v41 = vmax.f32 %v9206_v18, 0.0 }
0x13a9   : > { %v9253_v20 = vadd.f32 %v9252_v59, %v19216_v57  ;;  %v19240_v12 = vpop.f32.mrf.mxu0  ;;  %11847 = vmatmul.mubr.bf16.gmra.mxu0 %v19233_v28  ;;  %v9513_v29 = vmax.f32 %v9322_v39, 0.0  ;;  %v9208_v54 = vadd.f32 %v19194_v46, %v9135_v24  ;;  %v15904_v39 = vld [vmem:[#allocation21 + $0x6f4] ss:$12 sps:$4 sm:$0xff]   ;;  %v15922_v24 = vld [vmem:[#allocation21 + $0x7b0] ss:$12 sps:$4 sm:$0xff]  }
0x13aa   : > { %v19244_v14 = vpop.f32.mrf.mxu1  ;;  %11856 = vmatprep.mubr.bf16.mxu0 %v19236_v42  ;;  %11955 = vmatpush1.bf16.msra.mxu0 %v15905_v10  ;;  %v19262_v36 = vpack.c.bf16 %v9595_v0, %v9583_v41  ;;  %v20148_v46 = vld [vmem:[#allocation35_spill] sm:$0xff] }
0x13ab   : > { %v9326_v11 = vadd.f32 %v9325_v19, %v9253_v20  ;;  %v19249_v43 = vpop.f32.mrf.mxu0  ;;  %11898 = vmatpush2.bf16.msra.mxu1 %v15887_v21  ;;  %11956 = vmatprep.subr.bf16.mxu0 %v15913_v8  ;;  %v15917_v19 = vld [vmem:[#allocation21 + $0x7c8] ss:$12 sps:$4 sm:$0xff]   ;;  %v19257_v21 = vpack.c.bf16 %v9570_v61, %v9558_v23  ;;  %v9204_v20 = vadd.f32 %v19174_v25, %v9131_v31  ;;  %v15902_v25 = vld [vmem:[#allocation21 + $0x6f0] ss:$12 sps:$4 sm:$0xff]  }
0x13ac   : > { %v9258_v9 = vpop.f32.mrf.mxu1  ;;  %11899 = vmatprep.subr.bf16.mxu1 %v15892_v6  ;;  %v15896_v6 = vld [vmem:[#allocation21 + $0x708] ss:$12 sps:$4 sm:$0xff]   ;;  %20147 = vst [vmem:[#allocation65_spill] sm:$0xff] %v19262_v36 }
0x13ad   : > { %v9525_v16 = vmax.f32 %v9326_v11, 0.0  ;;  %v19253_v10 = vpop.f32.mrf.mxu0  ;;  %20146 = vst [vmem:[#allocation67_spill] sm:$0xff] %v19257_v21  ;;  %v9594_v11 = vmax.f32 %v9208_v54, 0.0  ;;  %v15910_v23 = vld [vmem:[#allocation21 + $0x6dc] ss:$12 sps:$4 sm:$0xff]   ;;  %v9582_v31 = vmax.f32 %v9204_v20, 0.0 }
0x13ae   : > { %v19255_v40 = vpop.f32.mrf.mxu1  ;;  %11957 = vmatpush1.bf16.msra.mxu0 %v15911_v3  ;;  %v19271_v3 = vrot.slane %v19206_v34, %v20148_v46  ;;  %v15927_v54 = vld [vmem:[#allocation21 + $0x798] ss:$12 sps:$4 sm:$0xff]  }
0x13af   : > { %v9335_v8 = vpop.f32.mrf.mxu0  ;;  %11900 = vmatpush2.bf16.msra.mxu1 %v15890_v22  ;;  %v19260_v59 = vpack.c.bf16 %v9525_v16, %v9513_v29  ;;  %11958 = vmatprep.subr.bf16.mxu0 %v15919_v32  ;;  %v15929_v32 = vld [vmem:[#allocation21 + $0x79c] ss:$12 sps:$4 sm:$0xff]  }
0x13b0   : > { %v9262_v49 = vpop.f32.mrf.mxu1  ;;  %11901 = vmatprep.subr.bf16.mxu1 %v15898_v60  ;;  %v9251_v0 = vadd.f32 %v19231_v58, %v19271_v3  ;;  %v9247_v41 = vadd.f32 %v19219_v13, %v19271_v3  ;;  %v15908_v58 = vld [vmem:[#allocation21 + $0x6d8] ss:$12 sps:$4 sm:$0xff]  }
0x13b1   : > { %v19265_v18 = vpop.f32.mrf.mxu0  ;;  %11857 = vmatmul.mubr.bf16.gmra.mxu0 %v19257_v21  ;;  %11909 = vmatprep.mubr.bf16.mxu1 %v19260_v59  ;;  %v9263_v29 = vadd.f32 %v9262_v49, %v19216_v57 }
0x13b2   : > { %v19273_v61 = vpop.f32.mrf.mxu1  ;;  %11866 = vmatprep.mubr.bf16.mxu0 %v19262_v36  ;;  %11959 = vmatpush1.bf16.msra.mxu0 %v15917_v19  ;;  %v9324_v20 = vadd.f32 %v19228_v35, %v9251_v0  ;;  %v15916_v36 = vld [vmem:[#allocation21 + $0x6c4] ss:$12 sps:$4 sm:$0xff]   ;;  %v9320_v13 = vadd.f32 %v19211_v17, %v9247_v41  ;;  %v9261_v0 = vadd.f32 %v19255_v40, %v19271_v3 }
0x13b3   : > { %v19276_v22 = vpop.f32.mrf.mxu0  ;;  %11902 = vmatpush2.bf16.msra.mxu1 %v15896_v6  ;;  %11960 = vmatprep.subr.bf16.mxu0 %v15924_v27  ;;  %v19285_v6 = vpack.c.bf16 %v9594_v11, %v9582_v31  ;;  %v9259_v27 = vadd.f32 %v9258_v9, %v19216_v57  ;;  %v9336_v21 = vadd.f32 %v9335_v8, %v9263_v29  ;;  %v15932_v11 = vld [vmem:[#allocation21 + $0x780] ss:$12 sps:$4 sm:$0xff]   ;;  %v15920_v31 = vld [vmem:[#allocation21 + $0x170] ss:$12 sps:$4 sm:$0xff]  }
0x13b4   : > { %v9268_v60 = vpop.f32.mrf.mxu1  ;;  %11903 = vmatprep.subr.bf16.mxu1 %v15904_v39  ;;  %v15934_v39 = vld [vmem:[#allocation21 + $0x784] ss:$12 sps:$4 sm:$0xff]   ;;  %v9524_v35 = vmax.f32 %v9324_v20, 0.0  ;;  %v9512_v41 = vmax.f32 %v9320_v13, 0.0  ;;  %v15944_v13 = vld [vmem:[#allocation21 + $0x8d4] ss:$12 sps:$4 sm:$0xff]  }
0x13b5   : > { %v19281_v16 = vpop.f32.mrf.mxu0  ;;  %20149 = vst [vmem:[#allocation64_spill] sm:$0xff] %v19285_v6  ;;  %v9332_v9 = vadd.f32 %v19249_v43, %v9259_v27  ;;  %v9549_v17 = vmax.f32 %v9336_v21, 0.0  ;;  %v9257_v43 = vadd.f32 %v19244_v14, %v19271_v3  ;;  %v15937_v27 = vld [vmem:[#allocation21 + $0x8e8] ss:$12 sps:$4 sm:$0xff]   ;;  %v15921_v40 = vld [vmem:[#allocation21 + $0xb0] ss:$12 sps:$4 sm:$0xff]   ;;  %v9334_v21 = vadd.f32 %v19253_v10, %v9261_v0 }
0x13b6   : > { %v9270_v19 = vpop.f32.mrf.mxu1  ;;  %11961 = vmatpush1.bf16.msra.mxu0 %v15922_v24  ;;  %v19304_v20 = vpack.c.bf16 %v9524_v35, %v9512_v41  ;;  %v15926_v10 = vld [vmem:[#allocation21 + $0x98] ss:$12 sps:$4 sm:$0xff]   ;;  %v15930_v0 = vld [vmem:[#allocation21 + $0x140] ss:$12 sps:$4 sm:$0xff]  }
0x13b7   : > { %11904 = vmatpush2.bf16.msra.mxu1 %v15902_v25  ;;  %11962 = vmatprep.subr.bf16.mxu0 %v15929_v32  ;;  %v9345_v46 = vpop.f32.mrf.mxu0  ;;  %v15914_v25 = vld [vmem:[#allocation21 + $0x6c0] ss:$12 sps:$4 sm:$0xff]   ;;  %v9271_v35 = vadd.f32 %v9270_v19, %v19271_v3  ;;  %v15947_v41 = vld [vmem:[#allocation21 + $0x8b8] ss:$12 sps:$4 sm:$0xff]  }
0x13b8   : > { %v9272_v49 = vpop.f32.mrf.mxu1  ;;  %11905 = vmatprep.subr.bf16.mxu1 %v15910_v23  ;;  %v15939_v32 = vld [vmem:[#allocation21 + $0x8ec] ss:$12 sps:$4 sm:$0xff]  }
0x13b9   : > { %11867 = vmatmul.mubr.bf16.gmra.mxu0 %v19285_v6  ;;  %v19296_v23 = vpop.f32.mrf.mxu0  ;;  %v9273_v29 = vadd.f32 %v9272_v49, %v19216_v57  ;;  %v15925_v49 = vld [vmem:[#allocation21 + $0x158] ss:$12 sps:$4 sm:$0xff]   ;;  %v15931_v19 = vld [vmem:[#allocation21 + $0x80] ss:$12 sps:$4 sm:$0xff]  }
0x13ba   : > { %v19291_v24 = vpop.f32.mrf.mxu1  ;;  %11963 = vmatpush1.bf16.msra.mxu0 %v15927_v54 }
0x13bb   : > { %11906 = vmatpush2.bf16.msra.mxu1 %v15908_v58  ;;  %11964 = vmatprep.subr.bf16.mxu0 %v15934_v39  ;;  %v9537_v58 = vmax.f32 %v9332_v9, 0.0  ;;  %v9269_v39 = vadd.f32 %v9268_v60, %v19216_v57  ;;  %v9346_v6 = vadd.f32 %v9345_v46, %v9273_v29  ;;  %v15942_v60 = vld [vmem:[#allocation21 + $0x8d0] ss:$12 sps:$4 sm:$0xff]  }
0x13bc   : > { %v9278_v8 = vpop.f32.mrf.mxu1  ;;  %11907 = vmatprep.subr.bf16.mxu1 %v15916_v36  ;;  %v9351_v36 = vpop.f32.mrf.mxu0 }
0x13bd   : > { %v19307_v42 = vpack.c.bf16 %v9549_v17, %v9537_v58  ;;  %v9342_v9 = vadd.f32 %v19276_v22, %v9269_v39  ;;  %v9267_v22 = vadd.f32 %v19273_v61, %v19271_v3 }
0x13be   : > { %v19301_v54 = vpop.f32.mrf.mxu1  ;;  %11965 = vmatpush1.bf16.msra.mxu0 %v15932_v11  ;;  %v9330_v11 = vadd.f32 %v19240_v12, %v9257_v43  ;;  %v9353_v46 = vpop.f32.mrf.mxu0 }
0x13bf   : > { %11908 = vmatpush2.bf16.msra.mxu1 %v15914_v25  ;;  %11966 = vmatprep.subr.bf16.mxu0 %v15939_v32  ;;  %v15949_v25 = vld [vmem:[#allocation21 + $0x8bc] ss:$12 sps:$4 sm:$0xff]   ;;  %v9548_v32 = vmax.f32 %v9334_v21, 0.0  ;;  %v9561_v43 = vmax.f32 %v9342_v9, 0.0  ;;  %v15954_v21 = vld [vmem:[#allocation21 + $0x8a4] ss:$12 sps:$4 sm:$0xff]   ;;  %v9281_v9 = vadd.f32 %v19301_v54, %v19271_v3 }
0x13c0   : > { %14060 = vmatprep.subr.bf16.mxu1 %v15920_v31  ;;  %v9282_v14 = vpop.f32.mrf.mxu1  ;;  %v9573_v31 = vmax.f32 %v9346_v6, 0.0  ;;  %v9536_v29 = vmax.f32 %v9330_v11, 0.0  ;;  %v9344_v6 = vadd.f32 %v19281_v16, %v9271_v35  ;;  %v9355_v39 = vpop.f32.mrf.mxu0  ;;  %v15936_v16 = vld [vmem:[#allocation21 + $0x68] ss:$12 sps:$4 sm:$0xff]   ;;  %v15959_v11 = vld [vmem:[#allocation21 + $0x88c] ss:$12 sps:$4 sm:$0xff]   ;;  %v9277_v35 = vadd.f32 %v19291_v24, %v19271_v3 }
0x13c1   : > { %v9283_v12 = vadd.f32 %v9282_v14, %v19216_v57  ;;  %v9340_v14 = vadd.f32 %v19265_v18, %v9267_v22  ;;  %v15945_v54 = vld [vmem:[#allocation21 + $0xf8] ss:$12 sps:$4 sm:$0xff]   ;;  %v15964_v22 = vld [vmem:[#allocation21 + $0x874] ss:$12 sps:$4 sm:$0xff]   ;;  %v15962_v3 = vld [vmem:[#allocation21 + $0x870] ss:$12 sps:$4 sm:$0xff]  }
0x13c2   : > { %11910 = vmatmul.mubr.bf16.vlgmr.msra.gmra.mxu1 %v19304_v20  ;;  %11967 = vmatpush2.bf16.msra.mxu0 %v15937_v27  ;;  %v19315_v17 = vpop.f32.mrf.mxu1  ;;  %v9279_v27 = vadd.f32 %v9278_v8, %v19216_v57  ;;  %v19320_v58 = vpack.c.bf16 %v9548_v32, %v9536_v29  ;;  %v19325_v61 = vpack.c.bf16 %v9573_v31, %v9561_v43  ;;  %v15952_v57 = vld [vmem:[#allocation21 + $0x8a0] ss:$12 sps:$4 sm:$0xff]   ;;  %v15941_v31 = vld [vmem:[#allocation21 + $0x50] ss:$12 sps:$4 sm:$0xff]   ;;  %v15946_v24 = vld [vmem:[#allocation21 + $0x38] ss:$12 sps:$4 sm:$0xff]  }
0x13c3   : > { %11919 = vmatprep.mubr.bf16.mxu1 %v19307_v42  ;;  %14061 = vmatpush3.bf16.msra.mxu1 %v15921_v40  ;;  %v15935_v40 = vld [vmem:[#allocation21 + $0x128] ss:$12 sps:$4 sm:$0xff]   ;;  %v9560_v18 = vmax.f32 %v9340_v14, 0.0  ;;  %v9354_v29 = vadd.f32 %v9353_v46, %v9281_v9  ;;  %v15950_v46 = vld [vmem:[#allocation21 + $0xe0] ss:$12 sps:$4 sm:$0xff]  }
0x13c4   : > { %14062 = vmatprep.subr.bf16.mxu1 %v15925_v49  ;;  %11968 = vmatprep.subr.bf16.mxu0 %v15944_v13  ;;  %v9356_v49 = vadd.f32 %v9355_v39, %v9283_v12  ;;  %v19323_v13 = vpop.f32.mrf.mxu1  ;;  %v9352_v8 = vadd.f32 %v9351_v36, %v9279_v27  ;;  %v15957_v36 = vld [vmem:[#allocation21 + $0x888] ss:$12 sps:$4 sm:$0xff]   ;;  %v9350_v27 = vadd.f32 %v19296_v23, %v9277_v35  ;;  %v15951_v23 = vld [vmem:[#allocation21 + $0x20] ss:$12 sps:$4 sm:$0xff]   ;;  %v15977_v9 = vld [vmem:[#allocation21 + $0x2f0] ss:$12 sps:$4 sm:$0xff]  }
0x13c5   : > { %v15955_v14 = vld [vmem:[#allocation21 + $0xc8] ss:$12 sps:$4 sm:$0xff]   ;;  %v20151_v35 = vsub.s32 3, %v17233_v44  ;;  %v15970_v44 = vld [vmem:[#allocation21 + $0x440] ss:$12 sps:$4 sm:$0xff]  }
0x13c6   : > { %11969 = vmatpush2.bf16.msra.mxu0 %v15942_v60  ;;  %v9572_v60 = vmax.f32 %v9344_v6, 0.0  ;;  %v19332_v32 = vpop.f32.mrf.mxu1  ;;  %v9596_v6 = vmax.f32 %v9354_v29, 0.0  ;;  %v19360_v29 = vrot.slane %v19206_v34, %v17239_v55 }
0x13c7   : > { %14063 = vmatpush3.bf16.msra.mxu1 %v15926_v10  ;;  %11970 = vmatprep.subr.bf16.mxu0 %v15949_v25  ;;  %v15940_v10 = vld [vmem:[#allocation21 + $0x110] ss:$12 sps:$4 sm:$0xff]   ;;  %v9597_v25 = vmax.f32 %v9356_v49, 0.0 }
0x13c8   : > { %14064 = vmatprep.subr.bf16.mxu1 %v15930_v0  ;;  %v9585_v0 = vmax.f32 %v9352_v8, 0.0  ;;  %v19336_v12 = vpack.c.bf16 %v9572_v60, %v9560_v18  ;;  %v15956_v60 = vld [vmem:[#allocation21 + $0x8] ss:$12 sps:$4 sm:$0xff]   ;;  %v15961_v18 = vld [vmem:[#allocation21 + $0x3b0] ss:$12 sps:$4 sm:$0xff]  }
0x13ca   : > { %11920 = vmatmul.mubr.bf16.gmra.mxu1 %v19320_v58  ;;  %11971 = vmatpush2.bf16.msra.mxu0 %v15947_v41  ;;  %v19338_v41 = vpop.f32.mrf.mxu1  ;;  %v19340_v43 = vpack.c.bf16 %v9597_v25, %v9585_v0  ;;  %v15965_v0 = vld [vmem:[#allocation21 + $0x458] ss:$12 sps:$4 sm:$0xff]  }
0x13cb   : > { %11929 = vmatprep.mubr.bf16.mxu1 %v19325_v61  ;;  %14065 = vmatpush3.bf16.msra.mxu1 %v15931_v19  ;;  %v15969_v19 = vld [vmem:[#allocation21 + $0x85c] ss:$12 sps:$4 sm:$0xff]  }
0x13cc   : > { %14066 = vmatprep.subr.bf16.mxu1 %v15935_v40  ;;  %11972 = vmatprep.subr.bf16.mxu0 %v15954_v21  ;;  %v19345_v39 = vpop.f32.mrf.mxu1  ;;  %v9584_v40 = vmax.f32 %v9350_v27, 0.0  ;;  %v15967_v21 = vld [vmem:[#allocation21 + $0x858] ss:$12 sps:$4 sm:$0xff]  }
0x13cd   : > { %v15966_v27 = vld [vmem:[#allocation21 + $0x398] ss:$12 sps:$4 sm:$0xff]  }
0x13ce   : > { %11973 = vmatpush2.bf16.msra.mxu0 %v15952_v57  ;;  %v19347_v49 = vpack.c.bf16 %v9596_v6, %v9584_v40  ;;  %v15974_v57 = vld [vmem:[#allocation21 + $0x844] ss:$12 sps:$4 sm:$0xff]   ;;  %v19349_v8 = vpop.f32.mrf.mxu1  ;;  %v15971_v40 = vld [vmem:[#allocation21 + $0x380] ss:$12 sps:$4 sm:$0xff]  }
0x13cf   : > { %14067 = vmatpush3.bf16.msra.mxu1 %v15936_v16  ;;  %11974 = vmatprep.subr.bf16.mxu0 %v15959_v11  ;;  %v15972_v16 = vld [vmem:[#allocation21 + $0x840] ss:$12 sps:$4 sm:$0xff]   ;;  %v20150_v11 = vld [vmem:[#allocation61_spill] sm:$0xff] }
0x13d0   : > { %14068 = vmatprep.subr.bf16.mxu1 %v15940_v10  ;;  %v15960_v10 = vld [vmem:[#allocation21 + $0x470] ss:$12 sps:$4 sm:$0xff]   ;;  %v9479_v25 = vpop.f32.mrf.mxu1 }
0x13d2   : > { %11930 = vmatmul.mubr.bf16.gmra.mxu1 %v19336_v12  ;;  %11975 = vmatpush2.bf16.msra.mxu0 %v15957_v36  ;;  %v19356_v36 = vrot.slane %v19206_v34, %v20151_v35  ;;  %v15979_v35 = vld [vmem:[#allocation21 + $0x410] ss:$12 sps:$4 sm:$0xff]  }
0x13d3   : > { %11939 = vmatprep.mubr.bf16.mxu1 %v19340_v43  ;;  %14069 = vmatpush3.bf16.msra.mxu1 %v15941_v31  ;;  %v9481_v31 = vpop.f32.mrf.mxu1 }
0x13d4   : > { %14070 = vmatprep.subr.bf16.mxu1 %v15945_v54  ;;  %11976 = vmatprep.subr.bf16.mxu0 %v15964_v22 }
0x13d6   : > { %11977 = vmatpush2.bf16.msra.mxu0 %v15962_v3 }
0x13d7   : > { %14071 = vmatpush3.bf16.msra.mxu1 %v15946_v24  ;;  %11978 = vmatprep.subr.bf16.mxu0 %v15969_v19  ;;  %v19365_v24 = vpop.f32.mrf.mxu1 }
0x13d8   : > { %14072 = vmatprep.subr.bf16.mxu1 %v15950_v46 }
0x13da   : > { %11940 = vmatmul.mubr.bf16.gmra.mxu1 %v19347_v49  ;;  %11979 = vmatpush2.bf16.msra.mxu0 %v15967_v21 }
0x13db   : > { %14073 = vmatpush3.bf16.msra.mxu1 %v15951_v23  ;;  %12055 = vmatprep.mubr.bf16.mxu1 %v20150_v11  ;;  %v15975_v23 = vld [vmem:[#allocation21 + $0x428] ss:$12 sps:$4 sm:$0xff]  }
0x13dc   : > { %14074 = vmatprep.subr.bf16.mxu1 %v15955_v14  ;;  %11980 = vmatprep.subr.bf16.mxu0 %v15974_v57  ;;  %v19372_v14 = vpop.f32.mrf.mxu1 }
0x13de   : > { %11981 = vmatpush2.bf16.msra.mxu0 %v15972_v16 }
0x13df   : > { %14075 = vmatpush3.bf16.msra.mxu1 %v15956_v60  ;;  %14100 = vmatprep.subr.bf16.mxu0 %v15977_v9 }
0x13e0   : > { %14140 = vmatprep.subr.bf16.mxu1 %v15960_v10 }
0x13e1   : > { %v9392_v54 = vpop.f32.mrf.mxu0 }
0x13e2   : > { %12056 = vmatmul.mubr.bf16.vlgmr.msra.gmra.mxu1 %v18888_v45  ;;  %v9393_v19 = vadd.f32 %v9392_v54, %v19360_v29 }
0x13e3   : > { %v9394_v22 = vpop.f32.mrf.mxu0  ;;  %12063 = vmatprep.mubr.bf16.mxu1 %v18894_v52  ;;  %14141 = vmatpush3.bf16.msra.mxu1 %v15961_v18 }
0x13e4   : > { %v9395_v3 = vadd.f32 %v9394_v22, %v19356_v36  ;;  %14142 = vmatprep.subr.bf16.mxu1 %v15965_v0  ;;  %v9466_v57 = vadd.f32 %v19315_v17, %v9393_v19  ;;  %v9489_v0 = vpop.f32.mrf.mxu1 }
0x13e5   : > { %v9396_v6 = vpop.f32.mrf.mxu0 }
0x13e6   : > { %v9397_v34 = vadd.f32 %v9396_v6, %v19360_v29  ;;  %v9468_v45 = vadd.f32 %v19323_v13, %v9395_v3  ;;  %v15976_v13 = vld [vmem:[#allocation21 + $0x368] ss:$12 sps:$4 sm:$0xff]   ;;  %v9514_v54 = vmax.f32 %v9466_v57, 0.0  ;;  %v15982_v57 = vld [vmem:[#allocation21 + $0x218] ss:$12 sps:$4 sm:$0xff]  }
0x13e7   : > { %v9398_v46 = vpop.f32.mrf.mxu0  ;;  %14143 = vmatpush3.bf16.msra.mxu1 %v15966_v27  ;;  %v15978_v27 = vld [vmem:[#allocation21 + $0x230] ss:$12 sps:$4 sm:$0xff]  }
0x13e8   : > { %v9470_v52 = vadd.f32 %v19332_v32, %v9397_v34  ;;  %v9399_v21 = vadd.f32 %v9398_v46, %v19356_v36  ;;  %14144 = vmatprep.subr.bf16.mxu1 %v15970_v44  ;;  %v9515_v32 = vmax.f32 %v9468_v45, 0.0  ;;  %v15980_v44 = vld [vmem:[#allocation21 + $0x350] ss:$12 sps:$4 sm:$0xff]   ;;  %v15981_v46 = vld [vmem:[#allocation21 + $0x2d8] ss:$12 sps:$4 sm:$0xff]   ;;  %v9491_v45 = vpop.f32.mrf.mxu1 }
0x13e9   : > { %v9402_v16 = vpop.f32.mrf.mxu0 }
0x13ea   : > { %v9472_v11 = vadd.f32 %v19338_v41, %v9399_v21  ;;  %12064 = vmatmul.mubr.bf16.gmra.mxu1 %v18915_v51  ;;  %v9526_v60 = vmax.f32 %v9470_v52, 0.0  ;;  %v9403_v17 = vadd.f32 %v9402_v16, %v19360_v29  ;;  %v15984_v16 = vld [vmem:[#allocation21 + $0x338] ss:$12 sps:$4 sm:$0xff]  }
0x13eb   : > { %v9404_v9 = vpop.f32.mrf.mxu0  ;;  %12071 = vmatprep.mubr.bf16.mxu1 %v18919_v47  ;;  %14145 = vmatpush3.bf16.msra.mxu1 %v15971_v40  ;;  %v15983_v40 = vld [vmem:[#allocation21 + $0x3f8] ss:$12 sps:$4 sm:$0xff]  }
0x13ec   : > { %v9527_v10 = vmax.f32 %v9472_v11, 0.0  ;;  %v9405_v18 = vadd.f32 %v9404_v9, %v19356_v36  ;;  %14146 = vmatprep.subr.bf16.mxu1 %v15975_v23  ;;  %v19383_v3 = vpack.c.bf16 %v9526_v60, %v9514_v54  ;;  %v9476_v52 = vadd.f32 %v19345_v39, %v9403_v17  ;;  %v15985_v11 = vld [vmem:[#allocation21 + $0x2c0] ss:$12 sps:$4 sm:$0xff]  }
0x13ed   : > { %v9406_v22 = vpop.f32.mrf.mxu0  ;;  %v15987_v39 = vld [vmem:[#allocation21 + $0x3e0] ss:$12 sps:$4 sm:$0xff]  }
0x13ee   : > { %v9407_v41 = vadd.f32 %v9406_v22, %v19360_v29  ;;  %v19381_v51 = vpack.c.bf16 %v9527_v10, %v9515_v32  ;;  %v9478_v19 = vadd.f32 %v19349_v8, %v9405_v18  ;;  %v9495_v32 = vpop.f32.mrf.mxu1  ;;  %v15988_v22 = vld [vmem:[#allocation21 + $0x320] ss:$12 sps:$4 sm:$0xff]  }
0x13ef   : > { %v9408_v47 = vpop.f32.mrf.mxu0  ;;  %14147 = vmatpush3.bf16.msra.mxu1 %v15976_v13 }
0x13f0   : > { %v9480_v6 = vadd.f32 %v9479_v25, %v9407_v41  ;;  %v9409_v34 = vadd.f32 %v9408_v47, %v19356_v36  ;;  %11982 = vmatprep.mubr.bf16.mxu0 %v19381_v51  ;;  %14148 = vmatprep.subr.bf16.mxu1 %v15979_v35  ;;  %v9539_v60 = vmax.f32 %v9478_v19, 0.0  ;;  %v15991_v19 = vld [vmem:[#allocation21 + $0x3c8] ss:$12 sps:$4 sm:$0xff]  }
0x13f1   : > { %v9412_v21 = vpop.f32.mrf.mxu0  ;;  %11983 = vmatmul.mubr.bf16.vlgmr.msra.gmra.mxu0 %v19383_v3 }
0x13f2   : > { %v9482_v23 = vadd.f32 %v9481_v31, %v9409_v34  ;;  %12072 = vmatmul.mubr.bf16.gmra.mxu1 %v18942_v30  ;;  %14101 = vmatpush3.bf16.msra.mxu0 %v15978_v27  ;;  %v9550_v8 = vmax.f32 %v9480_v6, 0.0  ;;  %v9538_v31 = vmax.f32 %v9476_v52, 0.0  ;;  %v9413_v30 = vadd.f32 %v9412_v21, %v19360_v29  ;;  %v9497_v6 = vpop.f32.mrf.mxu1  ;;  %v15990_v52 = vld [vmem:[#allocation21 + $0x1e8] ss:$12 sps:$4 sm:$0xff]  }
0x13f3   : > { %v9414_v25 = vpop.f32.mrf.mxu0  ;;  %12079 = vmatprep.mubr.bf16.mxu1 %v18951_v38  ;;  %14149 = vmatpush3.bf16.msra.mxu1 %v15980_v44  ;;  %v15986_v38 = vld [vmem:[#allocation21 + $0x200] ss:$12 sps:$4 sm:$0xff]   ;;  %v15989_v44 = vld [vmem:[#allocation21 + $0x2a8] ss:$12 sps:$4 sm:$0xff]  }
0x13f4   : > { %v9551_v9 = vmax.f32 %v9482_v23, 0.0  ;;  %v9415_v13 = vadd.f32 %v9414_v25, %v19356_v36  ;;  %14102 = vmatprep.subr.bf16.mxu0 %v15981_v46  ;;  %14150 = vmatprep.subr.bf16.mxu1 %v15983_v40  ;;  %v19397_v54 = vpack.c.bf16 %v9550_v8, %v9538_v31  ;;  %v9486_v34 = vadd.f32 %v19365_v24, %v9413_v30  ;;  %v20152_v21 = vld [vmem:[#allocation69_spill] sm:$0xff]  ;;  %v15995_v24 = vld [vmem:[#allocation21 + $0x770] ss:$12 sps:$4 sm:$0xff]  }
0x13f5   : > { %v9416_v10 = vpop.f32.mrf.mxu0  ;;  %v15992_v23 = vld [vmem:[#allocation21 + $0x308] ss:$12 sps:$4 sm:$0xff]  }
0x13f6   : > { %v9417_v18 = vadd.f32 %v9416_v10, %v19360_v29  ;;  %14103 = vmatpush3.bf16.msra.mxu0 %v15982_v57  ;;  %v19395_v35 = vpack.c.bf16 %v9551_v9, %v9539_v60  ;;  %v9488_v41 = vadd.f32 %v19372_v14, %v9415_v13  ;;  %v15993_v57 = vld [vmem:[#allocation21 + $0x290] ss:$12 sps:$4 sm:$0xff]  }
0x13f7   : > { %v9418_v17 = vpop.f32.mrf.mxu0  ;;  %14151 = vmatpush3.bf16.msra.mxu1 %v15984_v16  ;;  %14104 = vmatprep.subr.bf16.mxu0 %v15985_v11  ;;  %v9499_v11 = vpop.f32.mrf.mxu1  ;;  %v15996_v10 = vld [vmem:[#allocation21 + $0x6b0] ss:$12 sps:$4 sm:$0xff]  }
0x13f8   : > { %v9490_v27 = vadd.f32 %v9489_v0, %v9417_v18  ;;  %v9419_v47 = vadd.f32 %v9418_v17, %v19356_v36  ;;  %11992 = vmatprep.mubr.bf16.mxu0 %v19395_v35  ;;  %14152 = vmatprep.subr.bf16.mxu1 %v15987_v39  ;;  %v9563_v8 = vmax.f32 %v9488_v41, 0.0  ;;  %v15994_v39 = vld [vmem:[#allocation21 + $0x1d0] ss:$12 sps:$4 sm:$0xff]   ;;  %v15999_v41 = vld [vmem:[#allocation21 + $0x758] ss:$12 sps:$4 sm:$0xff]  }
0x13f9   : > { %v9422_v46 = vpop.f32.mrf.mxu0  ;;  %11993 = vmatmul.mubr.bf16.gmra.mxu0 %v19397_v54 }
0x13fa   : > { %v9492_v40 = vadd.f32 %v9491_v45, %v9419_v47  ;;  %12080 = vmatmul.mubr.bf16.gmra.mxu1 %v18975_v62  ;;  %14105 = vmatpush3.bf16.msra.mxu0 %v15986_v38  ;;  %v9574_v14 = vmax.f32 %v9490_v27, 0.0  ;;  %v9562_v45 = vmax.f32 %v9486_v34, 0.0  ;;  %v9423_v62 = vadd.f32 %v9422_v46, %v19360_v29 }
0x13fb   : > { %v9424_v0 = vpop.f32.mrf.mxu0  ;;  %14153 = vmatpush3.bf16.msra.mxu1 %v15988_v22  ;;  %12185 = vmatprep.mubr.bf16.mxu1 %v20152_v21  ;;  %v15997_v22 = vld [vmem:[#allocation21 + $0x278] ss:$12 sps:$4 sm:$0xff]   ;;  %v16004_v21 = vld [vmem:[#allocation21 + $0x680] ss:$12 sps:$4 sm:$0xff]  }
0x13fc   : > { %v9575_v25 = vmax.f32 %v9492_v40, 0.0  ;;  %v9425_v16 = vadd.f32 %v9424_v0, %v19356_v36  ;;  %14106 = vmatprep.subr.bf16.mxu0 %v15989_v44  ;;  %14154 = vmatprep.subr.bf16.mxu1 %v15991_v19  ;;  %v19411_v31 = vpack.c.bf16 %v9574_v14, %v9562_v45  ;;  %v9496_v27 = vadd.f32 %v9495_v32, %v9423_v62  ;;  %v15998_v44 = vld [vmem:[#allocation21 + $0x1b8] ss:$12 sps:$4 sm:$0xff]   ;;  %v16003_v40 = vld [vmem:[#allocation21 + $0x740] ss:$12 sps:$4 sm:$0xff]  }
0x13fd   : > { %v9426_v60 = vpop.f32.mrf.mxu0  ;;  %v16002_v0 = vld [vmem:[#allocation21 + $0x1a0] ss:$12 sps:$4 sm:$0xff]   ;;  %v16010_v62 = vld [vmem:[#allocation21 + $0x530] ss:$12 sps:$4 sm:$0xff]  }
0x13fe   : > { %v9427_v9 = vadd.f32 %v9426_v60, %v19360_v29  ;;  %14107 = vmatpush3.bf16.msra.mxu0 %v15990_v52  ;;  %v19409_v13 = vpack.c.bf16 %v9575_v25, %v9563_v8  ;;  %v9498_v18 = vadd.f32 %v9497_v6, %v9425_v16  ;;  %v9501_v29 = vpop.f32.mrf.mxu1  ;;  %v16000_v6 = vld [vmem:[#allocation21 + $0x698] ss:$12 sps:$4 sm:$0xff]   ;;  %v9586_v52 = vmax.f32 %v9496_v27, 0.0  ;;  %v20153_v8 = vld [vmem:[#allocation68_spill] sm:$0xff]  ;;  %v16006_v25 = vld [vmem:[#allocation21 + $0x188] ss:$12 sps:$4 sm:$0xff]  }
0x13ff   : > { %v9428_v30 = vpop.f32.mrf.mxu0  ;;  %14155 = vmatpush3.bf16.msra.mxu1 %v15992_v23  ;;  %14108 = vmatprep.subr.bf16.mxu0 %v15993_v57  ;;  %v16007_v23 = vld [vmem:[#allocation21 + $0x728] ss:$12 sps:$4 sm:$0xff]   ;;  %v16009_v16 = vld [vmem:[#allocation21 + $0x5f0] ss:$12 sps:$4 sm:$0xff]   ;;  %v16013_v60 = vld [vmem:[#allocation21 + $0x5d8] ss:$12 sps:$4 sm:$0xff]  }
0x1400   : > { %v9500_v38 = vadd.f32 %v9499_v11, %v9427_v9  ;;  %v9429_v17 = vadd.f32 %v9428_v30, %v19356_v36  ;;  %12002 = vmatprep.mubr.bf16.mxu0 %v19409_v13  ;;  %14220 = vmatprep.subr.bf16.mxu1 %v15995_v24  ;;  %v16001_v36 = vld [vmem:[#allocation21 + $0x260] ss:$12 sps:$4 sm:$0xff]   ;;  %v9587_v34 = vmax.f32 %v9498_v18, 0.0  ;;  %v16008_v24 = vld [vmem:[#allocation21 + $0x668] ss:$12 sps:$4 sm:$0xff]  }
0x1401   : > { %12003 = vmatmul.mubr.bf16.gmra.mxu0 %v19411_v31  ;;  %v16011_v11 = vld [vmem:[#allocation21 + $0x710] ss:$12 sps:$4 sm:$0xff]   ;;  %v16017_v18 = vld [vmem:[#allocation21 + $0x5c0] ss:$12 sps:$4 sm:$0xff]  }
0x1402   : > { %v9502_v47 = vadd.f32 %v9501_v29, %v9429_v17  ;;  %14109 = vmatpush3.bf16.msra.mxu0 %v15994_v39  ;;  %12186 = vmatmul.mubr.bf16.vlgmr.msra.gmra.mxu1 %v19102_v53  ;;  %v9598_v19 = vmax.f32 %v9500_v38, 0.0  ;;  %v19418_v32 = vpop.f32.mrf.mxu1  ;;  %v16012_v9 = vld [vmem:[#allocation21 + $0x650] ss:$12 sps:$4 sm:$0xff]   ;;  %v16016_v38 = vld [vmem:[#allocation21 + $0x638] ss:$12 sps:$4 sm:$0xff]  }
0x1403   : > { %12193 = vmatprep.mubr.bf16.mxu1 %v19113_v7  ;;  %14221 = vmatpush3.bf16.msra.mxu1 %v15996_v10  ;;  %v16005_v7 = vld [vmem:[#allocation21 + $0x248] ss:$12 sps:$4 sm:$0xff]   ;;  %v20154_v39 = vld [vmem:[#allocation70_spill] sm:$0xff] }
0x1404   : > { %v9599_v46 = vmax.f32 %v9502_v47, 0.0  ;;  %14110 = vmatprep.subr.bf16.mxu0 %v15997_v22  ;;  %14222 = vmatprep.subr.bf16.mxu1 %v15999_v41  ;;  %v19422_v53 = vpack.c.bf16 %v9598_v19, %v9586_v52  ;;  %v19426_v57 = vpop.f32.mrf.mxu1  ;;  %v20155_v10 = vld [vmem:[#allocation71_spill] sm:$0xff]  ;;  %v16019_v17 = vld [vmem:[#allocation21 + $0x6e0] ss:$12 sps:$4 sm:$0xff]   ;;  %v16034_v52 = vld [vmem:[#allocation21 + $0x830] ss:$12 sps:$4 sm:$0xff]  }
0x1405   : > { %v16018_v41 = vld [vmem:[#allocation21 + $0x500] ss:$12 sps:$4 sm:$0xff]   ;;  %v16021_v29 = vld [vmem:[#allocation21 + $0x5a8] ss:$12 sps:$4 sm:$0xff]  }
0x1406   : > { %14111 = vmatpush3.bf16.msra.mxu0 %v15998_v44  ;;  %v19420_v14 = vpack.c.bf16 %v9599_v46, %v9587_v34  ;;  %v19431_v45 = vpop.f32.mrf.mxu1  ;;  %v16020_v27 = vld [vmem:[#allocation21 + $0x620] ss:$12 sps:$4 sm:$0xff]   ;;  %v16025_v44 = vld [vmem:[#allocation21 + $0x590] ss:$12 sps:$4 sm:$0xff]   ;;  %v16024_v19 = vld [vmem:[#allocation21 + $0x608] ss:$12 sps:$4 sm:$0xff]  }
0x1407   : > { %14223 = vmatpush3.bf16.msra.mxu1 %v16000_v6  ;;  %14112 = vmatprep.subr.bf16.mxu0 %v16001_v36  ;;  %v16027_v36 = vld [vmem:[#allocation21 + $0x578] ss:$12 sps:$4 sm:$0xff]   ;;  %v16030_v46 = vld [vmem:[#allocation21 + $0x4a0] ss:$12 sps:$4 sm:$0xff]  }
0x1408   : > { %12012 = vmatprep.mubr.bf16.mxu0 %v19420_v14  ;;  %14224 = vmatprep.subr.bf16.mxu1 %v16003_v40  ;;  %v19434_v30 = vpop.f32.mrf.mxu1  ;;  %v16031_v40 = vld [vmem:[#allocation21 + $0x548] ss:$12 sps:$4 sm:$0xff]  }
0x1409   : > { %12013 = vmatmul.mubr.bf16.gmra.mxu0 %v19422_v53 }
0x140a   : > { %14113 = vmatpush3.bf16.msra.mxu0 %v16002_v0  ;;  %12120 = vmatprep.mubr.bf16.mxu0 %v20153_v8  ;;  %v19439_v22 = vpop.f32.mrf.mxu1  ;;  %v16035_v0 = vld [vmem:[#allocation21 + $0x8d8] ss:$12 sps:$4 sm:$0xff]  }
0x140b   : > { %12194 = vmatmul.mubr.bf16.gmra.mxu1 %v19132_v33  ;;  %14114 = vmatprep.subr.bf16.mxu0 %v16005_v7  ;;  %v16015_v33 = vld [vmem:[#allocation21 + $0x6f8] ss:$12 sps:$4 sm:$0xff]   ;;  %v20156_v7 = vld [vmem:[#allocation60_spill] sm:$0xff] }
0x140c   : > { %12201 = vmatprep.mubr.bf16.mxu1 %v19141_v1  ;;  %14225 = vmatpush3.bf16.msra.mxu1 %v16004_v21  ;;  %v16014_v1 = vld [vmem:[#allocation21 + $0x518] ss:$12 sps:$4 sm:$0xff]   ;;  %v19442_v47 = vpop.f32.mrf.mxu1 }
0x140d   : > { %14226 = vmatprep.subr.bf16.mxu1 %v16007_v23  ;;  %v16038_v23 = vld [vmem:[#allocation21 + $0x800] ss:$12 sps:$4 sm:$0xff]  }
0x140e   : > { %14115 = vmatpush3.bf16.msra.mxu0 %v16006_v25  ;;  %v19447_v6 = vpop.f32.mrf.mxu1 }
0x140f   : > { %14180 = vmatprep.subr.bf16.mxu0 %v16009_v16  ;;  %v20158_v16 = vld [vmem:[#allocation63_spill] sm:$0xff] }
0x1410   : > { %14227 = vmatpush3.bf16.msra.mxu1 %v16008_v24 }
0x1411   : > { %12121 = vmatmul.mubr.bf16.vlgmr.msra.gmra.mxu0 %v20154_v39  ;;  %14228 = vmatprep.subr.bf16.mxu1 %v16011_v11 }
0x1412   : > { %12128 = vmatprep.mubr.bf16.mxu0 %v20155_v10  ;;  %14181 = vmatpush3.bf16.msra.mxu0 %v16010_v62  ;;  %v16042_v62 = vld [vmem:[#allocation21 + $0x7d0] ss:$12 sps:$4 sm:$0xff]   ;;  %v16045_v10 = vld [vmem:[#allocation21 + $0x860] ss:$12 sps:$4 sm:$0xff]  }
0x1413   : > { %12202 = vmatmul.mubr.bf16.gmra.mxu1 %v19157_v2  ;;  %14182 = vmatprep.subr.bf16.mxu0 %v16013_v60  ;;  %v16023_v2 = vld [vmem:[#allocation21 + $0x6c8] ss:$12 sps:$4 sm:$0xff]   ;;  %v16043_v60 = vld [vmem:[#allocation21 + $0x878] ss:$12 sps:$4 sm:$0xff]  }
0x1414   : > { %12209 = vmatprep.mubr.bf16.mxu1 %v19167_v48  ;;  %14229 = vmatpush3.bf16.msra.mxu1 %v16012_v9  ;;  %v16022_v48 = vld [vmem:[#allocation21 + $0x4e8] ss:$12 sps:$4 sm:$0xff]  }
0x1415   : > { %14230 = vmatprep.subr.bf16.mxu1 %v16015_v33  ;;  %v20162_v33 = vld [vmem:[#allocation65_spill] sm:$0xff] }
0x1416   : > { %14183 = vmatpush3.bf16.msra.mxu0 %v16014_v1 }
0x1417   : > { %14184 = vmatprep.subr.bf16.mxu0 %v16017_v18 }
0x1418   : > { %14231 = vmatpush3.bf16.msra.mxu1 %v16016_v38  ;;  %v16046_v38 = vld [vmem:[#allocation21 + $0x7a0] ss:$12 sps:$4 sm:$0xff]  }
0x1419   : > { %12129 = vmatmul.mubr.bf16.gmra.mxu0 %v19028_v26  ;;  %14232 = vmatprep.subr.bf16.mxu1 %v16019_v17  ;;  %v16026_v26 = vld [vmem:[#allocation21 + $0x4d0] ss:$12 sps:$4 sm:$0xff]   ;;  %v16047_v17 = vld [vmem:[#allocation21 + $0x848] ss:$12 sps:$4 sm:$0xff]  }
0x141a   : > { %12136 = vmatprep.mubr.bf16.mxu0 %v19036_v15  ;;  %14185 = vmatpush3.bf16.msra.mxu0 %v16018_v41  ;;  %v19450_v15 = vpop.f32.mrf.mxu1 }
0x141b   : > { %12210 = vmatmul.mubr.bf16.gmra.mxu1 %v19183_v4  ;;  %14186 = vmatprep.subr.bf16.mxu0 %v16021_v29  ;;  %v16028_v4 = vld [vmem:[#allocation21 + $0x4b8] ss:$12 sps:$4 sm:$0xff]  }
0x141c   : > { %14233 = vmatpush3.bf16.msra.mxu1 %v16020_v27  ;;  %12315 = vmatprep.mubr.bf16.mxu1 %v19260_v59  ;;  %v16029_v59 = vld [vmem:[#allocation21 + $0x560] ss:$12 sps:$4 sm:$0xff]   ;;  %v19455_v34 = vpop.f32.mrf.mxu1 }
0x141d   : > { %14234 = vmatprep.subr.bf16.mxu1 %v16023_v2  ;;  %v20163_v27 = vld [vmem:[#allocation64_spill] sm:$0xff]  ;;  %v16048_v2 = vld [vmem:[#allocation21 + $0x788] ss:$12 sps:$4 sm:$0xff]  }
0x141e   : > { %14187 = vmatpush3.bf16.msra.mxu0 %v16022_v48 }
0x141f   : > { %14188 = vmatprep.subr.bf16.mxu0 %v16025_v44 }
0x1420   : > { %14235 = vmatpush3.bf16.msra.mxu1 %v16024_v19 }
0x1421   : > { %12137 = vmatmul.mubr.bf16.gmra.mxu0 %v19051_v37  ;;  %v19458_v37 = vpop.f32.mrf.mxu1 }
0x1422   : > { %12144 = vmatprep.mubr.bf16.mxu0 %v19058_v5  ;;  %14189 = vmatpush3.bf16.msra.mxu0 %v16026_v26  ;;  %v16032_v5 = vld [vmem:[#allocation21 + $0x488] ss:$12 sps:$4 sm:$0xff]  }
0x1423   : > { %12316 = vmatmul.mubr.bf16.vlgmr.msra.gmra.mxu1 %v19304_v20  ;;  %14190 = vmatprep.subr.bf16.mxu0 %v16027_v36  ;;  %v16033_v20 = vld [vmem:[#allocation21 + $0x8f0] ss:$12 sps:$4 sm:$0xff]  }
0x1424   : > { %12323 = vmatprep.mubr.bf16.mxu1 %v19307_v42  ;;  %v19463_v42 = vpop.f32.mrf.mxu1 }
0x1426   : > { %14191 = vmatpush3.bf16.msra.mxu0 %v16028_v4 }
0x1427   : > { %14192 = vmatprep.subr.bf16.mxu0 %v16029_v59 }
0x1429   : > { %12145 = vmatmul.mubr.bf16.gmra.mxu0 %v19076_v56  ;;  %v19466_v56 = vpop.f32.mrf.mxu1 }
0x142a   : > { %14193 = vmatpush3.bf16.msra.mxu0 %v16030_v46  ;;  %12250 = vmatprep.mubr.bf16.mxu0 %v19155_v50  ;;  %v16036_v50 = vld [vmem:[#allocation21 + $0x818] ss:$12 sps:$4 sm:$0xff]  }
0x142b   : > { %12324 = vmatmul.mubr.bf16.gmra.mxu1 %v19320_v58  ;;  %14194 = vmatprep.subr.bf16.mxu0 %v16031_v40  ;;  %v16037_v58 = vld [vmem:[#allocation21 + $0x8c0] ss:$12 sps:$4 sm:$0xff]   ;;  %v19473_v21 = vpop.f32.mrf.mxu1 }
0x142c   : > { %12331 = vmatprep.mubr.bf16.mxu1 %v19325_v61  ;;  %v19471_v61 = vpop.f32.mrf.mxu0 }
0x142d   : > { %v19478_v25 = vpop.f32.mrf.mxu1 }
0x142e   : > { %14195 = vmatpush3.bf16.msra.mxu0 %v16032_v5  ;;  %v19475_v8 = vpop.f32.mrf.mxu0  ;;  %20157 = vst [vmem:[#allocation62_spill] sm:$0xff] %v19478_v25 }
0x142f   : > { %14260 = vmatprep.subr.bf16.mxu0 %v16033_v20  ;;  %v19484_v11 = vpop.f32.mrf.mxu1 }
0x1430   : > { %v19482_v24 = vpop.f32.mrf.mxu0  ;;  %20159 = vst [vmem:[#allocation66_spill] sm:$0xff] %v19484_v11 }
0x1431   : > { %12251 = vmatmul.mubr.bf16.vlgmr.msra.gmra.mxu0 %v19202_v63  ;;  %v16039_v63 = vld [vmem:[#allocation21 + $0x8a8] ss:$12 sps:$4 sm:$0xff]   ;;  %v19489_v39 = vpop.f32.mrf.mxu1 }
0x1432   : > { %12258 = vmatprep.mubr.bf16.mxu0 %v20156_v7  ;;  %14261 = vmatpush3.bf16.msra.mxu0 %v16034_v52  ;;  %v19486_v9 = vpop.f32.mrf.mxu0  ;;  %20161 = vst [vmem:[#allocation61_spill] sm:$0xff] %v19489_v39 }
0x1433   : > { %12332 = vmatmul.mubr.bf16.gmra.mxu1 %v19336_v12  ;;  %14262 = vmatprep.subr.bf16.mxu0 %v16035_v0  ;;  %v16040_v12 = vld [vmem:[#allocation21 + $0x7e8] ss:$12 sps:$4 sm:$0xff]  }
0x1434   : > { %12339 = vmatprep.mubr.bf16.mxu1 %v19340_v43  ;;  %v16041_v43 = vld [vmem:[#allocation21 + $0x890] ss:$12 sps:$4 sm:$0xff]   ;;  %v19494_v18 = vpop.f32.mrf.mxu0 }
0x1436   : > { %14263 = vmatpush3.bf16.msra.mxu0 %v16036_v50  ;;  %v19498_v29 = vpop.f32.mrf.mxu0 }
0x1437   : > { %14264 = vmatprep.subr.bf16.mxu0 %v16037_v58 }
0x1438   : > { %v19504_v44 = vpop.f32.mrf.mxu0 }
0x1439   : > { %12259 = vmatmul.mubr.bf16.gmra.mxu0 %v19233_v28  ;;  %v20160_v28 = vld [vmem:[#allocation67_spill] sm:$0xff] }
0x143a   : > { %12266 = vmatprep.mubr.bf16.mxu0 %v20158_v16  ;;  %14265 = vmatpush3.bf16.msra.mxu0 %v16038_v23  ;;  %v19508_v26 = vpop.f32.mrf.mxu0 }
0x143b   : > { %12340 = vmatmul.mubr.bf16.gmra.mxu1 %v19347_v49  ;;  %14266 = vmatprep.subr.bf16.mxu0 %v16039_v63  ;;  %v16044_v49 = vld [vmem:[#allocation21 + $0x7b8] ss:$12 sps:$4 sm:$0xff]  }
0x143c   : > { %v19514_v4 = vpop.f32.mrf.mxu0 }
0x143e   : > { %14267 = vmatpush3.bf16.msra.mxu0 %v16040_v12  ;;  %v19518_v59 = vpop.f32.mrf.mxu0 }
0x143f   : > { %14268 = vmatprep.subr.bf16.mxu0 %v16041_v43 }
0x1440   : > { %v19524_v40 = vpop.f32.mrf.mxu0 }
0x1441   : > { %12267 = vmatmul.mubr.bf16.gmra.mxu0 %v20160_v28 }
0x1442   : > { %12274 = vmatprep.mubr.bf16.mxu0 %v20162_v33  ;;  %14269 = vmatpush3.bf16.msra.mxu0 %v16042_v62  ;;  %v19492_v1 = vpop.f32.mrf.mxu1 }
0x1443   : > { %14270 = vmatprep.subr.bf16.mxu0 %v16043_v60 }
0x1444   : > { %v19496_v41 = vpop.f32.mrf.mxu1 }
0x1446   : > { %14271 = vmatpush3.bf16.msra.mxu0 %v16044_v49  ;;  %v19502_v48 = vpop.f32.mrf.mxu1 }
0x1447   : > { %14272 = vmatprep.subr.bf16.mxu0 %v16045_v10 }
0x1448   : > { %v19506_v19 = vpop.f32.mrf.mxu1 }
0x1449   : > { %12275 = vmatmul.mubr.bf16.gmra.mxu0 %v20163_v27 }
0x144a   : > { %14273 = vmatpush3.bf16.msra.mxu0 %v16046_v38  ;;  %12380 = vmatprep.mubr.bf16.mxu0 %v19381_v51  ;;  %v19512_v36 = vpop.f32.mrf.mxu1 }
0x144b   : > { %14274 = vmatprep.subr.bf16.mxu0 %v16047_v17 }
0x144c   : > { %v19516_v51 = vpop.f32.mrf.mxu1 }
0x144e   : > { %14275 = vmatpush3.bf16.msra.mxu0 %v16048_v2  ;;  %v19522_v46 = vpop.f32.mrf.mxu1 }
0x1450   : > { %v19526_v5 = vpop.f32.mrf.mxu1 }
0x1451   : > { %12381 = vmatmul.mubr.bf16.vlgmr.msra.gmra.mxu0 %v19383_v3  ;;  %v19528_v3 = vpop.f32.mrf.mxu0 }
0x1452   : > { %12388 = vmatprep.mubr.bf16.mxu0 %v19395_v35  ;;  %v19532_v35 = vpop.f32.mrf.mxu1 }
0x1453   : > { %v19534_v20 = vpop.f32.mrf.mxu0 }
0x1454   : > { %20164 = vst [vmem:[#allocation69_spill] sm:$0xff] %v19534_v20  ;;  %v19536_v52 = vpop.f32.mrf.mxu1 }
0x1459   : > { %12389 = vmatmul.mubr.bf16.gmra.mxu0 %v19397_v54  ;;  %v19538_v54 = vpop.f32.mrf.mxu0 }
0x145a   : > { %12396 = vmatprep.mubr.bf16.mxu0 %v19409_v13  ;;  %20165 = vst [vmem:[#allocation68_spill] sm:$0xff] %v19538_v54  ;;  %v19541_v13 = vpop.f32.mrf.mxu1 }
0x145b   : > { %20166 = vst [vmem:[#allocation70_spill] sm:$0xff] %v19541_v13  ;;  %v19543_v0 = vpop.f32.mrf.mxu0 }
0x145c   : > { %20167 = vst [vmem:[#allocation71_spill] sm:$0xff] %v19543_v0  ;;  %v19545_v7 = vpop.f32.mrf.mxu1 }
0x145d   : > { %20168 = vst [vmem:[#allocation60_spill] sm:$0xff] %v19545_v7  ;;  %v19547_v50 = vpop.f32.mrf.mxu0 }
0x145e   : > { %20169 = vst [vmem:[#allocation63_spill] sm:$0xff] %v19547_v50 }
0x1461   : > { %12397 = vmatmul.mubr.bf16.gmra.mxu0 %v19411_v31  ;;  %v11838_v31 = vpop.f32.mrf.mxu0 }
0x1462   : > { %12404 = vmatprep.mubr.bf16.mxu0 %v19420_v14  ;;  %v19549_v14 = vpop.f32.mrf.mxu1 }
0x1463   : > { %20170 = vst [vmem:[#allocation67_spill] sm:$0xff] %v19549_v14  ;;  %v11840_v58 = vpop.f32.mrf.mxu0 }
0x1464   : > { %v19551_v23 = vpop.f32.mrf.mxu1 }
0x1465   : > { %20171 = vst [vmem:[#allocation65_spill] sm:$0xff] %v19551_v23  ;;  %v11842_v63 = vpop.f32.mrf.mxu0 }
0x1466   : > { %v19553_v16 = vpop.f32.mrf.mxu1 }
0x1467   : > { %20172 = vst [vmem:[#allocation64_spill] sm:$0xff] %v19553_v16  ;;  %v19555_v12 = vpop.f32.mrf.mxu0 }
0x1469   : > { %12405 = vmatmul.mubr.bf16.gmra.mxu0 %v19422_v53  ;;  %v19557_v53 = vpop.f32.mrf.mxu1  ;;  %v19559_v62 = vpop.f32.mrf.mxu0 }
0x146a   : > { %20173 = vst [vmem:[#allocation72_spill] sm:$0xff] %v19557_v53 }
0x146b   : > { %v19563_v33 = vpop.f32.mrf.mxu0 }
0x146d   : > { %v19569_v38 = vpop.f32.mrf.mxu0 }
0x146f   : > { %v19575_v2 = vpop.f32.mrf.mxu0 }
0x1471   : > { %v19581_v16 = vpop.f32.mrf.mxu0 }
0x1473   : > { %v19587_v0 = vpop.f32.mrf.mxu0 }
0x1474   : > { %20177 = vst [vmem:[#allocation76_spill] sm:$0xff] %v19587_v0  ;;  %v20188_v0 = vld [vmem:[#allocation35_spill] sm:$0xff] }
0x1475   : > { %v19593_v54 = vpop.f32.mrf.mxu0 }
0x1476   : > { %20180 = vst [vmem:[#allocation79_spill] sm:$0xff] %v19593_v54  ;;  %v20190_v54 = vld [vmem:[#allocation33_spill] sm:$0xff] }
0x1477   : > { %v19599_v20 = vpop.f32.mrf.mxu0 }
0x1478   : > { %20183 = vst [vmem:[#allocation82_spill] sm:$0xff] %v19599_v20 }
0x1482   : > { %v11911_v43 = vpop.f32.mrf.mxu1 }
0x1484   : > { %v11913_v60 = vpop.f32.mrf.mxu1 }
0x1486   : > { %v19561_v28 = vpop.f32.mrf.mxu1 }
0x1488   : > { %v19565_v49 = vpop.f32.mrf.mxu1 }
0x148a   : > { %v19567_v10 = vpop.f32.mrf.mxu1 }
0x148c   : > { %v19571_v17 = vpop.f32.mrf.mxu1 }
0x148e   : > { %v19573_v27 = vpop.f32.mrf.mxu1 }
0x1490   : > { %v19577_v55 = vpop.f32.mrf.mxu1 }
0x1492   : > { %v19579_v53 = vpop.f32.mrf.mxu1 }
0x1493   : > { %20174 = vst [vmem:[#allocation73_spill] sm:$0xff] %v19579_v53  ;;  %v19603_v53 = vld [vmem:[#allocation22] sm:$0x7] }
0x1494   : > { %v19583_v50 = vpop.f32.mrf.mxu1  ;;  %20185 = vst [vmem:[#allocation84_spill] sm:$0xff] %v19603_v53 }
0x1495   : > { %20175 = vst [vmem:[#allocation74_spill] sm:$0xff] %v19583_v50 }
0x1496   : > { %v19585_v23 = vpop.f32.mrf.mxu1 }
0x1497   : > { %20176 = vst [vmem:[#allocation75_spill] sm:$0xff] %v19585_v23  ;;  %v19607_v23 = vpop.f32.mrf.mxu0 }
0x1498   : > { %v19589_v39 = vpop.f32.mrf.mxu1  ;;  %20187 = vst [vmem:[#allocation86_spill] sm:$0xff] %v19607_v23 }
0x1499   : > { %20178 = vst [vmem:[#allocation77_spill] sm:$0xff] %v19589_v39  ;;  %v19611_v39 = vrot.slane %v19603_v53, %v20188_v0  ;;  %v19621_v20 = vpop.f32.mrf.mxu0 }
0x149a   : > { %v19591_v14 = vpop.f32.mrf.mxu1  ;;  %20192 = vst [vmem:[#allocation87_spill] sm:$0xff] %v19621_v20 }
0x149b   : > { %20179 = vst [vmem:[#allocation78_spill] sm:$0xff] %v19591_v14 }
0x149c   : > { %v19595_v11 = vpop.f32.mrf.mxu1 }
0x149d   : > { %20181 = vst [vmem:[#allocation80_spill] sm:$0xff] %v19595_v11  ;;  %v19617_v11 = vrot.slane %v19603_v53, %v20190_v54  ;;  %v11624_v54 = vadd.f32 %v19431_v45, %v19611_v39 }
0x149e   : > { %v19597_v7 = vpop.f32.mrf.mxu1 }
0x149f   : > { %20182 = vst [vmem:[#allocation81_spill] sm:$0xff] %v19597_v7  ;;  %v11622_v23 = vadd.f32 %v19426_v57, %v19617_v11  ;;  %v11697_v57 = vadd.f32 %v19482_v24, %v11624_v54 }
0x14a0   : > { %v19601_v25 = vpop.f32.mrf.mxu1 }
0x14a1   : > { %20184 = vst [vmem:[#allocation83_spill] sm:$0xff] %v19601_v25  ;;  %v11620_v25 = vadd.f32 %v19418_v32, %v19611_v39  ;;  %v11626_v32 = vadd.f32 %v19434_v30, %v19617_v11  ;;  %v11632_v30 = vadd.f32 %v19442_v47, %v19617_v11 }
0x14a2   : > { %v19605_v50 = vpop.f32.mrf.mxu1 }
0x14a3   : > { %20186 = vst [vmem:[#allocation85_spill] sm:$0xff] %v19605_v50  ;;  %v11693_v0 = vadd.f32 %v19471_v61, %v11620_v25 }
0x14a4   : > { %v19613_v14 = vpop.f32.mrf.mxu1 }
0x14a5   : > { %20189 = vst [vmem:[#allocation35_spill] sm:$0xff] %v19613_v14  ;;  %v19632_v14 = vpop.f32.mrf.mxu0  ;;  %v11766_v53 = vadd.f32 %v19492_v1, %v11693_v0  ;;  %v11770_v1 = vadd.f32 %v19502_v48, %v11697_v57  ;;  %v11705_v48 = vadd.f32 %v19498_v29, %v11632_v30 }
0x14a6   : > { %v19619_v7 = vpop.f32.mrf.mxu1 }
0x14a7   : > { %20191 = vst [vmem:[#allocation33_spill] sm:$0xff] %v19619_v7  ;;  %v11695_v7 = vadd.f32 %v19475_v8, %v11622_v23  ;;  %v11839_v25 = vadd.f32 %v11838_v31, %v11766_v53  ;;  %v19648_v45 = vpop.f32.mrf.mxu0  ;;  %v11699_v8 = vadd.f32 %v19486_v9, %v11626_v32  ;;  %v11843_v31 = vadd.f32 %v11842_v63, %v11770_v1 }
0x14a8   : > { %v19625_v50 = vpop.f32.mrf.mxu1  ;;  %v11634_v9 = vadd.f32 %v19447_v6, %v19611_v39  ;;  %v11636_v32 = vadd.f32 %v19450_v15, %v19617_v11  ;;  %v11778_v6 = vadd.f32 %v19516_v51, %v11705_v48  ;;  %v11640_v15 = vadd.f32 %v19455_v34, %v19611_v39 }
0x14a9   : > { %20193 = vst [vmem:[#allocation88_spill] sm:$0xff] %v19625_v50  ;;  %v11768_v61 = vadd.f32 %v19496_v41, %v11695_v7  ;;  %v11630_v50 = vadd.f32 %v19439_v22, %v19611_v39  ;;  %v11912_v0 = vadd.f32 %v11911_v43, %v11839_v25  ;;  %v11772_v7 = vadd.f32 %v19506_v19, %v11699_v8 }
0x14aa   : > { %v19630_v13 = vpop.f32.mrf.mxu1  ;;  %v11707_v57 = vadd.f32 %v19504_v44, %v11634_v9  ;;  %v11709_v44 = vadd.f32 %v19508_v26, %v11636_v32  ;;  %v11713_v34 = vadd.f32 %v19514_v4, %v11640_v15  ;;  %v11644_v9 = vadd.f32 %v19463_v42, %v19611_v39  ;;  %v20208_v15 = vld [vmem:[#allocation62_spill] sm:$0xff] }
0x14ab   : > { %20194 = vst [vmem:[#allocation89_spill] sm:$0xff] %v19630_v13  ;;  %v11841_v23 = vadd.f32 %v11840_v58, %v11768_v61  ;;  %v11703_v24 = vadd.f32 %v19494_v18, %v11630_v50  ;;  %v11845_v47 = vadd.f32 %v19555_v12, %v11772_v7  ;;  %v11916_v18 = vadd.f32 %v19561_v28, %v11843_v31  ;;  %v20196_v50 = vld [vmem:[#allocation37_spill] sm:$0xff]  ;;  %v20197_v12 = vld [vmem:[#allocation36_spill] sm:$0xff] }
0x14ac   : > { %v19638_v20 = vpop.f32.mrf.mxu1  ;;  %v11780_v51 = vadd.f32 %v19522_v46, %v11707_v57  ;;  %v11782_v26 = vadd.f32 %v19526_v5, %v11709_v44  ;;  %v11786_v4 = vadd.f32 %v19532_v35, %v11713_v34  ;;  %v11717_v42 = vadd.f32 %v19524_v40, %v11644_v9  ;;  %v20203_v40 = vld [vmem:[#allocation70_spill] sm:$0xff] }
0x14ad   : > { %20195 = vst [vmem:[#allocation90_spill] sm:$0xff] %v19638_v20  ;;  %v11914_v22 = vadd.f32 %v11913_v60, %v11841_v23  ;;  %v11776_v58 = vadd.f32 %v19512_v36, %v11703_v24  ;;  %v11918_v61 = vadd.f32 %v19565_v49, %v11845_v47  ;;  %v11851_v49 = vadd.f32 %v19563_v33, %v11778_v6  ;;  %v20198_v23 = vld [vmem:[#allocation40_spill] sm:$0xff] }
0x14ae   : > { %v19644_v13 = vpop.f32.mrf.mxu1  ;;  %v11853_v7 = vadd.f32 %v19569_v38, %v11780_v51  ;;  %v11855_v48 = vadd.f32 %v19575_v2, %v11782_v26  ;;  %v11650_v57 = vadd.f32 %v19473_v21, %v19611_v39  ;;  %v11790_v6 = vadd.f32 %v20203_v40, %v11717_v42  ;;  %v20209_v21 = vld [vmem:[#allocation69_spill] sm:$0xff]  ;;  %v20225_v40 = vld [vmem:[#allocation47_spill] sm:$0xff] }
0x14af   : > { %v11849_v36 = vadd.f32 %v19559_v62, %v11776_v58  ;;  %v11924_v33 = vadd.f32 %v19571_v17, %v11851_v49  ;;  %v20200_v17 = vld [vmem:[#allocation43_spill] sm:$0xff]  ;;  %v11652_v44 = vadd.f32 %v20208_v15, %v19617_v11  ;;  %v20220_v42 = vld [vmem:[#allocation61_spill] sm:$0xff]  ;;  %v20229_v15 = vld [vmem:[#allocation78_spill] sm:$0xff] }
0x14b0   : > { %v19652_v20 = vpop.f32.mrf.mxu1  ;;  %v11926_v38 = vadd.f32 %v19573_v27, %v11853_v7  ;;  %v11928_v2 = vadd.f32 %v19577_v55, %v11855_v48  ;;  %v20201_v27 = vld [vmem:[#allocation41_spill] sm:$0xff]  ;;  %v20206_v55 = vld [vmem:[#allocation46_spill] sm:$0xff]  ;;  %v11723_v51 = vadd.f32 %v20209_v21, %v11650_v57  ;;  %v20218_v48 = vld [vmem:[#allocation75_spill] sm:$0xff] }
0x14b1   : > { %v11984_v41 = vpop.f32.mrf.mxu0  ;;  %v11922_v1 = vadd.f32 %v19567_v10, %v11849_v36  ;;  %v20199_v10 = vld [vmem:[#allocation38_spill] sm:$0xff]  ;;  %v20224_v57 = vld [vmem:[#allocation77_spill] sm:$0xff]  ;;  %v20230_v21 = vld [vmem:[#allocation52_spill] sm:$0xff] }
0x14b2   : > { %v11985_v53 = vadd.f32 %v11984_v41, %v11912_v0  ;;  %v19658_v54 = vpop.f32.mrf.mxu1  ;;  %v11642_v41 = vadd.f32 %v19458_v37, %v19617_v11  ;;  %v20214_v7 = vld [vmem:[#allocation66_spill] sm:$0xff] }
0x14b3   : > { %v11986_v43 = vpop.f32.mrf.mxu0 }
0x14b4   : > { %v12413_v19 = vadd.f32 %v11985_v53, %v20196_v50  ;;  %v11987_v63 = vadd.f32 %v11986_v43, %v11914_v22  ;;  %v19667_v60 = vpop.f32.mrf.mxu1  ;;  %v11715_v37 = vadd.f32 %v19518_v59, %v11642_v41  ;;  %v11859_v50 = vadd.f32 %v19581_v16, %v11786_v4  ;;  %v20205_v16 = vld [vmem:[#allocation73_spill] sm:$0xff]  ;;  %v20213_v41 = vld [vmem:[#allocation44_spill] sm:$0xff]  ;;  %v20217_v4 = vld [vmem:[#allocation82_spill] sm:$0xff] }
0x14b5   : > { %v11988_v29 = vpop.f32.mrf.mxu0 }
0x14b6   : > { %12437 = vst [vmem:[%s19677_s3] sm:$0xff] %v12413_v19  ;;  %v12414_v28 = vadd.f32 %v11987_v63, %v20197_v12  ;;  %v11989_v25 = vadd.f32 %v11988_v29, %v11916_v18  ;;  %v19681_v8 = vpop.f32.mrf.mxu1  ;;  %v11646_v18 = vadd.f32 %v19466_v56, %v19617_v11  ;;  %v11788_v59 = vadd.f32 %v19536_v52, %v11715_v37  ;;  %v20204_v29 = vld [vmem:[#allocation76_spill] sm:$0xff] }
0x14b7   : > { %v11990_v62 = vpop.f32.mrf.mxu0 }
0x14b8   : > { %12438 = vst [vmem:[%s19677_s3 + $0x8] sm:$0xff] %v12414_v28  ;;  %v12416_v0 = vadd.f32 %v11989_v25, %v20198_v23  ;;  %v11991_v30 = vadd.f32 %v11990_v62, %v11918_v61  ;;  %v19691_v24 = vpop.f32.mrf.mxu1  ;;  %v11719_v56 = vadd.f32 %v19528_v3, %v11646_v18  ;;  %v11861_v36 = vadd.f32 %v20204_v29, %v11788_v59  ;;  %v20210_v3 = vld [vmem:[#allocation60_spill] sm:$0xff]  ;;  %v20221_v59 = vld [vmem:[#allocation71_spill] sm:$0xff] }
0x14b9   : > { %v11994_v46 = vpop.f32.mrf.mxu0  ;;  %v11932_v61 = vadd.f32 %v20205_v16, %v11859_v50  ;;  %v20222_v50 = vld [vmem:[#allocation65_spill] sm:$0xff] }
0x14ba   : > { %12440 = vst [vmem:[%s19677_s3 + $0x18] sm:$0xff] %v12416_v0  ;;  %v12417_v31 = vadd.f32 %v11991_v30, %v20199_v10  ;;  %v11995_v22 = vadd.f32 %v11994_v46, %v11922_v1  ;;  %v19701_v53 = vpop.f32.mrf.mxu1  ;;  %v11792_v62 = vadd.f32 %v20210_v3, %v11719_v56  ;;  %v20211_v1 = vld [vmem:[#allocation79_spill] sm:$0xff]  ;;  %v20212_v0 = vld [vmem:[#allocation74_spill] sm:$0xff]  ;;  %v20215_v10 = vld [vmem:[#allocation68_spill] sm:$0xff] }
0x14bb   : > { %v11996_v5 = vpop.f32.mrf.mxu0  ;;  %v11863_v23 = vadd.f32 %v20211_v1, %v11790_v6  ;;  %v11934_v30 = vadd.f32 %v20212_v0, %v11861_v36  ;;  %v20226_v36 = vld [vmem:[#allocation63_spill] sm:$0xff] }
0x14bc   : > { %12441 = vst [vmem:[%s19677_s3 + $0x20] sm:$0xff] %v12417_v31  ;;  %v12419_v58 = vadd.f32 %v11995_v22, %v20200_v17  ;;  %v11997_v43 = vadd.f32 %v11996_v5, %v11924_v33  ;;  %v19711_v47 = vpop.f32.mrf.mxu1  ;;  %v11654_v33 = vadd.f32 %v20214_v7, %v19611_v39  ;;  %v11725_v31 = vadd.f32 %v20215_v10, %v11652_v44  ;;  %v20216_v22 = vld [vmem:[#allocation67_spill] sm:$0xff]  ;;  %v20219_v17 = vld [vmem:[#allocation49_spill] sm:$0xff] }
0x14bd   : > { %v11998_v35 = vpop.f32.mrf.mxu0  ;;  %v11796_v9 = vadd.f32 %v20216_v22, %v11723_v51  ;;  %v11865_v5 = vadd.f32 %v20217_v4, %v11792_v62  ;;  %v11656_v39 = vadd.f32 %v20220_v42, %v19617_v11  ;;  %v20234_v22 = vld [vmem:[#allocation81_spill] sm:$0xff] }
0x14be   : > { %12443 = vst [vmem:[%s19677_s3 + $0x30] sm:$0xff] %v12419_v58  ;;  %v12420_v19 = vadd.f32 %v11997_v43, %v20201_v27  ;;  %v11999_v63 = vadd.f32 %v11998_v35, %v11926_v38  ;;  %v19721_v32 = vpop.f32.mrf.mxu1  ;;  %v11936_v38 = vadd.f32 %v20218_v48, %v11863_v23  ;;  %v11727_v35 = vadd.f32 %v20221_v59, %v11654_v33  ;;  %v20238_v59 = vld [vmem:[#allocation58_spill] sm:$0xff] }
0x14bf   : > { %20202 = vst [vmem:[#allocation37_spill] sm:$0xff] %v19721_v32  ;;  %v12000_v52 = vpop.f32.mrf.mxu0  ;;  %v11938_v56 = vadd.f32 %v20224_v57, %v11865_v5  ;;  %v11729_v16 = vadd.f32 %v20226_v36, %v11656_v39 }
0x14c0   : > { %12444 = vst [vmem:[%s19677_s3 + $0x38] sm:$0xff] %v12420_v19  ;;  %v12422_v12 = vadd.f32 %v11999_v63, %v20206_v55  ;;  %v12001_v28 = vadd.f32 %v12000_v52, %v11928_v2  ;;  %v19731_v25 = vpop.f32.mrf.mxu1  ;;  %v11798_v2 = vadd.f32 %v20222_v50, %v11725_v31  ;;  %v20223_v19 = vld [vmem:[#allocation86_spill] sm:$0xff] }
0x14c1   : > { %20207 = vst [vmem:[#allocation36_spill] sm:$0xff] %v19731_v25  ;;  %v12004_v49 = vpop.f32.mrf.mxu0  ;;  %v11869_v63 = vadd.f32 %v20223_v19, %v11796_v9  ;;  %v20239_v19 = vld [vmem:[#allocation56_spill] sm:$0xff] }
0x14c2   : > { %12446 = vst [vmem:[%s19677_s3 + $0x48] sm:$0xff] %v12422_v12  ;;  %v12423_v34 = vadd.f32 %v12001_v28, %v20213_v41  ;;  %v12005_v26 = vadd.f32 %v12004_v49, %v11932_v61  ;;  %v19741_v46 = vpop.f32.mrf.mxu1  ;;  %v20227_v61 = vld [vmem:[#allocation64_spill] sm:$0xff]  ;;  %v20228_v12 = vld [vmem:[#allocation87_spill] sm:$0xff] }
0x14c3   : > { %v12006_v37 = vpop.f32.mrf.mxu0  ;;  %v11800_v11 = vadd.f32 %v20227_v61, %v11727_v35  ;;  %v11871_v28 = vadd.f32 %v20228_v12, %v11798_v2  ;;  %v11942_v44 = vadd.f32 %v20229_v15, %v11869_v63  ;;  %v20231_v49 = vld [vmem:[#allocation72_spill] sm:$0xff] }
0x14c4   : > { %12447 = vst [vmem:[%s19677_s3 + $0x50] sm:$0xff] %v12423_v34  ;;  %v12425_v58 = vadd.f32 %v12005_v26, %v20219_v17  ;;  %v12007_v43 = vadd.f32 %v12006_v37, %v11934_v30  ;;  %v19751_v18 = vpop.f32.mrf.mxu1  ;;  %v11802_v1 = vadd.f32 %v20231_v49, %v11729_v16  ;;  %v20232_v30 = vld [vmem:[#allocation80_spill] sm:$0xff]  ;;  %v20233_v34 = vld [vmem:[#allocation50_spill] sm:$0xff]  ;;  %v20235_v37 = vld [vmem:[#allocation55_spill] sm:$0xff] }
0x14c5   : > { %v12008_v27 = vpop.f32.mrf.mxu0  ;;  %v11873_v0 = vadd.f32 %v19632_v14, %v11800_v11  ;;  %v11944_v41 = vadd.f32 %v20232_v30, %v11871_v28 }
0x14c6   : > { %12449 = vst [vmem:[%s19677_s3 + $0x60] sm:$0xff] %v12425_v58  ;;  %v12426_v6 = vadd.f32 %v12007_v43, %v20225_v40  ;;  %v12009_v52 = vadd.f32 %v12008_v27, %v11936_v38  ;;  %v19761_v29 = vpop.f32.mrf.mxu1  ;;  %v11875_v31 = vadd.f32 %v19648_v45, %v11802_v1  ;;  %v20236_v38 = vld [vmem:[#allocation83_spill] sm:$0xff]  ;;  %v20237_v58 = vld [vmem:[#allocation53_spill] sm:$0xff] }
0x14c7   : > { %v12010_v55 = vpop.f32.mrf.mxu0  ;;  %v11946_v9 = vadd.f32 %v20234_v22, %v11873_v0 }
0x14c8   : > { %12450 = vst [vmem:[%s19677_s3 + $0x68] sm:$0xff] %v12426_v6  ;;  %v12428_v51 = vadd.f32 %v12009_v52, %v20230_v21  ;;  %v12011_v3 = vadd.f32 %v12010_v55, %v11938_v56  ;;  %v19769_v62 = vpop.f32.mrf.mxu1  ;;  %v11948_v17 = vadd.f32 %v20236_v38, %v11875_v31 }
0x14c9   : > { %v12014_v23 = vpop.f32.mrf.mxu0 }
0x14ca   : > { %12452 = vst [vmem:[%s19677_s3 + $0x78] sm:$0xff] %v12428_v51  ;;  %v12429_v26 = vadd.f32 %v12011_v3, %v20233_v34  ;;  %v12015_v7 = vadd.f32 %v12014_v23, %v11942_v44 }
0x14cb   : > { %v19776_v33 = vpop.f32.mrf.mxu1  ;;  %v12016_v10 = vpop.f32.mrf.mxu0 }
0x14cc   : > { %12453 = vst [vmem:[%s19677_s3 + $0x80] sm:$0xff] %v12429_v26  ;;  %v12431_v4 = vadd.f32 %v12015_v7, %v20235_v37  ;;  %v12017_v5 = vadd.f32 %v12016_v10, %v11944_v41 }
0x14cd   : > { %v19782_v14 = vpop.f32.mrf.mxu1  ;;  %v12018_v48 = vpop.f32.mrf.mxu0 }
0x14ce   : > { %12455 = vst [vmem:[%s19677_s3 + $0x90] sm:$0xff] %v12431_v4  ;;  %v12432_v43 = vadd.f32 %v12017_v5, %v20237_v58  ;;  %v12019_v42 = vadd.f32 %v12018_v48, %v11946_v9 }
0x14cf   : > { %v19787_v39 = vpop.f32.mrf.mxu1  ;;  %v12020_v45 = vpop.f32.mrf.mxu0 }
0x14d0   : > { %12456 = vst [vmem:[%s19677_s3 + $0x98] sm:$0xff] %v12432_v43  ;;  %v12434_v35 = vadd.f32 %v12019_v42, %v20238_v59  ;;  %v12021_v50 = vadd.f32 %v12020_v45, %v11948_v17  ;;  %v20250_v45 = vld [vmem:[#allocation34_spill] sm:$0xff]  ;;  %v20251_v59 = vld [vmem:[#allocation84_spill] sm:$0xff] }
0x14d1   : > { %v19791_v2 = vpop.f32.mrf.mxu1  ;;  %v14116_v27 = vpop.f32.mrf.mxu0 }
0x14d2   : > { %12458 = vst [vmem:[%s19677_s3 + $0xa8] sm:$0xff] %v12434_v35  ;;  %v12435_v63 = vadd.f32 %v12021_v50, %v20239_v19  ;;  %v19836_v35 = vrot.slane %v20251_v59, %v20250_v45  ;;  %v20252_v50 = vld [vmem:[#allocation85_spill] sm:$0xff]  ;;  %v20253_v19 = vld [vmem:[#allocation35_spill] sm:$0xff] }
0x14d3   : > { %v19795_v57 = vpop.f32.mrf.mxu1  ;;  %v14117_v56 = vpop.f32.mrf.mxu0  ;;  %v20258_v59 = vld [vmem:[#allocation89_spill] sm:$0xff] }
0x14d4   : > { %12459 = vst [vmem:[%s19677_s3 + $0xb0] sm:$0xff] %v12435_v63  ;;  %v14078_v63 = vadd.f32 %v20253_v19, %v20252_v50 }
0x14d5   : > { %v19798_v40 = vpop.f32.mrf.mxu1  ;;  %v14119_v6 = vpop.f32.mrf.mxu0 }
0x14d7   : > { %v19800_v52 = vpop.f32.mrf.mxu1  ;;  %v14120_v36 = vpop.f32.mrf.mxu0 }
0x14d8   : > { %20240 = vst [vmem:[#allocation40_spill] sm:$0xff] %v19800_v52  ;;  %v14121_v45 = vadd.f32 %v14120_v36, %v14119_v6 }
0x14d9   : > { %v14122_v16 = vpop.f32.mrf.mxu0  ;;  %v19802_v61 = vpop.f32.mrf.mxu1 }
0x14da   : > { %20241 = vst [vmem:[#allocation38_spill] sm:$0xff] %v19802_v61  ;;  %v20257_v61 = vld [vmem:[#allocation88_spill] sm:$0xff] }
0x14db   : > { %v14123_v11 = vpop.f32.mrf.mxu0  ;;  %v19804_v12 = vpop.f32.mrf.mxu1 }
0x14dc   : > { %20242 = vst [vmem:[#allocation43_spill] sm:$0xff] %v19804_v12 }
0x14dd   : > { %v14125_v55 = vpop.f32.mrf.mxu0  ;;  %v19808_v44 = vpop.f32.mrf.mxu1 }
0x14de   : > { %20243 = vst [vmem:[#allocation41_spill] sm:$0xff] %v19808_v44 }
0x14df   : > { %v14126_v28 = vpop.f32.mrf.mxu0  ;;  %v19814_v3 = vpop.f32.mrf.mxu1 }
0x14e0   : > { %20244 = vst [vmem:[#allocation70_spill] sm:$0xff] %v19814_v3  ;;  %v14118_v3 = vadd.f32 %v14117_v56, %v14116_v27  ;;  %v14158_v56 = vadd.f32 %v19751_v18, %v19741_v46 }
0x14e1   : > { %v19806_v15 = vpop.f32.mrf.mxu0  ;;  %v19820_v23 = vpop.f32.mrf.mxu1 }
0x14e2   : > { %20246 = vst [vmem:[#allocation73_spill] sm:$0xff] %v19820_v23 }
0x14e3   : > { %v19810_v21 = vpop.f32.mrf.mxu0  ;;  %v14236_v41 = vpop.f32.mrf.mxu1 }
0x14e5   : > { %v19812_v51 = vpop.f32.mrf.mxu0  ;;  %v14237_v7 = vpop.f32.mrf.mxu1 }
0x14e7   : > { %v19816_v49 = vpop.f32.mrf.mxu0  ;;  %v14239_v22 = vpop.f32.mrf.mxu1 }
0x14e9   : > { %v19818_v1 = vpop.f32.mrf.mxu0  ;;  %v14240_v4 = vpop.f32.mrf.mxu1 }
0x14ea   : > { %20245 = vst [vmem:[#allocation76_spill] sm:$0xff] %v19818_v1 }
0x14eb   : > { %v19822_v0 = vpop.f32.mrf.mxu0  ;;  %v19828_v38 = vpop.f32.mrf.mxu1 }
0x14ec   : > { %20247 = vst [vmem:[#allocation46_spill] sm:$0xff] %v19822_v0  ;;  %v20259_v0 = vld [vmem:[#allocation90_spill] sm:$0xff] }
0x14ed   : > { %v19824_v30 = vpop.f32.mrf.mxu0  ;;  %v14243_v43 = vpop.f32.mrf.mxu1  ;;  %v14084_v1 = vadd.f32 %v20259_v0, %v20258_v59  ;;  %v14087_v0 = vadd.f32 %v19652_v20, %v19644_v13 }
0x14ee   : > { %20248 = vst [vmem:[#allocation62_spill] sm:$0xff] %v19824_v30  ;;  %v20256_v30 = vld [vmem:[#allocation33_spill] sm:$0xff] }
0x14ef   : > { %v19826_v34 = vpop.f32.mrf.mxu0  ;;  %v19842_v44 = vpop.f32.mrf.mxu1  ;;  %v14081_v52 = vadd.f32 %v20257_v61, %v20256_v30  ;;  %v12066_v6 = vadd.f32 %v14084_v1, %v19836_v35  ;;  %v14164_v1 = vadd.f32 %v19782_v14, %v19776_v33  ;;  %v12069_v20 = vadd.f32 %v14087_v0, %v19836_v35 }
0x14f0   : > { %20249 = vst [vmem:[#allocation69_spill] sm:$0xff] %v19826_v34  ;;  %v12058_v34 = vadd.f32 %v14078_v63, %v19836_v35  ;;  %v14167_v33 = vadd.f32 %v19791_v2, %v19787_v39  ;;  %v14096_v39 = vadd.f32 %v19711_v47, %v19701_v53  ;;  %v14170_v2 = vadd.f32 %v19798_v40, %v19795_v57 }
0x14f1   : > { %v14196_v26 = vpop.f32.mrf.mxu0  ;;  %v19853_v50 = vpop.f32.mrf.mxu1  ;;  %v12061_v27 = vadd.f32 %v14081_v52, %v19836_v35  ;;  %v14161_v52 = vadd.f32 %v19769_v62, %v19761_v29 }
0x14f2   : > { %v12123_v32 = vadd.f32 %v14118_v3, %v12058_v34  ;;  %v14247_v53 = vadd.f32 %v19853_v50, %v19842_v44  ;;  %v12082_v40 = vadd.f32 %v14096_v39, %v19836_v35 }
0x14f3   : > { %v14197_v10 = vpop.f32.mrf.mxu0  ;;  %v12126_v61 = vadd.f32 %v14121_v45, %v12061_v27  ;;  %v19863_v36 = vpop.f32.mrf.mxu1 }
0x14f4   : > { %v14198_v63 = vadd.f32 %v14197_v10, %v14196_v26  ;;  %v12188_v30 = vadd.f32 %v14158_v56, %v12123_v32  ;;  %v14238_v26 = vadd.f32 %v14237_v7, %v14236_v41  ;;  %v14090_v32 = vadd.f32 %v19667_v60, %v19658_v54  ;;  %v20260_v56 = vld [vmem:[#allocation39_spill] sm:$0xff] }
0x14f5   : > { %v14199_v31 = vpop.f32.mrf.mxu0  ;;  %v12191_v10 = vadd.f32 %v14161_v52, %v12126_v61  ;;  %v14249_v45 = vpop.f32.mrf.mxu1  ;;  %v14093_v60 = vadd.f32 %v19691_v24, %v19681_v8 }
0x14f6   : > { %v12253_v34 = vadd.f32 %v14198_v63, %v12188_v30  ;;  %v12074_v54 = vadd.f32 %v14090_v32, %v19836_v35  ;;  %v20267_v32 = vld [vmem:[#allocation38_spill] sm:$0xff] }
0x14f7   : > { %v14200_v9 = vpop.f32.mrf.mxu0  ;;  %v14251_v14 = vpop.f32.mrf.mxu1  ;;  %v12077_v24 = vadd.f32 %v14093_v60, %v19836_v35 }
0x14f8   : > { %v14201_v46 = vadd.f32 %v14200_v9, %v14199_v31  ;;  %v12318_v29 = vadd.f32 %v14238_v26, %v12253_v34  ;;  %v20264_v26 = vld [vmem:[#allocation37_spill] sm:$0xff] }
0x14f9   : > { %v14202_v37 = vpop.f32.mrf.mxu0 }
0x14fa   : > { %v12256_v13 = vadd.f32 %v14201_v46, %v12191_v10  ;;  %v20265_v10 = vld [vmem:[#allocation36_spill] sm:$0xff] }
0x14fb   : > { %v14203_v5 = vpop.f32.mrf.mxu0 }
0x14fc   : > { %v14204_v59 = vadd.f32 %v14203_v5, %v14202_v37 }
0x14fd   : > { %v14205_v48 = vpop.f32.mrf.mxu0 }
0x14ff   : > { %v14206_v17 = vpop.f32.mrf.mxu0 }
0x1500   : > { %v14207_v5 = vadd.f32 %v14206_v17, %v14205_v48  ;;  %v14252_v48 = vpop.f32.mrf.mxu1 }
0x1501   : > { %v19830_v58 = vpop.f32.mrf.mxu0 }
0x1503   : > { %v19832_v42 = vpop.f32.mrf.mxu0 }
0x1505   : > { %v19840_v23 = vpop.f32.mrf.mxu0 }
0x1506   : > { %20254 = vst [vmem:[#allocation60_spill] sm:$0xff] %v19840_v23 }
0x1507   : > { %v19844_v12 = vpop.f32.mrf.mxu0 }
0x1508   : > { %20255 = vst [vmem:[#allocation79_spill] sm:$0xff] %v19844_v12  ;;  %v14124_v12 = vadd.f32 %v14123_v11, %v14122_v16  ;;  %v14127_v11 = vadd.f32 %v14126_v28, %v14125_v55  ;;  %v14130_v55 = vadd.f32 %v19810_v21, %v19806_v15  ;;  %v14241_v28 = vadd.f32 %v14240_v4, %v14239_v22 }
0x1509   : > { %v19849_v25 = vpop.f32.mrf.mxu0  ;;  %v14133_v15 = vadd.f32 %v19816_v49, %v19812_v51  ;;  %v14244_v21 = vadd.f32 %v14243_v43, %v19828_v38  ;;  %v14210_v49 = vadd.f32 %v19832_v42, %v19830_v58  ;;  %v20261_v38 = vld [vmem:[#allocation42_spill] sm:$0xff]  ;;  %v14099_v58 = vadd.f32 %v20265_v10, %v20264_v26  ;;  %v20266_v42 = vld [vmem:[#allocation40_spill] sm:$0xff] }
0x150a   : > { %v12131_v18 = vadd.f32 %v14124_v12, %v12066_v6  ;;  %v12134_v9 = vadd.f32 %v14127_v11, %v12069_v20  ;;  %v12321_v61 = vadd.f32 %v14241_v28, %v12256_v13  ;;  %v12139_v4 = vadd.f32 %v14130_v55, %v12074_v54  ;;  %v20272_v54 = vld [vmem:[#allocation69_spill] sm:$0xff] }
0x150b   : > { %v19855_v19 = vpop.f32.mrf.mxu0  ;;  %v12142_v34 = vadd.f32 %v14133_v15, %v12077_v24  ;;  %v14253_v24 = vadd.f32 %v14252_v48, %v14251_v14 }
0x150c   : > { %v12196_v31 = vadd.f32 %v14164_v1, %v12131_v18  ;;  %v12199_v6 = vadd.f32 %v14167_v33, %v12134_v9  ;;  %v20262_v18 = vld [vmem:[#allocation76_spill] sm:$0xff]  ;;  %v12204_v47 = vadd.f32 %v14170_v2, %v12139_v4  ;;  %v14173_v1 = vadd.f32 %v20267_v32, %v20266_v42  ;;  %v20276_v2 = vld [vmem:[#allocation70_spill] sm:$0xff]  ;;  %v20280_v42 = vld [vmem:[#allocation57_spill] sm:$0xff] }
0x150d   : > { %v19860_v23 = vpop.f32.mrf.mxu0  ;;  %v14250_v33 = vadd.f32 %v14249_v45, %v19863_v36 }
0x150e   : > { %v12261_v7 = vadd.f32 %v14204_v59, %v12196_v31  ;;  %v12264_v51 = vadd.f32 %v14207_v5, %v12199_v6  ;;  %v14254_v59 = vpop.f32.mrf.mxu1  ;;  %v20270_v31 = vld [vmem:[#allocation45_spill] sm:$0xff]  ;;  %v12207_v9 = vadd.f32 %v14173_v1, %v12142_v34  ;;  %v20273_v5 = vld [vmem:[#allocation43_spill] sm:$0xff] }
0x150f   : > { %v19865_v3 = vpop.f32.mrf.mxu0  ;;  %v20269_v20 = vld [vmem:[#allocation79_spill] sm:$0xff] }
0x1510   : > { %v12326_v17 = vadd.f32 %v14244_v21, %v12261_v7  ;;  %v12329_v50 = vadd.f32 %v14247_v53, %v12264_v51  ;;  %v14216_v21 = vadd.f32 %v19855_v19, %v19849_v25  ;;  %v14219_v25 = vadd.f32 %v19865_v3, %v19860_v23  ;;  %v20278_v19 = vld [vmem:[#allocation51_spill] sm:$0xff] }
0x1511   : > { %v14276_v16 = vpop.f32.mrf.mxu0 }
0x1513   : > { %v14277_v27 = vpop.f32.mrf.mxu0 }
0x1514   : > { %v14278_v62 = vadd.f32 %v14277_v27, %v14276_v16  ;;  %v20263_v16 = vld [vmem:[#allocation46_spill] sm:$0xff]  ;;  %v20268_v27 = vld [vmem:[#allocation60_spill] sm:$0xff] }
0x1515   : > { %v14279_v12 = vpop.f32.mrf.mxu0  ;;  %v14136_v11 = vadd.f32 %v20263_v16, %v20262_v18  ;;  %v14213_v13 = vadd.f32 %v20269_v20, %v20268_v27  ;;  %v20281_v20 = vld [vmem:[#allocation59_spill] sm:$0xff] }
0x1516   : > { %v12383_v41 = vadd.f32 %v14278_v62, %v12318_v29  ;;  %v12269_v62 = vadd.f32 %v14210_v49, %v12204_v47  ;;  %v20279_v47 = vld [vmem:[#allocation54_spill] sm:$0xff] }
0x1517   : > { %v14280_v37 = vpop.f32.mrf.mxu0  ;;  %v12147_v28 = vadd.f32 %v14136_v11, %v12082_v40 }
0x1518   : > { %v12415_v63 = vadd.f32 %v12383_v41, %v20260_v56  ;;  %v14281_v30 = vadd.f32 %v14280_v37, %v14279_v12  ;;  %v20271_v41 = vld [vmem:[#allocation62_spill] sm:$0xff]  ;;  %v12085_v37 = vadd.f32 %v14099_v58, %v19836_v35  ;;  %v20274_v56 = vld [vmem:[#allocation41_spill] sm:$0xff]  ;;  %v12334_v6 = vadd.f32 %v14250_v33, %v12269_v62 }
0x1519   : > { %v14282_v22 = vpop.f32.mrf.mxu0  ;;  %v14139_v60 = vadd.f32 %v20272_v54, %v20271_v41 }
0x151a   : > { %12439 = vst [vmem:[%s19677_s3 + $0x10] sm:$0xff] %v12415_v63  ;;  %v12386_v8 = vadd.f32 %v14281_v30, %v12321_v61  ;;  %v14176_v63 = vadd.f32 %v20274_v56, %v20273_v5  ;;  %v14255_v61 = vpop.f32.mrf.mxu1  ;;  %v12272_v30 = vadd.f32 %v14213_v13, %v12207_v9 }
0x151b   : > { %v14283_v0 = vpop.f32.mrf.mxu0  ;;  %v12150_v45 = vadd.f32 %v14139_v60, %v12085_v37  ;;  %v14256_v34 = vadd.f32 %v14255_v61, %v14254_v59 }
0x151c   : > { %v12418_v43 = vadd.f32 %v12386_v8, %v20261_v38  ;;  %v14284_v52 = vadd.f32 %v14283_v0, %v14282_v22  ;;  %v20275_v22 = vld [vmem:[#allocation48_spill] sm:$0xff]  ;;  %v12212_v39 = vadd.f32 %v14176_v63, %v12147_v28  ;;  %v14257_v51 = vpop.f32.mrf.mxu1  ;;  %v12337_v49 = vadd.f32 %v14253_v24, %v12272_v30 }
0x151d   : > { %v14285_v46 = vpop.f32.mrf.mxu0 }
0x151e   : > { %12442 = vst [vmem:[%s19677_s3 + $0x28] sm:$0xff] %v12418_v43  ;;  %v12391_v57 = vadd.f32 %v14284_v52, %v12326_v17  ;;  %v20277_v17 = vld [vmem:[#allocation73_spill] sm:$0xff]  ;;  %v12277_v43 = vadd.f32 %v14216_v21, %v12212_v39  ;;  %v14258_v16 = vpop.f32.mrf.mxu1 }
0x151f   : > { %v14286_v29 = vpop.f32.mrf.mxu0  ;;  %v14179_v0 = vadd.f32 %v20277_v17, %v20276_v2  ;;  %v14259_v3 = vadd.f32 %v14258_v16, %v14257_v51 }
0x1520   : > { %v12421_v44 = vadd.f32 %v12391_v57, %v20270_v31  ;;  %v14287_v12 = vadd.f32 %v14286_v29, %v14285_v46  ;;  %v12342_v40 = vadd.f32 %v14256_v34, %v12277_v43 }
0x1521   : > { %v14288_v55 = vpop.f32.mrf.mxu0  ;;  %v12215_v46 = vadd.f32 %v14179_v0, %v12150_v45 }
0x1522   : > { %12445 = vst [vmem:[%s19677_s3 + $0x40] sm:$0xff] %v12421_v44  ;;  %v12394_v7 = vadd.f32 %v14287_v12, %v12329_v50 }
0x1523   : > { %v14289_v15 = vpop.f32.mrf.mxu0  ;;  %v12280_v53 = vadd.f32 %v14219_v25, %v12215_v46 }
0x1524   : > { %v12424_v4 = vadd.f32 %v12394_v7, %v20275_v22  ;;  %v14290_v8 = vadd.f32 %v14289_v15, %v14288_v55 }
0x1525   : > { %v14291_v36 = vpop.f32.mrf.mxu0  ;;  %v12345_v1 = vadd.f32 %v14259_v3, %v12280_v53 }
0x1526   : > { %12448 = vst [vmem:[%s19677_s3 + $0x58] sm:$0xff] %v12424_v4  ;;  %v12399_v35 = vadd.f32 %v14290_v8, %v12334_v6 }
0x1527   : > { %v14292_v38 = vpop.f32.mrf.mxu0 }
0x1528   : > { %v12427_v52 = vadd.f32 %v12399_v35, %v20278_v19  ;;  %v14293_v14 = vadd.f32 %v14292_v38, %v14291_v36 }
0x1529   : > { %v14294_v48 = vpop.f32.mrf.mxu0 }
0x152a   : > { %12451 = vst [vmem:[%s19677_s3 + $0x70] sm:$0xff] %v12427_v52  ;;  %v12402_v18 = vadd.f32 %v14293_v14, %v12337_v49 }
0x152b   : > { %v14295_v11 = vpop.f32.mrf.mxu0 }
0x152c   : > { %v12430_v57 = vadd.f32 %v12402_v18, %v20279_v47  ;;  %v14296_v26 = vadd.f32 %v14295_v11, %v14294_v48 }
0x152d   : > { %v14297_v23 = vpop.f32.mrf.mxu0 }
0x152e   : > { %12454 = vst [vmem:[%s19677_s3 + $0x88] sm:$0xff] %v12430_v57  ;;  %v12407_v10 = vadd.f32 %v14296_v26, %v12342_v40 }
0x152f   : > { %v14298_v58 = vpop.f32.mrf.mxu0 }
0x1530   : > { %v12433_v32 = vadd.f32 %v12407_v10, %v20280_v42  ;;  %v14299_v59 = vadd.f32 %v14298_v58, %v14297_v23 }
0x1532   : > { %12457 = vst [vmem:[%s19677_s3 + $0xa0] sm:$0xff] %v12433_v32  ;;  %v12410_v27 = vadd.f32 %v14299_v59, %v12345_v1 }
0x1534   : > { %v12436_v13 = vadd.f32 %v12410_v27, %v20281_v20 }
0x1536   : > { %12460 = vst [vmem:[%s19677_s3 + $0xb8] sm:$0xff] %v12436_v13 }
0x1537   : > { %16637 = shalt.err (!%p16634_p11)
}
0x1538   : > { %s16638_s15 = scalar_lea.hbm %s19935_s19, 3072  ;;  %s16642_s2 = scalar_lea.hbm %s19994_s12, 6144 }
0x1539   : > { %p16639_p10 = scmp.ne.s32.totalorder %s19935_s19, %s16638_s15  ;;  %p16643_p2 = scmp.lt.s32.totalorder %s19935_s19, %s19994_s12 }
0x153a   : > { %p16644_p4 = scmp.lt.s32.totalorder %s16642_s2, %s16638_s15 }
0x153b   : > { %p16640_p12 = pnand %p16639_p10, %p20282_p13 }
0x153c   : > { %p16645_p5 = por %p16644_p4, %p16643_p2 }
0x153d   : > { %p16641_p0 = pneg %p16640_p12 }
0x153f   : > { %p16646_p7 = pnand %p16645_p5, %p16641_p0 }
0x1541   : > { %16649 = shalt.err (!%p16646_p7)
}
0x1542   : > { %s16737_s26 = smov 384   ;;  %s16738_s18 = smov 24  }
0x1543   : > { %14614 = dma.vmem_to_hbm [thread:$0]  (%p20282_p13), %s19938_s20, 3072, %s19935_s19, %s12462_s27, %s16737_s26, %s16737_s26, %s16738_s18  }
0x1544 PF: > { %s12491_s16 = sand.u32 1, %s16700_s21   ;;  %p20283_p6 = scmp.ne.s32.totalorder %s20064_s1, 0 }
0x1545   : > { %p20284_p1 = scmp.ge.s32.totalorder %s16712_s24, 2  ;;  %s12492_s5 = scalar_lea.sflag [#allocation6], %s12491_s16 }
0x1547   : > { %p14655_p3 = pnand %p20284_p1, %p20283_p6 }
0x1549   : > { %p14656_p8 = pneg %p14655_p3 }
0x154b   : > { %16695 = dma.done.wait (%p14656_p8), %s12492_s5, 3072  }
0x154c   : > { %16697 = vsyncadd (%p14656_p8), %s12492_s5, 4294964224  ;;  %p31_p9 = scmp.ge.s32.totalorder %s16949_s13, 4   ;;  %s20285_s21 = smov %s16704_s22 }
0x154d   : > { %s20286_s22 = smov %s16708_s23  ;;  %s20287_s23 = smov %s16961_s17 }
0x154e   : > { %s20288_s24 = smov %s16949_s13  ;;  %33 = sbr.rel (!%p31_p9) target bundleno = 18 (0x12), region = 157 }
0x1553   :  { %12497 = vsyncpa [#allocation5], 1 }
0x1554   :  { %12499 = vsyncpa [#allocation5 + $0x1], 1 }
0x1555   :  { %12500 = vsyncpa [#allocation8], 1 }
0x1556   :  { %12501 = vsyncpa [#allocation11], 1 }
0x1557   :  { %12502 = vsyncpa [#allocation14], 1 }
0x1558   :  { %12503 = vsyncpa [#allocation17], 1 }
0x1559   :  { %12504 = vsyncpa [#allocation20], 1 }
0x155a   :  { %12505 = vsyncpa [#allocation23], 1 }
0x155b   :  { %12506 = vsyncpa [#allocation6], 1 }
0x155c   :  { %12508 = vsyncpa [#allocation6 + $0x1], 1 }

</bundles_post_ra>
